<compile_context>
chip_gen: v7x
topology: tpu7x:2x2x1
jax: 0.10.0
libtpu: 0.0.40
codegen_flags: <defaults>
</compile_context>

<pallas_src>
import functools

import jax
import jax.numpy as jnp
from jax import lax
from jax.experimental import pallas as pl
from jax.experimental.pallas import tpu as pltpu

LANE = 128  # TPU lane width; pad every feature dim to a multiple of this


def _round_up(x, m):
    return ((x + m - 1) // m) * m


def _pad_to(x, shape):
    """Zero-pad a 2D array up to `shape` (no-op if already that shape)."""
    pads = [(0, t - s) for s, t in zip(x.shape, shape)]
    if all(p == (0, 0) for p in pads):
        return x
    return jnp.pad(x, pads)


def _matmul(x, w):
    """x @ W on the MXU: activations cast to the weight dtype (bf16), f32 accumulate."""
    return jnp.dot(x.astype(w.dtype), w, preferred_element_type=jnp.float32)


def transition_model_kernel(
    obs_ref, act_ref, next_obs_ref,
    # bf16 weight matrices
    w0_ref, w1_ref, w2_ref, wf0p_ref, wf0a_ref, wf1_ref, wf2_ref,
    # f32 bias / LayerNorm vectors
    bias_h_ref,   # (8, Hp): rows = [b0, ln_w, ln_b, b1, bf0, bf1, 0, 0]
    b2_ref,       # (1, Zp)
    bf2_ref,      # (1, Do)
    out_ref,
    *, hidden_dim, batch, block_b,
):
    bias = bias_h_ref[...]                       # single (8, Hp) load, slice rows
    b0, ln_w, ln_b, b1, bf0, bf1 = (bias[i:i + 1, :] for i in range(6))

    # ---- feature_net: Linear -> LayerNorm -> Tanh -> Linear -> ReLU -> Linear -> L2 ----
    h = _matmul(obs_ref[...], w0_ref[...]) + b0   # f32; padded lanes are exactly 0

    # LayerNorm (eps=1e-5) over the TRUE hidden_dim; one-pass stats, rsqrt on the EUP.
    # TODO(synk): one-pass variance (E[x^2]-E[x]^2) can cancel if |mean| >> std with
    # real checkpoints; switch to two-pass if that regime shows up.
    inv_h = 1.0 / hidden_dim
    mu = jnp.sum(h, axis=-1, keepdims=True) * inv_h
    msq = jnp.sum(h * h, axis=-1, keepdims=True) * inv_h
    var = jnp.maximum(msq - mu * mu, 0.0)
    h = (h - mu) * lax.rsqrt(var + 1e-5)
    # ln_w / ln_b are ZERO-padded, so padded lanes return to exactly 0 after tanh.
    h = jnp.tanh(h * ln_w + ln_b)

    h = jnp.maximum(_matmul(h, w1_ref[...]) + b1, 0.0)          # ReLU
    phi = _matmul(h, w2_ref[...]) + b2_ref[...]

    # F.normalize(phi, dim=1): x / max(||x||, 1e-12) == x * rsqrt(max(||x||^2, 1e-24))
    sumsq = jnp.sum(phi * phi, axis=-1, keepdims=True)
    phi = phi * lax.rsqrt(jnp.maximum(sumsq, 1e-24))

    # ---- forward_dynamic_net on concat([phi, action], -1) via split weights ----
    g = (_matmul(phi, wf0p_ref[...])
         + _matmul(act_ref[...], wf0a_ref[...])
         + bf0)
    g = jnp.maximum(g, 0.0)                                     # inplace ReLU == ReLU
    g = jnp.maximum(_matmul(g, wf1_ref[...]) + bf1, 0.0)
    pred = _matmul(g, wf2_ref[...]) + bf2_ref[...]

    # ---- partial sum of (pred - next_obs)^2 for this batch tile ----
    diff = pred - next_obs_ref[...].astype(jnp.float32)
    sq = diff * diff
    # Padded feature lanes are exactly zero; only padded batch rows need masking.
    row = pl.program_id(0) * block_b + lax.broadcasted_iota(jnp.int32, sq.shape, 0)
    sq = jnp.where(row < batch, sq, 0.0)

    out_ref[0, 0] = jnp.sum(sq)   # scalar partial sum -> SMEM


def _pick_batch_tile(batch):
    """Generation-aware batch tile (rows, multiple of 8)."""
    kind = ""
    try:
        kind = jax.devices()[0].device_kind.lower()
    except Exception:  # pragma: no cover - device query is best-effort
        pass
    bp8 = _round_up(batch, 8)
    if "v7" in kind:
        # v7x: 2 TensorCores shard the "parallel" grid axis -> keep the grid even
        # (>=2) and balanced; re-budgeted against 64 MiB VMEM (tiles capped at 256).
        tb = min(256, _round_up(pl.cdiv(bp8, 2), 8))
    elif "v5 lite" in kind or "v5e" in kind:
        # v5e: single TensorCore -> grid>1 is a pure serial loop; minimize grid steps.
        tb = min(bp8, 512)
    else:
        # v6e / default: 2x256x256 MXU -> 256-row tiles keep it fed.
        tb = min(bp8, 256)
    return max(tb, 8)


def transition_model_forward(obs, action, next_obs, params, *, block_b=None):
    """Full TransitionModel forward pass; returns the scalar forward_error."""
    B, obs_dim = obs.shape
    act_dim = action.shape[-1]
    hidden_dim = params["w0"].shape[-1]
    z_dim = params["w2"].shape[-1]

    # Lane-pad every feature dim to a multiple of 128 (zero padding keeps math exact).
    Do = _round_up(obs_dim, LANE)
    Da = _round_up(act_dim, LANE)
    Hp = _round_up(hidden_dim, LANE)
    Zp = _round_up(z_dim, LANE)

    # Batch tiling: sublane-aligned tile, pad batch up to a multiple of the tile.
    tb = _pick_batch_tile(B) if block_b is None else max(8, min(block_b, _round_up(B, 8)))
    Bp = _round_up(B, tb)
    grid = Bp // tb

    obs_p = _pad_to(obs, (Bp, Do))
    act_p = _pad_to(action, (Bp, Da))
    nxt_p = _pad_to(next_obs, (Bp, Do))
    data = (obs_p, act_p, nxt_p)

    bf16 = jnp.bfloat16

    def _row(v, width):
        return _pad_to(v.reshape(1, -1), (1, width))

    # Pack the six (1, hidden)-shaped vectors into a single (8, Hp) f32 block.
    bias_h = jnp.concatenate(
        [_row(params["b0"], Hp), _row(params["ln_w"], Hp), _row(params["ln_b"], Hp),
         _row(params["b1"], Hp), _row(params["bf0"], Hp), _row(params["bf1"], Hp),
         jnp.zeros((2, Hp), jnp.float32)], axis=0)

    weights = (
        # matmul weights: bf16 for native MXU passes + half the DMA / VMEM.
        _pad_to(params["w0"], (Do, Hp)).astype(bf16),
        _pad_to(params["w1"], (Hp, Hp)).astype(bf16),
        _pad_to(params["w2"], (Hp, Zp)).astype(bf16),
        _pad_to(params["wf0_phi"], (Zp, Hp)).astype(bf16),
        _pad_to(params["wf0_act"], (Da, Hp)).astype(bf16),
        _pad_to(params["wf1"], (Hp, Hp)).astype(bf16),
        _pad_to(params["wf2"], (Hp, Do)).astype(bf16),
        # small vectors stay f32 (precision; negligible bandwidth).
        bias_h,
        _row(params["b2"], Zp),
        _row(params["bf2"], Do),
    )

    data_specs = [pl.BlockSpec((tb, a.shape[1]), lambda g: (g, 0)) for a in data]

    # Explicit VMEM budget: weights (worst case double-buffered) + activation tiles
    # (double-buffered) + f32 intermediates + slack.  Capped at 64 MiB (v7x-safe).
    weight_bytes = sum(int(w.size) * w.dtype.itemsize for w in weights)
    data_bytes = 2 * sum(tb * a.shape[1] * 4 for a in data)
    scratch_bytes = 8 * tb * max(Hp, Do, Zp) * 4
    vmem_limit = int(min(64 << 20,
                         max(16 << 20,
                             2 * weight_bytes + data_bytes + scratch_bytes + (4 << 20))))

    kernel = functools.partial(
        transition_model_kernel,
        hidden_dim=hidden_dim, batch=B, block_b=tb,
    )

    def _build(single_buffer_weights):
        if single_buffer_weights:
            # Constant index_map -> the block never changes; double-buffering buys
            # nothing but 2x VMEM, so request a single buffer.
            weight_specs = [pl.BlockSpec(w.shape, lambda g: (0, 0),
                                         pipeline_mode=pl.Buffered(1))
                            for w in weights]
        else:
            weight_specs = [pl.BlockSpec(w.shape, lambda g: (0, 0)) for w in weights]
        return pl.pallas_call(
            kernel,
            grid=(grid,),
            in_specs=data_specs + weight_specs,
            out_specs=pl.BlockSpec((1, 1), lambda g: (g, 0),
                                   memory_space=pltpu.MemorySpace.SMEM),
            out_shape=jax.ShapeDtypeStruct((grid, 1), jnp.float32),
            compiler_params=pltpu.CompilerParams(
                dimension_semantics=("parallel",),
                vmem_limit_bytes=vmem_limit),
        )

    try:
        partial_sums = _build(True)(*data, *weights)
    except Exception:
        # Fallback if this jax/libtpu build rejects pipeline_mode=pl.Buffered(1);
        # identical math, just default (double) buffering of the weight blocks.
        partial_sums = _build(False)(*data, *weights)

    return jnp.sum(partial_sums) / (B * obs_dim)


def init_params(key, obs_dim, action_dim, z_dim, hidden_dim):
    """Deterministic synthetic parameter init (shapes follow the module's __init__)."""
    ks = jax.random.split(key, 12)
    s = 0.1  # small scale for numerically tame activations

    def lin(k, fan_in, fan_out):
        return s * jax.random.normal(k, (fan_in, fan_out), jnp.float32)

    return {
        # feature_net: mlp(obs_dim, hidden, 'ntanh', hidden, 'relu', z_dim, 'L2')
        "w0": lin(ks[0], obs_dim, hidden_dim),
        "b0": jnp.zeros((1, hidden_dim), jnp.float32),
        "ln_w": jnp.ones((1, hidden_dim), jnp.float32),
        "ln_b": jnp.zeros((1, hidden_dim), jnp.float32),
        "w1": lin(ks[1], hidden_dim, hidden_dim),
        "b1": s * jax.random.normal(ks[2], (1, hidden_dim), jnp.float32),
        "w2": lin(ks[3], hidden_dim, z_dim),
        "b2": s * jax.random.normal(ks[4], (1, z_dim), jnp.float32),
        # forward_dynamic_net: mlp(z_dim + action_dim, hidden, 'irelu', hidden, 'irelu', obs_dim)
        "wf0_phi": lin(ks[5], z_dim, hidden_dim),
        "wf0_act": lin(ks[6], action_dim, hidden_dim),
        "bf0": s * jax.random.normal(ks[7], (1, hidden_dim), jnp.float32),
        "wf1": lin(ks[8], hidden_dim, hidden_dim),
        "bf1": s * jax.random.normal(ks[9], (1, hidden_dim), jnp.float32),
        "wf2": lin(ks[10], hidden_dim, obs_dim),
        "bf2": s * jax.random.normal(ks[11], (1, obs_dim), jnp.float32),
    }


def reference_forward(obs, action, next_obs, p):
    """Pure-JAX f32 reference (mirrors the PyTorch module) for a correctness check."""
    h = obs @ p["w0"] + p["b0"]
    mu = h.mean(-1, keepdims=True)
    var = ((h - mu) ** 2).mean(-1, keepdims=True)
    h = (h - mu) / jnp.sqrt(var + 1e-5) * p["ln_w"] + p["ln_b"]
    h = jnp.tanh(h)
    h = jax.nn.relu(h @ p["w1"] + p["b1"])
    phi = h @ p["w2"] + p["b2"]
    phi = phi / jnp.maximum(jnp.linalg.norm(phi, axis=-1, keepdims=True), 1e-12)
    x = jnp.concatenate([phi, action], axis=-1)
    wf0 = jnp.concatenate([p["wf0_phi"], p["wf0_act"]], axis=0)
    g = jax.nn.relu(x @ wf0 + p["bf0"])
    g = jax.nn.relu(g @ p["wf1"] + p["bf1"])
    pred = g @ p["wf2"] + p["bf2"]
    return jnp.mean((pred - next_obs) ** 2)


if __name__ == "__main__":
    # Small shapes consistent with the module; batch chosen non-multiple of the tile
    # to exercise the padded-row mask (and a 2-step "parallel" grid on v7x).
    batch, obs_dim, action_dim, z_dim, hidden_dim = 200, 16, 8, 16, 32

    key = jax.random.PRNGKey(0)
    k_obs, k_act, k_next, k_par = jax.random.split(key, 4)

    obs = jax.random.normal(k_obs, (batch, obs_dim), jnp.float32)
    action = jax.random.normal(k_act, (batch, action_dim), jnp.float32)
    next_obs = jax.random.normal(k_next, (batch, obs_dim), jnp.float32)
    params = init_params(k_par, obs_dim, action_dim, z_dim, hidden_dim)

    err = transition_model_forward(obs, action, next_obs, params)
    err = jax.block_until_ready(err)

    ref = jax.block_until_ready(reference_forward(obs, action, next_obs, params))
    assert jnp.isfinite(err), "kernel produced non-finite output"
    # Tolerance is loosened slightly vs. the pure-f32 reference because the matmul
    # weights run on the MXU in bf16 (f32 accumulation), per the performance review.
    assert jnp.allclose(err, ref, rtol=1e-2, atol=1e-4), (err, ref)

    print("KERNEL_OK")
</pallas_src>

<mosaic_0001>
module attributes {stable_mosaic.version = 11 : i64} {
  func.func @transition_model_kernel(%arg0: i32, %arg1: memref<200x128xf32, #tpu.memory_space<vmem>>, %arg2: memref<200x128xf32, #tpu.memory_space<vmem>>, %arg3: memref<200x128xf32, #tpu.memory_space<vmem>>, %arg4: memref<128x128xbf16, #tpu.memory_space<vmem>>, %arg5: memref<128x128xbf16, #tpu.memory_space<vmem>>, %arg6: memref<128x128xbf16, #tpu.memory_space<vmem>>, %arg7: memref<128x128xbf16, #tpu.memory_space<vmem>>, %arg8: memref<128x128xbf16, #tpu.memory_space<vmem>>, %arg9: memref<128x128xbf16, #tpu.memory_space<vmem>>, %arg10: memref<128x128xbf16, #tpu.memory_space<vmem>>, %arg11: memref<8x128xf32, #tpu.memory_space<vmem>>, %arg12: memref<1x128xf32, #tpu.memory_space<vmem>>, %arg13: memref<1x128xf32, #tpu.memory_space<vmem>>, %arg14: memref<1x1xf32, #tpu.memory_space<smem>>) attributes {dimension_semantics = [#tpu.dimension_semantics<parallel>], iteration_bounds = array<i64: 1>, scalar_prefetch = 0 : i64, scratch_operands = 0 : i64, tpu.core_type = #tpu.core_type<tc>, window_params = [{transform_indices = @transform_0, window_bounds = array<i64: 200, 128>}, {transform_indices = @transform_1, window_bounds = array<i64: 200, 128>}, {transform_indices = @transform_2, window_bounds = array<i64: 200, 128>}, {pipeline_mode = #tpu.pipeline_mode<synchronous>, transform_indices = @transform_3, window_bounds = array<i64: 128, 128>}, {pipeline_mode = #tpu.pipeline_mode<synchronous>, transform_indices = @transform_4, window_bounds = array<i64: 128, 128>}, {pipeline_mode = #tpu.pipeline_mode<synchronous>, transform_indices = @transform_5, window_bounds = array<i64: 128, 128>}, {pipeline_mode = #tpu.pipeline_mode<synchronous>, transform_indices = @transform_6, window_bounds = array<i64: 128, 128>}, {pipeline_mode = #tpu.pipeline_mode<synchronous>, transform_indices = @transform_7, window_bounds = array<i64: 128, 128>}, {pipeline_mode = #tpu.pipeline_mode<synchronous>, transform_indices = @transform_8, window_bounds = array<i64: 128, 128>}, {pipeline_mode = #tpu.pipeline_mode<synchronous>, transform_indices = @transform_9, window_bounds = array<i64: 128, 128>}, {pipeline_mode = #tpu.pipeline_mode<synchronous>, transform_indices = @transform_10, window_bounds = array<i64: 8, 128>}, {pipeline_mode = #tpu.pipeline_mode<synchronous>, transform_indices = @transform_11, window_bounds = array<i64: 1, 128>}, {pipeline_mode = #tpu.pipeline_mode<synchronous>, transform_indices = @transform_12, window_bounds = array<i64: 1, 128>}, {transform_indices = @transform_13, window_bounds = array<i64: 1, 1>}]} {
    %c0 = arith.constant 0 : index
    %c0_0 = arith.constant 0 : index
    %0 = vector.load %arg11[%c0, %c0_0] : memref<8x128xf32, #tpu.memory_space<vmem>>, vector<8x128xf32>
    %1 = vector.extract_strided_slice %0 {offsets = [0, 0], sizes = [1, 128], strides = [1, 1]} : vector<8x128xf32> to vector<1x128xf32>
    %2 = vector.extract_strided_slice %0 {offsets = [1, 0], sizes = [1, 128], strides = [1, 1]} : vector<8x128xf32> to vector<1x128xf32>
    %3 = vector.extract_strided_slice %0 {offsets = [2, 0], sizes = [1, 128], strides = [1, 1]} : vector<8x128xf32> to vector<1x128xf32>
    %4 = vector.extract_strided_slice %0 {offsets = [3, 0], sizes = [1, 128], strides = [1, 1]} : vector<8x128xf32> to vector<1x128xf32>
    %5 = vector.extract_strided_slice %0 {offsets = [4, 0], sizes = [1, 128], strides = [1, 1]} : vector<8x128xf32> to vector<1x128xf32>
    %6 = vector.extract_strided_slice %0 {offsets = [5, 0], sizes = [1, 128], strides = [1, 1]} : vector<8x128xf32> to vector<1x128xf32>
    %c0_1 = arith.constant 0 : index
    %c0_2 = arith.constant 0 : index
    %7 = vector.load %arg1[%c0_1, %c0_2] : memref<200x128xf32, #tpu.memory_space<vmem>>, vector<200x128xf32>
    %c0_3 = arith.constant 0 : index
    %c0_4 = arith.constant 0 : index
    %8 = vector.load %arg4[%c0_3, %c0_4] : memref<128x128xbf16, #tpu.memory_space<vmem>>, vector<128x128xbf16>
    %9 = arith.truncf %7 : vector<200x128xf32> to vector<200x128xbf16>
    %cst = arith.constant dense<0.000000e+00> : vector<200x128xf32>
    %10 = tpu.matmul %9, %8, %cst {dimension_numbers = #tpu.dot_dimension_numbers<[1], [0], [0], [1], [0, 0, 1, 1], [], []>} : vector<200x128xbf16>, vector<128x128xbf16>, vector<200x128xf32> -> vector<200x128xf32>
    %11 = vector.broadcast %1 : vector<1x128xf32> to vector<200x128xf32>
    %12 = arith.addf %10, %11 : vector<200x128xf32>
    %cst_5 = arith.constant dense<0.000000e+00> : vector<200xf32>
    %13 = vector.multi_reduction <add>, %12, %cst_5 [1] : vector<200x128xf32> to vector<200xf32>
    %14 = vector.shape_cast %13 : vector<200xf32> to vector<200x1xf32>
    %cst_6 = arith.constant 3.125000e-02 : f32
    %15 = vector.broadcast %cst_6 : f32 to vector<200x1xf32>
    %16 = arith.mulf %14, %15 : vector<200x1xf32>
    %17 = arith.mulf %12, %12 : vector<200x128xf32>
    %cst_7 = arith.constant dense<0.000000e+00> : vector<200xf32>
    %18 = vector.multi_reduction <add>, %17, %cst_7 [1] : vector<200x128xf32> to vector<200xf32>
    %19 = vector.shape_cast %18 : vector<200xf32> to vector<200x1xf32>
    %cst_8 = arith.constant 3.125000e-02 : f32
    %20 = vector.broadcast %cst_8 : f32 to vector<200x1xf32>
    %21 = arith.mulf %19, %20 : vector<200x1xf32>
    %22 = arith.mulf %16, %16 : vector<200x1xf32>
    %23 = arith.subf %21, %22 : vector<200x1xf32>
    %cst_9 = arith.constant 0.000000e+00 : f32
    %24 = vector.broadcast %cst_9 : f32 to vector<200x1xf32>
    %25 = arith.maximumf %23, %24 : vector<200x1xf32>
    %26 = vector.broadcast %16 : vector<200x1xf32> to vector<200x128xf32>
    %27 = arith.subf %12, %26 : vector<200x128xf32>
    %cst_10 = arith.constant 9.99999974E-6 : f32
    %28 = vector.broadcast %cst_10 : f32 to vector<200x1xf32>
    %29 = arith.addf %25, %28 : vector<200x1xf32>
    %30 = math.rsqrt %29 : vector<200x1xf32>
    %31 = vector.broadcast %30 : vector<200x1xf32> to vector<200x128xf32>
    %32 = arith.mulf %27, %31 : vector<200x128xf32>
    %33 = vector.broadcast %2 : vector<1x128xf32> to vector<200x128xf32>
    %34 = arith.mulf %32, %33 : vector<200x128xf32>
    %35 = vector.broadcast %3 : vector<1x128xf32> to vector<200x128xf32>
    %36 = arith.addf %34, %35 : vector<200x128xf32>
    %37 = math.tanh %36 : vector<200x128xf32>
    %c0_11 = arith.constant 0 : index
    %c0_12 = arith.constant 0 : index
    %38 = vector.load %arg5[%c0_11, %c0_12] : memref<128x128xbf16, #tpu.memory_space<vmem>>, vector<128x128xbf16>
    %39 = arith.truncf %37 : vector<200x128xf32> to vector<200x128xbf16>
    %cst_13 = arith.constant dense<0.000000e+00> : vector<200x128xf32>
    %40 = tpu.matmul %39, %38, %cst_13 {dimension_numbers = #tpu.dot_dimension_numbers<[1], [0], [0], [1], [0, 0, 1, 1], [], []>} : vector<200x128xbf16>, vector<128x128xbf16>, vector<200x128xf32> -> vector<200x128xf32>
    %41 = vector.broadcast %4 : vector<1x128xf32> to vector<200x128xf32>
    %42 = arith.addf %40, %41 : vector<200x128xf32>
    %cst_14 = arith.constant 0.000000e+00 : f32
    %43 = vector.broadcast %cst_14 : f32 to vector<200x128xf32>
    %44 = arith.maximumf %42, %43 : vector<200x128xf32>
    %c0_15 = arith.constant 0 : index
    %c0_16 = arith.constant 0 : index
    %45 = vector.load %arg6[%c0_15, %c0_16] : memref<128x128xbf16, #tpu.memory_space<vmem>>, vector<128x128xbf16>
    %46 = arith.truncf %44 : vector<200x128xf32> to vector<200x128xbf16>
    %cst_17 = arith.constant dense<0.000000e+00> : vector<200x128xf32>
    %47 = tpu.matmul %46, %45, %cst_17 {dimension_numbers = #tpu.dot_dimension_numbers<[1], [0], [0], [1], [0, 0, 1, 1], [], []>} : vector<200x128xbf16>, vector<128x128xbf16>, vector<200x128xf32> -> vector<200x128xf32>
    %c0_18 = arith.constant 0 : index
    %c0_19 = arith.constant 0 : index
    %48 = vector.load %arg12[%c0_18, %c0_19] : memref<1x128xf32, #tpu.memory_space<vmem>>, vector<1x128xf32>
    %49 = vector.broadcast %48 : vector<1x128xf32> to vector<200x128xf32>
    %50 = arith.addf %47, %49 : vector<200x128xf32>
    %51 = arith.mulf %50, %50 : vector<200x128xf32>
    %cst_20 = arith.constant dense<0.000000e+00> : vector<200xf32>
    %52 = vector.multi_reduction <add>, %51, %cst_20 [1] : vector<200x128xf32> to vector<200xf32>
    %53 = vector.shape_cast %52 : vector<200xf32> to vector<200x1xf32>
    %cst_21 = arith.constant 1.000000e-24 : f32
    %54 = vector.broadcast %cst_21 : f32 to vector<200x1xf32>
    %55 = arith.maximumf %53, %54 : vector<200x1xf32>
    %56 = math.rsqrt %55 : vector<200x1xf32>
    %57 = vector.broadcast %56 : vector<200x1xf32> to vector<200x128xf32>
    %58 = arith.mulf %50, %57 : vector<200x128xf32>
    %c0_22 = arith.constant 0 : index
    %c0_23 = arith.constant 0 : index
    %59 = vector.load %arg7[%c0_22, %c0_23] : memref<128x128xbf16, #tpu.memory_space<vmem>>, vector<128x128xbf16>
    %60 = arith.truncf %58 : vector<200x128xf32> to vector<200x128xbf16>
    %cst_24 = arith.constant dense<0.000000e+00> : vector<200x128xf32>
    %61 = tpu.matmul %60, %59, %cst_24 {dimension_numbers = #tpu.dot_dimension_numbers<[1], [0], [0], [1], [0, 0, 1, 1], [], []>} : vector<200x128xbf16>, vector<128x128xbf16>, vector<200x128xf32> -> vector<200x128xf32>
    %c0_25 = arith.constant 0 : index
    %c0_26 = arith.constant 0 : index
    %62 = vector.load %arg2[%c0_25, %c0_26] : memref<200x128xf32, #tpu.memory_space<vmem>>, vector<200x128xf32>
    %c0_27 = arith.constant 0 : index
    %c0_28 = arith.constant 0 : index
    %63 = vector.load %arg8[%c0_27, %c0_28] : memref<128x128xbf16, #tpu.memory_space<vmem>>, vector<128x128xbf16>
    %64 = arith.truncf %62 : vector<200x128xf32> to vector<200x128xbf16>
    %cst_29 = arith.constant dense<0.000000e+00> : vector<200x128xf32>
    %65 = tpu.matmul %64, %63, %cst_29 {dimension_numbers = #tpu.dot_dimension_numbers<[1], [0], [0], [1], [0, 0, 1, 1], [], []>} : vector<200x128xbf16>, vector<128x128xbf16>, vector<200x128xf32> -> vector<200x128xf32>
    %66 = arith.addf %61, %65 : vector<200x128xf32>
    %67 = vector.broadcast %5 : vector<1x128xf32> to vector<200x128xf32>
    %68 = arith.addf %66, %67 : vector<200x128xf32>
    %cst_30 = arith.constant 0.000000e+00 : f32
    %69 = vector.broadcast %cst_30 : f32 to vector<200x128xf32>
    %70 = arith.maximumf %68, %69 : vector<200x128xf32>
    %c0_31 = arith.constant 0 : index
    %c0_32 = arith.constant 0 : index
    %71 = vector.load %arg9[%c0_31, %c0_32] : memref<128x128xbf16, #tpu.memory_space<vmem>>, vector<128x128xbf16>
    %72 = arith.truncf %70 : vector<200x128xf32> to vector<200x128xbf16>
    %cst_33 = arith.constant dense<0.000000e+00> : vector<200x128xf32>
    %73 = tpu.matmul %72, %71, %cst_33 {dimension_numbers = #tpu.dot_dimension_numbers<[1], [0], [0], [1], [0, 0, 1, 1], [], []>} : vector<200x128xbf16>, vector<128x128xbf16>, vector<200x128xf32> -> vector<200x128xf32>
    %74 = vector.broadcast %6 : vector<1x128xf32> to vector<200x128xf32>
    %75 = arith.addf %73, %74 : vector<200x128xf32>
    %cst_34 = arith.constant 0.000000e+00 : f32
    %76 = vector.broadcast %cst_34 : f32 to vector<200x128xf32>
    %77 = arith.maximumf %75, %76 : vector<200x128xf32>
    %c0_35 = arith.constant 0 : index
    %c0_36 = arith.constant 0 : index
    %78 = vector.load %arg10[%c0_35, %c0_36] : memref<128x128xbf16, #tpu.memory_space<vmem>>, vector<128x128xbf16>
    %79 = arith.truncf %77 : vector<200x128xf32> to vector<200x128xbf16>
    %cst_37 = arith.constant dense<0.000000e+00> : vector<200x128xf32>
    %80 = tpu.matmul %79, %78, %cst_37 {dimension_numbers = #tpu.dot_dimension_numbers<[1], [0], [0], [1], [0, 0, 1, 1], [], []>} : vector<200x128xbf16>, vector<128x128xbf16>, vector<200x128xf32> -> vector<200x128xf32>
    %c0_38 = arith.constant 0 : index
    %c0_39 = arith.constant 0 : index
    %81 = vector.load %arg13[%c0_38, %c0_39] : memref<1x128xf32, #tpu.memory_space<vmem>>, vector<1x128xf32>
    %82 = vector.broadcast %81 : vector<1x128xf32> to vector<200x128xf32>
    %83 = arith.addf %80, %82 : vector<200x128xf32>
    %c0_40 = arith.constant 0 : index
    %c0_41 = arith.constant 0 : index
    %84 = vector.load %arg3[%c0_40, %c0_41] : memref<200x128xf32, #tpu.memory_space<vmem>>, vector<200x128xf32>
    %85 = arith.subf %83, %84 : vector<200x128xf32>
    %86 = arith.mulf %85, %85 : vector<200x128xf32>
    %c200_i32 = arith.constant 200 : i32
    %87 = arith.muli %arg0, %c200_i32 : i32
    %88 = tpu.iota {dimensions = array<i32: 0>} : vector<200x128xi32>
    %89 = vector.broadcast %87 : i32 to vector<200x128xi32>
    %90 = arith.addi %89, %88 : vector<200x128xi32>
    %c200_i32_42 = arith.constant 200 : i32
    %91 = vector.broadcast %c200_i32_42 : i32 to vector<200x128xi32>
    %92 = arith.cmpi slt, %90, %91 : vector<200x128xi32>
    %cst_43 = arith.constant 0.000000e+00 : f32
    %93 = vector.broadcast %cst_43 : f32 to vector<200x128xf32>
    %94 = arith.select %92, %86, %93 : vector<200x128xi1>, vector<200x128xf32>
    %95 = vector.shape_cast %94 : vector<200x128xf32> to vector<1x200x128xf32>
    %cst_44 = arith.constant dense<0.000000e+00> : vector<1xf32>
    %96 = vector.multi_reduction <add>, %95, %cst_44 [1, 2] : vector<1x200x128xf32> to vector<1xf32>
    %97 = vector.shape_cast %96 : vector<1xf32> to vector<1x1x1xf32>
    %98 = vector.extract %97[0, 0, 0] : f32 from vector<1x1x1xf32>
    %c0_45 = arith.constant 0 : index
    %c0_46 = arith.constant 0 : index
    %99 = memref.load %arg14[%c0_45, %c0_46] : memref<1x1xf32, #tpu.memory_space<smem>>
    memref.store %98, %arg14[%c0_45, %c0_46] : memref<1x1xf32, #tpu.memory_space<smem>>
    return
  }
  func.func @transform_0(%arg0: i32) -> (i32, i32) {
    %c0_i32 = arith.constant 0 : i32
    %c0_i32_0 = arith.constant 0 : i32
    return %arg0, %c0_i32 : i32, i32
  }
  func.func @transform_1(%arg0: i32) -> (i32, i32) {
    %c0_i32 = arith.constant 0 : i32
    %c0_i32_0 = arith.constant 0 : i32
    return %arg0, %c0_i32 : i32, i32
  }
  func.func @transform_2(%arg0: i32) -> (i32, i32) {
    %c0_i32 = arith.constant 0 : i32
    %c0_i32_0 = arith.constant 0 : i32
    return %arg0, %c0_i32 : i32, i32
  }
  func.func @transform_3(%arg0: i32) -> (i32, i32) {
    %c0_i32 = arith.constant 0 : i32
    %c0_i32_0 = arith.constant 0 : i32
    %c0_i32_1 = arith.constant 0 : i32
    return %c0_i32, %c0_i32_0 : i32, i32
  }
  func.func @transform_4(%arg0: i32) -> (i32, i32) {
    %c0_i32 = arith.constant 0 : i32
    %c0_i32_0 = arith.constant 0 : i32
    %c0_i32_1 = arith.constant 0 : i32
    return %c0_i32, %c0_i32_0 : i32, i32
  }
  func.func @transform_5(%arg0: i32) -> (i32, i32) {
    %c0_i32 = arith.constant 0 : i32
    %c0_i32_0 = arith.constant 0 : i32
    %c0_i32_1 = arith.constant 0 : i32
    return %c0_i32, %c0_i32_0 : i32, i32
  }
  func.func @transform_6(%arg0: i32) -> (i32, i32) {
    %c0_i32 = arith.constant 0 : i32
    %c0_i32_0 = arith.constant 0 : i32
    %c0_i32_1 = arith.constant 0 : i32
    return %c0_i32, %c0_i32_0 : i32, i32
  }
  func.func @transform_7(%arg0: i32) -> (i32, i32) {
    %c0_i32 = arith.constant 0 : i32
    %c0_i32_0 = arith.constant 0 : i32
    %c0_i32_1 = arith.constant 0 : i32
    return %c0_i32, %c0_i32_0 : i32, i32
  }
  func.func @transform_8(%arg0: i32) -> (i32, i32) {
    %c0_i32 = arith.constant 0 : i32
    %c0_i32_0 = arith.constant 0 : i32
    %c0_i32_1 = arith.constant 0 : i32
    return %c0_i32, %c0_i32_0 : i32, i32
  }
  func.func @transform_9(%arg0: i32) -> (i32, i32) {
    %c0_i32 = arith.constant 0 : i32
    %c0_i32_0 = arith.constant 0 : i32
    %c0_i32_1 = arith.constant 0 : i32
    return %c0_i32, %c0_i32_0 : i32, i32
  }
  func.func @transform_10(%arg0: i32) -> (i32, i32) {
    %c0_i32 = arith.constant 0 : i32
    %c0_i32_0 = arith.constant 0 : i32
    %c0_i32_1 = arith.constant 0 : i32
    return %c0_i32, %c0_i32_0 : i32, i32
  }
  func.func @transform_11(%arg0: i32) -> (i32, i32) {
    %c0_i32 = arith.constant 0 : i32
    %c0_i32_0 = arith.constant 0 : i32
    %c0_i32_1 = arith.constant 0 : i32
    return %c0_i32, %c0_i32_0 : i32, i32
  }
  func.func @transform_12(%arg0: i32) -> (i32, i32) {
    %c0_i32 = arith.constant 0 : i32
    %c0_i32_0 = arith.constant 0 : i32
    %c0_i32_1 = arith.constant 0 : i32
    return %c0_i32, %c0_i32_0 : i32, i32
  }
  func.func @transform_13(%arg0: i32) -> (i32, i32) {
    %c0_i32 = arith.constant 0 : i32
    %c0_i32_0 = arith.constant 0 : i32
    return %arg0, %c0_i32 : i32, i32
  }
}

module attributes {stable_mosaic.version = 11 : i64} {
  func.func @transition_model_kernel(%arg0: i32, %arg1: memref<200x128xf32, #tpu.memory_space<vmem>>, %arg2: memref<200x128xf32, #tpu.memory_space<vmem>>, %arg3: memref<200x128xf32, #tpu.memory_space<vmem>>, %arg4: memref<128x128xbf16, #tpu.memory_space<vmem>>, %arg5: memref<128x128xbf16, #tpu.memory_space<vmem>>, %arg6: memref<128x128xbf16, #tpu.memory_space<vmem>>, %arg7: memref<128x128xbf16, #tpu.memory_space<vmem>>, %arg8: memref<128x128xbf16, #tpu.memory_space<vmem>>, %arg9: memref<128x128xbf16, #tpu.memory_space<vmem>>, %arg10: memref<128x128xbf16, #tpu.memory_space<vmem>>, %arg11: memref<8x128xf32, #tpu.memory_space<vmem>>, %arg12: memref<1x128xf32, #tpu.memory_space<vmem>>, %arg13: memref<1x128xf32, #tpu.memory_space<vmem>>, %arg14: memref<1x1xf32, #tpu.memory_space<smem>>) attributes {dimension_semantics = [#tpu.dimension_semantics<parallel>], iteration_bounds = array<i64: 1>, scalar_prefetch = 0 : i64, scratch_operands = 0 : i64, tpu.core_type = #tpu.core_type<tc>, window_params = [{transform_indices = @transform_0, window_bounds = array<i64: 200, 128>}, {transform_indices = @transform_1, window_bounds = array<i64: 200, 128>}, {transform_indices = @transform_2, window_bounds = array<i64: 200, 128>}, {pipeline_mode = #tpu.pipeline_mode<synchronous>, transform_indices = @transform_3, window_bounds = array<i64: 128, 128>}, {pipeline_mode = #tpu.pipeline_mode<synchronous>, transform_indices = @transform_4, window_bounds = array<i64: 128, 128>}, {pipeline_mode = #tpu.pipeline_mode<synchronous>, transform_indices = @transform_5, window_bounds = array<i64: 128, 128>}, {pipeline_mode = #tpu.pipeline_mode<synchronous>, transform_indices = @transform_6, window_bounds = array<i64: 128, 128>}, {pipeline_mode = #tpu.pipeline_mode<synchronous>, transform_indices = @transform_7, window_bounds = array<i64: 128, 128>}, {pipeline_mode = #tpu.pipeline_mode<synchronous>, transform_indices = @transform_8, window_bounds = array<i64: 128, 128>}, {pipeline_mode = #tpu.pipeline_mode<synchronous>, transform_indices = @transform_9, window_bounds = array<i64: 128, 128>}, {pipeline_mode = #tpu.pipeline_mode<synchronous>, transform_indices = @transform_10, window_bounds = array<i64: 8, 128>}, {pipeline_mode = #tpu.pipeline_mode<synchronous>, transform_indices = @transform_11, window_bounds = array<i64: 1, 128>}, {pipeline_mode = #tpu.pipeline_mode<synchronous>, transform_indices = @transform_12, window_bounds = array<i64: 1, 128>}, {transform_indices = @transform_13, window_bounds = array<i64: 1, 1>}]} {
    %c0 = arith.constant 0 : index
    %c0_0 = arith.constant 0 : index
    %0 = vector.load %arg11[%c0, %c0_0] : memref<8x128xf32, #tpu.memory_space<vmem>>, vector<8x128xf32>
    %1 = vector.extract_strided_slice %0 {offsets = [0, 0], sizes = [1, 128], strides = [1, 1]} : vector<8x128xf32> to vector<1x128xf32>
    %2 = vector.extract_strided_slice %0 {offsets = [1, 0], sizes = [1, 128], strides = [1, 1]} : vector<8x128xf32> to vector<1x128xf32>
    %3 = vector.extract_strided_slice %0 {offsets = [2, 0], sizes = [1, 128], strides = [1, 1]} : vector<8x128xf32> to vector<1x128xf32>
    %4 = vector.extract_strided_slice %0 {offsets = [3, 0], sizes = [1, 128], strides = [1, 1]} : vector<8x128xf32> to vector<1x128xf32>
    %5 = vector.extract_strided_slice %0 {offsets = [4, 0], sizes = [1, 128], strides = [1, 1]} : vector<8x128xf32> to vector<1x128xf32>
    %6 = vector.extract_strided_slice %0 {offsets = [5, 0], sizes = [1, 128], strides = [1, 1]} : vector<8x128xf32> to vector<1x128xf32>
    %c0_1 = arith.constant 0 : index
    %c0_2 = arith.constant 0 : index
    %7 = vector.load %arg1[%c0_1, %c0_2] : memref<200x128xf32, #tpu.memory_space<vmem>>, vector<200x128xf32>
    %c0_3 = arith.constant 0 : index
    %c0_4 = arith.constant 0 : index
    %8 = vector.load %arg4[%c0_3, %c0_4] : memref<128x128xbf16, #tpu.memory_space<vmem>>, vector<128x128xbf16>
    %9 = arith.truncf %7 : vector<200x128xf32> to vector<200x128xbf16>
    %cst = arith.constant dense<0.000000e+00> : vector<200x128xf32>
    %10 = tpu.matmul %9, %8, %cst {dimension_numbers = #tpu.dot_dimension_numbers<[1], [0], [0], [1], [0, 0, 1, 1], [], []>} : vector<200x128xbf16>, vector<128x128xbf16>, vector<200x128xf32> -> vector<200x128xf32>
    %11 = vector.broadcast %1 : vector<1x128xf32> to vector<200x128xf32>
    %12 = arith.addf %10, %11 : vector<200x128xf32>
    %cst_5 = arith.constant dense<0.000000e+00> : vector<200xf32>
    %13 = vector.multi_reduction <add>, %12, %cst_5 [1] : vector<200x128xf32> to vector<200xf32>
    %14 = vector.shape_cast %13 : vector<200xf32> to vector<200x1xf32>
    %cst_6 = arith.constant 3.125000e-02 : f32
    %15 = vector.broadcast %cst_6 : f32 to vector<200x1xf32>
    %16 = arith.mulf %14, %15 : vector<200x1xf32>
    %17 = arith.mulf %12, %12 : vector<200x128xf32>
    %cst_7 = arith.constant dense<0.000000e+00> : vector<200xf32>
    %18 = vector.multi_reduction <add>, %17, %cst_7 [1] : vector<200x128xf32> to vector<200xf32>
    %19 = vector.shape_cast %18 : vector<200xf32> to vector<200x1xf32>
    %cst_8 = arith.constant 3.125000e-02 : f32
    %20 = vector.broadcast %cst_8 : f32 to vector<200x1xf32>
    %21 = arith.mulf %19, %20 : vector<200x1xf32>
    %22 = arith.mulf %16, %16 : vector<200x1xf32>
    %23 = arith.subf %21, %22 : vector<200x1xf32>
    %cst_9 = arith.constant 0.000000e+00 : f32
    %24 = vector.broadcast %cst_9 : f32 to vector<200x1xf32>
    %25 = arith.maximumf %23, %24 : vector<200x1xf32>
    %26 = vector.broadcast %16 : vector<200x1xf32> to vector<200x128xf32>
    %27 = arith.subf %12, %26 : vector<200x128xf32>
    %cst_10 = arith.constant 9.99999974E-6 : f32
    %28 = vector.broadcast %cst_10 : f32 to vector<200x1xf32>
    %29 = arith.addf %25, %28 : vector<200x1xf32>
    %30 = math.rsqrt %29 : vector<200x1xf32>
    %31 = vector.broadcast %30 : vector<200x1xf32> to vector<200x128xf32>
    %32 = arith.mulf %27, %31 : vector<200x128xf32>
    %33 = vector.broadcast %2 : vector<1x128xf32> to vector<200x128xf32>
    %34 = arith.mulf %32, %33 : vector<200x128xf32>
    %35 = vector.broadcast %3 : vector<1x128xf32> to vector<200x128xf32>
    %36 = arith.addf %34, %35 : vector<200x128xf32>
    %37 = math.tanh %36 : vector<200x128xf32>
    %c0_11 = arith.constant 0 : index
    %c0_12 = arith.constant 0 : index
    %38 = vector.load %arg5[%c0_11, %c0_12] : memref<128x128xbf16, #tpu.memory_space<vmem>>, vector<128x128xbf16>
    %39 = arith.truncf %37 : vector<200x128xf32> to vector<200x128xbf16>
    %cst_13 = arith.constant dense<0.000000e+00> : vector<200x128xf32>
    %40 = tpu.matmul %39, %38, %cst_13 {dimension_numbers = #tpu.dot_dimension_numbers<[1], [0], [0], [1], [0, 0, 1, 1], [], []>} : vector<200x128xbf16>, vector<128x128xbf16>, vector<200x128xf32> -> vector<200x128xf32>
    %41 = vector.broadcast %4 : vector<1x128xf32> to vector<200x128xf32>
    %42 = arith.addf %40, %41 : vector<200x128xf32>
    %cst_14 = arith.constant 0.000000e+00 : f32
    %43 = vector.broadcast %cst_14 : f32 to vector<200x128xf32>
    %44 = arith.maximumf %42, %43 : vector<200x128xf32>
    %c0_15 = arith.constant 0 : index
    %c0_16 = arith.constant 0 : index
    %45 = vector.load %arg6[%c0_15, %c0_16] : memref<128x128xbf16, #tpu.memory_space<vmem>>, vector<128x128xbf16>
    %46 = arith.truncf %44 : vector<200x128xf32> to vector<200x128xbf16>
    %cst_17 = arith.constant dense<0.000000e+00> : vector<200x128xf32>
    %47 = tpu.matmul %46, %45, %cst_17 {dimension_numbers = #tpu.dot_dimension_numbers<[1], [0], [0], [1], [0, 0, 1, 1], [], []>} : vector<200x128xbf16>, vector<128x128xbf16>, vector<200x128xf32> -> vector<200x128xf32>
    %c0_18 = arith.constant 0 : index
    %c0_19 = arith.constant 0 : index
    %48 = vector.load %arg12[%c0_18, %c0_19] : memref<1x128xf32, #tpu.memory_space<vmem>>, vector<1x128xf32>
    %49 = vector.broadcast %48 : vector<1x128xf32> to vector<200x128xf32>
    %50 = arith.addf %47, %49 : vector<200x128xf32>
    %51 = arith.mulf %50, %50 : vector<200x128xf32>
    %cst_20 = arith.constant dense<0.000000e+00> : vector<200xf32>
    %52 = vector.multi_reduction <add>, %51, %cst_20 [1] : vector<200x128xf32> to vector<200xf32>
    %53 = vector.shape_cast %52 : vector<200xf32> to vector<200x1xf32>
    %cst_21 = arith.constant 1.000000e-24 : f32
    %54 = vector.broadcast %cst_21 : f32 to vector<200x1xf32>
    %55 = arith.maximumf %53, %54 : vector<200x1xf32>
    %56 = math.rsqrt %55 : vector<200x1xf32>
    %57 = vector.broadcast %56 : vector<200x1xf32> to vector<200x128xf32>
    %58 = arith.mulf %50, %57 : vector<200x128xf32>
    %c0_22 = arith.constant 0 : index
    %c0_23 = arith.constant 0 : index
    %59 = vector.load %arg7[%c0_22, %c0_23] : memref<128x128xbf16, #tpu.memory_space<vmem>>, vector<128x128xbf16>
    %60 = arith.truncf %58 : vector<200x128xf32> to vector<200x128xbf16>
    %cst_24 = arith.constant dense<0.000000e+00> : vector<200x128xf32>
    %61 = tpu.matmul %60, %59, %cst_24 {dimension_numbers = #tpu.dot_dimension_numbers<[1], [0], [0], [1], [0, 0, 1, 1], [], []>} : vector<200x128xbf16>, vector<128x128xbf16>, vector<200x128xf32> -> vector<200x128xf32>
    %c0_25 = arith.constant 0 : index
    %c0_26 = arith.constant 0 : index
    %62 = vector.load %arg2[%c0_25, %c0_26] : memref<200x128xf32, #tpu.memory_space<vmem>>, vector<200x128xf32>
    %c0_27 = arith.constant 0 : index
    %c0_28 = arith.constant 0 : index
    %63 = vector.load %arg8[%c0_27, %c0_28] : memref<128x128xbf16, #tpu.memory_space<vmem>>, vector<128x128xbf16>
    %64 = arith.truncf %62 : vector<200x128xf32> to vector<200x128xbf16>
    %cst_29 = arith.constant dense<0.000000e+00> : vector<200x128xf32>
    %65 = tpu.matmul %64, %63, %cst_29 {dimension_numbers = #tpu.dot_dimension_numbers<[1], [0], [0], [1], [0, 0, 1, 1], [], []>} : vector<200x128xbf16>, vector<128x128xbf16>, vector<200x128xf32> -> vector<200x128xf32>
    %66 = arith.addf %61, %65 : vector<200x128xf32>
    %67 = vector.broadcast %5 : vector<1x128xf32> to vector<200x128xf32>
    %68 = arith.addf %66, %67 : vector<200x128xf32>
    %cst_30 = arith.constant 0.000000e+00 : f32
    %69 = vector.broadcast %cst_30 : f32 to vector<200x128xf32>
    %70 = arith.maximumf %68, %69 : vector<200x128xf32>
    %c0_31 = arith.constant 0 : index
    %c0_32 = arith.constant 0 : index
    %71 = vector.load %arg9[%c0_31, %c0_32] : memref<128x128xbf16, #tpu.memory_space<vmem>>, vector<128x128xbf16>
    %72 = arith.truncf %70 : vector<200x128xf32> to vector<200x128xbf16>
    %cst_33 = arith.constant dense<0.000000e+00> : vector<200x128xf32>
    %73 = tpu.matmul %72, %71, %cst_33 {dimension_numbers = #tpu.dot_dimension_numbers<[1], [0], [0], [1], [0, 0, 1, 1], [], []>} : vector<200x128xbf16>, vector<128x128xbf16>, vector<200x128xf32> -> vector<200x128xf32>
    %74 = vector.broadcast %6 : vector<1x128xf32> to vector<200x128xf32>
    %75 = arith.addf %73, %74 : vector<200x128xf32>
    %cst_34 = arith.constant 0.000000e+00 : f32
    %76 = vector.broadcast %cst_34 : f32 to vector<200x128xf32>
    %77 = arith.maximumf %75, %76 : vector<200x128xf32>
    %c0_35 = arith.constant 0 : index
    %c0_36 = arith.constant 0 : index
    %78 = vector.load %arg10[%c0_35, %c0_36] : memref<128x128xbf16, #tpu.memory_space<vmem>>, vector<128x128xbf16>
    %79 = arith.truncf %77 : vector<200x128xf32> to vector<200x128xbf16>
    %cst_37 = arith.constant dense<0.000000e+00> : vector<200x128xf32>
    %80 = tpu.matmul %79, %78, %cst_37 {dimension_numbers = #tpu.dot_dimension_numbers<[1], [0], [0], [1], [0, 0, 1, 1], [], []>} : vector<200x128xbf16>, vector<128x128xbf16>, vector<200x128xf32> -> vector<200x128xf32>
    %c0_38 = arith.constant 0 : index
    %c0_39 = arith.constant 0 : index
    %81 = vector.load %arg13[%c0_38, %c0_39] : memref<1x128xf32, #tpu.memory_space<vmem>>, vector<1x128xf32>
    %82 = vector.broadcast %81 : vector<1x128xf32> to vector<200x128xf32>
    %83 = arith.addf %80, %82 : vector<200x128xf32>
    %c0_40 = arith.constant 0 : index
    %c0_41 = arith.constant 0 : index
    %84 = vector.load %arg3[%c0_40, %c0_41] : memref<200x128xf32, #tpu.memory_space<vmem>>, vector<200x128xf32>
    %85 = arith.subf %83, %84 : vector<200x128xf32>
    %86 = arith.mulf %85, %85 : vector<200x128xf32>
    %c200_i32 = arith.constant 200 : i32
    %87 = arith.muli %arg0, %c200_i32 : i32
    %88 = tpu.iota {dimensions = array<i32: 0>} : vector<200x128xi32>
    %89 = vector.broadcast %87 : i32 to vector<200x128xi32>
    %90 = arith.addi %89, %88 : vector<200x128xi32>
    %c200_i32_42 = arith.constant 200 : i32
    %91 = vector.broadcast %c200_i32_42 : i32 to vector<200x128xi32>
    %92 = arith.cmpi slt, %90, %91 : vector<200x128xi32>
    %cst_43 = arith.constant 0.000000e+00 : f32
    %93 = vector.broadcast %cst_43 : f32 to vector<200x128xf32>
    %94 = arith.select %92, %86, %93 : vector<200x128xi1>, vector<200x128xf32>
    %95 = vector.shape_cast %94 : vector<200x128xf32> to vector<1x200x128xf32>
    %cst_44 = arith.constant dense<0.000000e+00> : vector<1xf32>
    %96 = vector.multi_reduction <add>, %95, %cst_44 [1, 2] : vector<1x200x128xf32> to vector<1xf32>
    %97 = vector.shape_cast %96 : vector<1xf32> to vector<1x1x1xf32>
    %98 = vector.extract %97[0, 0, 0] : f32 from vector<1x1x1xf32>
    %c0_45 = arith.constant 0 : index
    %c0_46 = arith.constant 0 : index
    %99 = memref.load %arg14[%c0_45, %c0_46] : memref<1x1xf32, #tpu.memory_space<smem>>
    memref.store %98, %arg14[%c0_45, %c0_46] : memref<1x1xf32, #tpu.memory_space<smem>>
    return
  }
  func.func @transform_0(%arg0: i32) -> (i32, i32) {
    %c0_i32 = arith.constant 0 : i32
    %c0_i32_0 = arith.constant 0 : i32
    return %arg0, %c0_i32 : i32, i32
  }
  func.func @transform_1(%arg0: i32) -> (i32, i32) {
    %c0_i32 = arith.constant 0 : i32
    %c0_i32_0 = arith.constant 0 : i32
    return %arg0, %c0_i32 : i32, i32
  }
  func.func @transform_2(%arg0: i32) -> (i32, i32) {
    %c0_i32 = arith.constant 0 : i32
    %c0_i32_0 = arith.constant 0 : i32
    return %arg0, %c0_i32 : i32, i32
  }
  func.func @transform_3(%arg0: i32) -> (i32, i32) {
    %c0_i32 = arith.constant 0 : i32
    %c0_i32_0 = arith.constant 0 : i32
    %c0_i32_1 = arith.constant 0 : i32
    return %c0_i32, %c0_i32_0 : i32, i32
  }
  func.func @transform_4(%arg0: i32) -> (i32, i32) {
    %c0_i32 = arith.constant 0 : i32
    %c0_i32_0 = arith.constant 0 : i32
    %c0_i32_1 = arith.constant 0 : i32
    return %c0_i32, %c0_i32_0 : i32, i32
  }
  func.func @transform_5(%arg0: i32) -> (i32, i32) {
    %c0_i32 = arith.constant 0 : i32
    %c0_i32_0 = arith.constant 0 : i32
    %c0_i32_1 = arith.constant 0 : i32
    return %c0_i32, %c0_i32_0 : i32, i32
  }
  func.func @transform_6(%arg0: i32) -> (i32, i32) {
    %c0_i32 = arith.constant 0 : i32
    %c0_i32_0 = arith.constant 0 : i32
    %c0_i32_1 = arith.constant 0 : i32
    return %c0_i32, %c0_i32_0 : i32, i32
  }
  func.func @transform_7(%arg0: i32) -> (i32, i32) {
    %c0_i32 = arith.constant 0 : i32
    %c0_i32_0 = arith.constant 0 : i32
    %c0_i32_1 = arith.constant 0 : i32
    return %c0_i32, %c0_i32_0 : i32, i32
  }
  func.func @transform_8(%arg0: i32) -> (i32, i32) {
    %c0_i32 = arith.constant 0 : i32
    %c0_i32_0 = arith.constant 0 : i32
    %c0_i32_1 = arith.constant 0 : i32
    return %c0_i32, %c0_i32_0 : i32, i32
  }
  func.func @transform_9(%arg0: i32) -> (i32, i32) {
    %c0_i32 = arith.constant 0 : i32
    %c0_i32_0 = arith.constant 0 : i32
    %c0_i32_1 = arith.constant 0 : i32
    return %c0_i32, %c0_i32_0 : i32, i32
  }
  func.func @transform_10(%arg0: i32) -> (i32, i32) {
    %c0_i32 = arith.constant 0 : i32
    %c0_i32_0 = arith.constant 0 : i32
    %c0_i32_1 = arith.constant 0 : i32
    return %c0_i32, %c0_i32_0 : i32, i32
  }
  func.func @transform_11(%arg0: i32) -> (i32, i32) {
    %c0_i32 = arith.constant 0 : i32
    %c0_i32_0 = arith.constant 0 : i32
    %c0_i32_1 = arith.constant 0 : i32
    return %c0_i32, %c0_i32_0 : i32, i32
  }
  func.func @transform_12(%arg0: i32) -> (i32, i32) {
    %c0_i32 = arith.constant 0 : i32
    %c0_i32_0 = arith.constant 0 : i32
    %c0_i32_1 = arith.constant 0 : i32
    return %c0_i32, %c0_i32_0 : i32, i32
  }
  func.func @transform_13(%arg0: i32) -> (i32, i32) {
    %c0_i32 = arith.constant 0 : i32
    %c0_i32_0 = arith.constant 0 : i32
    return %arg0, %c0_i32 : i32, i32
  }
}

</mosaic_0001>

<bundles_post_ra>
// kernel: tpu_custom_call.1
= control target key start
LH: loop header
LB: loop body
LE: loop exit
PB: predicated region body
PF: predicated region fallthrough
CT: control target
= control target key end

     0   :  { %18 = vsyncpa [#allocation3], 0  ;;  %s5086_s0 = inlined_call_operand.hbm [shape: f32[200,128], index: 0, kind: input, shape index: {}]   ;;  %s5087_s1 = inlined_call_operand.hbm [shape: f32[200,128], index: 1, kind: input, shape index: {}]   ;;  %s5088_s2 = inlined_call_operand.hbm [shape: f32[200,128], index: 2, kind: input, shape index: {}]   ;;  %s5089_s3 = inlined_call_operand.hbm [shape: bf16[128,128], index: 3, kind: input, shape index: {}]   ;;  %s5090_s4 = inlined_call_operand.hbm [shape: bf16[128,128], index: 4, kind: input, shape index: {}]   ;;  %s5091_s5 = inlined_call_operand.hbm [shape: bf16[128,128], index: 5, kind: input, shape index: {}]   ;;  %s5092_s6 = inlined_call_operand.hbm [shape: bf16[128,128], index: 6, kind: input, shape index: {}]   ;;  %s5093_s7 = inlined_call_operand.hbm [shape: bf16[128,128], index: 7, kind: input, shape index: {}]   ;;  %s5094_s8 = inlined_call_operand.hbm [shape: bf16[128,128], index: 8, kind: input, shape index: {}]   ;;  %s5095_s9 = inlined_call_operand.hbm [shape: bf16[128,128], index: 9, kind: input, shape index: {}]   ;;  %s5096_s10 = inlined_call_operand.vmem [shape: f32[8,128], index: 10, kind: input, shape index: {}]   ;;  %s5097_s11 = inlined_call_operand.vmem [shape: f32[1,128], index: 11, kind: input, shape index: {}]   ;;  %s5098_s12 = inlined_call_operand.vmem [shape: f32[1,128], index: 12, kind: input, shape index: {}]   ;;  %s5099_s13 = inlined_call_operand.hbm [shape: f32[1,1], index: 13, kind: output, shape index: {}]  }
   0x1   :  { %19 = vsyncpa [#allocation6], 0 }
   0x2   :  { %20 = vsyncpa [#allocation9], 0 }
   0x3   :  { %21 = vsyncpa [#allocation12], 0 }
   0x4   :  { %22 = vsyncpa [#allocation15], 0 }
   0x5   :  { %23 = vsyncpa [#allocation18], 0 }
   0x6   :  { %24 = vsyncpa [#allocation4], 0  ;;  %s3837_s25 = smov [#allocation5]   ;;  %s3838_s27 = smov [#allocation8]  }
   0x7   :  { %s42_s26 = sshll.u32 %s3837_s25, 4  ;;  %s66_s28 = sshll.u32 %s3838_s27, 4  ;;  %s43_s26 = int_to_ptr.vmem [resolvable:$true] %s42_s26  ;;  %s3924_s28 = int_to_ptr.vmem [resolvable:$true] %s66_s28 }
   0x8   :  { %s3593_s14 = scalar_lea.hbm %s5087_s1, 3200 }
   0x9   :  { %p3594_p0 = scmp.ne.s32.totalorder %s5087_s1, %s3593_s14  ;;  %p3597_p1 = scmp.lt.u32.totalorder %s3593_s14, %s5087_s1 }
   0xb   :  { %p3599_p2 = pnand %p3597_p1, %p3594_p0 }
   0xd   :  { %3602 = shalt.err (!%p3599_p2)
}
   0xe   :  { %s3603_s19 = scalar_lea.vmem %s43_s26, 3200  ;;  %p3608_p4 = scmp.lt.s32.totalorder %s43_s26, %s43_s26 }
   0xf   :  { %p3604_p3 = scmp.ne.s32.totalorder %s43_s26, %s3603_s19  ;;  %p3609_p5 = scmp.lt.s32.totalorder %s3603_s19, %s3603_s19 }
  0x11   :  { %p3610_p6 = por %p3609_p5, %p3608_p4 }
  0x13   :  { %p3611_p7 = pnand %p3610_p6, %p3604_p3 }
  0x15   :  { %3614 = shalt.err (!%p3611_p7)
}
  0x16   :  { %s3839_s20 = smov 128   ;;  %s3840_s21 = smov 8  }
  0x17   :  { %48 = dma.hbm_to_vmem [thread:$0]  %s5087_s1, 3200, %s43_s26, [#allocation6], %s3839_s20, %s3839_s20, %s3840_s21  }
  0x18   :  { %s3615_s27 = scalar_lea.hbm %s5089_s3, 1024 }
  0x19   :  { %p3616_p8 = scmp.ne.s32.totalorder %s5089_s3, %s3615_s27  ;;  %p3619_p9 = scmp.lt.u32.totalorder %s3615_s27, %s5089_s3 }
  0x1b   :  { %p3621_p10 = pnand %p3619_p9, %p3616_p8 }
  0x1d   :  { %3624 = shalt.err (!%p3621_p10)
}
  0x1e   :  { %s3625_s16 = scalar_lea.vmem %s3924_s28, 1024  ;;  %p3630_p12 = scmp.lt.s32.totalorder %s3924_s28, %s3924_s28 }
  0x1f   :  { %p3626_p11 = scmp.ne.s32.totalorder %s3924_s28, %s3625_s16  ;;  %p3631_p13 = scmp.lt.s32.totalorder %s3625_s16, %s3625_s16 }
  0x21   :  { %p3632_p0 = por %p3631_p13, %p3630_p12 }
  0x23   :  { %p3633_p1 = pnand %p3632_p0, %p3626_p11 }
  0x25   :  { %3636 = shalt.err (!%p3633_p1)
}
  0x26   :  { %s3841_s1 = smov 64   ;;  %s3842_s26 = smov 4  }
  0x27   :  { %72 = dma.hbm_to_vmem [thread:$0]  %s5089_s3, 1024, %s3924_s28, [#allocation9], %s3841_s1, %s3841_s1, %s3842_s26  }
  0x28   :  { %s3843_s19 = smov [#allocation11]   ;;  %s3844_s23 = smov [#allocation14]  }
  0x29   :  { %s90_s22 = sshll.u32 %s3843_s19, 4  ;;  %s114_s24 = sshll.u32 %s3844_s23, 4  ;;  %s91_s22 = int_to_ptr.vmem [resolvable:$true] %s90_s22  ;;  %s3961_s24 = int_to_ptr.vmem [resolvable:$true] %s114_s24 }
  0x2a   :  { %s3637_s29 = scalar_lea.hbm %s5091_s5, 1024 }
  0x2b   :  { %p3638_p2 = scmp.ne.s32.totalorder %s5091_s5, %s3637_s29  ;;  %p3641_p3 = scmp.lt.u32.totalorder %s3637_s29, %s5091_s5 }
  0x2d   :  { %p3643_p4 = pnand %p3641_p3, %p3638_p2 }
  0x2f   :  { %3646 = shalt.err (!%p3643_p4)
}
  0x30   :  { %s3647_s3 = scalar_lea.vmem %s91_s22, 1024  ;;  %p3652_p6 = scmp.lt.s32.totalorder %s91_s22, %s91_s22 }
  0x31   :  { %p3648_p5 = scmp.ne.s32.totalorder %s91_s22, %s3647_s3  ;;  %p3653_p7 = scmp.lt.s32.totalorder %s3647_s3, %s3647_s3 }
  0x33   :  { %p3654_p8 = por %p3653_p7, %p3652_p6 }
  0x35   :  { %p3655_p9 = pnand %p3654_p8, %p3648_p5 }
  0x37   :  { %3658 = shalt.err (!%p3655_p9)
}
  0x38   :  { %96 = dma.hbm_to_vmem [thread:$0]  %s5091_s5, 1024, %s91_s22, [#allocation12], %s3841_s1, %s3841_s1, %s3842_s26  }
  0x39   :  { %s3659_s23 = scalar_lea.hbm %s5093_s7, 1024 }
  0x3a   :  { %p3660_p10 = scmp.ne.s32.totalorder %s5093_s7, %s3659_s23  ;;  %p3663_p11 = scmp.lt.u32.totalorder %s3659_s23, %s5093_s7 }
  0x3c   :  { %p3665_p12 = pnand %p3663_p11, %p3660_p10 }
  0x3e   :  { %3668 = shalt.err (!%p3665_p12)
}
  0x3f   :  { %s3669_s14 = scalar_lea.vmem %s3961_s24, 1024  ;;  %p3674_p0 = scmp.lt.s32.totalorder %s3961_s24, %s3961_s24 }
  0x40   :  { %p3670_p13 = scmp.ne.s32.totalorder %s3961_s24, %s3669_s14  ;;  %p3675_p1 = scmp.lt.s32.totalorder %s3669_s14, %s3669_s14 }
  0x42   :  { %p3676_p2 = por %p3675_p1, %p3674_p0 }
  0x44   :  { %p3677_p3 = pnand %p3676_p2, %p3670_p13 }
  0x46   :  { %3680 = shalt.err (!%p3677_p3)
}
  0x47   :  { %120 = dma.hbm_to_vmem [thread:$0]  %s5093_s7, 1024, %s3961_s24, [#allocation15], %s3841_s1, %s3841_s1, %s3842_s26  }
  0x48   :  { %s3845_s15 = smov [#allocation2]   ;;  %s3846_s3 = smov [#allocation7]  }
  0x49   :  { %s30_s16 = sshll.u32 %s3845_s15, 4  ;;  %s54_s28 = sshll.u32 %s3846_s3, 4  ;;  %s31_s16 = int_to_ptr.vmem [resolvable:$true] %s30_s16  ;;  %s3998_s28 = int_to_ptr.vmem [resolvable:$true] %s54_s28 }
  0x4a   :  { %s3681_s19 = scalar_lea.hbm %s5086_s0, 3200 }
  0x4b   :  { %p3682_p4 = scmp.ne.s32.totalorder %s5086_s0, %s3681_s19  ;;  %p3685_p5 = scmp.lt.u32.totalorder %s3681_s19, %s5086_s0 }
  0x4d   :  { %p3687_p6 = pnand %p3685_p5, %p3682_p4 }
  0x4f   :  { %3690 = shalt.err (!%p3687_p6)
}
  0x50   :  { %s3691_s7 = scalar_lea.vmem %s31_s16, 3200  ;;  %p3696_p8 = scmp.lt.s32.totalorder %s31_s16, %s31_s16 }
  0x51   :  { %p3692_p7 = scmp.ne.s32.totalorder %s31_s16, %s3691_s7  ;;  %p3697_p9 = scmp.lt.s32.totalorder %s3691_s7, %s3691_s7 }
  0x53   :  { %p3698_p10 = por %p3697_p9, %p3696_p8 }
  0x55   :  { %p3699_p11 = pnand %p3698_p10, %p3692_p7 }
  0x57   :  { %3702 = shalt.err (!%p3699_p11)
}
  0x58   :  { %36 = dma.hbm_to_vmem [thread:$0]  %s5086_s0, 3200, %s31_s16, [#allocation3], %s3839_s20, %s3839_s20, %s3840_s21  }
  0x59   :  { %s3703_s22 = scalar_lea.hbm %s5088_s2, 3200 }
  0x5a   :  { %p3704_p12 = scmp.ne.s32.totalorder %s5088_s2, %s3703_s22  ;;  %p3707_p13 = scmp.lt.u32.totalorder %s3703_s22, %s5088_s2 }
  0x5c   :  { %p3709_p0 = pnand %p3707_p13, %p3704_p12 }
  0x5e   :  { %3712 = shalt.err (!%p3709_p0)
}
  0x5f   :  { %s3713_s19 = scalar_lea.vmem %s3998_s28, 3200  ;;  %p3718_p2 = scmp.lt.s32.totalorder %s3998_s28, %s3998_s28 }
  0x60   :  { %p3714_p1 = scmp.ne.s32.totalorder %s3998_s28, %s3713_s19  ;;  %p3719_p3 = scmp.lt.s32.totalorder %s3713_s19, %s3713_s19 }
  0x62   :  { %p3720_p4 = por %p3719_p3, %p3718_p2 }
  0x64   :  { %p3721_p5 = pnand %p3720_p4, %p3714_p1 }
  0x66   :  { %3724 = shalt.err (!%p3721_p5)
}
  0x67   :  { %60 = dma.hbm_to_vmem [thread:$0]  %s5088_s2, 3200, %s3998_s28, [#allocation6], %s3839_s20, %s3839_s20, %s3840_s21  }
  0x68   :  { %s3847_s23 = smov [#allocation10]   ;;  %s3848_s27 = smov [#allocation13]  }
  0x69   :  { %s78_s25 = sshll.u32 %s3847_s23, 4  ;;  %s102_s29 = sshll.u32 %s3848_s27, 4  ;;  %s79_s25 = int_to_ptr.vmem [resolvable:$true] %s78_s25  ;;  %s4035_s29 = int_to_ptr.vmem [resolvable:$true] %s102_s29 }
  0x6a   :  { %s3725_s30 = scalar_lea.hbm %s5090_s4, 1024 }
  0x6b   :  { %p3726_p6 = scmp.ne.s32.totalorder %s5090_s4, %s3725_s30  ;;  %p3729_p7 = scmp.lt.u32.totalorder %s3725_s30, %s5090_s4 }
  0x6d   :  { %p3731_p8 = pnand %p3729_p7, %p3726_p6 }
  0x6f   :  { %3734 = shalt.err (!%p3731_p8)
}
  0x70   :  { %s3735_s2 = scalar_lea.vmem %s79_s25, 1024  ;;  %p3740_p10 = scmp.lt.s32.totalorder %s79_s25, %s79_s25 }
  0x71   :  { %p3736_p9 = scmp.ne.s32.totalorder %s79_s25, %s3735_s2  ;;  %p3741_p11 = scmp.lt.s32.totalorder %s3735_s2, %s3735_s2 }
  0x73   :  { %p3742_p12 = por %p3741_p11, %p3740_p10 }
  0x75   :  { %p3743_p13 = pnand %p3742_p12, %p3736_p9 }
  0x77   :  { %3746 = shalt.err (!%p3743_p13)
}
  0x78   :  { %84 = dma.hbm_to_vmem [thread:$0]  %s5090_s4, 1024, %s79_s25, [#allocation9], %s3841_s1, %s3841_s1, %s3842_s26  }
  0x79   :  { %s3747_s17 = scalar_lea.hbm %s5092_s6, 1024 }
  0x7a   :  { %p3748_p0 = scmp.ne.s32.totalorder %s5092_s6, %s3747_s17  ;;  %p3751_p1 = scmp.lt.u32.totalorder %s3747_s17, %s5092_s6 }
  0x7c   :  { %p3753_p2 = pnand %p3751_p1, %p3748_p0 }
  0x7e   :  { %3756 = shalt.err (!%p3753_p2)
}
  0x7f   :  { %s3757_s23 = scalar_lea.vmem %s4035_s29, 1024  ;;  %p3762_p4 = scmp.lt.s32.totalorder %s4035_s29, %s4035_s29 }
  0x80   :  { %p3758_p3 = scmp.ne.s32.totalorder %s4035_s29, %s3757_s23  ;;  %p3763_p5 = scmp.lt.s32.totalorder %s3757_s23, %s3757_s23 }
  0x82   :  { %p3764_p6 = por %p3763_p5, %p3762_p4 }
  0x84   :  { %p3765_p7 = pnand %p3764_p6, %p3758_p3 }
  0x86   :  { %3768 = shalt.err (!%p3765_p7)
}
  0x87   :  { %108 = dma.hbm_to_vmem [thread:$0]  %s5092_s6, 1024, %s4035_s29, [#allocation12], %s3841_s1, %s3841_s1, %s3842_s26  }
  0x88   :  { %s3849_s27 = smov [#allocation16]   ;;  %s3850_s24 = smov [#allocation17]  }
  0x89   :  { %s126_s7 = sshll.u32 %s3849_s27, 4  ;;  %s138_s30 = sshll.u32 %s3850_s24, 4  ;;  %s127_s7 = int_to_ptr.vmem [resolvable:$true] %s126_s7  ;;  %s4072_s30 = int_to_ptr.vmem [resolvable:$true] %s138_s30 }
  0x8a   :  { %s3769_s22 = scalar_lea.hbm %s5094_s8, 1024 }
  0x8b   :  { %p3770_p8 = scmp.ne.s32.totalorder %s5094_s8, %s3769_s22  ;;  %p3773_p9 = scmp.lt.u32.totalorder %s3769_s22, %s5094_s8 }
  0x8d   :  { %p3775_p10 = pnand %p3773_p9, %p3770_p8 }
  0x8f   :  { %3778 = shalt.err (!%p3775_p10)
}
  0x90   :  { %s3779_s6 = scalar_lea.vmem %s127_s7, 1024  ;;  %p3784_p12 = scmp.lt.s32.totalorder %s127_s7, %s127_s7 }
  0x91   :  { %p3780_p11 = scmp.ne.s32.totalorder %s127_s7, %s3779_s6  ;;  %p3785_p13 = scmp.lt.s32.totalorder %s3779_s6, %s3779_s6 }
  0x93   :  { %p3786_p0 = por %p3785_p13, %p3784_p12 }
  0x95   :  { %p3787_p1 = pnand %p3786_p0, %p3780_p11 }
  0x97   :  { %3790 = shalt.err (!%p3787_p1)
}
  0x98   :  { %132 = dma.hbm_to_vmem [thread:$0]  %s5094_s8, 1024, %s127_s7, [#allocation15], %s3841_s1, %s3841_s1, %s3842_s26  }
  0x99   :  { %s3791_s18 = scalar_lea.hbm %s5095_s9, 1024 }
  0x9a   :  { %p3792_p2 = scmp.ne.s32.totalorder %s5095_s9, %s3791_s18  ;;  %p3795_p3 = scmp.lt.u32.totalorder %s3791_s18, %s5095_s9 }
  0x9c   :  { %p3797_p4 = pnand %p3795_p3, %p3792_p2 }
  0x9e   :  { %3800 = shalt.err (!%p3797_p4)
}
  0x9f   :  { %s3801_s4 = scalar_lea.vmem %s4072_s30, 1024  ;;  %p3806_p6 = scmp.lt.s32.totalorder %s4072_s30, %s4072_s30 }
  0xa0   :  { %p3802_p5 = scmp.ne.s32.totalorder %s4072_s30, %s3801_s4  ;;  %p3807_p7 = scmp.lt.s32.totalorder %s3801_s4, %s3801_s4 }
  0xa2   :  { %p3808_p8 = por %p3807_p7, %p3806_p6 }
  0xa4   :  { %p3809_p9 = pnand %p3808_p8, %p3802_p5 }
  0xa6   :  { %3812 = shalt.err (!%p3809_p9)
}
  0xa7   :  { %144 = dma.hbm_to_vmem [thread:$0]  %s5095_s9, 1024, %s4072_s30, [#allocation18], %s3841_s1, %s3841_s1, %s3842_s26  }
  0xa8   :  { %3823 = dma.done.wait [#allocation3], 3200  }
  0xa9   :  { %3824 = vsyncadd [#allocation3], 4294964096 }
  0xaa   :  { %3825 = dma.done.wait [#allocation6], 6400  }
  0xab   :  { %3826 = vsyncadd [#allocation6], 4294960896 }
  0xac   :  { %3827 = dma.done.wait [#allocation9], 2048  }
  0xad   :  { %3828 = vsyncadd [#allocation9], 4294965248 }
  0xae   :  { %3829 = dma.done.wait [#allocation12], 2048  }
  0xaf   :  { %3830 = vsyncadd [#allocation12], 4294965248 }
  0xb0   :  { %3831 = dma.done.wait [#allocation15], 2048  }
  0xb1   :  { %3832 = vsyncadd [#allocation15], 4294965248 }
  0xb2   :  { %3833 = dma.done.wait [#allocation18], 1024  }
  0xb3   :  { %3834 = vsyncadd [#allocation18], 4294966272  ;;  %v3851_v0 = vmov 0.0   ;;  %vm3852_vm0 = vmmov 0   ;;  %v3385_v1 = vld [vmem:[#allocation8] sm:$0xff]   ;;  %v3386_v2 = vld [vmem:[#allocation8 + $0x8] sm:$0xff]   ;;  %v237_v48 = vlaneseq }
  0xb4   :  { %2874 = vmatprep.subr.bf16.mxu0 %v3851_v0  ;;  %2890 = vmatprep.mubr.msk.bf16.mxu0 %vm3852_vm0, %v3851_v0  ;;  %v3387_v3 = vld [vmem:[#allocation8 + $0x10] sm:$0xff]   ;;  %v3388_v4 = vld [vmem:[#allocation8 + $0x18] sm:$0xff]   ;;  %v3389_v5 = vld [vmem:[#allocation8 + $0x20] sm:$0xff]   ;;  %s3813_s15 = scalar_lea.hbm %s5099_s13, 16 }
  0xb5   :  { %3350 = vmatprep.subr.bf16.mxu1 %v3851_v0  ;;  %2918 = vmatprep.mubr.msk.bf16.mxu1 %vm3852_vm0, %v3851_v0  ;;  %v3390_v6 = vld [vmem:[#allocation8 + $0x28] sm:$0xff]   ;;  %v3391_v7 = vld [vmem:[#allocation8 + $0x30] sm:$0xff]   ;;  %v3392_v8 = vld [vmem:[#allocation8 + $0x38] sm:$0xff]   ;;  %v4158_v49 = vshrl.u32 %v237_v48, 7  ;;  %p3814_p10 = scmp.ne.s32.totalorder %s5099_s13, %s3813_s15  ;;  %p3817_p11 = scmp.lt.u32.totalorder %s3813_s15, %s5099_s13 }
  0xb6   :  { %2875 = vmatpush3.bf16.msra.mxu0 %v3385_v1  ;;  %3358 = vmatpush3.bf16.msra.mxu1 %v3385_v1  ;;  %v183_v9 = vld [vmem:[#allocation2] sm:$0xff]  ;;  %v184_v10 = vld [vmem:[#allocation2 + $0x8] sm:$0xff]  ;;  %v197_v11 = vld [vmem:[#allocation2 + $0x70] sm:$0xff] }
  0xb7   :  { %2876 = vmatprep.subr.bf16.mxu0 %v3851_v0  ;;  %3351 = vmatprep.subr.bf16.mxu1 %v3851_v0  ;;  %v198_v12 = vld [vmem:[#allocation2 + $0x78] sm:$0xff]  ;;  %v224_v13 = vpack.c.bf16 %v184_v10, %v183_v9  ;;  %v185_v15 = vld [vmem:[#allocation2 + $0x10] sm:$0xff]  ;;  %v199_v17 = vld [vmem:[#allocation2 + $0x80] sm:$0xff]  ;;  %v239_v50 = vsub.s32 0, %v4158_v49  ;;  %p3819_p12 = pnand %p3817_p11, %p3814_p10 }
  0xb8   :  { %v231_v14 = vpack.c.bf16 %v198_v12, %v197_v11  ;;  %v186_v16 = vld [vmem:[#allocation2 + $0x18] sm:$0xff]  ;;  %v200_v18 = vld [vmem:[#allocation2 + $0x88] sm:$0xff]  ;;  %v187_v21 = vld [vmem:[#allocation2 + $0x20] sm:$0xff] }
  0xb9   :  { %v225_v19 = vpack.c.bf16 %v186_v16, %v185_v15  ;;  %v232_v20 = vpack.c.bf16 %v200_v18, %v199_v17  ;;  %v188_v22 = vld [vmem:[#allocation2 + $0x28] sm:$0xff]  ;;  %v201_v23 = vld [vmem:[#allocation2 + $0x90] sm:$0xff]  ;;  %v202_v24 = vld [vmem:[#allocation2 + $0x98] sm:$0xff] }
  0xba   :  { %2877 = vmatpush3.bf16.msra.mxu0 %v3386_v2  ;;  %3359 = vmatpush3.bf16.msra.mxu1 %v3386_v2  ;;  %v226_v25 = vpack.c.bf16 %v188_v22, %v187_v21  ;;  %v233_v26 = vpack.c.bf16 %v202_v24, %v201_v23  ;;  %v189_v27 = vld [vmem:[#allocation2 + $0x30] sm:$0xff]  ;;  %v190_v28 = vld [vmem:[#allocation2 + $0x38] sm:$0xff]  ;;  %v203_v29 = vld [vmem:[#allocation2 + $0xa0] sm:$0xff] }
  0xbb   :  { %2878 = vmatprep.subr.bf16.mxu0 %v3851_v0  ;;  %3352 = vmatprep.subr.bf16.mxu1 %v3851_v0  ;;  %v204_v30 = vld [vmem:[#allocation2 + $0xa8] sm:$0xff]  ;;  %v227_v31 = vpack.c.bf16 %v190_v28, %v189_v27  ;;  %v191_v33 = vld [vmem:[#allocation2 + $0x40] sm:$0xff]  ;;  %v205_v35 = vld [vmem:[#allocation2 + $0xb0] sm:$0xff] }
  0xbc   :  { %v234_v32 = vpack.c.bf16 %v204_v30, %v203_v29  ;;  %v192_v34 = vld [vmem:[#allocation2 + $0x48] sm:$0xff]  ;;  %v206_v36 = vld [vmem:[#allocation2 + $0xb8] sm:$0xff]  ;;  %v193_v39 = vld [vmem:[#allocation2 + $0x50] sm:$0xff] }
  0xbd   :  { %v228_v37 = vpack.c.bf16 %v192_v34, %v191_v33  ;;  %v235_v38 = vpack.c.bf16 %v206_v36, %v205_v35  ;;  %v194_v40 = vld [vmem:[#allocation2 + $0x58] sm:$0xff]  ;;  %v207_v41 = vld [vmem:[#allocation2 + $0xc0] sm:$0xff]  ;;  %v196_v45 = vld [vmem:[#allocation2 + $0x68] sm:$0xff] }
  0xbe   :  { %2879 = vmatpush3.bf16.msra.mxu0 %v3387_v3  ;;  %3360 = vmatpush3.bf16.msra.mxu1 %v3387_v3  ;;  %v229_v42 = vpack.c.bf16 %v194_v40, %v193_v39  ;;  %v236_v43 = vpack.c.bf16 %v207_v41, %v207_v41  ;;  %v195_v44 = vld [vmem:[#allocation2 + $0x60] sm:$0xff]  ;;  %v3393_v47 = vld [vmem:[#allocation10] sm:$0xff]  }
  0xbf   :  { %2880 = vmatprep.subr.bf16.mxu0 %v3851_v0  ;;  %3353 = vmatprep.subr.bf16.mxu1 %v3851_v0  ;;  %v230_v46 = vpack.c.bf16 %v196_v45, %v195_v44  ;;  %v4164_v51 = vld [vmem:[%s5096_s10] sm:$0xff] }
  0xc0   :  { %v4167_v52 = vrot.slane %v4164_v51, %v239_v50 }
  0xc2   :  { %2881 = vmatpush3.bf16.msra.mxu0 %v3388_v4  ;;  %3361 = vmatpush3.bf16.msra.mxu1 %v3388_v4 }
  0xc3   :  { %2882 = vmatprep.subr.bf16.mxu0 %v3851_v0  ;;  %3354 = vmatprep.subr.bf16.mxu1 %v3851_v0 }
  0xc6   :  { %2883 = vmatpush3.bf16.msra.mxu0 %v3389_v5  ;;  %3362 = vmatpush3.bf16.msra.mxu1 %v3389_v5 }
  0xc7   :  { %2884 = vmatprep.subr.bf16.mxu0 %v3851_v0  ;;  %3355 = vmatprep.subr.bf16.mxu1 %v3851_v0 }
  0xca   :  { %2885 = vmatpush3.bf16.msra.mxu0 %v3390_v6  ;;  %3363 = vmatpush3.bf16.msra.mxu1 %v3390_v6 }
  0xcb   :  { %2886 = vmatprep.subr.bf16.mxu0 %v3851_v0  ;;  %3356 = vmatprep.subr.bf16.mxu1 %v3851_v0 }
  0xce   :  { %2887 = vmatpush3.bf16.msra.mxu0 %v3391_v7  ;;  %3364 = vmatpush3.bf16.msra.mxu1 %v3391_v7 }
  0xcf   :  { %2888 = vmatprep.subr.bf16.mxu0 %v3851_v0  ;;  %3357 = vmatprep.subr.bf16.mxu1 %v3851_v0 }
  0xd2   :  { %2889 = vmatpush3.bf16.msra.mxu0 %v3392_v8  ;;  %3365 = vmatpush3.bf16.msra.mxu1 %v3392_v8 }
  0xd3   :  { %2942 = vmatprep.subr.bf16.mxu1 %v3851_v0  ;;  %3010 = vmatprep.subr.bf16.mxu0 %v3851_v0 }
  0xd5   :  { %2891 = vmatmul.mubr.bf16.vlgmr.msra.gmra.mrb[0].mxu0 %v224_v13  ;;  %2919 = vmatmul.mubr.bf16.vlgmr.msra.gmra.mrb[0].mxu1 %v231_v14 }
  0xd6   :  { %2894 = vmatprep.mubr.msk.bf16.mxu0 %vm3852_vm0, %v3851_v0  ;;  %2922 = vmatprep.mubr.msk.bf16.mxu1 %vm3852_vm0, %v3851_v0 }
  0xd7   :  { %2943 = vmatpush3.bf16.msra.mxu1 %v3393_v47 }
  0xd8   :  { %2944 = vmatprep.subr.bf16.mxu1 %v3851_v0 }
  0xdd   :  { %2895 = vmatmul.mubr.bf16.gmra.mrb[4].mxu0 %v225_v19  ;;  %2923 = vmatmul.mubr.bf16.gmra.mrb[4].mxu1 %v232_v20 }
  0xde   :  { %2898 = vmatprep.mubr.msk.bf16.mxu0 %vm3852_vm0, %v3851_v0  ;;  %2926 = vmatprep.mubr.msk.bf16.mxu1 %vm3852_vm0, %v3851_v0 }
  0xe5   :  { %2899 = vmatmul.mubr.bf16.gmra.mrb[8].mxu0 %v226_v25  ;;  %2927 = vmatmul.mubr.bf16.gmra.mrb[8].mxu1 %v233_v26 }
  0xe6   :  { %2902 = vmatprep.mubr.msk.bf16.mxu0 %vm3852_vm0, %v3851_v0  ;;  %2930 = vmatprep.mubr.msk.bf16.mxu1 %vm3852_vm0, %v3851_v0 }
  0xed   :  { %2903 = vmatmul.mubr.bf16.gmra.mrb[12].mxu0 %v227_v31  ;;  %2931 = vmatmul.mubr.bf16.gmra.mrb[12].mxu1 %v234_v32 }
  0xee   :  { %2906 = vmatprep.mubr.msk.bf16.mxu0 %vm3852_vm0, %v3851_v0  ;;  %2934 = vmatprep.mubr.msk.bf16.mxu1 %vm3852_vm0, %v3851_v0 }
  0xf5   :  { %2907 = vmatmul.mubr.bf16.gmra.mrb[16].mxu0 %v228_v37  ;;  %2935 = vmatmul.mubr.bf16.gmra.mrb[16].mxu1 %v235_v38 }
  0xf6   :  { %2910 = vmatprep.mubr.msk.bf16.mxu0 %vm3852_vm0, %v3851_v0  ;;  %2938 = vmatprep.mubr.msk.bf16.mxu1 %vm3852_vm0, %v3851_v0 }
  0xfd   :  { %2911 = vmatmul.mubr.bf16.gmra.mrb[20].mxu0 %v229_v42  ;;  %2939 = vmatmul.mubr.bf16.gmra.mrb[20].mxu1 %v236_v43 }
  0xfe   :  { %2914 = vmatprep.mubr.msk.bf16.mxu0 %vm3852_vm0, %v3851_v0  ;;  %2958 = vmatprep.mubr.msk.bf16.mxu1 %vm3852_vm0, %v3851_v0 }
 0x105   :  { %2915 = vmatmul.mubr.bf16.gmra.mrb[24].mxu0 %v230_v46  ;;  %v3394_v46 = vld [vmem:[#allocation10 + $0x8] sm:$0xff]  }
 0x106   :  { %3026 = vmatprep.mubr.msk.bf16.mxu0 %vm3852_vm0, %v3851_v0  ;;  %2945 = vmatpush3.bf16.msra.mxu1 %v3394_v46 }
 0x107   :  { %2946 = vmatprep.subr.bf16.mxu1 %v3851_v0 }
 0x1a8   :  { %v323_v53 = vpop.f32.mrb[0].mxu0  ;;  %v4169_v54 = vpop.f32.mrb[0].mxu1 }
 0x1a9   :  { %v4172_v55 = vadd.f32 %v323_v53, %v4167_v52  ;;  %v2892_v56 = vpop.f32.mrb[1].mxu0  ;;  %v2920_v57 = vpop.f32.mrb[1].mxu1 }
 0x1aa   :  { %v326_v58 = vpop.f32.mrb[2].mxu0  ;;  %v4174_v59 = vpop.f32.mrb[2].mxu1 }
 0x1ab   :  { %v4177_v60 = vadd.f32 %v326_v58, %v4167_v52  ;;  %v2893_v61 = vpop.f32.mrb[3].mxu0  ;;  %425 = vadd.xlane.f32.xlu0 %v4172_v55  ;;  %v500_v62 = vmul.f32 %v4172_v55, %v4172_v55  ;;  %v2921_v63 = vpop.f32.mrb[3].mxu1 }
 0x1ad   :  { %525 = vadd.xlane.f32.xlu1 %v500_v62  ;;  %v501_v1 = vmul.f32 %v4177_v60, %v4177_v60 }
 0x1af   :  { %427 = vadd.xlane.f32.xlu0 %v4177_v60 }
 0x1b0   :  { %v331_v2 = vpop.f32.mrb[4].mxu0  ;;  %v387_v3 = vpop.f32.mrb[4].mxu1 }
 0x1b1   :  { %v4186_v4 = vadd.f32 %v331_v2, %v4167_v52  ;;  %v2896_v5 = vpop.f32.mrb[5].mxu0  ;;  %527 = vadd.xlane.f32.xlu1 %v501_v1  ;;  %v4189_v6 = vadd.f32 %v387_v3, %v4167_v52  ;;  %v2924_v7 = vpop.f32.mrb[5].mxu1  ;;  %v3395_v1 = vld [vmem:[#allocation10 + $0x10] sm:$0xff]  }
 0x1b2   :  { %v334_v8 = vpop.f32.mrb[6].mxu0  ;;  %v390_v9 = vpop.f32.mrb[6].mxu1  ;;  %2947 = vmatpush3.bf16.msra.mxu1 %v3395_v1 }
 0x1b3   :  { %v4192_v10 = vadd.f32 %v334_v8, %v4167_v52  ;;  %v2897_v11 = vpop.f32.mrb[7].mxu0  ;;  %429 = vadd.xlane.f32.xlu0 %v4186_v4  ;;  %v4196_v12 = vadd.f32 %v390_v9, %v4167_v52  ;;  %v2925_v13 = vpop.f32.mrb[7].mxu1  ;;  %v502_v14 = vmul.f32 %v4186_v4, %v4186_v4  ;;  %2948 = vmatprep.subr.bf16.mxu1 %v3851_v0 }
 0x1b5   :  { %431 = vadd.xlane.f32.xlu1 %v4192_v10  ;;  %v503_v15 = vmul.f32 %v4192_v10, %v4192_v10 }
 0x1b7   :  { %529 = vadd.xlane.f32.xlu0 %v502_v14  ;;  %v3396_v14 = vld [vmem:[#allocation10 + $0x18] sm:$0xff]  }
 0x1b8   :  { %v339_v16 = vpop.f32.mrb[8].mxu0  ;;  %v395_v17 = vpop.f32.mrb[8].mxu1  ;;  %2949 = vmatpush3.bf16.msra.mxu1 %v3396_v14 }
 0x1b9   :  { %v4204_v18 = vadd.f32 %v339_v16, %v4167_v52  ;;  %v2900_v19 = vpop.f32.mrb[9].mxu0  ;;  %531 = vadd.xlane.f32.xlu1 %v503_v15  ;;  %v4207_v20 = vadd.f32 %v395_v17, %v4167_v52  ;;  %v2928_v21 = vpop.f32.mrb[9].mxu1  ;;  %2950 = vmatprep.subr.bf16.mxu1 %v3851_v0 }
 0x1ba   :  { %v342_v22 = vpop.f32.mrb[10].mxu0  ;;  %v398_v23 = vpop.f32.mrb[10].mxu1 }
 0x1bb   :  { %v4210_v24 = vadd.f32 %v342_v22, %v4167_v52  ;;  %v2901_v25 = vpop.f32.mrb[11].mxu0  ;;  %433 = vadd.xlane.f32.xlu0 %v4204_v18  ;;  %v4214_v26 = vadd.f32 %v398_v23, %v4167_v52  ;;  %v2929_v27 = vpop.f32.mrb[11].mxu1  ;;  %v504_v28 = vmul.f32 %v4204_v18, %v4204_v18  ;;  %v3397_v23 = vld [vmem:[#allocation10 + $0x20] sm:$0xff]  }
 0x1bc   :  { %2951 = vmatpush3.bf16.msra.mxu1 %v3397_v23 }
 0x1bd   :  { %435 = vadd.xlane.f32.xlu1 %v4210_v24  ;;  %v505_v29 = vmul.f32 %v4210_v24, %v4210_v24  ;;  %2952 = vmatprep.subr.bf16.mxu1 %v3851_v0  ;;  %v519_v46 = vmul.f32 %v4214_v26, %v4214_v26 }
 0x1bf   :  { %533 = vadd.xlane.f32.xlu0 %v504_v28 }
 0x1c0   :  { %v347_v30 = vpop.f32.mrb[12].mxu0  ;;  %v403_v31 = vpop.f32.mrb[12].mxu1 }
 0x1c1   :  { %v4222_v32 = vadd.f32 %v347_v30, %v4167_v52  ;;  %v2904_v33 = vpop.f32.mrb[13].mxu0  ;;  %535 = vadd.xlane.f32.xlu1 %v505_v29  ;;  %v4225_v34 = vadd.f32 %v403_v31, %v4167_v52  ;;  %v2932_v35 = vpop.f32.mrb[13].mxu1  ;;  %v3398_v30 = vld [vmem:[#allocation10 + $0x28] sm:$0xff]  }
 0x1c2   :  { %v350_v36 = vpop.f32.mrb[14].mxu0  ;;  %v406_v37 = vpop.f32.mrb[14].mxu1  ;;  %2953 = vmatpush3.bf16.msra.mxu1 %v3398_v30 }
 0x1c3   :  { %v4228_v38 = vadd.f32 %v350_v36, %v4167_v52  ;;  %v2905_v39 = vpop.f32.mrb[15].mxu0  ;;  %437 = vadd.xlane.f32.xlu0 %v4222_v32  ;;  %v4232_v40 = vadd.f32 %v406_v37, %v4167_v52  ;;  %v2933_v41 = vpop.f32.mrb[15].mxu1  ;;  %v506_v42 = vmul.f32 %v4222_v32, %v4222_v32  ;;  %2954 = vmatprep.subr.bf16.mxu1 %v3851_v0  ;;  %v3399_v37 = vld [vmem:[#allocation10 + $0x30] sm:$0xff]  }
 0x1c4   :  { %v4289_v39 = vadd.f32 %v4169_v54, %v4167_v52 }
 0x1c5   :  { %439 = vadd.xlane.f32.xlu1 %v4228_v38  ;;  %v507_v43 = vmul.f32 %v4228_v38, %v4228_v38 }
 0x1c6   :  { %2955 = vmatpush3.bf16.msra.mxu1 %v3399_v37  ;;  %v514_v54 = vmul.f32 %v4289_v39, %v4289_v39 }
 0x1c7   :  { %537 = vadd.xlane.f32.xlu0 %v506_v42  ;;  %2956 = vmatprep.subr.bf16.mxu1 %v3851_v0  ;;  %v3400_v42 = vld [vmem:[#allocation10 + $0x38] sm:$0xff]  }
 0x1c8   :  { %v355_v44 = vpop.f32.mrb[16].mxu0  ;;  %v411_v45 = vpop.f32.mrb[16].mxu1 }
 0x1c9   :  { %v4240_v47 = vadd.f32 %v355_v44, %v4167_v52  ;;  %v2908_v48 = vpop.f32.mrb[17].mxu0  ;;  %539 = vadd.xlane.f32.xlu1 %v507_v43  ;;  %v4243_v50 = vadd.f32 %v411_v45, %v4167_v52  ;;  %v2936_v53 = vpop.f32.mrb[17].mxu1  ;;  %v4296_v43 = vadd.f32 %v4174_v59, %v4167_v52  ;;  %v517_v59 = vmul.f32 %v4196_v12, %v4196_v12 }
 0x1ca   :  { %v358_v56 = vpop.f32.mrb[18].mxu0  ;;  %v414_v57 = vpop.f32.mrb[18].mxu1  ;;  %2957 = vmatpush3.bf16.msra.mxu1 %v3400_v42  ;;  %v518_v45 = vmul.f32 %v4207_v20, %v4207_v20  ;;  %v520_v48 = vmul.f32 %v4225_v34, %v4225_v34  ;;  %v521_v53 = vmul.f32 %v4232_v40, %v4232_v40  ;;  %v3401_v42 = vld [vmem:[#allocation11] sm:$0xff]  }
 0x1cb   :  { %v4246_v58 = vadd.f32 %v358_v56, %v4167_v52  ;;  %v2909_v61 = vpop.f32.mrb[19].mxu0  ;;  %441 = vadd.xlane.f32.xlu0 %v4240_v47  ;;  %v4250_v62 = vadd.f32 %v414_v57, %v4167_v52  ;;  %v2937_v63 = vpop.f32.mrb[19].mxu1  ;;  %v508_v2 = vmul.f32 %v4240_v47, %v4240_v47  ;;  %3078 = vmatprep.subr.bf16.mxu1 %v3851_v0 }
 0x1cc   :  { %v515_v44 = vmul.f32 %v4296_v43, %v4296_v43  ;;  %v522_v56 = vmul.f32 %v4243_v50, %v4243_v50  ;;  %3011 = vmatpush3.bf16.msra.mxu0 %v3401_v42 }
 0x1cd   :  { %443 = vadd.xlane.f32.xlu1 %v4246_v58  ;;  %v509_v3 = vmul.f32 %v4246_v58, %v4246_v58  ;;  %v523_v57 = vmul.f32 %v4250_v62, %v4250_v62  ;;  %3012 = vmatprep.subr.bf16.mxu0 %v3851_v0 }
 0x1cf   :  { %541 = vadd.xlane.f32.xlu0 %v508_v2 }
 0x1d0   :  { %v363_v5 = vpop.f32.mrb[20].mxu0  ;;  %v419_v7 = vpop.f32.mrb[20].mxu1 }
 0x1d1   :  { %v4260_v8 = vadd.f32 %v363_v5, %v4167_v52  ;;  %v2912_v9 = vpop.f32.mrb[21].mxu0  ;;  %543 = vadd.xlane.f32.xlu1 %v509_v3  ;;  %v4263_v11 = vadd.f32 %v419_v7, %v4167_v52  ;;  %v2940_v13 = vpop.f32.mrb[21].mxu1 }
 0x1d2   :  { %v366_v15 = vpop.f32.mrb[22].mxu0  ;;  %v422_v16 = vpop.f32.mrb[22].mxu1 }
 0x1d3   :  { %v4266_v17 = vadd.f32 %v366_v15, %v4167_v52  ;;  %v2913_v19 = vpop.f32.mrb[23].mxu0  ;;  %445 = vadd.xlane.f32.xlu0 %v4260_v8  ;;  %v2941_v21 = vpop.f32.mrb[23].mxu1  ;;  %v510_v22 = vmul.f32 %v4260_v8, %v4260_v8  ;;  %v524_v61 = vmul.f32 %v4263_v11, %v4263_v11 }
 0x1d5   :  { %447 = vadd.xlane.f32.xlu1 %v4266_v17  ;;  %v511_v25 = vmul.f32 %v4266_v17, %v4266_v17 }
 0x1d7   :  { %545 = vadd.xlane.f32.xlu0 %v510_v22 }
 0x1d8   :  { %v371_v27 = vpop.f32.mrb[24].mxu0 }
 0x1d9   :  { %v4277_v28 = vadd.f32 %v371_v27, %v4167_v52  ;;  %v2916_v29 = vpop.f32.mrb[25].mxu0  ;;  %547 = vadd.xlane.f32.xlu1 %v511_v25 }
 0x1da   :  { %v374_v31 = vpop.f32.mrb[26].mxu0 }
 0x1db   :  { %v4280_v33 = vadd.f32 %v374_v31, %v4167_v52  ;;  %v2917_v35 = vpop.f32.mrb[27].mxu0  ;;  %449 = vadd.xlane.f32.xlu0 %v4277_v28  ;;  %v512_v36 = vmul.f32 %v4277_v28, %v4277_v28  ;;  %v516_v52 = vmul.f32 %v4189_v6, %v4189_v6 }
 0x1dd   :  { %451 = vadd.xlane.f32.xlu1 %v4280_v33  ;;  %v513_v41 = vmul.f32 %v4280_v33, %v4280_v33 }
 0x1df   :  { %549 = vadd.xlane.f32.xlu0 %v512_v36 }
 0x1e1   :  { %551 = vadd.xlane.f32.xlu1 %v513_v41 }
 0x1e3   :  { %453 = vadd.xlane.f32.xlu0 %v4289_v39 }
 0x1e5   :  { %455 = vadd.xlane.f32.xlu1 %v4296_v43 }
 0x1e7   :  { %553 = vadd.xlane.f32.xlu0 %v514_v54 }
 0x1e9   :  { %555 = vadd.xlane.f32.xlu1 %v515_v44 }
 0x1eb   :  { %457 = vadd.xlane.f32.xlu0 %v4189_v6 }
 0x1ed   :  { %459 = vadd.xlane.f32.xlu1 %v4196_v12 }
 0x1ef   :  { %557 = vadd.xlane.f32.xlu0 %v516_v52 }
 0x1f1   :  { %559 = vadd.xlane.f32.xlu1 %v517_v59  ;;  %v777_v59 = vsub.s32 1, %v4158_v49 }
 0x1f3   :  { %461 = vadd.xlane.f32.xlu0 %v4207_v20 }
 0x1f5   :  { %463 = vadd.xlane.f32.xlu1 %v4214_v26 }
 0x1f7   :  { %561 = vadd.xlane.f32.xlu0 %v518_v45 }
 0x1f9   :  { %563 = vadd.xlane.f32.xlu1 %v519_v46  ;;  %v3402_v46 = vld [vmem:[#allocation11 + $0x8] sm:$0xff]  }
 0x1fa   :  { %3013 = vmatpush3.bf16.msra.mxu0 %v3402_v46 }
 0x1fb   :  { %465 = vadd.xlane.f32.xlu0 %v4225_v34  ;;  %3014 = vmatprep.subr.bf16.mxu0 %v3851_v0 }
 0x1fd   :  { %467 = vadd.xlane.f32.xlu1 %v4232_v40 }
 0x1ff   :  { %565 = vadd.xlane.f32.xlu0 %v520_v48 }
 0x201   :  { %567 = vadd.xlane.f32.xlu1 %v521_v53 }
 0x203   :  { %469 = vadd.xlane.f32.xlu0 %v4243_v50 }
 0x205   :  { %471 = vadd.xlane.f32.xlu1 %v4250_v62 }
 0x207   :  { %569 = vadd.xlane.f32.xlu0 %v522_v56 }
 0x209   :  { %571 = vadd.xlane.f32.xlu1 %v523_v57 }
 0x20b   :  { %473 = vadd.xlane.f32.xlu0 %v4263_v11 }
 0x20d   :  { %573 = vadd.xlane.f32.xlu1 %v524_v61 }
 0x238   :  { %v426_v63 = vpop.xlane.xlu0 %425 }
 0x239   :  { %v475_v1 = vmul.f32 0.03125, %v426_v63 }
 0x23a   :  { %v526_v2 = vpop.xlane.xlu1 %525 }
 0x23b   :  { %v600_v3 = vmul.f32 %v475_v1, %v475_v1  ;;  %v575_v5 = vmul.f32 0.03125, %v526_v2  ;;  %v675_v2 = vsub.f32 %v4172_v55, %v475_v1 }
 0x23c   :  { %v428_v7 = vpop.xlane.xlu0 %427 }
 0x23d   :  { %v625_v9 = vsub.f32 %v575_v5, %v600_v3  ;;  %v4332_v13 = vmul.f32 0.03125, %v428_v7  ;;  %v4350_v3 = vrot.slane %v4164_v51, %v777_v59  ;;  %v806_v5 = vsub.s32 2, %v4158_v49 }
 0x23e   :  { %v528_v14 = vpop.xlane.xlu1 %527 }
 0x23f   :  { %v650_v15 = vmax.f32 %v625_v9, 0.0  ;;  %v601_v16 = vmul.f32 %v4332_v13, %v4332_v13  ;;  %v576_v19 = vmul.f32 0.03125, %v528_v14  ;;  %v3403_v14 = vld [vmem:[#allocation11 + $0x10] sm:$0xff]  }
 0x240   :  { %v430_v21 = vpop.xlane.xlu0 %429  ;;  %3015 = vmatpush3.bf16.msra.mxu0 %v3403_v14 }
 0x241   :  { %v700_v22 = vadd.f32 1e-05, %v650_v15  ;;  %v626_v23 = vsub.f32 %v576_v19, %v601_v16  ;;  %v4336_v25 = vmul.f32 0.03125, %v430_v21  ;;  %3016 = vmatprep.subr.bf16.mxu0 %v3851_v0 }
 0x242   :  { %v432_v27 = vpop.xlane.xlu1 %431 }
 0x243   :  { %3441 = vrsqrt.f32 %v700_v22  ;;  %v651_v29 = vmax.f32 %v626_v23, 0.0  ;;  %v4338_v30 = vmul.f32 0.03125, %v432_v27  ;;  %v602_v36 = vmul.f32 %v4336_v25, %v4336_v25 }
 0x244   :  { %v530_v31 = vpop.xlane.xlu0 %529 }
 0x245   :  { %v701_v35 = vadd.f32 1e-05, %v651_v29  ;;  %v577_v37 = vmul.f32 0.03125, %v530_v31  ;;  %v603_v54 = vmul.f32 %v4338_v30, %v4338_v30  ;;  %v4361_v29 = vrot.slane %v4164_v51, %v806_v5 }
 0x246   :  { %v532_v41 = vpop.xlane.xlu1 %531  ;;  %v677_v5 = vsub.f32 %v4186_v4, %v4336_v25 }
 0x247   :  { %3443 = vrsqrt.f32 %v701_v35  ;;  %v627_v44 = vsub.f32 %v577_v37, %v602_v36  ;;  %v578_v52 = vmul.f32 0.03125, %v532_v41  ;;  %v676_v35 = vsub.f32 %v4177_v60, %v4332_v13  ;;  %v3404_v37 = vld [vmem:[#allocation11 + $0x18] sm:$0xff]   ;;  %v3405_v13 = vld [vmem:[#allocation11 + $0x20] sm:$0xff]  }
 0x248   :  { %v434_v45 = vpop.xlane.xlu0 %433  ;;  %3017 = vmatpush3.bf16.msra.mxu0 %v3404_v37 }
 0x249   :  { %v652_v48 = vmax.f32 %v627_v44, 0.0  ;;  %v628_v53 = vsub.f32 %v578_v52, %v603_v54  ;;  %v4345_v56 = vmul.f32 0.03125, %v434_v45  ;;  %3018 = vmatprep.subr.bf16.mxu0 %v3851_v0 }
 0x24a   :  { %v436_v57 = vpop.xlane.xlu1 %435 }
 0x24b   :  { %v702_v61 = vadd.f32 1e-05, %v652_v48  ;;  %v653_v63 = vmax.f32 %v628_v53, 0.0  ;;  %v4353_v7 = vmul.f32 0.03125, %v436_v57  ;;  %v604_v19 = vmul.f32 %v4345_v56, %v4345_v56 }
 0x24c   :  { %v534_v9 = vpop.xlane.xlu0 %533  ;;  %3019 = vmatpush3.bf16.msra.mxu0 %v3405_v13 }
 0x24d   :  { %v3442_v15 = vpop.eup %3441  ;;  %3445 = vrsqrt.f32 %v702_v61  ;;  %v703_v16 = vadd.f32 1e-05, %v653_v63  ;;  %v579_v21 = vmul.f32 0.03125, %v534_v9  ;;  %v605_v22 = vmul.f32 %v4353_v7, %v4353_v7  ;;  %3020 = vmatprep.subr.bf16.mxu0 %v3851_v0 }
 0x24e   :  { %v750_v55 = vmul.f32 %v3442_v15, %v675_v2  ;;  %v536_v1 = vpop.xlane.xlu1 %535 }
 0x24f   :  { %3447 = vrsqrt.f32 %v703_v16  ;;  %v629_v23 = vsub.f32 %v579_v21, %v604_v19  ;;  %v580_v27 = vmul.f32 0.03125, %v536_v1  ;;  %v678_v21 = vsub.f32 %v4192_v10, %v4338_v30 }
 0x250   :  { %v779_v31 = vmul.f32 %v4350_v3, %v750_v55  ;;  %v438_v36 = vpop.xlane.xlu0 %437 }
 0x251   :  { %v3444_v41 = vpop.eup %3443  ;;  %v654_v42 = vmax.f32 %v629_v23, 0.0  ;;  %v630_v54 = vsub.f32 %v580_v27, %v605_v22  ;;  %v4366_v44 = vmul.f32 0.03125, %v438_v36  ;;  %v3406_v22 = vld [vmem:[#allocation11 + $0x28] sm:$0xff]  }
 0x252   :  { %v751_v52 = vmul.f32 %v3444_v41, %v676_v35  ;;  %v440_v59 = vpop.xlane.xlu1 %439  ;;  %v808_v46 = vadd.f32 %v4361_v29, %v779_v31  ;;  %3021 = vmatpush3.bf16.msra.mxu0 %v3406_v22 }
 0x253   :  { %v704_v45 = vadd.f32 1e-05, %v654_v42  ;;  %v655_v51 = vmax.f32 %v630_v54, 0.0  ;;  %v4371_v53 = vmul.f32 0.03125, %v440_v59  ;;  %v606_v61 = vmul.f32 %v4366_v44, %v4366_v44  ;;  %3022 = vmatprep.subr.bf16.mxu0 %v3851_v0 }
 0x254   :  { %v780_v48 = vmul.f32 %v4350_v3, %v751_v52  ;;  %v538_v60 = vpop.xlane.xlu0 %537  ;;  %v3407_v52 = vld [vmem:[#allocation11 + $0x30] sm:$0xff]  }
 0x255   :  { %3449 = vrsqrt.f32 %v704_v45  ;;  %v705_v57 = vadd.f32 1e-05, %v655_v51  ;;  %v581_v63 = vmul.f32 0.03125, %v538_v60  ;;  %v607_v15 = vmul.f32 %v4371_v53, %v4371_v53 }
 0x256   :  { %v809_v2 = vadd.f32 %v4361_v29, %v780_v48  ;;  %v540_v9 = vpop.xlane.xlu1 %539  ;;  %3023 = vmatpush3.bf16.msra.mxu0 %v3407_v52 }
 0x257   :  { %v3446_v14 = vpop.eup %3445  ;;  %3451 = vrsqrt.f32 %v705_v57  ;;  %v631_v16 = vsub.f32 %v581_v63, %v606_v61  ;;  %v582_v19 = vmul.f32 0.03125, %v540_v9  ;;  %3024 = vmatprep.subr.bf16.mxu0 %v3851_v0 }
 0x258   :  { %3453 = vtanh.f32 %v809_v2  ;;  %v752_v55 = vmul.f32 %v3446_v14, %v677_v5  ;;  %v442_v1 = vpop.xlane.xlu0 %441  ;;  %v680_v2 = vsub.f32 %v4210_v24, %v4353_v7 }
 0x259   :  { %v3448_v23 = vpop.eup %3447  ;;  %3455 = vtanh.f32 %v808_v46  ;;  %v656_v27 = vmax.f32 %v631_v16, 0.0  ;;  %v632_v4 = vsub.f32 %v582_v19, %v607_v15  ;;  %v4383_v25 = vmul.f32 0.03125, %v442_v1 }
 0x25a   :  { %v781_v31 = vmul.f32 %v4350_v3, %v752_v55  ;;  %v753_v35 = vmul.f32 %v3448_v23, %v678_v21  ;;  %v444_v36 = vpop.xlane.xlu1 %443  ;;  %v679_v46 = vsub.f32 %v4204_v18, %v4345_v56 }
 0x25b   :  { %v706_v37 = vadd.f32 1e-05, %v656_v27  ;;  %v657_v41 = vmax.f32 %v632_v4, 0.0  ;;  %v608_v30 = vmul.f32 %v4383_v25, %v4383_v25  ;;  %v4390_v42 = vmul.f32 0.03125, %v444_v36 }
 0x25c   :  { %v782_v10 = vmul.f32 %v4350_v3, %v753_v35  ;;  %v542_v54 = vpop.xlane.xlu0 %541  ;;  %v810_v51 = vadd.f32 %v4361_v29, %v781_v31 }
 0x25d   :  { %3457 = vrsqrt.f32 %v706_v37  ;;  %v707_v59 = vadd.f32 1e-05, %v657_v41  ;;  %v583_v45 = vmul.f32 0.03125, %v542_v54  ;;  %v609_v57 = vmul.f32 %v4390_v42, %v4390_v42 }
 0x25e   :  { %v544_v48 = vpop.xlane.xlu1 %543  ;;  %v811_v60 = vadd.f32 %v4361_v29, %v782_v10  ;;  %v681_v41 = vsub.f32 %v4222_v32, %v4366_v44 }
 0x25f   :  { %v3450_v13 = vpop.eup %3449  ;;  %3459 = vrsqrt.f32 %v707_v59  ;;  %v633_v61 = vsub.f32 %v583_v45, %v608_v30  ;;  %v584_v63 = vmul.f32 0.03125, %v544_v48 }
 0x260   :  { %v754_v5 = vmul.f32 %v3450_v13, %v679_v46  ;;  %v446_v9 = vpop.xlane.xlu0 %445  ;;  %3461 = vtanh.f32 %v811_v60 }
 0x261   :  { %v3452_v14 = vpop.eup %3451  ;;  %v658_v15 = vmax.f32 %v633_v61, 0.0  ;;  %v634_v18 = vsub.f32 %v584_v63, %v609_v57  ;;  %v4401_v56 = vmul.f32 0.03125, %v446_v9  ;;  %3463 = vtanh.f32 %v810_v51 }
 0x262   :  { %v3454_v16 = vpop.eup %3453  ;;  %v783_v19 = vmul.f32 %v4350_v3, %v754_v5  ;;  %v755_v21 = vmul.f32 %v3452_v14, %v680_v2  ;;  %v448_v55 = vpop.xlane.xlu1 %447  ;;  %v682_v51 = vsub.f32 %v4228_v38, %v4371_v53 }
 0x263   :  { %v3456_v1 = vpop.eup %3455  ;;  %v708_v22 = vadd.f32 1e-05, %v658_v15  ;;  %v659_v24 = vmax.f32 %v634_v18, 0.0  ;;  %v610_v23 = vmul.f32 %v4401_v56, %v4401_v56  ;;  %v4408_v27 = vmul.f32 0.03125, %v448_v55 }
 0x264   :  { %v784_v7 = vmul.f32 %v4350_v3, %v755_v21  ;;  %v546_v4 = vpop.xlane.xlu0 %545  ;;  %v874_v31 = vpack.c.bf16 %v3454_v16, %v3456_v1  ;;  %v812_v37 = vadd.f32 %v4361_v29, %v783_v19  ;;  %v683_v1 = vsub.f32 %v4240_v47, %v4383_v25 }
 0x265   :  { %3465 = vrsqrt.f32 %v708_v22  ;;  %v709_v35 = vadd.f32 1e-05, %v659_v24  ;;  %v585_v36 = vmul.f32 0.03125, %v546_v4  ;;  %v611_v52 = vmul.f32 %v4408_v27, %v4408_v27 }
 0x266   :  { %2959 = vmatmul.mubr.bf16.vlgmr.msra.gmra.mrb[24].mxu1 %v874_v31  ;;  %v548_v10 = vpop.xlane.xlu1 %547  ;;  %v813_v30 = vadd.f32 %v4361_v29, %v784_v7 }
 0x267   :  { %v3458_v54 = vpop.eup %3457  ;;  %3467 = vrsqrt.f32 %v709_v35  ;;  %v635_v59 = vsub.f32 %v585_v36, %v610_v23  ;;  %v586_v45 = vmul.f32 0.03125, %v548_v10  ;;  %2962 = vmatprep.mubr.msk.bf16.mxu1 %vm3852_vm0, %v3851_v0  ;;  %v684_v35 = vsub.f32 %v4246_v58, %v4390_v42 }
 0x268   :  { %v756_v46 = vmul.f32 %v3458_v54, %v681_v41  ;;  %v450_v48 = vpop.xlane.xlu0 %449  ;;  %3469 = vtanh.f32 %v813_v30 }
 0x269   :  { %v3460_v32 = vpop.eup %3459  ;;  %v660_v44 = vmax.f32 %v635_v59, 0.0  ;;  %v636_v60 = vsub.f32 %v586_v45, %v611_v52  ;;  %v4420_v13 = vmul.f32 0.03125, %v450_v48  ;;  %3471 = vtanh.f32 %v812_v37 }
 0x26a   :  { %v3462_v57 = vpop.eup %3461  ;;  %v785_v61 = vmul.f32 %v4350_v3, %v756_v46  ;;  %v757_v63 = vmul.f32 %v3460_v32, %v682_v51  ;;  %v452_v2 = vpop.xlane.xlu1 %451 }
 0x26b   :  { %v3464_v5 = vpop.eup %3463  ;;  %v710_v9 = vadd.f32 1e-05, %v660_v44  ;;  %v661_v14 = vmax.f32 %v636_v60, 0.0  ;;  %v612_v38 = vmul.f32 %v4420_v13, %v4420_v13  ;;  %v4426_v53 = vmul.f32 0.03125, %v452_v2 }
 0x26c   :  { %v786_v15 = vmul.f32 %v4350_v3, %v757_v63  ;;  %v550_v18 = vpop.xlane.xlu0 %549  ;;  %v875_v16 = vpack.c.bf16 %v3462_v57, %v3464_v5  ;;  %v814_v55 = vadd.f32 %v4361_v29, %v785_v61  ;;  %v685_v63 = vsub.f32 %v4260_v8, %v4401_v56 }
 0x26d   :  { %3473 = vrsqrt.f32 %v710_v9  ;;  %v711_v19 = vadd.f32 1e-05, %v661_v14  ;;  %v587_v21 = vmul.f32 0.03125, %v550_v18  ;;  %v613_v23 = vmul.f32 %v4426_v53, %v4426_v53 }
 0x26e   :  { %2963 = vmatmul.mubr.bf16.gmra.mrb[28].mxu1 %v875_v16  ;;  %v552_v22 = vpop.xlane.xlu1 %551  ;;  %v815_v24 = vadd.f32 %v4361_v29, %v786_v15  ;;  %v686_v18 = vsub.f32 %v4266_v17, %v4408_v27 }
 0x26f   :  { %v3466_v7 = vpop.eup %3465  ;;  %3475 = vrsqrt.f32 %v711_v19  ;;  %v637_v4 = vsub.f32 %v587_v21, %v612_v38  ;;  %v588_v31 = vmul.f32 0.03125, %v552_v22  ;;  %2966 = vmatprep.mubr.msk.bf16.mxu1 %vm3852_vm0, %v3851_v0 }
 0x270   :  { %v758_v36 = vmul.f32 %v3466_v7, %v683_v1  ;;  %v454_v37 = vpop.xlane.xlu0 %453  ;;  %3477 = vtanh.f32 %v815_v24 }
 0x271   :  { %v3468_v47 = vpop.eup %3467  ;;  %v662_v25 = vmax.f32 %v637_v4, 0.0  ;;  %v638_v41 = vsub.f32 %v588_v31, %v613_v23  ;;  %v4438_v10 = vmul.f32 0.03125, %v454_v37  ;;  %3479 = vtanh.f32 %v814_v55 }
 0x272   :  { %v3470_v30 = vpop.eup %3469  ;;  %v787_v54 = vmul.f32 %v4350_v3, %v758_v36  ;;  %v759_v52 = vmul.f32 %v3468_v47, %v684_v35  ;;  %v456_v59 = vpop.xlane.xlu1 %455 }
 0x273   :  { %v3472_v45 = vpop.eup %3471  ;;  %v712_v51 = vadd.f32 1e-05, %v662_v25  ;;  %v663_v46 = vmax.f32 %v638_v41, 0.0  ;;  %v614_v58 = vmul.f32 %v4438_v10, %v4438_v10  ;;  %v4444_v42 = vmul.f32 0.03125, %v456_v59 }
 0x274   :  { %v788_v48 = vmul.f32 %v4350_v3, %v759_v52  ;;  %v554_v32 = vpop.xlane.xlu0 %553  ;;  %v876_v44 = vpack.c.bf16 %v3470_v30, %v3472_v45  ;;  %v816_v61 = vadd.f32 %v4361_v29, %v787_v54  ;;  %v687_v30 = vsub.f32 %v4277_v28, %v4420_v13 }
 0x275   :  { %3481 = vrsqrt.f32 %v712_v51  ;;  %v713_v60 = vadd.f32 1e-05, %v663_v46  ;;  %v589_v57 = vmul.f32 0.03125, %v554_v32  ;;  %v615_v14 = vmul.f32 %v4444_v42, %v4444_v42 }
 0x276   :  { %2967 = vmatmul.mubr.bf16.gmra.mrb[32].mxu1 %v876_v44  ;;  %v556_v2 = vpop.xlane.xlu1 %555  ;;  %v817_v5 = vadd.f32 %v4361_v29, %v788_v48  ;;  %v688_v48 = vsub.f32 %v4280_v33, %v4426_v53 }
 0x277   :  { %v3474_v9 = vpop.eup %3473  ;;  %3483 = vrsqrt.f32 %v713_v60  ;;  %v639_v15 = vsub.f32 %v589_v57, %v614_v58  ;;  %v590_v38 = vmul.f32 0.03125, %v556_v2  ;;  %2970 = vmatprep.mubr.msk.bf16.mxu1 %vm3852_vm0, %v3851_v0 }
 0x278   :  { %v760_v16 = vmul.f32 %v3474_v9, %v685_v63  ;;  %v458_v19 = vpop.xlane.xlu0 %457  ;;  %3485 = vtanh.f32 %v817_v5 }
 0x279   :  { %v3476_v8 = vpop.eup %3475  ;;  %v664_v56 = vmax.f32 %v639_v15, 0.0  ;;  %v640_v21 = vsub.f32 %v590_v38, %v615_v14  ;;  %v4456_v55 = vmul.f32 0.03125, %v458_v19  ;;  %3487 = vtanh.f32 %v816_v61 }
 0x27a   :  { %v3478_v1 = vpop.eup %3477  ;;  %v789_v22 = vmul.f32 %v4350_v3, %v760_v16  ;;  %v761_v24 = vmul.f32 %v3476_v8, %v686_v18  ;;  %v460_v7 = vpop.xlane.xlu1 %459 }
 0x27b   :  { %v3480_v23 = vpop.eup %3479  ;;  %v714_v4 = vadd.f32 1e-05, %v664_v56  ;;  %v665_v31 = vmax.f32 %v640_v21, 0.0  ;;  %v616_v17 = vmul.f32 %v4456_v55, %v4456_v55  ;;  %v4462_v27 = vmul.f32 0.03125, %v460_v7 }
 0x27c   :  { %v790_v35 = vmul.f32 %v4350_v3, %v761_v24  ;;  %v558_v36 = vpop.xlane.xlu0 %557  ;;  %v877_v37 = vpack.c.bf16 %v3478_v1, %v3480_v23  ;;  %v818_v41 = vadd.f32 %v4361_v29, %v789_v22  ;;  %v689_v56 = vsub.f32 %v4289_v39, %v4438_v10 }
 0x27d   :  { %3489 = vrsqrt.f32 %v714_v4  ;;  %v715_v47 = vadd.f32 1e-05, %v665_v31  ;;  %v591_v25 = vmul.f32 0.03125, %v558_v36  ;;  %v617_v45 = vmul.f32 %v4462_v27, %v4462_v27 }
 0x27e   :  { %2971 = vmatmul.mubr.bf16.gmra.mrb[36].mxu1 %v877_v37  ;;  %v560_v54 = vpop.xlane.xlu1 %559  ;;  %v819_v52 = vadd.f32 %v4361_v29, %v790_v35  ;;  %v690_v4 = vsub.f32 %v4296_v43, %v4444_v42 }
 0x27f   :  { %v3482_v59 = vpop.eup %3481  ;;  %3491 = vrsqrt.f32 %v715_v47  ;;  %v641_v51 = vsub.f32 %v591_v25, %v616_v17  ;;  %v592_v46 = vmul.f32 0.03125, %v560_v54  ;;  %2974 = vmatprep.mubr.msk.bf16.mxu1 %vm3852_vm0, %v3851_v0 }
 0x280   :  { %v762_v58 = vmul.f32 %v3482_v59, %v687_v30  ;;  %v462_v32 = vpop.xlane.xlu0 %461  ;;  %3493 = vtanh.f32 %v819_v52 }
 0x281   :  { %v3484_v28 = vpop.eup %3483  ;;  %v666_v13 = vmax.f32 %v641_v51, 0.0  ;;  %v642_v44 = vsub.f32 %v592_v46, %v617_v45  ;;  %v4474_v60 = vmul.f32 0.03125, %v462_v32  ;;  %3495 = vtanh.f32 %v818_v41 }
 0x282   :  { %v3486_v57 = vpop.eup %3485  ;;  %v791_v61 = vmul.f32 %v4350_v3, %v762_v58  ;;  %v763_v63 = vmul.f32 %v3484_v28, %v688_v48  ;;  %v464_v2 = vpop.xlane.xlu1 %463  ;;  %v691_v32 = vsub.f32 %v4189_v6, %v4456_v55 }
 0x283   :  { %v3488_v5 = vpop.eup %3487  ;;  %v716_v9 = vadd.f32 1e-05, %v666_v13  ;;  %v667_v14 = vmax.f32 %v642_v44, 0.0  ;;  %v618_v33 = vmul.f32 %v4474_v60, %v4474_v60  ;;  %v4480_v53 = vmul.f32 0.03125, %v464_v2 }
 0x284   :  { %v792_v15 = vmul.f32 %v4350_v3, %v763_v63  ;;  %v562_v38 = vpop.xlane.xlu0 %561  ;;  %v878_v18 = vpack.c.bf16 %v3486_v57, %v3488_v5  ;;  %v820_v8 = vadd.f32 %v4361_v29, %v791_v61  ;;  %v692_v2 = vsub.f32 %v4196_v12, %v4462_v27 }
 0x285   :  { %3497 = vrsqrt.f32 %v716_v9  ;;  %v717_v16 = vadd.f32 1e-05, %v667_v14  ;;  %v593_v19 = vmul.f32 0.03125, %v562_v38  ;;  %v619_v24 = vmul.f32 %v4480_v53, %v4480_v53 }
 0x286   :  { %2975 = vmatmul.mubr.bf16.gmra.mrb[40].mxu1 %v878_v18  ;;  %v564_v21 = vpop.xlane.xlu1 %563  ;;  %v821_v1 = vadd.f32 %v4361_v29, %v792_v15 }
 0x287   :  { %v3490_v22 = vpop.eup %3489  ;;  %3499 = vrsqrt.f32 %v717_v16  ;;  %v643_v7 = vsub.f32 %v593_v19, %v618_v33  ;;  %v594_v23 = vmul.f32 0.03125, %v564_v21  ;;  %2978 = vmatprep.mubr.msk.bf16.mxu1 %vm3852_vm0, %v3851_v0 }
 0x288   :  { %v764_v31 = vmul.f32 %v3490_v22, %v689_v56  ;;  %v466_v35 = vpop.xlane.xlu0 %465  ;;  %3501 = vtanh.f32 %v821_v1 }
 0x289   :  { %v3492_v39 = vpop.eup %3491  ;;  %v668_v10 = vmax.f32 %v643_v7, 0.0  ;;  %v644_v17 = vsub.f32 %v594_v23, %v619_v24  ;;  %v4492_v36 = vmul.f32 0.03125, %v466_v35  ;;  %3503 = vtanh.f32 %v820_v8 }
 0x28a   :  { %v3494_v37 = vpop.eup %3493  ;;  %v793_v47 = vmul.f32 %v4350_v3, %v764_v31  ;;  %v765_v25 = vmul.f32 %v3492_v39, %v690_v4  ;;  %v468_v41 = vpop.xlane.xlu1 %467  ;;  %v693_v4 = vsub.f32 %v4207_v20, %v4474_v60 }
 0x28b   :  { %v3496_v30 = vpop.eup %3495  ;;  %v718_v54 = vadd.f32 1e-05, %v668_v10  ;;  %v669_v52 = vmax.f32 %v644_v17, 0.0  ;;  %v620_v43 = vmul.f32 %v4492_v36, %v4492_v36  ;;  %v4498_v42 = vmul.f32 0.03125, %v468_v41 }
 0x28c   :  { %v794_v59 = vmul.f32 %v4350_v3, %v765_v25  ;;  %v566_v45 = vpop.xlane.xlu0 %565  ;;  %v879_v51 = vpack.c.bf16 %v3494_v37, %v3496_v30  ;;  %v822_v58 = vadd.f32 %v4361_v29, %v793_v47  ;;  %v694_v47 = vsub.f32 %v4214_v26, %v4480_v53 }
 0x28d   :  { %3505 = vrsqrt.f32 %v718_v54  ;;  %v719_v46 = vadd.f32 1e-05, %v669_v52  ;;  %v595_v48 = vmul.f32 0.03125, %v566_v45  ;;  %v621_v57 = vmul.f32 %v4498_v42, %v4498_v42 }
 0x28e   :  { %2979 = vmatmul.mubr.bf16.gmra.mrb[44].mxu1 %v879_v51  ;;  %v568_v28 = vpop.xlane.xlu1 %567  ;;  %v823_v13 = vadd.f32 %v4361_v29, %v794_v59 }
 0x28f   :  { %v3498_v44 = vpop.eup %3497  ;;  %3507 = vrsqrt.f32 %v719_v46  ;;  %v645_v61 = vsub.f32 %v595_v48, %v620_v43  ;;  %v596_v63 = vmul.f32 0.03125, %v568_v28  ;;  %2982 = vmatprep.mubr.msk.bf16.mxu1 %vm3852_vm0, %v3851_v0 }
 0x290   :  { %v766_v5 = vmul.f32 %v3498_v44, %v691_v32  ;;  %v470_v9 = vpop.xlane.xlu0 %469  ;;  %3509 = vtanh.f32 %v823_v13  ;;  %v695_v44 = vsub.f32 %v4225_v34, %v4492_v36 }
 0x291   :  { %v3500_v6 = vpop.eup %3499  ;;  %v670_v55 = vmax.f32 %v645_v61, 0.0  ;;  %v646_v14 = vsub.f32 %v596_v63, %v621_v57  ;;  %v4510_v15 = vmul.f32 0.03125, %v470_v9  ;;  %3511 = vtanh.f32 %v822_v58 }
 0x292   :  { %v3502_v33 = vpop.eup %3501  ;;  %v795_v38 = vmul.f32 %v4350_v3, %v766_v5  ;;  %v767_v18 = vmul.f32 %v3500_v6, %v692_v2  ;;  %v472_v16 = vpop.xlane.xlu1 %471  ;;  %v696_v5 = vsub.f32 %v4232_v40, %v4498_v42 }
 0x293   :  { %v3504_v19 = vpop.eup %3503  ;;  %v720_v8 = vadd.f32 1e-05, %v670_v55  ;;  %v671_v56 = vmax.f32 %v646_v14, 0.0  ;;  %v4514_v12 = vmul.f32 0.03125, %v472_v16  ;;  %v622_v7 = vmul.f32 %v4510_v15, %v4510_v15 }
 0x294   :  { %v796_v21 = vmul.f32 %v4350_v3, %v767_v18  ;;  %v570_v27 = vpop.xlane.xlu0 %569  ;;  %v880_v1 = vpack.c.bf16 %v3502_v33, %v3504_v19  ;;  %v824_v22 = vadd.f32 %v4361_v29, %v795_v38  ;;  %v697_v19 = vsub.f32 %v4243_v50, %v4510_v15 }
 0x295   :  { %3513 = vrsqrt.f32 %v720_v8  ;;  %v721_v24 = vadd.f32 1e-05, %v671_v56  ;;  %v597_v23 = vmul.f32 0.03125, %v570_v27  ;;  %v623_v10 = vmul.f32 %v4514_v12, %v4514_v12 }
 0x296   :  { %2983 = vmatmul.mubr.bf16.gmra.mrb[48].mxu1 %v880_v1  ;;  %v572_v31 = vpop.xlane.xlu1 %571  ;;  %v825_v35 = vadd.f32 %v4361_v29, %v796_v21  ;;  %3515 = vtanh.f32 %v824_v22  ;;  %v698_v56 = vsub.f32 %v4250_v62, %v4514_v12 }
 0x297   :  { %v3506_v39 = vpop.eup %3505  ;;  %3517 = vrsqrt.f32 %v721_v24  ;;  %v647_v17 = vsub.f32 %v597_v23, %v622_v7  ;;  %v598_v37 = vmul.f32 0.03125, %v572_v31  ;;  %2986 = vmatprep.mubr.msk.bf16.mxu1 %vm3852_vm0, %v3851_v0 }
 0x298   :  { %v768_v25 = vmul.f32 %v3506_v39, %v693_v4  ;;  %v474_v20 = vpop.xlane.xlu0 %473  ;;  %3519 = vtanh.f32 %v825_v35 }
 0x299   :  { %v3508_v60 = vpop.eup %3507  ;;  %v672_v41 = vmax.f32 %v647_v17, 0.0  ;;  %v648_v30 = vsub.f32 %v598_v37, %v623_v10  ;;  %v499_v54 = vmul.f32 0.03125, %v474_v20 }
 0x29a   :  { %v3510_v52 = vpop.eup %3509  ;;  %v797_v59 = vmul.f32 %v4350_v3, %v768_v25  ;;  %v769_v43 = vmul.f32 %v3508_v60, %v694_v47  ;;  %v574_v45 = vpop.xlane.xlu1 %573  ;;  %v3408_v25 = vld [vmem:[#allocation11 + $0x38] sm:$0xff]   ;;  %v3591_v60 = vld [vmem:[%s5096_s10] sm:$0xff] }
 0x29b   :  { %v3512_v51 = vpop.eup %3511  ;;  %v722_v46 = vadd.f32 1e-05, %v672_v41  ;;  %v673_v48 = vmax.f32 %v648_v30, 0.0  ;;  %v624_v58 = vmul.f32 %v499_v54, %v499_v54  ;;  %v599_v28 = vmul.f32 0.03125, %v574_v45  ;;  %3025 = vmatpush3.bf16.msra.mxu0 %v3408_v25 }
 0x29c   :  { %v798_v32 = vmul.f32 %v4350_v3, %v769_v43  ;;  %v881_v26 = vpack.c.bf16 %v3510_v52, %v3512_v51  ;;  %v826_v53 = vadd.f32 %v4361_v29, %v797_v59  ;;  %v699_v23 = vsub.f32 %v4263_v11, %v499_v54  ;;  %3146 = vmatprep.subr.bf16.mxu0 %v3851_v0 }
 0x29d   :  { %3521 = vrsqrt.f32 %v722_v46  ;;  %v723_v13 = vadd.f32 1e-05, %v673_v48  ;;  %v649_v57 = vsub.f32 %v599_v28, %v624_v58 }
 0x29e   :  { %2987 = vmatmul.mubr.bf16.gmra.mrb[52].mxu1 %v881_v26  ;;  %v827_v61 = vadd.f32 %v4361_v29, %v798_v32  ;;  %3523 = vtanh.f32 %v826_v53 }
 0x29f   :  { %v3514_v63 = vpop.eup %3513  ;;  %3525 = vrsqrt.f32 %v723_v13  ;;  %2990 = vmatprep.mubr.msk.bf16.mxu1 %vm3852_vm0, %v3851_v0  ;;  %v674_v6 = vmax.f32 %v649_v57, 0.0 }
 0x2a0   :  { %v3516_v2 = vpop.eup %3515  ;;  %v770_v9 = vmul.f32 %v3514_v63, %v695_v44  ;;  %3527 = vtanh.f32 %v827_v61 }
 0x2a1   :  { %v3518_v55 = vpop.eup %3517  ;;  %v724_v33 = vadd.f32 1e-05, %v674_v6 }
 0x2a2   :  { %v3520_v14 = vpop.eup %3519  ;;  %v799_v34 = vmul.f32 %v4350_v3, %v770_v9  ;;  %v771_v36 = vmul.f32 %v3518_v55, %v696_v5 }
 0x2a3   :  { %v882_v38 = vpack.c.bf16 %v3520_v14, %v3516_v2  ;;  %3529 = vrsqrt.f32 %v724_v33 }
 0x2a4   :  { %v800_v18 = vmul.f32 %v4350_v3, %v771_v36  ;;  %v828_v16 = vadd.f32 %v4361_v29, %v799_v34 }
 0x2a6   :  { %2991 = vmatmul.mubr.bf16.gmra.mrb[56].mxu1 %v882_v38  ;;  %v829_v40 = vadd.f32 %v4361_v29, %v800_v18  ;;  %3531 = vtanh.f32 %v828_v16 }
 0x2a7   :  { %v3522_v42 = vpop.eup %3521  ;;  %2994 = vmatprep.mubr.msk.bf16.mxu1 %vm3852_vm0, %v3851_v0 }
 0x2a8   :  { %v3524_v8 = vpop.eup %3523  ;;  %v772_v21 = vmul.f32 %v3522_v42, %v697_v19  ;;  %3533 = vtanh.f32 %v829_v40 }
 0x2a9   :  { %v3526_v27 = vpop.eup %3525 }
 0x2aa   :  { %v3528_v1 = vpop.eup %3527  ;;  %v801_v22 = vmul.f32 %v4350_v3, %v772_v21  ;;  %v773_v24 = vmul.f32 %v3526_v27, %v698_v56 }
 0x2ab   :  { %v883_v50 = vpack.c.bf16 %v3528_v1, %v3524_v8 }
 0x2ac   :  { %v802_v15 = vmul.f32 %v4350_v3, %v773_v24  ;;  %v830_v7 = vadd.f32 %v4361_v29, %v801_v22 }
 0x2ad   :  { %v3530_v4 = vpop.eup %3529 }
 0x2ae   :  { %2995 = vmatmul.mubr.bf16.gmra.mrb[60].mxu1 %v883_v50  ;;  %v831_v31 = vadd.f32 %v4361_v29, %v802_v15  ;;  %3535 = vtanh.f32 %v830_v7  ;;  %v774_v62 = vmul.f32 %v3530_v4, %v699_v23 }
 0x2af   :  { %2998 = vmatprep.mubr.msk.bf16.mxu1 %vm3852_vm0, %v3851_v0 }
 0x2b0   :  { %3537 = vtanh.f32 %v831_v31  ;;  %v3532_v12 = vpop.eup %3531  ;;  %v803_v35 = vmul.f32 %v4350_v3, %v774_v62 }
 0x2b2   :  { %v3534_v39 = vpop.eup %3533  ;;  %v832_v17 = vadd.f32 %v4361_v29, %v803_v35  ;;  %v889_v29 = vsub.s32 3, %v4158_v49 }
 0x2b3   :  { %v884_v10 = vpack.c.bf16 %v3534_v39, %v3532_v12 }
 0x2b4   :  { %3539 = vtanh.f32 %v832_v17  ;;  %v4568_v41 = vrot.slane %v3591_v60, %v889_v29 }
 0x2b6   :  { %2999 = vmatmul.mubr.bf16.gmra.mrb[64].mxu1 %v884_v10 }
 0x2b7   :  { %3002 = vmatprep.mubr.msk.bf16.mxu1 %vm3852_vm0, %v3851_v0 }
 0x2b8   :  { %v3536_v11 = vpop.eup %3535 }
 0x2ba   :  { %v3538_v37 = vpop.eup %3537 }
 0x2bb   :  { %v885_v47 = vpack.c.bf16 %v3538_v37, %v3536_v11 }
 0x2be   :  { %3003 = vmatmul.mubr.bf16.gmra.mrb[68].mxu1 %v885_v47  ;;  %v3540_v3 = vpop.eup %3539 }
 0x2bf   :  { %3006 = vmatprep.mubr.msk.bf16.mxu1 %vm3852_vm0, %v3851_v0  ;;  %v886_v20 = vpack.c.bf16 %v3540_v3, %v3540_v3 }
 0x2c6   :  { %3007 = vmatmul.mubr.bf16.gmra.mrb[72].mxu1 %v886_v20 }
 0x2c7   :  { %3094 = vmatprep.mubr.msk.bf16.mxu1 %vm3852_vm0, %v3851_v0 }
 0x339   :  { %v973_v30 = vpop.f32.mrb[24].mxu1 }
 0x33a   :  { %v974_v54 = vadd.f32 %v973_v30, %v4568_v41  ;;  %v2960_v52 = vpop.f32.mrb[25].mxu1 }
 0x33b   :  { %v976_v59 = vpop.f32.mrb[26].mxu1 }
 0x33c   :  { %v977_v43 = vadd.f32 %v976_v59, %v4568_v41  ;;  %v2961_v45 = vpop.f32.mrb[27].mxu1  ;;  %v1075_v51 = vmax.f32 %v974_v54, 0.0 }
 0x33e   :  { %v1076_v46 = vmax.f32 %v977_v43, 0.0 }
 0x340   :  { %v1116_v48 = vpack.c.bf16 %v1076_v46, %v1075_v51 }
 0x341   :  { %v981_v58 = vpop.f32.mrb[28].mxu1 }
 0x342   :  { %v982_v32 = vadd.f32 %v981_v58, %v4568_v41  ;;  %v2964_v28 = vpop.f32.mrb[29].mxu1  ;;  %3027 = vmatmul.mubr.bf16.vlgmr.msra.gmra.mrb[28].mxu0 %v1116_v48 }
 0x343   :  { %v984_v26 = vpop.f32.mrb[30].mxu1  ;;  %3030 = vmatprep.mubr.msk.bf16.mxu0 %vm3852_vm0, %v3851_v0 }
 0x344   :  { %v985_v53 = vadd.f32 %v984_v26, %v4568_v41  ;;  %v2965_v13 = vpop.f32.mrb[31].mxu1  ;;  %v1077_v44 = vmax.f32 %v982_v32, 0.0 }
 0x346   :  { %v1078_v57 = vmax.f32 %v985_v53, 0.0 }
 0x348   :  { %v1117_v61 = vpack.c.bf16 %v1078_v57, %v1077_v44 }
 0x349   :  { %v989_v63 = vpop.f32.mrb[32].mxu1 }
 0x34a   :  { %v990_v2 = vadd.f32 %v989_v63, %v4568_v41  ;;  %v2968_v5 = vpop.f32.mrb[33].mxu1  ;;  %3031 = vmatmul.mubr.bf16.gmra.mrb[32].mxu0 %v1117_v61 }
 0x34b   :  { %v992_v9 = vpop.f32.mrb[34].mxu1  ;;  %3034 = vmatprep.mubr.msk.bf16.mxu0 %vm3852_vm0, %v3851_v0 }
 0x34c   :  { %v993_v6 = vadd.f32 %v992_v9, %v4568_v41  ;;  %v2969_v55 = vpop.f32.mrb[35].mxu1  ;;  %v1079_v14 = vmax.f32 %v990_v2, 0.0 }
 0x34e   :  { %v1080_v34 = vmax.f32 %v993_v6, 0.0 }
 0x350   :  { %v1118_v36 = vpack.c.bf16 %v1080_v34, %v1079_v14 }
 0x351   :  { %v997_v33 = vpop.f32.mrb[36].mxu1 }
 0x352   :  { %v998_v38 = vadd.f32 %v997_v33, %v4568_v41  ;;  %v2972_v18 = vpop.f32.mrb[37].mxu1  ;;  %3035 = vmatmul.mubr.bf16.gmra.mrb[36].mxu0 %v1118_v36 }
 0x353   :  { %v1000_v16 = vpop.f32.mrb[38].mxu1  ;;  %3038 = vmatprep.mubr.msk.bf16.mxu0 %vm3852_vm0, %v3851_v0 }
 0x354   :  { %v1001_v19 = vadd.f32 %v1000_v16, %v4568_v41  ;;  %v2973_v40 = vpop.f32.mrb[39].mxu1  ;;  %v1081_v42 = vmax.f32 %v998_v38, 0.0 }
 0x356   :  { %v1082_v8 = vmax.f32 %v1001_v19, 0.0 }
 0x358   :  { %v1119_v56 = vpack.c.bf16 %v1082_v8, %v1081_v42 }
 0x359   :  { %v1005_v21 = vpop.f32.mrb[40].mxu1 }
 0x35a   :  { %v1006_v27 = vadd.f32 %v1005_v21, %v4568_v41  ;;  %v2976_v1 = vpop.f32.mrb[41].mxu1  ;;  %3039 = vmatmul.mubr.bf16.gmra.mrb[40].mxu0 %v1119_v56 }
 0x35b   :  { %v1008_v22 = vpop.f32.mrb[42].mxu1  ;;  %3042 = vmatprep.mubr.msk.bf16.mxu0 %vm3852_vm0, %v3851_v0 }
 0x35c   :  { %v1009_v24 = vadd.f32 %v1008_v22, %v4568_v41  ;;  %v2977_v50 = vpop.f32.mrb[43].mxu1  ;;  %v1083_v15 = vmax.f32 %v1006_v27, 0.0 }
 0x35e   :  { %v1084_v7 = vmax.f32 %v1009_v24, 0.0 }
 0x360   :  { %v1120_v23 = vpack.c.bf16 %v1084_v7, %v1083_v15 }
 0x361   :  { %v1013_v4 = vpop.f32.mrb[44].mxu1 }
 0x362   :  { %v1014_v31 = vadd.f32 %v1013_v4, %v4568_v41  ;;  %v2980_v62 = vpop.f32.mrb[45].mxu1  ;;  %3043 = vmatmul.mubr.bf16.gmra.mrb[44].mxu0 %v1120_v23 }
 0x363   :  { %v1016_v12 = vpop.f32.mrb[46].mxu1  ;;  %3046 = vmatprep.mubr.msk.bf16.mxu0 %vm3852_vm0, %v3851_v0 }
 0x364   :  { %v1017_v35 = vadd.f32 %v1016_v12, %v4568_v41  ;;  %v2981_v39 = vpop.f32.mrb[47].mxu1  ;;  %v1085_v10 = vmax.f32 %v1014_v31, 0.0 }
 0x366   :  { %v1086_v17 = vmax.f32 %v1017_v35, 0.0 }
 0x368   :  { %v1121_v11 = vpack.c.bf16 %v1086_v17, %v1085_v10 }
 0x369   :  { %v1021_v37 = vpop.f32.mrb[48].mxu1 }
 0x36a   :  { %v1022_v47 = vadd.f32 %v1021_v37, %v4568_v41  ;;  %v2984_v25 = vpop.f32.mrb[49].mxu1  ;;  %3047 = vmatmul.mubr.bf16.gmra.mrb[48].mxu0 %v1121_v11  ;;  %v3409_v37 = vld [vmem:[#allocation14] sm:$0xff]  }
 0x36b   :  { %v1024_v3 = vpop.f32.mrb[50].mxu1  ;;  %3050 = vmatprep.mubr.msk.bf16.mxu0 %vm3852_vm0, %v3851_v0  ;;  %3079 = vmatpush3.bf16.msra.mxu1 %v3409_v37  ;;  %v3412_v25 = vld [vmem:[#allocation13 + $0x8] sm:$0xff]  }
 0x36c   :  { %v1025_v20 = vadd.f32 %v1024_v3, %v4568_v41  ;;  %v2985_v29 = vpop.f32.mrb[51].mxu1  ;;  %v1087_v60 = vmax.f32 %v1022_v47, 0.0  ;;  %v3410_v47 = vld [vmem:[#allocation13] sm:$0xff]   ;;  %3080 = vmatprep.subr.bf16.mxu1 %v3851_v0  ;;  %v3413_v3 = vld [vmem:[#allocation14 + $0x10] sm:$0xff]   ;;  %v1502_v37 = vld [vmem:[#allocation5 + $0x18] sm:$0xff] }
 0x36d   :  { %3147 = vmatpush3.bf16.msra.mxu0 %v3410_v47  ;;  %v3415_v29 = vld [vmem:[#allocation14 + $0x18] sm:$0xff]  }
 0x36e   :  { %v1088_v30 = vmax.f32 %v1025_v20, 0.0  ;;  %3148 = vmatprep.subr.bf16.mxu0 %v3851_v0  ;;  %v3414_v20 = vld [vmem:[#allocation13 + $0x10] sm:$0xff]  }
 0x370   :  { %v1122_v54 = vpack.c.bf16 %v1088_v30, %v1087_v60  ;;  %v3416_v60 = vld [vmem:[#allocation13 + $0x18] sm:$0xff]   ;;  %v3417_v30 = vld [vmem:[#allocation14 + $0x20] sm:$0xff]  }
 0x371   :  { %v1029_v52 = vpop.f32.mrb[52].mxu1  ;;  %3149 = vmatpush3.bf16.msra.mxu0 %v3412_v25 }
 0x372   :  { %v1030_v59 = vadd.f32 %v1029_v52, %v4568_v41  ;;  %v2988_v43 = vpop.f32.mrb[53].mxu1  ;;  %3051 = vmatmul.mubr.bf16.gmra.mrb[52].mxu0 %v1122_v54  ;;  %3150 = vmatprep.subr.bf16.mxu0 %v3851_v0  ;;  %v3418_v54 = vld [vmem:[#allocation13 + $0x20] sm:$0xff]   ;;  %v3419_v52 = vld [vmem:[#allocation14 + $0x28] sm:$0xff]  }
 0x373   :  { %v1032_v45 = vpop.f32.mrb[54].mxu1  ;;  %3054 = vmatprep.mubr.msk.bf16.mxu0 %vm3852_vm0, %v3851_v0  ;;  %v3421_v43 = vld [vmem:[#allocation14 + $0x30] sm:$0xff]  }
 0x374   :  { %v1033_v51 = vadd.f32 %v1032_v45, %v4568_v41  ;;  %v2989_v46 = vpop.f32.mrb[55].mxu1  ;;  %v1089_v48 = vmax.f32 %v1030_v59, 0.0  ;;  %v3420_v59 = vld [vmem:[#allocation13 + $0x28] sm:$0xff]   ;;  %v3422_v45 = vld [vmem:[#allocation13 + $0x30] sm:$0xff]  }
 0x375   :  { %3151 = vmatpush3.bf16.msra.mxu0 %v3414_v20 }
 0x376   :  { %v1090_v58 = vmax.f32 %v1033_v51, 0.0  ;;  %3152 = vmatprep.subr.bf16.mxu0 %v3851_v0  ;;  %v4638_v51 = vld [vmem:[%s5097_s11] ss:$0 sm:$0xff] }
 0x378   :  { %v1123_v32 = vpack.c.bf16 %v1090_v58, %v1089_v48 }
 0x379   :  { %v1037_v28 = vpop.f32.mrb[56].mxu1  ;;  %3153 = vmatpush3.bf16.msra.mxu0 %v3416_v60 }
 0x37a   :  { %v1038_v26 = vadd.f32 %v1037_v28, %v4568_v41  ;;  %v2992_v53 = vpop.f32.mrb[57].mxu1  ;;  %3055 = vmatmul.mubr.bf16.gmra.mrb[56].mxu0 %v1123_v32  ;;  %3154 = vmatprep.subr.bf16.mxu0 %v3851_v0 }
 0x37b   :  { %v1040_v13 = vpop.f32.mrb[58].mxu1  ;;  %3058 = vmatprep.mubr.msk.bf16.mxu0 %vm3852_vm0, %v3851_v0 }
 0x37c   :  { %v1041_v44 = vadd.f32 %v1040_v13, %v4568_v41  ;;  %v2993_v57 = vpop.f32.mrb[59].mxu1  ;;  %v1091_v61 = vmax.f32 %v1038_v26, 0.0 }
 0x37d   :  { %3155 = vmatpush3.bf16.msra.mxu0 %v3418_v54 }
 0x37e   :  { %v1092_v63 = vmax.f32 %v1041_v44, 0.0  ;;  %3156 = vmatprep.subr.bf16.mxu0 %v3851_v0 }
 0x380   :  { %v1124_v2 = vpack.c.bf16 %v1092_v63, %v1091_v61 }
 0x381   :  { %v1045_v5 = vpop.f32.mrb[60].mxu1  ;;  %3157 = vmatpush3.bf16.msra.mxu0 %v3420_v59  ;;  %v1504_v59 = vld [vmem:[#allocation5 + $0x28] sm:$0xff] }
 0x382   :  { %v1046_v9 = vadd.f32 %v1045_v5, %v4568_v41  ;;  %v2996_v6 = vpop.f32.mrb[61].mxu1  ;;  %3059 = vmatmul.mubr.bf16.gmra.mrb[60].mxu0 %v1124_v2  ;;  %3158 = vmatprep.subr.bf16.mxu0 %v3851_v0 }
 0x383   :  { %v1048_v55 = vpop.f32.mrb[62].mxu1  ;;  %3062 = vmatprep.mubr.msk.bf16.mxu0 %vm3852_vm0, %v3851_v0 }
 0x384   :  { %v1049_v14 = vadd.f32 %v1048_v55, %v4568_v41  ;;  %v2997_v34 = vpop.f32.mrb[63].mxu1  ;;  %v1093_v36 = vmax.f32 %v1046_v9, 0.0 }
 0x385   :  { %3159 = vmatpush3.bf16.msra.mxu0 %v3422_v45 }
 0x386   :  { %v1094_v33 = vmax.f32 %v1049_v14, 0.0  ;;  %3160 = vmatprep.subr.bf16.mxu0 %v3851_v0 }
 0x388   :  { %v1125_v38 = vpack.c.bf16 %v1094_v33, %v1093_v36 }
 0x389   :  { %v1053_v18 = vpop.f32.mrb[64].mxu1 }
 0x38a   :  { %v1054_v16 = vadd.f32 %v1053_v18, %v4568_v41  ;;  %v3000_v19 = vpop.f32.mrb[65].mxu1  ;;  %3063 = vmatmul.mubr.bf16.gmra.mrb[64].mxu0 %v1125_v38 }
 0x38b   :  { %v1056_v40 = vpop.f32.mrb[66].mxu1  ;;  %3066 = vmatprep.mubr.msk.bf16.mxu0 %vm3852_vm0, %v3851_v0 }
 0x38c   :  { %v1057_v42 = vadd.f32 %v1056_v40, %v4568_v41  ;;  %v3001_v8 = vpop.f32.mrb[67].mxu1  ;;  %v1095_v56 = vmax.f32 %v1054_v16, 0.0 }
 0x38e   :  { %v1096_v21 = vmax.f32 %v1057_v42, 0.0 }
 0x390   :  { %v1126_v27 = vpack.c.bf16 %v1096_v21, %v1095_v56 }
 0x391   :  { %v1061_v1 = vpop.f32.mrb[68].mxu1 }
 0x392   :  { %v1062_v22 = vadd.f32 %v1061_v1, %v4568_v41  ;;  %v3004_v24 = vpop.f32.mrb[69].mxu1  ;;  %3067 = vmatmul.mubr.bf16.gmra.mrb[68].mxu0 %v1126_v27 }
 0x393   :  { %v1064_v50 = vpop.f32.mrb[70].mxu1  ;;  %3070 = vmatprep.mubr.msk.bf16.mxu0 %vm3852_vm0, %v3851_v0 }
 0x394   :  { %v1065_v15 = vadd.f32 %v1064_v50, %v4568_v41  ;;  %v3005_v7 = vpop.f32.mrb[71].mxu1  ;;  %v1097_v23 = vmax.f32 %v1062_v22, 0.0  ;;  %v3423_v22 = vld [vmem:[#allocation14 + $0x38] sm:$0xff]   ;;  %v1499_v50 = vld [vmem:[#allocation5] sm:$0xff] }
 0x396   :  { %v1098_v4 = vmax.f32 %v1065_v15, 0.0  ;;  %v1500_v15 = vld [vmem:[#allocation5 + $0x8] sm:$0xff] }
 0x398   :  { %v1127_v31 = vpack.c.bf16 %v1098_v4, %v1097_v23  ;;  %v3424_v4 = vld [vmem:[#allocation13 + $0x38] sm:$0xff]  }
 0x399   :  { %v1069_v62 = vpop.f32.mrb[72].mxu1  ;;  %3161 = vmatpush3.bf16.msra.mxu0 %v3424_v4  ;;  %v1509_v4 = vld [vmem:[#allocation5 + $0x50] sm:$0xff] }
 0x39a   :  { %v1070_v12 = vadd.f32 %v1069_v62, %v4568_v41  ;;  %v3008_v35 = vpop.f32.mrb[73].mxu1  ;;  %3071 = vmatmul.mubr.bf16.gmra.mrb[72].mxu0 %v1127_v31  ;;  %v3411_v41 = vld [vmem:[#allocation14 + $0x8] sm:$0xff]   ;;  %v1540_v31 = vpack.c.bf16 %v1500_v15, %v1499_v50  ;;  %3282 = vmatprep.subr.bf16.mxu0 %v3851_v0 }
 0x39b   :  { %v1072_v39 = vpop.f32.mrb[74].mxu1  ;;  %3074 = vmatprep.mubr.msk.bf16.mxu0 %vm3852_vm0, %v3851_v0  ;;  %3081 = vmatpush3.bf16.msra.mxu1 %v3411_v41 }
 0x39c   :  { %v1099_v10 = vmax.f32 %v1070_v12, 0.0  ;;  %v3009_v17 = vpop.f32.mrb[75].mxu1  ;;  %3082 = vmatprep.subr.bf16.mxu1 %v3851_v0 }
 0x39e   :  { %v1128_v11 = vpack.c.bf16 %v1099_v10, %v1099_v10 }
 0x39f   :  { %3083 = vmatpush3.bf16.msra.mxu1 %v3413_v3 }
 0x3a0   :  { %3084 = vmatprep.subr.bf16.mxu1 %v3851_v0 }
 0x3a2   :  { %3075 = vmatmul.mubr.bf16.gmra.mrb[76].mxu0 %v1128_v11  ;;  %v1501_v11 = vld [vmem:[#allocation5 + $0x10] sm:$0xff] }
 0x3a3   :  { %3162 = vmatprep.mubr.msk.bf16.mxu0 %vm3852_vm0, %v3851_v0  ;;  %3085 = vmatpush3.bf16.msra.mxu1 %v3415_v29  ;;  %v1541_v25 = vpack.c.bf16 %v1502_v37, %v1501_v11 }
 0x3a4   :  { %3086 = vmatprep.subr.bf16.mxu1 %v3851_v0 }
 0x3a7   :  { %3087 = vmatpush3.bf16.msra.mxu1 %v3417_v30 }
 0x3a8   :  { %3088 = vmatprep.subr.bf16.mxu1 %v3851_v0 }
 0x3ab   :  { %3089 = vmatpush3.bf16.msra.mxu1 %v3419_v52  ;;  %v1503_v52 = vld [vmem:[#allocation5 + $0x20] sm:$0xff] }
 0x3ac   :  { %3090 = vmatprep.subr.bf16.mxu1 %v3851_v0 }
 0x3af   :  { %3091 = vmatpush3.bf16.msra.mxu1 %v3421_v43 }
 0x3b0   :  { %3092 = vmatprep.subr.bf16.mxu1 %v3851_v0 }
 0x3b3   :  { %3093 = vmatpush3.bf16.msra.mxu1 %v3423_v22 }
 0x3b4   :  { %3214 = vmatprep.subr.bf16.mxu1 %v3851_v0 }
 0x3b6   :  { %3095 = vmatmul.mubr.bf16.vlgmr.msra.gmra.mrb[76].mxu1 %v1540_v31  ;;  %v1510_v31 = vld [vmem:[#allocation5 + $0x58] sm:$0xff] }
 0x3b7   :  { %3098 = vmatprep.mubr.msk.bf16.mxu1 %vm3852_vm0, %v3851_v0 }
 0x3be   :  { %3099 = vmatmul.mubr.bf16.gmra.mrb[80].mxu1 %v1541_v25 }
 0x3bf   :  { %3102 = vmatprep.mubr.msk.bf16.mxu1 %vm3852_vm0, %v3851_v0 }
 0x415   :  { %v1218_v46 = vpop.f32.mrb[28].mxu0 }
 0x416   :  { %v4641_v48 = vadd.f32 %v4638_v51, %v1218_v46  ;;  %v3028_v58 = vpop.f32.mrb[29].mxu0  ;;  %v1542_v46 = vpack.c.bf16 %v1504_v59, %v1503_v52 }
 0x417   :  { %v1221_v32 = vpop.f32.mrb[30].mxu0 }
 0x418   :  { %v4644_v28 = vadd.f32 %v4638_v51, %v1221_v32  ;;  %v3029_v26 = vpop.f32.mrb[31].mxu0  ;;  %v1320_v53 = vmul.f32 %v4641_v48, %v4641_v48  ;;  %3103 = vmatmul.mubr.bf16.gmra.mrb[84].mxu1 %v1542_v46 }
 0x419   :  { %3106 = vmatprep.mubr.msk.bf16.mxu1 %vm3852_vm0, %v3851_v0 }
 0x41a   :  { %1345 = vadd.xlane.f32.xlu0 %v1320_v53  ;;  %v1321_v13 = vmul.f32 %v4644_v28, %v4644_v28 }
 0x41c   :  { %1347 = vadd.xlane.f32.xlu1 %v1321_v13 }
 0x41d   :  { %v1226_v44 = vpop.f32.mrb[32].mxu0 }
 0x41e   :  { %v4651_v57 = vadd.f32 %v4638_v51, %v1226_v44  ;;  %v3032_v61 = vpop.f32.mrb[33].mxu0 }
 0x41f   :  { %v1229_v63 = vpop.f32.mrb[34].mxu0  ;;  %v1505_v61 = vld [vmem:[#allocation5 + $0x30] sm:$0xff] }
 0x420   :  { %v4654_v2 = vadd.f32 %v4638_v51, %v1229_v63  ;;  %v3033_v5 = vpop.f32.mrb[35].mxu0  ;;  %v1322_v9 = vmul.f32 %v4651_v57, %v4651_v57  ;;  %v1506_v63 = vld [vmem:[#allocation5 + $0x38] sm:$0xff] }
 0x422   :  { %1349 = vadd.xlane.f32.xlu0 %v1322_v9  ;;  %v1323_v6 = vmul.f32 %v4654_v2, %v4654_v2 }
 0x424   :  { %1351 = vadd.xlane.f32.xlu1 %v1323_v6  ;;  %v1543_v6 = vpack.c.bf16 %v1506_v63, %v1505_v61 }
 0x425   :  { %v1234_v55 = vpop.f32.mrb[36].mxu0 }
 0x426   :  { %v4661_v14 = vadd.f32 %v4638_v51, %v1234_v55  ;;  %v3036_v34 = vpop.f32.mrb[37].mxu0  ;;  %3107 = vmatmul.mubr.bf16.gmra.mrb[88].mxu1 %v1543_v6 }
 0x427   :  { %v1237_v36 = vpop.f32.mrb[38].mxu0  ;;  %3110 = vmatprep.mubr.msk.bf16.mxu1 %vm3852_vm0, %v3851_v0 }
 0x428   :  { %v4664_v33 = vadd.f32 %v4638_v51, %v1237_v36  ;;  %v3037_v38 = vpop.f32.mrb[39].mxu0  ;;  %v1324_v18 = vmul.f32 %v4661_v14, %v4661_v14 }
 0x42a   :  { %1353 = vadd.xlane.f32.xlu0 %v1324_v18  ;;  %v1325_v16 = vmul.f32 %v4664_v33, %v4664_v33 }
 0x42c   :  { %1355 = vadd.xlane.f32.xlu1 %v1325_v16 }
 0x42d   :  { %v1242_v19 = vpop.f32.mrb[40].mxu0 }
 0x42e   :  { %v4671_v40 = vadd.f32 %v4638_v51, %v1242_v19  ;;  %v3040_v42 = vpop.f32.mrb[41].mxu0  ;;  %v1507_v19 = vld [vmem:[#allocation5 + $0x40] sm:$0xff] }
 0x42f   :  { %v1245_v8 = vpop.f32.mrb[42].mxu0  ;;  %v1508_v42 = vld [vmem:[#allocation5 + $0x48] sm:$0xff] }
 0x430   :  { %v4674_v56 = vadd.f32 %v4638_v51, %v1245_v8  ;;  %v3041_v21 = vpop.f32.mrb[43].mxu0  ;;  %v1326_v27 = vmul.f32 %v4671_v40, %v4671_v40 }
 0x432   :  { %1357 = vadd.xlane.f32.xlu0 %v1326_v27  ;;  %v1327_v1 = vmul.f32 %v4674_v56, %v4674_v56  ;;  %v1544_v27 = vpack.c.bf16 %v1508_v42, %v1507_v19  ;;  %v1516_v19 = vld [vmem:[#allocation5 + $0x88] sm:$0xff] }
 0x434   :  { %1359 = vadd.xlane.f32.xlu1 %v1327_v1  ;;  %3111 = vmatmul.mubr.bf16.gmra.mrb[92].mxu1 %v1544_v27 }
 0x435   :  { %v1250_v24 = vpop.f32.mrb[44].mxu0  ;;  %3114 = vmatprep.mubr.msk.bf16.mxu1 %vm3852_vm0, %v3851_v0 }
 0x436   :  { %v4681_v7 = vadd.f32 %v4638_v51, %v1250_v24  ;;  %v3044_v23 = vpop.f32.mrb[45].mxu0 }
 0x437   :  { %v1253_v62 = vpop.f32.mrb[46].mxu0 }
 0x438   :  { %v4685_v12 = vadd.f32 %v4638_v51, %v1253_v62  ;;  %v3045_v35 = vpop.f32.mrb[47].mxu0  ;;  %v1328_v39 = vmul.f32 %v4681_v7, %v4681_v7 }
 0x43a   :  { %1361 = vadd.xlane.f32.xlu0 %v1328_v39  ;;  %v1329_v10 = vmul.f32 %v4685_v12, %v4685_v12  ;;  %v1545_v39 = vpack.c.bf16 %v1510_v31, %v1509_v4  ;;  %v1520_v31 = vld [vmem:[#allocation5 + $0xa8] sm:$0xff] }
 0x43c   :  { %1363 = vadd.xlane.f32.xlu1 %v1329_v10  ;;  %3115 = vmatmul.mubr.bf16.gmra.mrb[96].mxu1 %v1545_v39  ;;  %v1521_v39 = vld [vmem:[#allocation5 + $0xb0] sm:$0xff] }
 0x43d   :  { %v1258_v17 = vpop.f32.mrb[48].mxu0  ;;  %3118 = vmatprep.mubr.msk.bf16.mxu1 %vm3852_vm0, %v3851_v0 }
 0x43e   :  { %v4695_v47 = vadd.f32 %v4638_v51, %v1258_v17  ;;  %v3048_v41 = vpop.f32.mrb[49].mxu0 }
 0x43f   :  { %v1261_v3 = vpop.f32.mrb[50].mxu0 }
 0x440   :  { %v4698_v20 = vadd.f32 %v4638_v51, %v1261_v3  ;;  %v3049_v29 = vpop.f32.mrb[51].mxu0  ;;  %v1330_v60 = vmul.f32 %v4695_v47, %v4695_v47  ;;  %v1511_v3 = vld [vmem:[#allocation5 + $0x60] sm:$0xff] }
 0x441   :  { %v1512_v29 = vld [vmem:[#allocation5 + $0x68] sm:$0xff] }
 0x442   :  { %1365 = vadd.xlane.f32.xlu0 %v1330_v60  ;;  %v1331_v30 = vmul.f32 %v4698_v20, %v4698_v20 }
 0x444   :  { %1367 = vadd.xlane.f32.xlu1 %v1331_v30 }
 0x445   :  { %v1266_v54 = vpop.f32.mrb[52].mxu0 }
 0x446   :  { %v4707_v43 = vadd.f32 %v4638_v51, %v1266_v54  ;;  %v3052_v45 = vpop.f32.mrb[53].mxu0  ;;  %v1546_v54 = vpack.c.bf16 %v1512_v29, %v1511_v3  ;;  %v3426_v3 = vld [vmem:[#allocation16 + $0x8] sm:$0xff]   ;;  %v3427_v29 = vld [vmem:[#allocation16 + $0x10] sm:$0xff]  }
 0x447   :  { %v1269_v58 = vpop.f32.mrb[54].mxu0 }
 0x448   :  { %v4710_v32 = vadd.f32 %v4638_v51, %v1269_v58  ;;  %v3053_v26 = vpop.f32.mrb[55].mxu0  ;;  %v1332_v53 = vmul.f32 %v4707_v43, %v4707_v43  ;;  %3119 = vmatmul.mubr.bf16.gmra.mrb[100].mxu1 %v1546_v54 }
 0x449   :  { %3122 = vmatprep.mubr.msk.bf16.mxu1 %vm3852_vm0, %v3851_v0 }
 0x44a   :  { %1369 = vadd.xlane.f32.xlu0 %v1332_v53  ;;  %v1333_v13 = vmul.f32 %v4710_v32, %v4710_v32  ;;  %v1513_v53 = vld [vmem:[#allocation5 + $0x70] sm:$0xff] }
 0x44c   :  { %1371 = vadd.xlane.f32.xlu1 %v1333_v13  ;;  %v1514_v13 = vld [vmem:[#allocation5 + $0x78] sm:$0xff] }
 0x44d   :  { %v1274_v44 = vpop.f32.mrb[56].mxu0  ;;  %v1547_v63 = vpack.c.bf16 %v1514_v13, %v1513_v53 }
 0x44e   :  { %v4719_v5 = vadd.f32 %v4638_v51, %v1274_v44  ;;  %v3056_v9 = vpop.f32.mrb[57].mxu0 }
 0x44f   :  { %v1277_v55 = vpop.f32.mrb[58].mxu0 }
 0x450   :  { %v4722_v34 = vadd.f32 %v4638_v51, %v1277_v55  ;;  %v3057_v36 = vpop.f32.mrb[59].mxu0  ;;  %v1334_v38 = vmul.f32 %v4719_v5, %v4719_v5  ;;  %3123 = vmatmul.mubr.bf16.gmra.mrb[104].mxu1 %v1547_v63  ;;  %v3431_v63 = vld [vmem:[#allocation16 + $0x30] sm:$0xff]  }
 0x451   :  { %3126 = vmatprep.mubr.msk.bf16.mxu1 %vm3852_vm0, %v3851_v0 }
 0x452   :  { %1373 = vadd.xlane.f32.xlu0 %v1334_v38  ;;  %v1335_v18 = vmul.f32 %v4722_v34, %v4722_v34 }
 0x454   :  { %1375 = vadd.xlane.f32.xlu1 %v1335_v18 }
 0x455   :  { %v1282_v16 = vpop.f32.mrb[60].mxu0 }
 0x456   :  { %v4731_v8 = vadd.f32 %v4638_v51, %v1282_v16  ;;  %v3060_v21 = vpop.f32.mrb[61].mxu0  ;;  %v1515_v16 = vld [vmem:[#allocation5 + $0x80] sm:$0xff] }
 0x457   :  { %v1285_v1 = vpop.f32.mrb[62].mxu0  ;;  %v1548_v27 = vpack.c.bf16 %v1516_v19, %v1515_v16 }
 0x458   :  { %v4734_v22 = vadd.f32 %v4638_v51, %v1285_v1  ;;  %v3061_v24 = vpop.f32.mrb[63].mxu0  ;;  %v1336_v50 = vmul.f32 %v4731_v8, %v4731_v8 }
 0x459   :  { %3127 = vmatmul.mubr.bf16.gmra.mrb[108].mxu1 %v1548_v27 }
 0x45a   :  { %1377 = vadd.xlane.f32.xlu0 %v1336_v50  ;;  %v1337_v15 = vmul.f32 %v4734_v22, %v4734_v22  ;;  %3130 = vmatprep.mubr.msk.bf16.mxu1 %vm3852_vm0, %v3851_v0 }
 0x45c   :  { %1379 = vadd.xlane.f32.xlu1 %v1337_v15  ;;  %v1517_v15 = vld [vmem:[#allocation5 + $0x90] sm:$0xff] }
 0x45d   :  { %v1290_v23 = vpop.f32.mrb[64].mxu0 }
 0x45e   :  { %v4743_v62 = vadd.f32 %v4638_v51, %v1290_v23  ;;  %v3064_v35 = vpop.f32.mrb[65].mxu0  ;;  %v1518_v23 = vld [vmem:[#allocation5 + $0x98] sm:$0xff] }
 0x45f   :  { %v1293_v10 = vpop.f32.mrb[66].mxu0  ;;  %v1549_v4 = vpack.c.bf16 %v1518_v23, %v1517_v15 }
 0x460   :  { %v4746_v17 = vadd.f32 %v4638_v51, %v1293_v10  ;;  %v3065_v11 = vpop.f32.mrb[67].mxu0  ;;  %v1338_v37 = vmul.f32 %v4743_v62, %v4743_v62  ;;  %v1522_v10 = vld [vmem:[#allocation5 + $0xb8] sm:$0xff] }
 0x461   :  { %3131 = vmatmul.mubr.bf16.gmra.mrb[112].mxu1 %v1549_v4  ;;  %v1551_v11 = vpack.c.bf16 %v1522_v10, %v1521_v39 }
 0x462   :  { %1381 = vadd.xlane.f32.xlu0 %v1338_v37  ;;  %v1339_v41 = vmul.f32 %v4746_v17, %v4746_v17  ;;  %3134 = vmatprep.mubr.msk.bf16.mxu1 %vm3852_vm0, %v3851_v0  ;;  %v1523_v37 = vld [vmem:[#allocation5 + $0xc0] sm:$0xff] }
 0x464   :  { %1383 = vadd.xlane.f32.xlu1 %v1339_v41  ;;  %v1552_v41 = vpack.c.bf16 %v1523_v37, %v1523_v37 }
 0x465   :  { %v1298_v25 = vpop.f32.mrb[68].mxu0 }
 0x466   :  { %v4755_v60 = vadd.f32 %v4638_v51, %v1298_v25  ;;  %v3068_v30 = vpop.f32.mrb[69].mxu0  ;;  %v3425_v25 = vld [vmem:[#allocation16] sm:$0xff]  }
 0x467   :  { %v1301_v52 = vpop.f32.mrb[70].mxu0  ;;  %3215 = vmatpush3.bf16.msra.mxu1 %v3425_v25  ;;  %v3428_v30 = vld [vmem:[#allocation16 + $0x18] sm:$0xff]  }
 0x468   :  { %v4758_v59 = vadd.f32 %v4638_v51, %v1301_v52  ;;  %v3069_v45 = vpop.f32.mrb[71].mxu0  ;;  %v1340_v46 = vmul.f32 %v4755_v60, %v4755_v60  ;;  %3216 = vmatprep.subr.bf16.mxu1 %v3851_v0 }
 0x46a   :  { %1385 = vadd.xlane.f32.xlu0 %v1340_v46  ;;  %v1341_v58 = vmul.f32 %v4758_v59, %v4758_v59  ;;  %v3429_v46 = vld [vmem:[#allocation16 + $0x20] sm:$0xff]  }
 0x46b   :  { %3217 = vmatpush3.bf16.msra.mxu1 %v3426_v3 }
 0x46c   :  { %1387 = vadd.xlane.f32.xlu1 %v1341_v58  ;;  %3218 = vmatprep.subr.bf16.mxu1 %v3851_v0 }
 0x46d   :  { %v1306_v26 = vpop.f32.mrb[72].mxu0 }
 0x46e   :  { %v4767_v44 = vadd.f32 %v4638_v51, %v1306_v26  ;;  %v3072_v61 = vpop.f32.mrb[73].mxu0  ;;  %v3430_v26 = vld [vmem:[#allocation16 + $0x28] sm:$0xff]  }
 0x46f   :  { %v1309_v9 = vpop.f32.mrb[74].mxu0  ;;  %3219 = vmatpush3.bf16.msra.mxu1 %v3427_v29 }
 0x470   :  { %v4770_v6 = vadd.f32 %v4638_v51, %v1309_v9  ;;  %v3073_v55 = vpop.f32.mrb[75].mxu0  ;;  %v1342_v36 = vmul.f32 %v4767_v44, %v4767_v44  ;;  %3220 = vmatprep.subr.bf16.mxu1 %v3851_v0 }
 0x472   :  { %1389 = vadd.xlane.f32.xlu0 %v1342_v36  ;;  %v1343_v38 = vmul.f32 %v4770_v6, %v4770_v6  ;;  %v3432_v36 = vld [vmem:[#allocation16 + $0x38] sm:$0xff]  }
 0x473   :  { %3221 = vmatpush3.bf16.msra.mxu1 %v3428_v30 }
 0x474   :  { %1391 = vadd.xlane.f32.xlu1 %v1343_v38  ;;  %3222 = vmatprep.subr.bf16.mxu1 %v3851_v0 }
 0x475   :  { %v1314_v18 = vpop.f32.mrb[76].mxu0 }
 0x476   :  { %v4779_v42 = vadd.f32 %v4638_v51, %v1314_v18  ;;  %v3076_v21 = vpop.f32.mrb[77].mxu0  ;;  %v1519_v51 = vld [vmem:[#allocation5 + $0xa0] sm:$0xff] }
 0x477   :  { %v1317_v1 = vpop.f32.mrb[78].mxu0  ;;  %v1550_v35 = vpack.c.bf16 %v1520_v31, %v1519_v51  ;;  %3223 = vmatpush3.bf16.msra.mxu1 %v3429_v46 }
 0x478   :  { %v3077_v24 = vpop.f32.mrb[79].mxu0  ;;  %v1344_v50 = vmul.f32 %v4779_v42, %v4779_v42  ;;  %3224 = vmatprep.subr.bf16.mxu1 %v3851_v0 }
 0x479   :  { %3135 = vmatmul.mubr.bf16.gmra.mrb[116].mxu1 %v1550_v35 }
 0x47a   :  { %1393 = vadd.xlane.f32.xlu0 %v1344_v50  ;;  %3138 = vmatprep.mubr.msk.bf16.mxu1 %vm3852_vm0, %v3851_v0 }
 0x47b   :  { %3225 = vmatpush3.bf16.msra.mxu1 %v3430_v26 }
 0x47c   :  { %3226 = vmatprep.subr.bf16.mxu1 %v3851_v0 }
 0x47f   :  { %3227 = vmatpush3.bf16.msra.mxu1 %v3431_v63 }
 0x480   :  { %3228 = vmatprep.subr.bf16.mxu1 %v3851_v0 }
 0x481   :  { %3139 = vmatmul.mubr.bf16.gmra.mrb[120].mxu1 %v1551_v11 }
 0x482   :  { %3142 = vmatprep.mubr.msk.bf16.mxu1 %vm3852_vm0, %v3851_v0 }
 0x483   :  { %3229 = vmatpush3.bf16.msra.mxu1 %v3432_v36 }
 0x489   :  { %3143 = vmatmul.mubr.bf16.gmra.mrb[124].mxu1 %v1552_v41 }
 0x48a   :  { %3230 = vmatprep.mubr.msk.bf16.mxu1 %vm3852_vm0, %v3851_v0 }
 0x4a7   :  { %v1346_v54 = vpop.xlane.xlu0 %1345 }
 0x4a8   :  { %v1395_v52 = vmax.f32 %v1346_v54, 1e-24 }
 0x4a9   :  { %v1348_v45 = vpop.xlane.xlu1 %1347 }
 0x4aa   :  { %3541 = vrsqrt.f32 %v1395_v52  ;;  %v1396_v58 = vmax.f32 %v1348_v45, 1e-24 }
 0x4ac   :  { %3543 = vrsqrt.f32 %v1396_v58 }
 0x4af   :  { %v1350_v53 = vpop.xlane.xlu0 %1349 }
 0x4b0   :  { %v1397_v13 = vmax.f32 %v1350_v53, 1e-24 }
 0x4b1   :  { %v1352_v61 = vpop.xlane.xlu1 %1351 }
 0x4b2   :  { %3545 = vrsqrt.f32 %v1397_v13  ;;  %v1398_v9 = vmax.f32 %v1352_v61, 1e-24 }
 0x4b4   :  { %v3542_v55 = vpop.eup %3541  ;;  %3547 = vrsqrt.f32 %v1398_v9 }
 0x4b5   :  { %v1445_v18 = vmul.f32 %v3542_v55, %v4641_v48 }
 0x4b6   :  { %v3544_v38 = vpop.eup %3543 }
 0x4b7   :  { %v1446_v16 = vmul.f32 %v3544_v38, %v4644_v28  ;;  %v1354_v19 = vpop.xlane.xlu0 %1353 }
 0x4b8   :  { %v1399_v21 = vmax.f32 %v1354_v19, 1e-24 }
 0x4b9   :  { %v1356_v27 = vpop.xlane.xlu1 %1355  ;;  %v1486_v1 = vpack.c.bf16 %v1446_v16, %v1445_v18 }
 0x4ba   :  { %3549 = vrsqrt.f32 %v1399_v21  ;;  %v1400_v24 = vmax.f32 %v1356_v27, 1e-24 }
 0x4bb   :  { %3163 = vmatmul.mubr.bf16.vlgmr.msra.gmra.mrb[80].mxu0 %v1486_v1 }
 0x4bc   :  { %v3546_v50 = vpop.eup %3545  ;;  %3551 = vrsqrt.f32 %v1400_v24  ;;  %3166 = vmatprep.mubr.msk.bf16.mxu0 %vm3852_vm0, %v3851_v0 }
 0x4bd   :  { %v1447_v4 = vmul.f32 %v3546_v50, %v4651_v57 }
 0x4be   :  { %v3548_v15 = vpop.eup %3547 }
 0x4bf   :  { %v1358_v23 = vpop.xlane.xlu0 %1357  ;;  %v1448_v48 = vmul.f32 %v3548_v15, %v4654_v2 }
 0x4c0   :  { %v1401_v28 = vmax.f32 %v1358_v23, 1e-24 }
 0x4c1   :  { %v1360_v51 = vpop.xlane.xlu1 %1359  ;;  %v1487_v31 = vpack.c.bf16 %v1448_v48, %v1447_v4 }
 0x4c2   :  { %3553 = vrsqrt.f32 %v1401_v28  ;;  %v1402_v35 = vmax.f32 %v1360_v51, 1e-24 }
 0x4c3   :  { %3167 = vmatmul.mubr.bf16.gmra.mrb[84].mxu0 %v1487_v31 }
 0x4c4   :  { %v3550_v39 = vpop.eup %3549  ;;  %3555 = vrsqrt.f32 %v1402_v35  ;;  %3170 = vmatprep.mubr.msk.bf16.mxu0 %vm3852_vm0, %v3851_v0 }
 0x4c5   :  { %v1449_v37 = vmul.f32 %v3550_v39, %v4661_v14 }
 0x4c6   :  { %v3552_v10 = vpop.eup %3551 }
 0x4c7   :  { %v1362_v11 = vpop.xlane.xlu0 %1361  ;;  %v1450_v41 = vmul.f32 %v3552_v10, %v4664_v33 }
 0x4c8   :  { %v1403_v57 = vmax.f32 %v1362_v11, 1e-24 }
 0x4c9   :  { %v1364_v25 = vpop.xlane.xlu1 %1363  ;;  %v1488_v2 = vpack.c.bf16 %v1450_v41, %v1449_v37 }
 0x4ca   :  { %3557 = vrsqrt.f32 %v1403_v57  ;;  %v1404_v3 = vmax.f32 %v1364_v25, 1e-24 }
 0x4cb   :  { %3171 = vmatmul.mubr.bf16.gmra.mrb[88].mxu0 %v1488_v2 }
 0x4cc   :  { %v3554_v29 = vpop.eup %3553  ;;  %3559 = vrsqrt.f32 %v1404_v3  ;;  %3174 = vmatprep.mubr.msk.bf16.mxu0 %vm3852_vm0, %v3851_v0 }
 0x4cd   :  { %v1451_v52 = vmul.f32 %v3554_v29, %v4671_v40 }
 0x4ce   :  { %v3556_v30 = vpop.eup %3555 }
 0x4cf   :  { %v1366_v54 = vpop.xlane.xlu0 %1365  ;;  %v1452_v45 = vmul.f32 %v3556_v30, %v4674_v56 }
 0x4d0   :  { %v1405_v14 = vmax.f32 %v1366_v54, 1e-24 }
 0x4d1   :  { %v1368_v46 = vpop.xlane.xlu1 %1367  ;;  %v1489_v33 = vpack.c.bf16 %v1452_v45, %v1451_v52 }
 0x4d2   :  { %3561 = vrsqrt.f32 %v1405_v14  ;;  %v1406_v58 = vmax.f32 %v1368_v46, 1e-24 }
 0x4d3   :  { %3175 = vmatmul.mubr.bf16.gmra.mrb[92].mxu0 %v1489_v33 }
 0x4d4   :  { %v3558_v26 = vpop.eup %3557  ;;  %3563 = vrsqrt.f32 %v1406_v58  ;;  %3178 = vmatprep.mubr.msk.bf16.mxu0 %vm3852_vm0, %v3851_v0 }
 0x4d5   :  { %v1453_v61 = vmul.f32 %v3558_v26, %v4681_v7 }
 0x4d6   :  { %v3560_v53 = vpop.eup %3559 }
 0x4d7   :  { %v1370_v13 = vpop.xlane.xlu0 %1369  ;;  %v1454_v63 = vmul.f32 %v3560_v53, %v4685_v12 }
 0x4d8   :  { %v1407_v40 = vmax.f32 %v1370_v13, 1e-24 }
 0x4d9   :  { %v1372_v9 = vpop.xlane.xlu1 %1371  ;;  %v1490_v56 = vpack.c.bf16 %v1454_v63, %v1453_v61 }
 0x4da   :  { %3565 = vrsqrt.f32 %v1407_v40  ;;  %v1408_v55 = vmax.f32 %v1372_v9, 1e-24 }
 0x4db   :  { %3179 = vmatmul.mubr.bf16.gmra.mrb[96].mxu0 %v1490_v56 }
 0x4dc   :  { %v3562_v36 = vpop.eup %3561  ;;  %3567 = vrsqrt.f32 %v1408_v55  ;;  %3182 = vmatprep.mubr.msk.bf16.mxu0 %vm3852_vm0, %v3851_v0 }
 0x4dd   :  { %v1455_v16 = vmul.f32 %v3562_v36, %v4695_v47 }
 0x4de   :  { %v3564_v38 = vpop.eup %3563 }
 0x4df   :  { %v1374_v18 = vpop.xlane.xlu0 %1373  ;;  %v1456_v19 = vmul.f32 %v3564_v38, %v4698_v20 }
 0x4e0   :  { %v1409_v7 = vmax.f32 %v1374_v18, 1e-24 }
 0x4e1   :  { %v1376_v21 = vpop.xlane.xlu1 %1375  ;;  %v1491_v12 = vpack.c.bf16 %v1456_v19, %v1455_v16 }
 0x4e2   :  { %3569 = vrsqrt.f32 %v1409_v7  ;;  %v1410_v27 = vmax.f32 %v1376_v21, 1e-24 }
 0x4e3   :  { %3183 = vmatmul.mubr.bf16.gmra.mrb[100].mxu0 %v1491_v12 }
 0x4e4   :  { %v3566_v1 = vpop.eup %3565  ;;  %3571 = vrsqrt.f32 %v1410_v27  ;;  %3186 = vmatprep.mubr.msk.bf16.mxu0 %vm3852_vm0, %v3851_v0 }
 0x4e5   :  { %v1457_v15 = vmul.f32 %v3566_v1, %v4707_v43 }
 0x4e6   :  { %v3568_v24 = vpop.eup %3567 }
 0x4e7   :  { %v1378_v50 = vpop.xlane.xlu0 %1377  ;;  %v1458_v23 = vmul.f32 %v3568_v24, %v4710_v32 }
 0x4e8   :  { %v1411_v47 = vmax.f32 %v1378_v50, 1e-24 }
 0x4e9   :  { %v1380_v4 = vpop.xlane.xlu1 %1379  ;;  %v1492_v20 = vpack.c.bf16 %v1458_v23, %v1457_v15 }
 0x4ea   :  { %3573 = vrsqrt.f32 %v1411_v47  ;;  %v1412_v48 = vmax.f32 %v1380_v4, 1e-24 }
 0x4eb   :  { %3187 = vmatmul.mubr.bf16.gmra.mrb[104].mxu0 %v1492_v20 }
 0x4ec   :  { %v3570_v28 = vpop.eup %3569  ;;  %3575 = vrsqrt.f32 %v1412_v48  ;;  %3190 = vmatprep.mubr.msk.bf16.mxu0 %vm3852_vm0, %v3851_v0 }
 0x4ed   :  { %v1459_v35 = vmul.f32 %v3570_v28, %v4719_v5 }
 0x4ee   :  { %v3572_v51 = vpop.eup %3571 }
 0x4ef   :  { %v1382_v31 = vpop.xlane.xlu0 %1381  ;;  %v1460_v39 = vmul.f32 %v3572_v51, %v4722_v34 }
 0x4f0   :  { %v1413_v43 = vmax.f32 %v1382_v31, 1e-24 }
 0x4f1   :  { %v1384_v10 = vpop.xlane.xlu1 %1383  ;;  %v1493_v32 = vpack.c.bf16 %v1460_v39, %v1459_v35 }
 0x4f2   :  { %3577 = vrsqrt.f32 %v1413_v43  ;;  %v1414_v11 = vmax.f32 %v1384_v10, 1e-24 }
 0x4f3   :  { %3191 = vmatmul.mubr.bf16.gmra.mrb[108].mxu0 %v1493_v32 }
 0x4f4   :  { %v3574_v37 = vpop.eup %3573  ;;  %3579 = vrsqrt.f32 %v1414_v11  ;;  %3194 = vmatprep.mubr.msk.bf16.mxu0 %vm3852_vm0, %v3851_v0 }
 0x4f5   :  { %v1461_v25 = vmul.f32 %v3574_v37, %v4731_v8 }
 0x4f6   :  { %v3576_v41 = vpop.eup %3575 }
 0x4f7   :  { %v1386_v57 = vpop.xlane.xlu0 %1385  ;;  %v1462_v2 = vmul.f32 %v3576_v41, %v4734_v22 }
 0x4f8   :  { %v1415_v5 = vmax.f32 %v1386_v57, 1e-24 }
 0x4f9   :  { %v1388_v3 = vpop.xlane.xlu1 %1387  ;;  %v1494_v34 = vpack.c.bf16 %v1462_v2, %v1461_v25 }
 0x4fa   :  { %3581 = vrsqrt.f32 %v1415_v5  ;;  %v1416_v29 = vmax.f32 %v1388_v3, 1e-24 }
 0x4fb   :  { %3195 = vmatmul.mubr.bf16.gmra.mrb[112].mxu0 %v1494_v34 }
 0x4fc   :  { %v3578_v30 = vpop.eup %3577  ;;  %3583 = vrsqrt.f32 %v1416_v29  ;;  %3198 = vmatprep.mubr.msk.bf16.mxu0 %vm3852_vm0, %v3851_v0 }
 0x4fd   :  { %v1463_v45 = vmul.f32 %v3578_v30, %v4743_v62 }
 0x4fe   :  { %v3580_v54 = vpop.eup %3579 }
 0x4ff   :  { %v1390_v52 = vpop.xlane.xlu0 %1389  ;;  %v1464_v14 = vmul.f32 %v3580_v54, %v4746_v17  ;;  %v4842_v17 = vpop.f32.mrb[76].mxu1 }
 0x500   :  { %v1417_v8 = vmax.f32 %v1390_v52, 1e-24  ;;  %v3096_v9 = vpop.f32.mrb[77].mxu1 }
 0x501   :  { %v1392_v46 = vpop.xlane.xlu1 %1391  ;;  %v1495_v22 = vpack.c.bf16 %v1464_v14, %v1463_v45  ;;  %v4846_v56 = vpop.f32.mrb[78].mxu1  ;;  %v3436_v9 = vld [vmem:[#allocation17 + $0x18] sm:$0xff]  }
 0x502   :  { %3585 = vrsqrt.f32 %v1417_v8  ;;  %v1418_v33 = vmax.f32 %v1392_v46, 1e-24  ;;  %v3097_v36 = vpop.f32.mrb[79].mxu1 }
 0x503   :  { %3199 = vmatmul.mubr.bf16.gmra.mrb[116].mxu0 %v1495_v22  ;;  %v4850_v18 = vpop.f32.mrb[80].mxu1  ;;  %v1923_v36 = vsub.s32 4, %v4158_v49 }
 0x504   :  { %v3582_v58 = vpop.eup %3581  ;;  %3587 = vrsqrt.f32 %v1418_v33  ;;  %3202 = vmatprep.mubr.msk.bf16.mxu0 %vm3852_vm0, %v3851_v0  ;;  %v3100_v19 = vpop.f32.mrb[81].mxu1 }
 0x505   :  { %v1465_v13 = vmul.f32 %v3582_v58, %v4755_v60  ;;  %v4855_v21 = vpop.f32.mrb[82].mxu1 }
 0x506   :  { %v3584_v26 = vpop.eup %3583  ;;  %v3101_v12 = vpop.f32.mrb[83].mxu1 }
 0x507   :  { %v1394_v53 = vpop.xlane.xlu0 %1393  ;;  %v1466_v61 = vmul.f32 %v3584_v26, %v4758_v59  ;;  %v4857_v1 = vpop.f32.mrb[84].mxu1  ;;  %v3439_v12 = vld [vmem:[#allocation17 + $0x30] sm:$0xff]  }
 0x508   :  { %v1419_v62 = vmax.f32 %v1394_v53, 1e-24 }
 0x509   :  { %v1496_v63 = vpack.c.bf16 %v1466_v61, %v1465_v13 }
 0x50a   :  { %3589 = vrsqrt.f32 %v1419_v62  ;;  %v3433_v62 = vld [vmem:[#allocation17] sm:$0xff]  }
 0x50b   :  { %3203 = vmatmul.mubr.bf16.gmra.mrb[120].mxu0 %v1496_v63  ;;  %v3434_v63 = vld [vmem:[#allocation17 + $0x8] sm:$0xff]  }
 0x50c   :  { %v3586_v40 = vpop.eup %3585  ;;  %3206 = vmatprep.mubr.msk.bf16.mxu0 %vm3852_vm0, %v3851_v0  ;;  %3283 = vmatpush3.bf16.msra.mxu0 %v3433_v62 }
 0x50d   :  { %v1467_v38 = vmul.f32 %v3586_v40, %v4767_v44  ;;  %v3104_v44 = vpop.f32.mrb[85].mxu1  ;;  %3284 = vmatprep.subr.bf16.mxu0 %v3851_v0  ;;  %v3435_v40 = vld [vmem:[#allocation17 + $0x10] sm:$0xff]  }
 0x50e   :  { %v3588_v55 = vpop.eup %3587 }
 0x50f   :  { %v1468_v60 = vmul.f32 %v3588_v55, %v4770_v6  ;;  %v4861_v6 = vpop.f32.mrb[86].mxu1  ;;  %v3437_v55 = vld [vmem:[#allocation17 + $0x20] sm:$0xff]  }
 0x510   :  { %v3105_v24 = vpop.f32.mrb[87].mxu1  ;;  %3285 = vmatpush3.bf16.msra.mxu0 %v3434_v63 }
 0x511   :  { %v1497_v59 = vpack.c.bf16 %v1468_v60, %v1467_v38  ;;  %v4863_v50 = vpop.f32.mrb[88].mxu1  ;;  %3286 = vmatprep.subr.bf16.mxu0 %v3851_v0  ;;  %v3438_v38 = vld [vmem:[#allocation17 + $0x28] sm:$0xff]  }
 0x512   :  { %v3108_v15 = vpop.f32.mrb[89].mxu1  ;;  %v4910_v60 = vld [vmem:[%s5096_s10] sm:$0xff] }
 0x513   :  { %3207 = vmatmul.mubr.bf16.gmra.mrb[124].mxu0 %v1497_v59  ;;  %v4865_v23 = vpop.f32.mrb[90].mxu1  ;;  %v4913_v59 = vrot.slane %v4910_v60, %v1923_v36 }
 0x514   :  { %v3590_v16 = vpop.eup %3589  ;;  %3210 = vmatprep.mubr.msk.bf16.mxu0 %vm3852_vm0, %v3851_v0  ;;  %3287 = vmatpush3.bf16.msra.mxu0 %v3435_v40 }
 0x515   :  { %v1469_v7 = vmul.f32 %v3590_v16, %v4779_v42  ;;  %v3109_v42 = vpop.f32.mrb[91].mxu1  ;;  %3288 = vmatprep.subr.bf16.mxu0 %v3851_v0 }
 0x516   :  { %v4867_v47 = vpop.f32.mrb[92].mxu1 }
 0x517   :  { %v1498_v27 = vpack.c.bf16 %v1469_v7, %v1469_v7  ;;  %v3112_v4 = vpop.f32.mrb[93].mxu1 }
 0x518   :  { %v4869_v20 = vpop.f32.mrb[94].mxu1  ;;  %3289 = vmatpush3.bf16.msra.mxu0 %v3436_v9  ;;  %v3440_v4 = vld [vmem:[#allocation17 + $0x38] sm:$0xff]  }
 0x519   :  { %v3113_v48 = vpop.f32.mrb[95].mxu1  ;;  %3290 = vmatprep.subr.bf16.mxu0 %v3851_v0 }
 0x51a   :  { %v4871_v28 = vpop.f32.mrb[96].mxu1 }
 0x51b   :  { %3211 = vmatmul.mubr.bf16.gmra.mrb[128].mxu0 %v1498_v27  ;;  %v3116_v51 = vpop.f32.mrb[97].mxu1 }
 0x51c   :  { %3298 = vmatprep.mubr.msk.bf16.mxu0 %vm3852_vm0, %v3851_v0  ;;  %v4873_v31 = vpop.f32.mrb[98].mxu1  ;;  %3291 = vmatpush3.bf16.msra.mxu0 %v3437_v55 }
 0x51d   :  { %v3117_v35 = vpop.f32.mrb[99].mxu1  ;;  %3292 = vmatprep.subr.bf16.mxu0 %v3851_v0 }
 0x51e   :  { %v4875_v39 = vpop.f32.mrb[100].mxu1 }
 0x51f   :  { %v3120_v43 = vpop.f32.mrb[101].mxu1 }
 0x520   :  { %v4877_v10 = vpop.f32.mrb[102].mxu1  ;;  %3293 = vmatpush3.bf16.msra.mxu0 %v3438_v38 }
 0x521   :  { %v3121_v32 = vpop.f32.mrb[103].mxu1  ;;  %3294 = vmatprep.subr.bf16.mxu0 %v3851_v0 }
 0x523   :  { %v4879_v11 = vpop.f32.mrb[104].mxu1 }
 0x524   :  { %v3124_v37 = vpop.f32.mrb[105].mxu1  ;;  %3295 = vmatpush3.bf16.msra.mxu0 %v3439_v12 }
 0x525   :  { %v4881_v41 = vpop.f32.mrb[106].mxu1  ;;  %3296 = vmatprep.subr.bf16.mxu0 %v3851_v0 }
 0x526   :  { %v3125_v57 = vpop.f32.mrb[107].mxu1 }
 0x528   :  { %3297 = vmatpush3.bf16.msra.mxu0 %v3440_v4 }
 0x52c   :  { %v4883_v25 = vpop.f32.mrb[108].mxu1 }
 0x52d   :  { %v3128_v2 = vpop.f32.mrb[109].mxu1 }
 0x52e   :  { %v4885_v5 = vpop.f32.mrb[110].mxu1 }
 0x52f   :  { %v3129_v3 = vpop.f32.mrb[111].mxu1 }
 0x534   :  { %v4887_v34 = vpop.f32.mrb[112].mxu1 }
 0x535   :  { %v3132_v29 = vpop.f32.mrb[113].mxu1 }
 0x536   :  { %v4889_v30 = vpop.f32.mrb[114].mxu1 }
 0x537   :  { %v3133_v54 = vpop.f32.mrb[115].mxu1 }
 0x54c   :  { %v4891_v52 = vpop.f32.mrb[116].mxu1 }
 0x54d   :  { %v3136_v45 = vpop.f32.mrb[117].mxu1 }
 0x54e   :  { %v4893_v14 = vpop.f32.mrb[118].mxu1 }
 0x54f   :  { %v3137_v8 = vpop.f32.mrb[119].mxu1 }
 0x554   :  { %v4895_v46 = vpop.f32.mrb[120].mxu1 }
 0x555   :  { %v3140_v22 = vpop.f32.mrb[121].mxu1 }
 0x556   :  { %v4897_v33 = vpop.f32.mrb[122].mxu1 }
 0x557   :  { %v3141_v58 = vpop.f32.mrb[123].mxu1 }
 0x55c   :  { %v4899_v26 = vpop.f32.mrb[124].mxu1 }
 0x55d   :  { %v3144_v53 = vpop.f32.mrb[125].mxu1 }
 0x55e   :  { %v1734_v13 = vpop.f32.mrb[126].mxu1 }
 0x55f   :  { %v3145_v61 = vpop.f32.mrb[127].mxu1 }
 0x58e   :  { %v1819_v16 = vpop.f32.mrb[80].mxu0 }
 0x58f   :  { %v1820_v19 = vadd.f32 %v1819_v16, %v4842_v17  ;;  %v3164_v7 = vpop.f32.mrb[81].mxu0 }
 0x590   :  { %v1822_v27 = vpop.f32.mrb[82].mxu0 }
 0x591   :  { %v1925_v44 = vadd.f32 %v4913_v59, %v1820_v19  ;;  %v1823_v24 = vadd.f32 %v1822_v27, %v4846_v56  ;;  %v3165_v15 = vpop.f32.mrb[83].mxu0 }
 0x593   :  { %v1926_v42 = vadd.f32 %v4913_v59, %v1823_v24  ;;  %v1950_v48 = vmax.f32 %v1925_v44, 0.0 }
 0x595   :  { %v1951_v51 = vmax.f32 %v1926_v42, 0.0 }
 0x596   :  { %v1827_v17 = vpop.f32.mrb[84].mxu0 }
 0x597   :  { %v1991_v35 = vpack.c.bf16 %v1951_v51, %v1950_v48  ;;  %v1828_v43 = vadd.f32 %v1827_v17, %v4850_v18  ;;  %v3168_v32 = vpop.f32.mrb[85].mxu0 }
 0x598   :  { %v1830_v37 = vpop.f32.mrb[86].mxu0 }
 0x599   :  { %v1927_v57 = vadd.f32 %v4913_v59, %v1828_v43  ;;  %v1831_v56 = vadd.f32 %v1830_v37, %v4855_v21  ;;  %v3169_v2 = vpop.f32.mrb[87].mxu0  ;;  %3231 = vmatmul.mubr.bf16.vlgmr.msra.gmra.mrb[128].mxu1 %v1991_v35 }
 0x59a   :  { %3234 = vmatprep.mubr.msk.bf16.mxu1 %vm3852_vm0, %v3851_v0 }
 0x59b   :  { %v1928_v3 = vadd.f32 %v4913_v59, %v1831_v56  ;;  %v1952_v29 = vmax.f32 %v1927_v57, 0.0 }
 0x59d   :  { %v1953_v54 = vmax.f32 %v1928_v3, 0.0 }
 0x59e   :  { %v1835_v45 = vpop.f32.mrb[88].mxu0 }
 0x59f   :  { %v1836_v8 = vadd.f32 %v1835_v45, %v4857_v1  ;;  %v3172_v18 = vpop.f32.mrb[89].mxu0  ;;  %v1992_v22 = vpack.c.bf16 %v1953_v54, %v1952_v29 }
 0x5a0   :  { %v1838_v58 = vpop.f32.mrb[90].mxu0 }
 0x5a1   :  { %v1929_v53 = vadd.f32 %v4913_v59, %v1836_v8  ;;  %v1839_v13 = vadd.f32 %v1838_v58, %v4861_v6  ;;  %v3173_v21 = vpop.f32.mrb[91].mxu0  ;;  %3235 = vmatmul.mubr.bf16.gmra.mrb[132].mxu1 %v1992_v22 }
 0x5a2   :  { %3238 = vmatprep.mubr.msk.bf16.mxu1 %vm3852_vm0, %v3851_v0 }
 0x5a3   :  { %v1930_v61 = vadd.f32 %v4913_v59, %v1839_v13  ;;  %v1954_v62 = vmax.f32 %v1929_v53, 0.0 }
 0x5a5   :  { %v1955_v63 = vmax.f32 %v1930_v61, 0.0 }
 0x5a6   :  { %v1843_v40 = vpop.f32.mrb[92].mxu0 }
 0x5a7   :  { %v1844_v9 = vadd.f32 %v1843_v40, %v4863_v50  ;;  %v3176_v1 = vpop.f32.mrb[93].mxu0  ;;  %v1993_v55 = vpack.c.bf16 %v1955_v63, %v1954_v62 }
 0x5a8   :  { %v1846_v36 = vpop.f32.mrb[94].mxu0 }
 0x5a9   :  { %v1931_v38 = vadd.f32 %v4913_v59, %v1844_v9  ;;  %v1847_v16 = vadd.f32 %v1846_v36, %v4865_v23  ;;  %v3177_v6 = vpop.f32.mrb[95].mxu0  ;;  %3239 = vmatmul.mubr.bf16.gmra.mrb[136].mxu1 %v1993_v55 }
 0x5aa   :  { %3242 = vmatprep.mubr.msk.bf16.mxu1 %vm3852_vm0, %v3851_v0 }
 0x5ab   :  { %v1932_v19 = vadd.f32 %v4913_v59, %v1847_v16  ;;  %v1956_v7 = vmax.f32 %v1931_v38, 0.0 }
 0x5ad   :  { %v1957_v12 = vmax.f32 %v1932_v19, 0.0 }
 0x5ae   :  { %v1851_v27 = vpop.f32.mrb[96].mxu0 }
 0x5af   :  { %v1852_v44 = vadd.f32 %v1851_v27, %v4867_v47  ;;  %v3180_v50 = vpop.f32.mrb[97].mxu0  ;;  %v1994_v24 = vpack.c.bf16 %v1957_v12, %v1956_v7 }
 0x5b0   :  { %v1854_v15 = vpop.f32.mrb[98].mxu0 }
 0x5b1   :  { %v1933_v42 = vadd.f32 %v4913_v59, %v1852_v44  ;;  %v1855_v4 = vadd.f32 %v1854_v15, %v4869_v20  ;;  %v3181_v23 = vpop.f32.mrb[99].mxu0  ;;  %3243 = vmatmul.mubr.bf16.gmra.mrb[140].mxu1 %v1994_v24 }
 0x5b2   :  { %3246 = vmatprep.mubr.msk.bf16.mxu1 %vm3852_vm0, %v3851_v0 }
 0x5b3   :  { %v1934_v48 = vadd.f32 %v4913_v59, %v1855_v4  ;;  %v1958_v51 = vmax.f32 %v1933_v42, 0.0 }
 0x5b5   :  { %v1959_v17 = vmax.f32 %v1934_v48, 0.0 }
 0x5b6   :  { %v1859_v35 = vpop.f32.mrb[100].mxu0 }
 0x5b7   :  { %v1860_v43 = vadd.f32 %v1859_v35, %v4871_v28  ;;  %v3184_v47 = vpop.f32.mrb[101].mxu0  ;;  %v1995_v32 = vpack.c.bf16 %v1959_v17, %v1958_v51 }
 0x5b8   :  { %v1862_v37 = vpop.f32.mrb[102].mxu0 }
 0x5b9   :  { %v1935_v57 = vadd.f32 %v4913_v59, %v1860_v43  ;;  %v1863_v56 = vadd.f32 %v1862_v37, %v4873_v31  ;;  %v3185_v20 = vpop.f32.mrb[103].mxu0  ;;  %3247 = vmatmul.mubr.bf16.gmra.mrb[144].mxu1 %v1995_v32 }
 0x5ba   :  { %3250 = vmatprep.mubr.msk.bf16.mxu1 %vm3852_vm0, %v3851_v0 }
 0x5bb   :  { %v1936_v2 = vadd.f32 %v4913_v59, %v1863_v56  ;;  %v1960_v3 = vmax.f32 %v1935_v57, 0.0 }
 0x5bd   :  { %v1961_v29 = vmax.f32 %v1936_v2, 0.0 }
 0x5be   :  { %v1867_v54 = vpop.f32.mrb[104].mxu0 }
 0x5bf   :  { %v1868_v45 = vadd.f32 %v1867_v54, %v4875_v39  ;;  %v3188_v28 = vpop.f32.mrb[105].mxu0  ;;  %v1996_v8 = vpack.c.bf16 %v1961_v29, %v1960_v3 }
 0x5c0   :  { %v1870_v18 = vpop.f32.mrb[106].mxu0 }
 0x5c1   :  { %v1937_v22 = vadd.f32 %v4913_v59, %v1868_v45  ;;  %v1871_v58 = vadd.f32 %v1870_v18, %v4877_v10  ;;  %v3189_v31 = vpop.f32.mrb[107].mxu0  ;;  %3251 = vmatmul.mubr.bf16.gmra.mrb[148].mxu1 %v1996_v8 }
 0x5c2   :  { %3254 = vmatprep.mubr.msk.bf16.mxu1 %vm3852_vm0, %v3851_v0 }
 0x5c3   :  { %v1938_v53 = vadd.f32 %v4913_v59, %v1871_v58  ;;  %v1962_v13 = vmax.f32 %v1937_v22, 0.0 }
 0x5c5   :  { %v1963_v21 = vmax.f32 %v1938_v53, 0.0 }
 0x5c6   :  { %v1875_v61 = vpop.f32.mrb[108].mxu0 }
 0x5c7   :  { %v1876_v62 = vadd.f32 %v1875_v61, %v4879_v11  ;;  %v3192_v39 = vpop.f32.mrb[109].mxu0  ;;  %v1997_v63 = vpack.c.bf16 %v1963_v21, %v1962_v13 }
 0x5c8   :  { %v1878_v40 = vpop.f32.mrb[110].mxu0 }
 0x5c9   :  { %v1939_v9 = vadd.f32 %v4913_v59, %v1876_v62  ;;  %v1879_v1 = vadd.f32 %v1878_v40, %v4881_v41  ;;  %v3193_v10 = vpop.f32.mrb[111].mxu0  ;;  %3255 = vmatmul.mubr.bf16.gmra.mrb[152].mxu1 %v1997_v63 }
 0x5ca   :  { %3258 = vmatprep.mubr.msk.bf16.mxu1 %vm3852_vm0, %v3851_v0 }
 0x5cb   :  { %v1940_v55 = vadd.f32 %v4913_v59, %v1879_v1  ;;  %v1964_v36 = vmax.f32 %v1939_v9, 0.0  ;;  %v2006_v9 = vsub.s32 5, %v4158_v49 }
 0x5cd   :  { %v1965_v38 = vmax.f32 %v1940_v55, 0.0  ;;  %v4993_v1 = vrot.slane %v4910_v60, %v2006_v9 }
 0x5ce   :  { %v1883_v16 = vpop.f32.mrb[112].mxu0 }
 0x5cf   :  { %v1884_v6 = vadd.f32 %v1883_v16, %v4883_v25  ;;  %v3196_v11 = vpop.f32.mrb[113].mxu0  ;;  %v1998_v19 = vpack.c.bf16 %v1965_v38, %v1964_v36 }
 0x5d0   :  { %v1886_v7 = vpop.f32.mrb[114].mxu0 }
 0x5d1   :  { %v1941_v12 = vadd.f32 %v4913_v59, %v1884_v6  ;;  %v1887_v27 = vadd.f32 %v1886_v7, %v4885_v5  ;;  %v3197_v41 = vpop.f32.mrb[115].mxu0  ;;  %3259 = vmatmul.mubr.bf16.gmra.mrb[156].mxu1 %v1998_v19 }
 0x5d2   :  { %3262 = vmatprep.mubr.msk.bf16.mxu1 %vm3852_vm0, %v3851_v0 }
 0x5d3   :  { %v1942_v44 = vadd.f32 %v4913_v59, %v1887_v27  ;;  %v1966_v50 = vmax.f32 %v1941_v12, 0.0 }
 0x5d5   :  { %v1967_v24 = vmax.f32 %v1942_v44, 0.0 }
 0x5d6   :  { %v1891_v15 = vpop.f32.mrb[116].mxu0 }
 0x5d7   :  { %v1892_v42 = vadd.f32 %v1891_v15, %v4887_v34  ;;  %v3200_v25 = vpop.f32.mrb[117].mxu0  ;;  %v1999_v4 = vpack.c.bf16 %v1967_v24, %v1966_v50 }
 0x5d8   :  { %v1894_v23 = vpop.f32.mrb[118].mxu0 }
 0x5d9   :  { %v1943_v48 = vadd.f32 %v4913_v59, %v1892_v42  ;;  %v1895_v51 = vadd.f32 %v1894_v23, %v4889_v30  ;;  %v3201_v5 = vpop.f32.mrb[119].mxu0  ;;  %3263 = vmatmul.mubr.bf16.gmra.mrb[160].mxu1 %v1999_v4 }
 0x5da   :  { %3266 = vmatprep.mubr.msk.bf16.mxu1 %vm3852_vm0, %v3851_v0 }
 0x5db   :  { %v1944_v17 = vadd.f32 %v4913_v59, %v1895_v51  ;;  %v1968_v35 = vmax.f32 %v1943_v48, 0.0 }
 0x5dd   :  { %v1969_v43 = vmax.f32 %v1944_v17, 0.0 }
 0x5de   :  { %v1899_v47 = vpop.f32.mrb[120].mxu0 }
 0x5df   :  { %v1900_v32 = vadd.f32 %v1899_v47, %v4891_v52  ;;  %v3204_v34 = vpop.f32.mrb[121].mxu0  ;;  %v2000_v37 = vpack.c.bf16 %v1969_v43, %v1968_v35 }
 0x5e0   :  { %v1902_v57 = vpop.f32.mrb[122].mxu0 }
 0x5e1   :  { %v1945_v56 = vadd.f32 %v4913_v59, %v1900_v32  ;;  %v1903_v20 = vadd.f32 %v1902_v57, %v4893_v14  ;;  %v3205_v30 = vpop.f32.mrb[123].mxu0  ;;  %3267 = vmatmul.mubr.bf16.gmra.mrb[164].mxu1 %v2000_v37 }
 0x5e2   :  { %3270 = vmatprep.mubr.msk.bf16.mxu1 %vm3852_vm0, %v3851_v0 }
 0x5e3   :  { %v1946_v2 = vadd.f32 %v4913_v59, %v1903_v20  ;;  %v1970_v3 = vmax.f32 %v1945_v56, 0.0 }
 0x5e5   :  { %v1971_v29 = vmax.f32 %v1946_v2, 0.0 }
 0x5e6   :  { %v1907_v54 = vpop.f32.mrb[124].mxu0 }
 0x5e7   :  { %v1908_v45 = vadd.f32 %v1907_v54, %v4895_v46  ;;  %v3208_v52 = vpop.f32.mrb[125].mxu0  ;;  %v2001_v28 = vpack.c.bf16 %v1971_v29, %v1970_v3 }
 0x5e8   :  { %v1910_v8 = vpop.f32.mrb[126].mxu0 }
 0x5e9   :  { %v1947_v18 = vadd.f32 %v4913_v59, %v1908_v45  ;;  %v1911_v22 = vadd.f32 %v1910_v8, %v4897_v33  ;;  %v3209_v14 = vpop.f32.mrb[127].mxu0  ;;  %3271 = vmatmul.mubr.bf16.gmra.mrb[168].mxu1 %v2001_v28 }
 0x5ea   :  { %3274 = vmatprep.mubr.msk.bf16.mxu1 %vm3852_vm0, %v3851_v0 }
 0x5eb   :  { %v1948_v58 = vadd.f32 %v4913_v59, %v1911_v22  ;;  %v1972_v31 = vmax.f32 %v1947_v18, 0.0 }
 0x5ed   :  { %v1973_v53 = vmax.f32 %v1948_v58, 0.0 }
 0x5ee   :  { %v1915_v13 = vpop.f32.mrb[128].mxu0 }
 0x5ef   :  { %v1916_v21 = vadd.f32 %v1915_v13, %v4899_v26  ;;  %v3212_v46 = vpop.f32.mrb[129].mxu0  ;;  %v2002_v61 = vpack.c.bf16 %v1973_v53, %v1972_v31 }
 0x5f0   :  { %v1918_v62 = vpop.f32.mrb[130].mxu0 }
 0x5f1   :  { %v1949_v39 = vadd.f32 %v4913_v59, %v1916_v21  ;;  %v3213_v63 = vpop.f32.mrb[131].mxu0  ;;  %3275 = vmatmul.mubr.bf16.gmra.mrb[172].mxu1 %v2002_v61 }
 0x5f2   :  { %3278 = vmatprep.mubr.msk.bf16.mxu1 %vm3852_vm0, %v3851_v0 }
 0x5f3   :  { %v1974_v33 = vmax.f32 %v1949_v39, 0.0 }
 0x5f5   :  { %v2003_v40 = vpack.c.bf16 %v1974_v33, %v1974_v33 }
 0x5f9   :  { %3279 = vmatmul.mubr.bf16.gmra.mrb[176].mxu1 %v2003_v40 }
 0x66c   :  { %v2090_v10 = vpop.f32.mrb[128].mxu1 }
 0x66d   :  { %v2091_v26 = vadd.f32 %v2090_v10, %v4993_v1  ;;  %v3232_v55 = vpop.f32.mrb[129].mxu1 }
 0x66e   :  { %v2093_v36 = vpop.f32.mrb[130].mxu1 }
 0x66f   :  { %v2094_v59 = vadd.f32 %v2093_v36, %v4993_v1  ;;  %v3233_v38 = vpop.f32.mrb[131].mxu1  ;;  %v2192_v16 = vmax.f32 %v2091_v26, 0.0 }
 0x671   :  { %v2193_v6 = vmax.f32 %v2094_v59, 0.0 }
 0x673   :  { %v2233_v11 = vpack.c.bf16 %v2193_v6, %v2192_v16 }
 0x674   :  { %v2098_v19 = vpop.f32.mrb[132].mxu1 }
 0x675   :  { %v2099_v7 = vadd.f32 %v2098_v19, %v4993_v1  ;;  %v3236_v12 = vpop.f32.mrb[133].mxu1  ;;  %3299 = vmatmul.mubr.bf16.vlgmr.msra.gmra.mrb[132].mxu0 %v2233_v11 }
 0x676   :  { %v2101_v49 = vpop.f32.mrb[134].mxu1  ;;  %3302 = vmatprep.mubr.msk.bf16.mxu0 %vm3852_vm0, %v3851_v0 }
 0x677   :  { %v2102_v60 = vadd.f32 %v2101_v49, %v4993_v1  ;;  %v3237_v27 = vpop.f32.mrb[135].mxu1  ;;  %v2194_v41 = vmax.f32 %v2099_v7, 0.0 }
 0x679   :  { %v2195_v44 = vmax.f32 %v2102_v60, 0.0 }
 0x67b   :  { %v2234_v50 = vpack.c.bf16 %v2195_v44, %v2194_v41 }
 0x67c   :  { %v2106_v24 = vpop.f32.mrb[136].mxu1 }
 0x67d   :  { %v2107_v15 = vadd.f32 %v2106_v24, %v4993_v1  ;;  %v3240_v42 = vpop.f32.mrb[137].mxu1  ;;  %3303 = vmatmul.mubr.bf16.gmra.mrb[136].mxu0 %v2234_v50 }
 0x67e   :  { %v2109_v25 = vpop.f32.mrb[138].mxu1  ;;  %3306 = vmatprep.mubr.msk.bf16.mxu0 %vm3852_vm0, %v3851_v0 }
 0x67f   :  { %v2110_v4 = vadd.f32 %v2109_v25, %v4993_v1  ;;  %v3241_v23 = vpop.f32.mrb[139].mxu1  ;;  %v2196_v48 = vmax.f32 %v2107_v15, 0.0 }
 0x681   :  { %v2197_v51 = vmax.f32 %v2110_v4, 0.0 }
 0x683   :  { %v2235_v5 = vpack.c.bf16 %v2197_v51, %v2196_v48 }
 0x684   :  { %v2114_v17 = vpop.f32.mrb[140].mxu1 }
 0x685   :  { %v2115_v35 = vadd.f32 %v2114_v17, %v4993_v1  ;;  %v3244_v43 = vpop.f32.mrb[141].mxu1  ;;  %3307 = vmatmul.mubr.bf16.gmra.mrb[140].mxu0 %v2235_v5 }
 0x686   :  { %v2117_v47 = vpop.f32.mrb[142].mxu1  ;;  %3310 = vmatprep.mubr.msk.bf16.mxu0 %vm3852_vm0, %v3851_v0 }
 0x687   :  { %v2118_v32 = vadd.f32 %v2117_v47, %v4993_v1  ;;  %v3245_v34 = vpop.f32.mrb[143].mxu1  ;;  %v2198_v37 = vmax.f32 %v2115_v35, 0.0 }
 0x689   :  { %v2199_v57 = vmax.f32 %v2118_v32, 0.0 }
 0x68b   :  { %v2236_v56 = vpack.c.bf16 %v2199_v57, %v2198_v37 }
 0x68c   :  { %v2122_v20 = vpop.f32.mrb[144].mxu1 }
 0x68d   :  { %v2123_v30 = vadd.f32 %v2122_v20, %v4993_v1  ;;  %v3248_v2 = vpop.f32.mrb[145].mxu1  ;;  %3311 = vmatmul.mubr.bf16.gmra.mrb[144].mxu0 %v2236_v56 }
 0x68e   :  { %v2125_v3 = vpop.f32.mrb[146].mxu1  ;;  %3314 = vmatprep.mubr.msk.bf16.mxu0 %vm3852_vm0, %v3851_v0 }
 0x68f   :  { %v2126_v29 = vadd.f32 %v2125_v3, %v4993_v1  ;;  %v3249_v54 = vpop.f32.mrb[147].mxu1  ;;  %v2200_v45 = vmax.f32 %v2123_v30, 0.0 }
 0x691   :  { %v2201_v52 = vmax.f32 %v2126_v29, 0.0 }
 0x693   :  { %v2237_v28 = vpack.c.bf16 %v2201_v52, %v2200_v45 }
 0x694   :  { %v2130_v8 = vpop.f32.mrb[148].mxu1 }
 0x695   :  { %v2131_v18 = vadd.f32 %v2130_v8, %v4993_v1  ;;  %v3252_v22 = vpop.f32.mrb[149].mxu1  ;;  %3315 = vmatmul.mubr.bf16.gmra.mrb[148].mxu0 %v2237_v28 }
 0x696   :  { %v2133_v14 = vpop.f32.mrb[150].mxu1  ;;  %3318 = vmatprep.mubr.msk.bf16.mxu0 %vm3852_vm0, %v3851_v0 }
 0x697   :  { %v2134_v58 = vadd.f32 %v2133_v14, %v4993_v1  ;;  %v3253_v31 = vpop.f32.mrb[151].mxu1  ;;  %v2202_v53 = vmax.f32 %v2131_v18, 0.0 }
 0x699   :  { %v2203_v13 = vmax.f32 %v2134_v58, 0.0 }
 0x69b   :  { %v2238_v21 = vpack.c.bf16 %v2203_v13, %v2202_v53 }
 0x69c   :  { %v2138_v46 = vpop.f32.mrb[152].mxu1 }
 0x69d   :  { %v2139_v61 = vadd.f32 %v2138_v46, %v4993_v1  ;;  %v3256_v62 = vpop.f32.mrb[153].mxu1  ;;  %3319 = vmatmul.mubr.bf16.gmra.mrb[152].mxu0 %v2238_v21  ;;  %v5047_v21 = vld [vmem:[%s5098_s12] ss:$0 sm:$0xff] }
 0x69e   :  { %v2141_v39 = vpop.f32.mrb[154].mxu1  ;;  %3322 = vmatprep.mubr.msk.bf16.mxu0 %vm3852_vm0, %v3851_v0 }
 0x69f   :  { %v2142_v63 = vadd.f32 %v2141_v39, %v4993_v1  ;;  %v3257_v33 = vpop.f32.mrb[155].mxu1  ;;  %v2204_v40 = vmax.f32 %v2139_v61, 0.0  ;;  %v2437_v61 = vld [vmem:[#allocation7] sm:$0xff] }
 0x6a1   :  { %v2205_v9 = vmax.f32 %v2142_v63, 0.0  ;;  %v2438_v63 = vld [vmem:[#allocation7 + $0x8] sm:$0xff] }
 0x6a3   :  { %v2239_v10 = vpack.c.bf16 %v2205_v9, %v2204_v40 }
 0x6a4   :  { %v2146_v26 = vpop.f32.mrb[156].mxu1 }
 0x6a5   :  { %v2147_v55 = vadd.f32 %v2146_v26, %v4993_v1  ;;  %v3260_v36 = vpop.f32.mrb[157].mxu1  ;;  %3323 = vmatmul.mubr.bf16.gmra.mrb[156].mxu0 %v2239_v10 }
 0x6a6   :  { %v2149_v59 = vpop.f32.mrb[158].mxu1  ;;  %3326 = vmatprep.mubr.msk.bf16.mxu0 %vm3852_vm0, %v3851_v0  ;;  %v2439_v36 = vld [vmem:[#allocation7 + $0x10] sm:$0xff] }
 0x6a7   :  { %v2150_v38 = vadd.f32 %v2149_v59, %v4993_v1  ;;  %v3261_v16 = vpop.f32.mrb[159].mxu1  ;;  %v2206_v6 = vmax.f32 %v2147_v55, 0.0 }
 0x6a9   :  { %v2207_v11 = vmax.f32 %v2150_v38, 0.0 }
 0x6ab   :  { %v2240_v19 = vpack.c.bf16 %v2207_v11, %v2206_v6  ;;  %v2440_v11 = vld [vmem:[#allocation7 + $0x18] sm:$0xff] }
 0x6ac   :  { %v2154_v7 = vpop.f32.mrb[160].mxu1 }
 0x6ad   :  { %v2155_v12 = vadd.f32 %v2154_v7, %v4993_v1  ;;  %v3264_v49 = vpop.f32.mrb[161].mxu1  ;;  %3327 = vmatmul.mubr.bf16.gmra.mrb[160].mxu0 %v2240_v19 }
 0x6ae   :  { %v2157_v60 = vpop.f32.mrb[162].mxu1  ;;  %3330 = vmatprep.mubr.msk.bf16.mxu0 %vm3852_vm0, %v3851_v0 }
 0x6af   :  { %v2158_v27 = vadd.f32 %v2157_v60, %v4993_v1  ;;  %v3265_v41 = vpop.f32.mrb[163].mxu1  ;;  %v2208_v44 = vmax.f32 %v2155_v12, 0.0 }
 0x6b1   :  { %v2209_v50 = vmax.f32 %v2158_v27, 0.0 }
 0x6b3   :  { %v2241_v24 = vpack.c.bf16 %v2209_v50, %v2208_v44  ;;  %v2441_v50 = vld [vmem:[#allocation7 + $0x20] sm:$0xff] }
 0x6b4   :  { %v2162_v15 = vpop.f32.mrb[164].mxu1 }
 0x6b5   :  { %v2163_v42 = vadd.f32 %v2162_v15, %v4993_v1  ;;  %v3268_v25 = vpop.f32.mrb[165].mxu1  ;;  %3331 = vmatmul.mubr.bf16.gmra.mrb[164].mxu0 %v2241_v24 }
 0x6b6   :  { %v2165_v4 = vpop.f32.mrb[166].mxu1  ;;  %3334 = vmatprep.mubr.msk.bf16.mxu0 %vm3852_vm0, %v3851_v0 }
 0x6b7   :  { %v2166_v23 = vadd.f32 %v2165_v4, %v4993_v1  ;;  %v3269_v48 = vpop.f32.mrb[167].mxu1  ;;  %v2210_v51 = vmax.f32 %v2163_v42, 0.0  ;;  %v2442_v4 = vld [vmem:[#allocation7 + $0x28] sm:$0xff] }
 0x6b9   :  { %v2211_v5 = vmax.f32 %v2166_v23, 0.0 }
 0x6bb   :  { %v2242_v17 = vpack.c.bf16 %v2211_v5, %v2210_v51 }
 0x6bc   :  { %v2170_v35 = vpop.f32.mrb[168].mxu1 }
 0x6bd   :  { %v2171_v43 = vadd.f32 %v2170_v35, %v4993_v1  ;;  %v3272_v47 = vpop.f32.mrb[169].mxu1  ;;  %3335 = vmatmul.mubr.bf16.gmra.mrb[168].mxu0 %v2242_v17 }
 0x6be   :  { %v2173_v32 = vpop.f32.mrb[170].mxu1  ;;  %3338 = vmatprep.mubr.msk.bf16.mxu0 %vm3852_vm0, %v3851_v0 }
 0x6bf   :  { %v2174_v34 = vadd.f32 %v2173_v32, %v4993_v1  ;;  %v3273_v37 = vpop.f32.mrb[171].mxu1  ;;  %v2212_v57 = vmax.f32 %v2171_v43, 0.0  ;;  %v2443_v32 = vld [vmem:[#allocation7 + $0x30] sm:$0xff] }
 0x6c1   :  { %v2213_v56 = vmax.f32 %v2174_v34, 0.0 }
 0x6c3   :  { %v2243_v20 = vpack.c.bf16 %v2213_v56, %v2212_v57 }
 0x6c4   :  { %v2178_v30 = vpop.f32.mrb[172].mxu1 }
 0x6c5   :  { %v2179_v2 = vadd.f32 %v2178_v30, %v4993_v1  ;;  %v3276_v3 = vpop.f32.mrb[173].mxu1  ;;  %3339 = vmatmul.mubr.bf16.gmra.mrb[172].mxu0 %v2243_v20  ;;  %v2444_v20 = vld [vmem:[#allocation7 + $0x38] sm:$0xff] }
 0x6c6   :  { %v2181_v29 = vpop.f32.mrb[174].mxu1  ;;  %3342 = vmatprep.mubr.msk.bf16.mxu0 %vm3852_vm0, %v3851_v0 }
 0x6c7   :  { %v2182_v54 = vadd.f32 %v2181_v29, %v4993_v1  ;;  %v3277_v45 = vpop.f32.mrb[175].mxu1  ;;  %v2214_v52 = vmax.f32 %v2179_v2, 0.0 }
 0x6c9   :  { %v2215_v28 = vmax.f32 %v2182_v54, 0.0 }
 0x6cb   :  { %v2244_v8 = vpack.c.bf16 %v2215_v28, %v2214_v52 }
 0x6cc   :  { %v2186_v18 = vpop.f32.mrb[176].mxu1 }
 0x6cd   :  { %v2187_v22 = vadd.f32 %v2186_v18, %v4993_v1  ;;  %v3280_v14 = vpop.f32.mrb[177].mxu1  ;;  %3343 = vmatmul.mubr.bf16.gmra.mrb[176].mxu0 %v2244_v8  ;;  %v2445_v8 = vld [vmem:[#allocation7 + $0x40] sm:$0xff] }
 0x6ce   :  { %v2189_v58 = vpop.f32.mrb[178].mxu1  ;;  %3346 = vmatprep.mubr.msk.bf16.mxu0 %vm3852_vm0, %v3851_v0 }
 0x6cf   :  { %v2216_v31 = vmax.f32 %v2187_v22, 0.0  ;;  %v3281_v53 = vpop.f32.mrb[179].mxu1 }
 0x6d1   :  { %v2245_v13 = vpack.c.bf16 %v2216_v31, %v2216_v31  ;;  %v2446_v31 = vld [vmem:[#allocation7 + $0x48] sm:$0xff] }
 0x6d5   :  { %3347 = vmatmul.mubr.bf16.gmra.mrb[180].mxu0 %v2245_v13 }
 0x748   :  { %v2335_v46 = vpop.f32.mrb[132].mxu0 }
 0x749   :  { %v2336_v62 = vadd.f32 %v5047_v21, %v2335_v46  ;;  %v3300_v1 = vpop.f32.mrb[133].mxu0 }
 0x74a   :  { %v2338_v39 = vpop.f32.mrb[134].mxu0 }
 0x74b   :  { %v2462_v33 = vsub.f32 %v2336_v62, %v2437_v61  ;;  %v2339_v40 = vadd.f32 %v5047_v21, %v2338_v39  ;;  %v3301_v0 = vpop.f32.mrb[135].mxu0 }
 0x74d   :  { %v2463_v9 = vsub.f32 %v2339_v40, %v2438_v63  ;;  %v2487_v10 = vmul.f32 %v2462_v33, %v2462_v33  ;;  %v2447_v33 = vld [vmem:[#allocation7 + $0x50] sm:$0xff] }
 0x74f   :  { %v2488_v26 = vmul.f32 %v2463_v9, %v2463_v9 }
 0x750   :  { %v2343_v55 = vpop.f32.mrb[136].mxu0 }
 0x751   :  { %v2615_v59 = vadd.f32 %v2488_v26, %v2487_v10  ;;  %v2344_v38 = vadd.f32 %v5047_v21, %v2343_v55  ;;  %v3304_v16 = vpop.f32.mrb[137].mxu0  ;;  %v2448_v26 = vld [vmem:[#allocation7 + $0x58] sm:$0xff] }
 0x752   :  { %v2346_v6 = vpop.f32.mrb[138].mxu0 }
 0x753   :  { %v2464_v19 = vsub.f32 %v2344_v38, %v2439_v36  ;;  %v2347_v7 = vadd.f32 %v5047_v21, %v2346_v6  ;;  %v3305_v12 = vpop.f32.mrb[139].mxu0 }
 0x755   :  { %v2489_v49 = vmul.f32 %v2464_v19, %v2464_v19  ;;  %v2465_v60 = vsub.f32 %v2347_v7, %v2440_v11  ;;  %v2449_v7 = vld [vmem:[#allocation7 + $0x60] sm:$0xff] }
 0x757   :  { %v2616_v27 = vadd.f32 %v2615_v59, %v2489_v49  ;;  %v2490_v41 = vmul.f32 %v2465_v60, %v2465_v60 }
 0x758   :  { %v2351_v44 = vpop.f32.mrb[140].mxu0 }
 0x759   :  { %v2617_v24 = vadd.f32 %v2616_v27, %v2490_v41  ;;  %v2352_v15 = vadd.f32 %v5047_v21, %v2351_v44  ;;  %v3308_v42 = vpop.f32.mrb[141].mxu0  ;;  %v2450_v41 = vld [vmem:[#allocation7 + $0x68] sm:$0xff] }
 0x75a   :  { %v2354_v25 = vpop.f32.mrb[142].mxu0 }
 0x75b   :  { %v2466_v23 = vsub.f32 %v2352_v15, %v2441_v50  ;;  %v2355_v48 = vadd.f32 %v5047_v21, %v2354_v25  ;;  %v3309_v51 = vpop.f32.mrb[143].mxu0 }
 0x75d   :  { %v2491_v5 = vmul.f32 %v2466_v23, %v2466_v23  ;;  %v2467_v17 = vsub.f32 %v2355_v48, %v2442_v4  ;;  %v2451_v48 = vld [vmem:[#allocation7 + $0x70] sm:$0xff] }
 0x75f   :  { %v2618_v35 = vadd.f32 %v2617_v24, %v2491_v5  ;;  %v2492_v43 = vmul.f32 %v2467_v17, %v2467_v17 }
 0x760   :  { %v2359_v47 = vpop.f32.mrb[144].mxu0 }
 0x761   :  { %v2619_v34 = vadd.f32 %v2618_v35, %v2492_v43  ;;  %v2360_v37 = vadd.f32 %v5047_v21, %v2359_v47  ;;  %v3312_v57 = vpop.f32.mrb[145].mxu0  ;;  %v2452_v43 = vld [vmem:[#allocation7 + $0x78] sm:$0xff] }
 0x762   :  { %v2362_v56 = vpop.f32.mrb[146].mxu0 }
 0x763   :  { %v2468_v30 = vsub.f32 %v2360_v37, %v2443_v32  ;;  %v2363_v2 = vadd.f32 %v5047_v21, %v2362_v56  ;;  %v3313_v3 = vpop.f32.mrb[147].mxu0 }
 0x765   :  { %v2493_v29 = vmul.f32 %v2468_v30, %v2468_v30  ;;  %v2469_v54 = vsub.f32 %v2363_v2, %v2444_v20  ;;  %v2453_v2 = vld [vmem:[#allocation7 + $0x80] sm:$0xff] }
 0x767   :  { %v2620_v45 = vadd.f32 %v2619_v34, %v2493_v29  ;;  %v2494_v52 = vmul.f32 %v2469_v54, %v2469_v54 }
 0x768   :  { %v2367_v28 = vpop.f32.mrb[148].mxu0 }
 0x769   :  { %v2621_v18 = vadd.f32 %v2620_v45, %v2494_v52  ;;  %v2368_v22 = vadd.f32 %v5047_v21, %v2367_v28  ;;  %v3316_v14 = vpop.f32.mrb[149].mxu0  ;;  %v2454_v52 = vld [vmem:[#allocation7 + $0x88] sm:$0xff] }
 0x76a   :  { %v2370_v58 = vpop.f32.mrb[150].mxu0 }
 0x76b   :  { %v2470_v53 = vsub.f32 %v2368_v22, %v2445_v8  ;;  %v2371_v13 = vadd.f32 %v5047_v21, %v2370_v58  ;;  %v3317_v46 = vpop.f32.mrb[151].mxu0 }
 0x76d   :  { %v2495_v61 = vmul.f32 %v2470_v53, %v2470_v53  ;;  %v2471_v62 = vsub.f32 %v2371_v13, %v2446_v31  ;;  %v2455_v13 = vld [vmem:[#allocation7 + $0x90] sm:$0xff] }
 0x76f   :  { %v2622_v1 = vadd.f32 %v2621_v18, %v2495_v61  ;;  %v2496_v39 = vmul.f32 %v2471_v62, %v2471_v62 }
 0x770   :  { %v2375_v63 = vpop.f32.mrb[152].mxu0 }
 0x771   :  { %v2623_v40 = vadd.f32 %v2622_v1, %v2496_v39  ;;  %v2376_v0 = vadd.f32 %v5047_v21, %v2375_v63  ;;  %v3320_v9 = vpop.f32.mrb[153].mxu0  ;;  %v2456_v39 = vld [vmem:[#allocation7 + $0x98] sm:$0xff] }
 0x772   :  { %v2378_v10 = vpop.f32.mrb[154].mxu0 }
 0x773   :  { %v2472_v55 = vsub.f32 %v2376_v0, %v2447_v33  ;;  %v2379_v36 = vadd.f32 %v5047_v21, %v2378_v10  ;;  %v3321_v59 = vpop.f32.mrb[155].mxu0 }
 0x775   :  { %v2497_v38 = vmul.f32 %v2472_v55, %v2472_v55  ;;  %v2473_v16 = vsub.f32 %v2379_v36, %v2448_v26  ;;  %v2457_v36 = vld [vmem:[#allocation7 + $0xa0] sm:$0xff] }
 0x777   :  { %v2624_v6 = vadd.f32 %v2623_v40, %v2497_v38  ;;  %v2498_v11 = vmul.f32 %v2473_v16, %v2473_v16 }
 0x778   :  { %v2383_v19 = vpop.f32.mrb[156].mxu0 }
 0x779   :  { %v2625_v12 = vadd.f32 %v2624_v6, %v2498_v11  ;;  %v2384_v49 = vadd.f32 %v5047_v21, %v2383_v19  ;;  %v3324_v60 = vpop.f32.mrb[157].mxu0  ;;  %v2458_v11 = vld [vmem:[#allocation7 + $0xa8] sm:$0xff] }
 0x77a   :  { %v2386_v27 = vpop.f32.mrb[158].mxu0 }
 0x77b   :  { %v2474_v44 = vsub.f32 %v2384_v49, %v2449_v7  ;;  %v2387_v50 = vadd.f32 %v5047_v21, %v2386_v27  ;;  %v3325_v24 = vpop.f32.mrb[159].mxu0 }
 0x77d   :  { %v2499_v15 = vmul.f32 %v2474_v44, %v2474_v44  ;;  %v2475_v42 = vsub.f32 %v2387_v50, %v2450_v41  ;;  %v2459_v50 = vld [vmem:[#allocation7 + $0xb0] sm:$0xff] }
 0x77f   :  { %v2626_v25 = vadd.f32 %v2625_v12, %v2499_v15  ;;  %v2500_v4 = vmul.f32 %v2475_v42, %v2475_v42 }
 0x780   :  { %v2391_v23 = vpop.f32.mrb[160].mxu0 }
 0x781   :  { %v2627_v51 = vadd.f32 %v2626_v25, %v2500_v4  ;;  %v2392_v5 = vadd.f32 %v5047_v21, %v2391_v23  ;;  %v3328_v17 = vpop.f32.mrb[161].mxu0  ;;  %v2460_v4 = vld [vmem:[#allocation7 + $0xb8] sm:$0xff] }
 0x782   :  { %v2394_v35 = vpop.f32.mrb[162].mxu0 }
 0x783   :  { %v2476_v47 = vsub.f32 %v2392_v5, %v2451_v48  ;;  %v2395_v32 = vadd.f32 %v5047_v21, %v2394_v35  ;;  %v3329_v34 = vpop.f32.mrb[163].mxu0 }
 0x785   :  { %v2501_v37 = vmul.f32 %v2476_v47, %v2476_v47  ;;  %v2477_v57 = vsub.f32 %v2395_v32, %v2452_v43  ;;  %v2461_v32 = vld [vmem:[#allocation7 + $0xc0] sm:$0xff] }
 0x787   :  { %v2628_v56 = vadd.f32 %v2627_v51, %v2501_v37  ;;  %v2502_v20 = vmul.f32 %v2477_v57, %v2477_v57 }
 0x788   :  { %v2399_v30 = vpop.f32.mrb[164].mxu0 }
 0x789   :  { %v2629_v3 = vadd.f32 %v2628_v56, %v2502_v20  ;;  %v2400_v29 = vadd.f32 %v5047_v21, %v2399_v30  ;;  %v3332_v54 = vpop.f32.mrb[165].mxu0 }
 0x78a   :  { %v2402_v45 = vpop.f32.mrb[166].mxu0 }
 0x78b   :  { %v2478_v28 = vsub.f32 %v2400_v29, %v2453_v2  ;;  %v2403_v8 = vadd.f32 %v5047_v21, %v2402_v45  ;;  %v3333_v18 = vpop.f32.mrb[167].mxu0 }
 0x78d   :  { %v2503_v22 = vmul.f32 %v2478_v28, %v2478_v28  ;;  %v2479_v14 = vsub.f32 %v2403_v8, %v2454_v52 }
 0x78f   :  { %v2630_v58 = vadd.f32 %v2629_v3, %v2503_v22  ;;  %v2504_v31 = vmul.f32 %v2479_v14, %v2479_v14 }
 0x790   :  { %v2407_v53 = vpop.f32.mrb[168].mxu0 }
 0x791   :  { %v2631_v46 = vadd.f32 %v2630_v58, %v2504_v31  ;;  %v2408_v61 = vadd.f32 %v5047_v21, %v2407_v53  ;;  %v3336_v62 = vpop.f32.mrb[169].mxu0 }
 0x792   :  { %v2410_v1 = vpop.f32.mrb[170].mxu0 }
 0x793   :  { %v2480_v63 = vsub.f32 %v2408_v61, %v2455_v13  ;;  %v2411_v33 = vadd.f32 %v5047_v21, %v2410_v1  ;;  %v3337_v40 = vpop.f32.mrb[171].mxu0 }
 0x795   :  { %v2505_v0 = vmul.f32 %v2480_v63, %v2480_v63  ;;  %v2481_v9 = vsub.f32 %v2411_v33, %v2456_v39 }
 0x797   :  { %v2632_v10 = vadd.f32 %v2631_v46, %v2505_v0  ;;  %v2506_v26 = vmul.f32 %v2481_v9, %v2481_v9 }
 0x798   :  { %v2415_v55 = vpop.f32.mrb[172].mxu0 }
 0x799   :  { %v2633_v59 = vadd.f32 %v2632_v10, %v2506_v26  ;;  %v2416_v38 = vadd.f32 %v5047_v21, %v2415_v55  ;;  %v3340_v16 = vpop.f32.mrb[173].mxu0 }
 0x79a   :  { %v2418_v6 = vpop.f32.mrb[174].mxu0 }
 0x79b   :  { %v2482_v19 = vsub.f32 %v2416_v38, %v2457_v36  ;;  %v2419_v7 = vadd.f32 %v5047_v21, %v2418_v6  ;;  %v3341_v12 = vpop.f32.mrb[175].mxu0 }
 0x79d   :  { %v2507_v49 = vmul.f32 %v2482_v19, %v2482_v19  ;;  %v2483_v60 = vsub.f32 %v2419_v7, %v2458_v11 }
 0x79f   :  { %v2634_v27 = vadd.f32 %v2633_v59, %v2507_v49  ;;  %v2508_v41 = vmul.f32 %v2483_v60, %v2483_v60 }
 0x7a0   :  { %v2423_v44 = vpop.f32.mrb[176].mxu0 }
 0x7a1   :  { %v2635_v24 = vadd.f32 %v2634_v27, %v2508_v41  ;;  %v2424_v15 = vadd.f32 %v5047_v21, %v2423_v44  ;;  %v3344_v42 = vpop.f32.mrb[177].mxu0 }
 0x7a2   :  { %v2426_v25 = vpop.f32.mrb[178].mxu0 }
 0x7a3   :  { %v2484_v23 = vsub.f32 %v2424_v15, %v2459_v50  ;;  %v2427_v48 = vadd.f32 %v5047_v21, %v2426_v25  ;;  %v3345_v51 = vpop.f32.mrb[179].mxu0 }
 0x7a5   :  { %v2509_v5 = vmul.f32 %v2484_v23, %v2484_v23  ;;  %v2485_v17 = vsub.f32 %v2427_v48, %v2460_v4 }
 0x7a7   :  { %v2636_v35 = vadd.f32 %v2635_v24, %v2509_v5  ;;  %v2510_v43 = vmul.f32 %v2485_v17, %v2485_v17 }
 0x7a8   :  { %v2431_v47 = vpop.f32.mrb[180].mxu0 }
 0x7a9   :  { %v2432_v34 = vadd.f32 %v5047_v21, %v2431_v47  ;;  %v3348_v37 = vpop.f32.mrb[181].mxu0  ;;  %v2637_v57 = vadd.f32 %v2636_v35, %v2510_v43 }
 0x7aa   :  { %v2434_v56 = vpop.f32.mrb[182].mxu0 }
 0x7ab   :  { %v2486_v20 = vsub.f32 %v2432_v34, %v2461_v32  ;;  %v3349_v30 = vpop.f32.mrb[183].mxu0 }
 0x7ad   :  { %v2511_v2 = vmul.f32 %v2486_v20, %v2486_v20 }
 0x7af   :  { %v2638_v3 = vadd.f32 %v2637_v57, %v2511_v2 }
 0x7b1   :  { %2639 = vadd.xlane.f32.xlu1 %v2638_v3 }
 0x83e   :  { %v2640_v29 = vpop.xlane.xlu1 %2639 }
 0x83f   :  { %v2641_v54 = vrot.slane %v2640_v29, 4 }
 0x841   :  { %v2642_v45 = vadd.f32 %v2641_v54, %v2640_v29 }
 0x843   :  { %v2643_v52 = vrot.slane %v2642_v45, 2 }
 0x845   :  { %v2644_v28 = vadd.f32 %v2643_v52, %v2642_v45 }
 0x847   :  { %v2645_v8 = vrot.slane %v2644_v28, 1 }
 0x849   :  { %v2646_v18 = vadd.f32 %v2645_v8, %v2644_v28 }
 0x84b   :  { %3366 = vpush %v2646_v18 }
 0x87c   :  { %s3367_s12 = spop %3366 }
 0x87d   :  { %2649 = sst [smem:[#allocation19]] %s3367_s12 }
 0x87e   :  { %3822 = shalt.err (!%p3819_p12)
}
 0x87f   :  { %s3853_s29 = smov [#allocation19]  }
 0x880   :  { %2657 = dma.smem_to_hbm %s3853_s29, 16, %s5099_s13, [#allocation4]  }
 0x881   :  { %3835 = dma.done.wait [#allocation4], 16  }
 0x882   :  { %3836 = vsyncadd [#allocation4], 4294967280 }
 0x883   :  { %2661 = sfence }
 0x884   :  { %2662 = vsyncpa [#allocation3], 1 }
 0x885   :  { %2663 = vsyncpa [#allocation6], 1 }
 0x886   :  { %2664 = vsyncpa [#allocation9], 1 }
 0x887   :  { %2665 = vsyncpa [#allocation12], 1 }
 0x888   :  { %2666 = vsyncpa [#allocation15], 1 }
 0x889   :  { %2667 = vsyncpa [#allocation18], 1 }
 0x88a   :  { %2668 = vsyncpa [#allocation4], 1 }

// kernel: tpu_custom_call.1
= control target key start
LH: loop header
LB: loop body
LE: loop exit
PB: predicated region body
PF: predicated region fallthrough
CT: control target
= control target key end

     0   :  { %18 = vsyncpa [#allocation3], 0  ;;  %s5086_s0 = inlined_call_operand.hbm [shape: f32[200,128], index: 0, kind: input, shape index: {}]   ;;  %s5087_s1 = inlined_call_operand.hbm [shape: f32[200,128], index: 1, kind: input, shape index: {}]   ;;  %s5088_s2 = inlined_call_operand.hbm [shape: f32[200,128], index: 2, kind: input, shape index: {}]   ;;  %s5089_s3 = inlined_call_operand.hbm [shape: bf16[128,128], index: 3, kind: input, shape index: {}]   ;;  %s5090_s4 = inlined_call_operand.hbm [shape: bf16[128,128], index: 4, kind: input, shape index: {}]   ;;  %s5091_s5 = inlined_call_operand.hbm [shape: bf16[128,128], index: 5, kind: input, shape index: {}]   ;;  %s5092_s6 = inlined_call_operand.hbm [shape: bf16[128,128], index: 6, kind: input, shape index: {}]   ;;  %s5093_s7 = inlined_call_operand.hbm [shape: bf16[128,128], index: 7, kind: input, shape index: {}]   ;;  %s5094_s8 = inlined_call_operand.hbm [shape: bf16[128,128], index: 8, kind: input, shape index: {}]   ;;  %s5095_s9 = inlined_call_operand.hbm [shape: bf16[128,128], index: 9, kind: input, shape index: {}]   ;;  %s5096_s10 = inlined_call_operand.vmem [shape: f32[8,128], index: 10, kind: input, shape index: {}]   ;;  %s5097_s11 = inlined_call_operand.vmem [shape: f32[1,128], index: 11, kind: input, shape index: {}]   ;;  %s5098_s12 = inlined_call_operand.vmem [shape: f32[1,128], index: 12, kind: input, shape index: {}]   ;;  %s5099_s13 = inlined_call_operand.hbm [shape: f32[1,1], index: 13, kind: output, shape index: {}]  }
   0x1   :  { %19 = vsyncpa [#allocation6], 0 }
   0x2   :  { %20 = vsyncpa [#allocation9], 0 }
   0x3   :  { %21 = vsyncpa [#allocation12], 0 }
   0x4   :  { %22 = vsyncpa [#allocation15], 0 }
   0x5   :  { %23 = vsyncpa [#allocation18], 0 }
   0x6   :  { %24 = vsyncpa [#allocation4], 0  ;;  %s3837_s25 = smov [#allocation5]   ;;  %s3838_s27 = smov [#allocation8]  }
   0x7   :  { %s42_s26 = sshll.u32 %s3837_s25, 4  ;;  %s66_s28 = sshll.u32 %s3838_s27, 4  ;;  %s43_s26 = int_to_ptr.vmem [resolvable:$true] %s42_s26  ;;  %s3924_s28 = int_to_ptr.vmem [resolvable:$true] %s66_s28 }
   0x8   :  { %s3593_s14 = scalar_lea.hbm %s5087_s1, 3200 }
   0x9   :  { %p3594_p0 = scmp.ne.s32.totalorder %s5087_s1, %s3593_s14  ;;  %p3597_p1 = scmp.lt.u32.totalorder %s3593_s14, %s5087_s1 }
   0xb   :  { %p3599_p2 = pnand %p3597_p1, %p3594_p0 }
   0xd   :  { %3602 = shalt.err (!%p3599_p2)
}
   0xe   :  { %s3603_s19 = scalar_lea.vmem %s43_s26, 3200  ;;  %p3608_p4 = scmp.lt.s32.totalorder %s43_s26, %s43_s26 }
   0xf   :  { %p3604_p3 = scmp.ne.s32.totalorder %s43_s26, %s3603_s19  ;;  %p3609_p5 = scmp.lt.s32.totalorder %s3603_s19, %s3603_s19 }
  0x11   :  { %p3610_p6 = por %p3609_p5, %p3608_p4 }
  0x13   :  { %p3611_p7 = pnand %p3610_p6, %p3604_p3 }
  0x15   :  { %3614 = shalt.err (!%p3611_p7)
}
  0x16   :  { %s3839_s20 = smov 128   ;;  %s3840_s21 = smov 8  }
  0x17   :  { %48 = dma.hbm_to_vmem [thread:$0]  %s5087_s1, 3200, %s43_s26, [#allocation6], %s3839_s20, %s3839_s20, %s3840_s21  }
  0x18   :  { %s3615_s27 = scalar_lea.hbm %s5089_s3, 1024 }
  0x19   :  { %p3616_p8 = scmp.ne.s32.totalorder %s5089_s3, %s3615_s27  ;;  %p3619_p9 = scmp.lt.u32.totalorder %s3615_s27, %s5089_s3 }
  0x1b   :  { %p3621_p10 = pnand %p3619_p9, %p3616_p8 }
  0x1d   :  { %3624 = shalt.err (!%p3621_p10)
}
  0x1e   :  { %s3625_s16 = scalar_lea.vmem %s3924_s28, 1024  ;;  %p3630_p12 = scmp.lt.s32.totalorder %s3924_s28, %s3924_s28 }
  0x1f   :  { %p3626_p11 = scmp.ne.s32.totalorder %s3924_s28, %s3625_s16  ;;  %p3631_p13 = scmp.lt.s32.totalorder %s3625_s16, %s3625_s16 }
  0x21   :  { %p3632_p0 = por %p3631_p13, %p3630_p12 }
  0x23   :  { %p3633_p1 = pnand %p3632_p0, %p3626_p11 }
  0x25   :  { %3636 = shalt.err (!%p3633_p1)
}
  0x26   :  { %s3841_s1 = smov 64   ;;  %s3842_s26 = smov 4  }
  0x27   :  { %72 = dma.hbm_to_vmem [thread:$0]  %s5089_s3, 1024, %s3924_s28, [#allocation9], %s3841_s1, %s3841_s1, %s3842_s26  }
  0x28   :  { %s3843_s19 = smov [#allocation11]   ;;  %s3844_s23 = smov [#allocation14]  }
  0x29   :  { %s90_s22 = sshll.u32 %s3843_s19, 4  ;;  %s114_s24 = sshll.u32 %s3844_s23, 4  ;;  %s91_s22 = int_to_ptr.vmem [resolvable:$true] %s90_s22  ;;  %s3961_s24 = int_to_ptr.vmem [resolvable:$true] %s114_s24 }
  0x2a   :  { %s3637_s29 = scalar_lea.hbm %s5091_s5, 1024 }
  0x2b   :  { %p3638_p2 = scmp.ne.s32.totalorder %s5091_s5, %s3637_s29  ;;  %p3641_p3 = scmp.lt.u32.totalorder %s3637_s29, %s5091_s5 }
  0x2d   :  { %p3643_p4 = pnand %p3641_p3, %p3638_p2 }
  0x2f   :  { %3646 = shalt.err (!%p3643_p4)
}
  0x30   :  { %s3647_s3 = scalar_lea.vmem %s91_s22, 1024  ;;  %p3652_p6 = scmp.lt.s32.totalorder %s91_s22, %s91_s22 }
  0x31   :  { %p3648_p5 = scmp.ne.s32.totalorder %s91_s22, %s3647_s3  ;;  %p3653_p7 = scmp.lt.s32.totalorder %s3647_s3, %s3647_s3 }
  0x33   :  { %p3654_p8 = por %p3653_p7, %p3652_p6 }
  0x35   :  { %p3655_p9 = pnand %p3654_p8, %p3648_p5 }
  0x37   :  { %3658 = shalt.err (!%p3655_p9)
}
  0x38   :  { %96 = dma.hbm_to_vmem [thread:$0]  %s5091_s5, 1024, %s91_s22, [#allocation12], %s3841_s1, %s3841_s1, %s3842_s26  }
  0x39   :  { %s3659_s23 = scalar_lea.hbm %s5093_s7, 1024 }
  0x3a   :  { %p3660_p10 = scmp.ne.s32.totalorder %s5093_s7, %s3659_s23  ;;  %p3663_p11 = scmp.lt.u32.totalorder %s3659_s23, %s5093_s7 }
  0x3c   :  { %p3665_p12 = pnand %p3663_p11, %p3660_p10 }
  0x3e   :  { %3668 = shalt.err (!%p3665_p12)
}
  0x3f   :  { %s3669_s14 = scalar_lea.vmem %s3961_s24, 1024  ;;  %p3674_p0 = scmp.lt.s32.totalorder %s3961_s24, %s3961_s24 }
  0x40   :  { %p3670_p13 = scmp.ne.s32.totalorder %s3961_s24, %s3669_s14  ;;  %p3675_p1 = scmp.lt.s32.totalorder %s3669_s14, %s3669_s14 }
  0x42   :  { %p3676_p2 = por %p3675_p1, %p3674_p0 }
  0x44   :  { %p3677_p3 = pnand %p3676_p2, %p3670_p13 }
  0x46   :  { %3680 = shalt.err (!%p3677_p3)
}
  0x47   :  { %120 = dma.hbm_to_vmem [thread:$0]  %s5093_s7, 1024, %s3961_s24, [#allocation15], %s3841_s1, %s3841_s1, %s3842_s26  }
  0x48   :  { %s3845_s15 = smov [#allocation2]   ;;  %s3846_s3 = smov [#allocation7]  }
  0x49   :  { %s30_s16 = sshll.u32 %s3845_s15, 4  ;;  %s54_s28 = sshll.u32 %s3846_s3, 4  ;;  %s31_s16 = int_to_ptr.vmem [resolvable:$true] %s30_s16  ;;  %s3998_s28 = int_to_ptr.vmem [resolvable:$true] %s54_s28 }
  0x4a   :  { %s3681_s19 = scalar_lea.hbm %s5086_s0, 3200 }
  0x4b   :  { %p3682_p4 = scmp.ne.s32.totalorder %s5086_s0, %s3681_s19  ;;  %p3685_p5 = scmp.lt.u32.totalorder %s3681_s19, %s5086_s0 }
  0x4d   :  { %p3687_p6 = pnand %p3685_p5, %p3682_p4 }
  0x4f   :  { %3690 = shalt.err (!%p3687_p6)
}
  0x50   :  { %s3691_s7 = scalar_lea.vmem %s31_s16, 3200  ;;  %p3696_p8 = scmp.lt.s32.totalorder %s31_s16, %s31_s16 }
  0x51   :  { %p3692_p7 = scmp.ne.s32.totalorder %s31_s16, %s3691_s7  ;;  %p3697_p9 = scmp.lt.s32.totalorder %s3691_s7, %s3691_s7 }
  0x53   :  { %p3698_p10 = por %p3697_p9, %p3696_p8 }
  0x55   :  { %p3699_p11 = pnand %p3698_p10, %p3692_p7 }
  0x57   :  { %3702 = shalt.err (!%p3699_p11)
}
  0x58   :  { %36 = dma.hbm_to_vmem [thread:$0]  %s5086_s0, 3200, %s31_s16, [#allocation3], %s3839_s20, %s3839_s20, %s3840_s21  }
  0x59   :  { %s3703_s22 = scalar_lea.hbm %s5088_s2, 3200 }
  0x5a   :  { %p3704_p12 = scmp.ne.s32.totalorder %s5088_s2, %s3703_s22  ;;  %p3707_p13 = scmp.lt.u32.totalorder %s3703_s22, %s5088_s2 }
  0x5c   :  { %p3709_p0 = pnand %p3707_p13, %p3704_p12 }
  0x5e   :  { %3712 = shalt.err (!%p3709_p0)
}
  0x5f   :  { %s3713_s19 = scalar_lea.vmem %s3998_s28, 3200  ;;  %p3718_p2 = scmp.lt.s32.totalorder %s3998_s28, %s3998_s28 }
  0x60   :  { %p3714_p1 = scmp.ne.s32.totalorder %s3998_s28, %s3713_s19  ;;  %p3719_p3 = scmp.lt.s32.totalorder %s3713_s19, %s3713_s19 }
  0x62   :  { %p3720_p4 = por %p3719_p3, %p3718_p2 }
  0x64   :  { %p3721_p5 = pnand %p3720_p4, %p3714_p1 }
  0x66   :  { %3724 = shalt.err (!%p3721_p5)
}
  0x67   :  { %60 = dma.hbm_to_vmem [thread:$0]  %s5088_s2, 3200, %s3998_s28, [#allocation6], %s3839_s20, %s3839_s20, %s3840_s21  }
  0x68   :  { %s3847_s23 = smov [#allocation10]   ;;  %s3848_s27 = smov [#allocation13]  }
  0x69   :  { %s78_s25 = sshll.u32 %s3847_s23, 4  ;;  %s102_s29 = sshll.u32 %s3848_s27, 4  ;;  %s79_s25 = int_to_ptr.vmem [resolvable:$true] %s78_s25  ;;  %s4035_s29 = int_to_ptr.vmem [resolvable:$true] %s102_s29 }
  0x6a   :  { %s3725_s30 = scalar_lea.hbm %s5090_s4, 1024 }
  0x6b   :  { %p3726_p6 = scmp.ne.s32.totalorder %s5090_s4, %s3725_s30  ;;  %p3729_p7 = scmp.lt.u32.totalorder %s3725_s30, %s5090_s4 }
  0x6d   :  { %p3731_p8 = pnand %p3729_p7, %p3726_p6 }
  0x6f   :  { %3734 = shalt.err (!%p3731_p8)
}
  0x70   :  { %s3735_s2 = scalar_lea.vmem %s79_s25, 1024  ;;  %p3740_p10 = scmp.lt.s32.totalorder %s79_s25, %s79_s25 }
  0x71   :  { %p3736_p9 = scmp.ne.s32.totalorder %s79_s25, %s3735_s2  ;;  %p3741_p11 = scmp.lt.s32.totalorder %s3735_s2, %s3735_s2 }
  0x73   :  { %p3742_p12 = por %p3741_p11, %p3740_p10 }
  0x75   :  { %p3743_p13 = pnand %p3742_p12, %p3736_p9 }
  0x77   :  { %3746 = shalt.err (!%p3743_p13)
}
  0x78   :  { %84 = dma.hbm_to_vmem [thread:$0]  %s5090_s4, 1024, %s79_s25, [#allocation9], %s3841_s1, %s3841_s1, %s3842_s26  }
  0x79   :  { %s3747_s17 = scalar_lea.hbm %s5092_s6, 1024 }
  0x7a   :  { %p3748_p0 = scmp.ne.s32.totalorder %s5092_s6, %s3747_s17  ;;  %p3751_p1 = scmp.lt.u32.totalorder %s3747_s17, %s5092_s6 }
  0x7c   :  { %p3753_p2 = pnand %p3751_p1, %p3748_p0 }
  0x7e   :  { %3756 = shalt.err (!%p3753_p2)
}
  0x7f   :  { %s3757_s23 = scalar_lea.vmem %s4035_s29, 1024  ;;  %p3762_p4 = scmp.lt.s32.totalorder %s4035_s29, %s4035_s29 }
  0x80   :  { %p3758_p3 = scmp.ne.s32.totalorder %s4035_s29, %s3757_s23  ;;  %p3763_p5 = scmp.lt.s32.totalorder %s3757_s23, %s3757_s23 }
  0x82   :  { %p3764_p6 = por %p3763_p5, %p3762_p4 }
  0x84   :  { %p3765_p7 = pnand %p3764_p6, %p3758_p3 }
  0x86   :  { %3768 = shalt.err (!%p3765_p7)
}
  0x87   :  { %108 = dma.hbm_to_vmem [thread:$0]  %s5092_s6, 1024, %s4035_s29, [#allocation12], %s3841_s1, %s3841_s1, %s3842_s26  }
  0x88   :  { %s3849_s27 = smov [#allocation16]   ;;  %s3850_s24 = smov [#allocation17]  }
  0x89   :  { %s126_s7 = sshll.u32 %s3849_s27, 4  ;;  %s138_s30 = sshll.u32 %s3850_s24, 4  ;;  %s127_s7 = int_to_ptr.vmem [resolvable:$true] %s126_s7  ;;  %s4072_s30 = int_to_ptr.vmem [resolvable:$true] %s138_s30 }
  0x8a   :  { %s3769_s22 = scalar_lea.hbm %s5094_s8, 1024 }
  0x8b   :  { %p3770_p8 = scmp.ne.s32.totalorder %s5094_s8, %s3769_s22  ;;  %p3773_p9 = scmp.lt.u32.totalorder %s3769_s22, %s5094_s8 }
  0x8d   :  { %p3775_p10 = pnand %p3773_p9, %p3770_p8 }
  0x8f   :  { %3778 = shalt.err (!%p3775_p10)
}
  0x90   :  { %s3779_s6 = scalar_lea.vmem %s127_s7, 1024  ;;  %p3784_p12 = scmp.lt.s32.totalorder %s127_s7, %s127_s7 }
  0x91   :  { %p3780_p11 = scmp.ne.s32.totalorder %s127_s7, %s3779_s6  ;;  %p3785_p13 = scmp.lt.s32.totalorder %s3779_s6, %s3779_s6 }
  0x93   :  { %p3786_p0 = por %p3785_p13, %p3784_p12 }
  0x95   :  { %p3787_p1 = pnand %p3786_p0, %p3780_p11 }
  0x97   :  { %3790 = shalt.err (!%p3787_p1)
}
  0x98   :  { %132 = dma.hbm_to_vmem [thread:$0]  %s5094_s8, 1024, %s127_s7, [#allocation15], %s3841_s1, %s3841_s1, %s3842_s26  }
  0x99   :  { %s3791_s18 = scalar_lea.hbm %s5095_s9, 1024 }
  0x9a   :  { %p3792_p2 = scmp.ne.s32.totalorder %s5095_s9, %s3791_s18  ;;  %p3795_p3 = scmp.lt.u32.totalorder %s3791_s18, %s5095_s9 }
  0x9c   :  { %p3797_p4 = pnand %p3795_p3, %p3792_p2 }
  0x9e   :  { %3800 = shalt.err (!%p3797_p4)
}
  0x9f   :  { %s3801_s4 = scalar_lea.vmem %s4072_s30, 1024  ;;  %p3806_p6 = scmp.lt.s32.totalorder %s4072_s30, %s4072_s30 }
  0xa0   :  { %p3802_p5 = scmp.ne.s32.totalorder %s4072_s30, %s3801_s4  ;;  %p3807_p7 = scmp.lt.s32.totalorder %s3801_s4, %s3801_s4 }
  0xa2   :  { %p3808_p8 = por %p3807_p7, %p3806_p6 }
  0xa4   :  { %p3809_p9 = pnand %p3808_p8, %p3802_p5 }
  0xa6   :  { %3812 = shalt.err (!%p3809_p9)
}
  0xa7   :  { %144 = dma.hbm_to_vmem [thread:$0]  %s5095_s9, 1024, %s4072_s30, [#allocation18], %s3841_s1, %s3841_s1, %s3842_s26  }
  0xa8   :  { %3823 = dma.done.wait [#allocation3], 3200  }
  0xa9   :  { %3824 = vsyncadd [#allocation3], 4294964096 }
  0xaa   :  { %3825 = dma.done.wait [#allocation6], 6400  }
  0xab   :  { %3826 = vsyncadd [#allocation6], 4294960896 }
  0xac   :  { %3827 = dma.done.wait [#allocation9], 2048  }
  0xad   :  { %3828 = vsyncadd [#allocation9], 4294965248 }
  0xae   :  { %3829 = dma.done.wait [#allocation12], 2048  }
  0xaf   :  { %3830 = vsyncadd [#allocation12], 4294965248 }
  0xb0   :  { %3831 = dma.done.wait [#allocation15], 2048  }
  0xb1   :  { %3832 = vsyncadd [#allocation15], 4294965248 }
  0xb2   :  { %3833 = dma.done.wait [#allocation18], 1024  }
  0xb3   :  { %3834 = vsyncadd [#allocation18], 4294966272  ;;  %v3851_v0 = vmov 0.0   ;;  %vm3852_vm0 = vmmov 0   ;;  %v3385_v1 = vld [vmem:[#allocation8] sm:$0xff]   ;;  %v3386_v2 = vld [vmem:[#allocation8 + $0x8] sm:$0xff]   ;;  %v237_v48 = vlaneseq }
  0xb4   :  { %2874 = vmatprep.subr.bf16.mxu0 %v3851_v0  ;;  %2890 = vmatprep.mubr.msk.bf16.mxu0 %vm3852_vm0, %v3851_v0  ;;  %v3387_v3 = vld [vmem:[#allocation8 + $0x10] sm:$0xff]   ;;  %v3388_v4 = vld [vmem:[#allocation8 + $0x18] sm:$0xff]   ;;  %v3389_v5 = vld [vmem:[#allocation8 + $0x20] sm:$0xff]   ;;  %s3813_s15 = scalar_lea.hbm %s5099_s13, 16 }
  0xb5   :  { %3350 = vmatprep.subr.bf16.mxu1 %v3851_v0  ;;  %2918 = vmatprep.mubr.msk.bf16.mxu1 %vm3852_vm0, %v3851_v0  ;;  %v3390_v6 = vld [vmem:[#allocation8 + $0x28] sm:$0xff]   ;;  %v3391_v7 = vld [vmem:[#allocation8 + $0x30] sm:$0xff]   ;;  %v3392_v8 = vld [vmem:[#allocation8 + $0x38] sm:$0xff]   ;;  %v4158_v49 = vshrl.u32 %v237_v48, 7  ;;  %p3814_p10 = scmp.ne.s32.totalorder %s5099_s13, %s3813_s15  ;;  %p3817_p11 = scmp.lt.u32.totalorder %s3813_s15, %s5099_s13 }
  0xb6   :  { %2875 = vmatpush3.bf16.msra.mxu0 %v3385_v1  ;;  %3358 = vmatpush3.bf16.msra.mxu1 %v3385_v1  ;;  %v183_v9 = vld [vmem:[#allocation2] sm:$0xff]  ;;  %v184_v10 = vld [vmem:[#allocation2 + $0x8] sm:$0xff]  ;;  %v197_v11 = vld [vmem:[#allocation2 + $0x70] sm:$0xff] }
  0xb7   :  { %2876 = vmatprep.subr.bf16.mxu0 %v3851_v0  ;;  %3351 = vmatprep.subr.bf16.mxu1 %v3851_v0  ;;  %v198_v12 = vld [vmem:[#allocation2 + $0x78] sm:$0xff]  ;;  %v224_v13 = vpack.c.bf16 %v184_v10, %v183_v9  ;;  %v185_v15 = vld [vmem:[#allocation2 + $0x10] sm:$0xff]  ;;  %v199_v17 = vld [vmem:[#allocation2 + $0x80] sm:$0xff]  ;;  %v239_v50 = vsub.s32 0, %v4158_v49  ;;  %p3819_p12 = pnand %p3817_p11, %p3814_p10 }
  0xb8   :  { %v231_v14 = vpack.c.bf16 %v198_v12, %v197_v11  ;;  %v186_v16 = vld [vmem:[#allocation2 + $0x18] sm:$0xff]  ;;  %v200_v18 = vld [vmem:[#allocation2 + $0x88] sm:$0xff]  ;;  %v187_v21 = vld [vmem:[#allocation2 + $0x20] sm:$0xff] }
  0xb9   :  { %v225_v19 = vpack.c.bf16 %v186_v16, %v185_v15  ;;  %v232_v20 = vpack.c.bf16 %v200_v18, %v199_v17  ;;  %v188_v22 = vld [vmem:[#allocation2 + $0x28] sm:$0xff]  ;;  %v201_v23 = vld [vmem:[#allocation2 + $0x90] sm:$0xff]  ;;  %v202_v24 = vld [vmem:[#allocation2 + $0x98] sm:$0xff] }
  0xba   :  { %2877 = vmatpush3.bf16.msra.mxu0 %v3386_v2  ;;  %3359 = vmatpush3.bf16.msra.mxu1 %v3386_v2  ;;  %v226_v25 = vpack.c.bf16 %v188_v22, %v187_v21  ;;  %v233_v26 = vpack.c.bf16 %v202_v24, %v201_v23  ;;  %v189_v27 = vld [vmem:[#allocation2 + $0x30] sm:$0xff]  ;;  %v190_v28 = vld [vmem:[#allocation2 + $0x38] sm:$0xff]  ;;  %v203_v29 = vld [vmem:[#allocation2 + $0xa0] sm:$0xff] }
  0xbb   :  { %2878 = vmatprep.subr.bf16.mxu0 %v3851_v0  ;;  %3352 = vmatprep.subr.bf16.mxu1 %v3851_v0  ;;  %v204_v30 = vld [vmem:[#allocation2 + $0xa8] sm:$0xff]  ;;  %v227_v31 = vpack.c.bf16 %v190_v28, %v189_v27  ;;  %v191_v33 = vld [vmem:[#allocation2 + $0x40] sm:$0xff]  ;;  %v205_v35 = vld [vmem:[#allocation2 + $0xb0] sm:$0xff] }
  0xbc   :  { %v234_v32 = vpack.c.bf16 %v204_v30, %v203_v29  ;;  %v192_v34 = vld [vmem:[#allocation2 + $0x48] sm:$0xff]  ;;  %v206_v36 = vld [vmem:[#allocation2 + $0xb8] sm:$0xff]  ;;  %v193_v39 = vld [vmem:[#allocation2 + $0x50] sm:$0xff] }
  0xbd   :  { %v228_v37 = vpack.c.bf16 %v192_v34, %v191_v33  ;;  %v235_v38 = vpack.c.bf16 %v206_v36, %v205_v35  ;;  %v194_v40 = vld [vmem:[#allocation2 + $0x58] sm:$0xff]  ;;  %v207_v41 = vld [vmem:[#allocation2 + $0xc0] sm:$0xff]  ;;  %v196_v45 = vld [vmem:[#allocation2 + $0x68] sm:$0xff] }
  0xbe   :  { %2879 = vmatpush3.bf16.msra.mxu0 %v3387_v3  ;;  %3360 = vmatpush3.bf16.msra.mxu1 %v3387_v3  ;;  %v229_v42 = vpack.c.bf16 %v194_v40, %v193_v39  ;;  %v236_v43 = vpack.c.bf16 %v207_v41, %v207_v41  ;;  %v195_v44 = vld [vmem:[#allocation2 + $0x60] sm:$0xff]  ;;  %v3393_v47 = vld [vmem:[#allocation10] sm:$0xff]  }
  0xbf   :  { %2880 = vmatprep.subr.bf16.mxu0 %v3851_v0  ;;  %3353 = vmatprep.subr.bf16.mxu1 %v3851_v0  ;;  %v230_v46 = vpack.c.bf16 %v196_v45, %v195_v44  ;;  %v4164_v51 = vld [vmem:[%s5096_s10] sm:$0xff] }
  0xc0   :  { %v4167_v52 = vrot.slane %v4164_v51, %v239_v50 }
  0xc2   :  { %2881 = vmatpush3.bf16.msra.mxu0 %v3388_v4  ;;  %3361 = vmatpush3.bf16.msra.mxu1 %v3388_v4 }
  0xc3   :  { %2882 = vmatprep.subr.bf16.mxu0 %v3851_v0  ;;  %3354 = vmatprep.subr.bf16.mxu1 %v3851_v0 }
  0xc6   :  { %2883 = vmatpush3.bf16.msra.mxu0 %v3389_v5  ;;  %3362 = vmatpush3.bf16.msra.mxu1 %v3389_v5 }
  0xc7   :  { %2884 = vmatprep.subr.bf16.mxu0 %v3851_v0  ;;  %3355 = vmatprep.subr.bf16.mxu1 %v3851_v0 }
  0xca   :  { %2885 = vmatpush3.bf16.msra.mxu0 %v3390_v6  ;;  %3363 = vmatpush3.bf16.msra.mxu1 %v3390_v6 }
  0xcb   :  { %2886 = vmatprep.subr.bf16.mxu0 %v3851_v0  ;;  %3356 = vmatprep.subr.bf16.mxu1 %v3851_v0 }
  0xce   :  { %2887 = vmatpush3.bf16.msra.mxu0 %v3391_v7  ;;  %3364 = vmatpush3.bf16.msra.mxu1 %v3391_v7 }
  0xcf   :  { %2888 = vmatprep.subr.bf16.mxu0 %v3851_v0  ;;  %3357 = vmatprep.subr.bf16.mxu1 %v3851_v0 }
  0xd2   :  { %2889 = vmatpush3.bf16.msra.mxu0 %v3392_v8  ;;  %3365 = vmatpush3.bf16.msra.mxu1 %v3392_v8 }
  0xd3   :  { %2942 = vmatprep.subr.bf16.mxu1 %v3851_v0  ;;  %3010 = vmatprep.subr.bf16.mxu0 %v3851_v0 }
  0xd5   :  { %2891 = vmatmul.mubr.bf16.vlgmr.msra.gmra.mrb[0].mxu0 %v224_v13  ;;  %2919 = vmatmul.mubr.bf16.vlgmr.msra.gmra.mrb[0].mxu1 %v231_v14 }
  0xd6   :  { %2894 = vmatprep.mubr.msk.bf16.mxu0 %vm3852_vm0, %v3851_v0  ;;  %2922 = vmatprep.mubr.msk.bf16.mxu1 %vm3852_vm0, %v3851_v0 }
  0xd7   :  { %2943 = vmatpush3.bf16.msra.mxu1 %v3393_v47 }
  0xd8   :  { %2944 = vmatprep.subr.bf16.mxu1 %v3851_v0 }
  0xdd   :  { %2895 = vmatmul.mubr.bf16.gmra.mrb[4].mxu0 %v225_v19  ;;  %2923 = vmatmul.mubr.bf16.gmra.mrb[4].mxu1 %v232_v20 }
  0xde   :  { %2898 = vmatprep.mubr.msk.bf16.mxu0 %vm3852_vm0, %v3851_v0  ;;  %2926 = vmatprep.mubr.msk.bf16.mxu1 %vm3852_vm0, %v3851_v0 }
  0xe5   :  { %2899 = vmatmul.mubr.bf16.gmra.mrb[8].mxu0 %v226_v25  ;;  %2927 = vmatmul.mubr.bf16.gmra.mrb[8].mxu1 %v233_v26 }
  0xe6   :  { %2902 = vmatprep.mubr.msk.bf16.mxu0 %vm3852_vm0, %v3851_v0  ;;  %2930 = vmatprep.mubr.msk.bf16.mxu1 %vm3852_vm0, %v3851_v0 }
  0xed   :  { %2903 = vmatmul.mubr.bf16.gmra.mrb[12].mxu0 %v227_v31  ;;  %2931 = vmatmul.mubr.bf16.gmra.mrb[12].mxu1 %v234_v32 }
  0xee   :  { %2906 = vmatprep.mubr.msk.bf16.mxu0 %vm3852_vm0, %v3851_v0  ;;  %2934 = vmatprep.mubr.msk.bf16.mxu1 %vm3852_vm0, %v3851_v0 }
  0xf5   :  { %2907 = vmatmul.mubr.bf16.gmra.mrb[16].mxu0 %v228_v37  ;;  %2935 = vmatmul.mubr.bf16.gmra.mrb[16].mxu1 %v235_v38 }
  0xf6   :  { %2910 = vmatprep.mubr.msk.bf16.mxu0 %vm3852_vm0, %v3851_v0  ;;  %2938 = vmatprep.mubr.msk.bf16.mxu1 %vm3852_vm0, %v3851_v0 }
  0xfd   :  { %2911 = vmatmul.mubr.bf16.gmra.mrb[20].mxu0 %v229_v42  ;;  %2939 = vmatmul.mubr.bf16.gmra.mrb[20].mxu1 %v236_v43 }
  0xfe   :  { %2914 = vmatprep.mubr.msk.bf16.mxu0 %vm3852_vm0, %v3851_v0  ;;  %2958 = vmatprep.mubr.msk.bf16.mxu1 %vm3852_vm0, %v3851_v0 }
 0x105   :  { %2915 = vmatmul.mubr.bf16.gmra.mrb[24].mxu0 %v230_v46  ;;  %v3394_v46 = vld [vmem:[#allocation10 + $0x8] sm:$0xff]  }
 0x106   :  { %3026 = vmatprep.mubr.msk.bf16.mxu0 %vm3852_vm0, %v3851_v0  ;;  %2945 = vmatpush3.bf16.msra.mxu1 %v3394_v46 }
 0x107   :  { %2946 = vmatprep.subr.bf16.mxu1 %v3851_v0 }
 0x1a8   :  { %v323_v53 = vpop.f32.mrb[0].mxu0  ;;  %v4169_v54 = vpop.f32.mrb[0].mxu1 }
 0x1a9   :  { %v4172_v55 = vadd.f32 %v323_v53, %v4167_v52  ;;  %v2892_v56 = vpop.f32.mrb[1].mxu0  ;;  %v2920_v57 = vpop.f32.mrb[1].mxu1 }
 0x1aa   :  { %v326_v58 = vpop.f32.mrb[2].mxu0  ;;  %v4174_v59 = vpop.f32.mrb[2].mxu1 }
 0x1ab   :  { %v4177_v60 = vadd.f32 %v326_v58, %v4167_v52  ;;  %v2893_v61 = vpop.f32.mrb[3].mxu0  ;;  %425 = vadd.xlane.f32.xlu0 %v4172_v55  ;;  %v500_v62 = vmul.f32 %v4172_v55, %v4172_v55  ;;  %v2921_v63 = vpop.f32.mrb[3].mxu1 }
 0x1ad   :  { %525 = vadd.xlane.f32.xlu1 %v500_v62  ;;  %v501_v1 = vmul.f32 %v4177_v60, %v4177_v60 }
 0x1af   :  { %427 = vadd.xlane.f32.xlu0 %v4177_v60 }
 0x1b0   :  { %v331_v2 = vpop.f32.mrb[4].mxu0  ;;  %v387_v3 = vpop.f32.mrb[4].mxu1 }
 0x1b1   :  { %v4186_v4 = vadd.f32 %v331_v2, %v4167_v52  ;;  %v2896_v5 = vpop.f32.mrb[5].mxu0  ;;  %527 = vadd.xlane.f32.xlu1 %v501_v1  ;;  %v4189_v6 = vadd.f32 %v387_v3, %v4167_v52  ;;  %v2924_v7 = vpop.f32.mrb[5].mxu1  ;;  %v3395_v1 = vld [vmem:[#allocation10 + $0x10] sm:$0xff]  }
 0x1b2   :  { %v334_v8 = vpop.f32.mrb[6].mxu0  ;;  %v390_v9 = vpop.f32.mrb[6].mxu1  ;;  %2947 = vmatpush3.bf16.msra.mxu1 %v3395_v1 }
 0x1b3   :  { %v4192_v10 = vadd.f32 %v334_v8, %v4167_v52  ;;  %v2897_v11 = vpop.f32.mrb[7].mxu0  ;;  %429 = vadd.xlane.f32.xlu0 %v4186_v4  ;;  %v4196_v12 = vadd.f32 %v390_v9, %v4167_v52  ;;  %v2925_v13 = vpop.f32.mrb[7].mxu1  ;;  %v502_v14 = vmul.f32 %v4186_v4, %v4186_v4  ;;  %2948 = vmatprep.subr.bf16.mxu1 %v3851_v0 }
 0x1b5   :  { %431 = vadd.xlane.f32.xlu1 %v4192_v10  ;;  %v503_v15 = vmul.f32 %v4192_v10, %v4192_v10 }
 0x1b7   :  { %529 = vadd.xlane.f32.xlu0 %v502_v14  ;;  %v3396_v14 = vld [vmem:[#allocation10 + $0x18] sm:$0xff]  }
 0x1b8   :  { %v339_v16 = vpop.f32.mrb[8].mxu0  ;;  %v395_v17 = vpop.f32.mrb[8].mxu1  ;;  %2949 = vmatpush3.bf16.msra.mxu1 %v3396_v14 }
 0x1b9   :  { %v4204_v18 = vadd.f32 %v339_v16, %v4167_v52  ;;  %v2900_v19 = vpop.f32.mrb[9].mxu0  ;;  %531 = vadd.xlane.f32.xlu1 %v503_v15  ;;  %v4207_v20 = vadd.f32 %v395_v17, %v4167_v52  ;;  %v2928_v21 = vpop.f32.mrb[9].mxu1  ;;  %2950 = vmatprep.subr.bf16.mxu1 %v3851_v0 }
 0x1ba   :  { %v342_v22 = vpop.f32.mrb[10].mxu0  ;;  %v398_v23 = vpop.f32.mrb[10].mxu1 }
 0x1bb   :  { %v4210_v24 = vadd.f32 %v342_v22, %v4167_v52  ;;  %v2901_v25 = vpop.f32.mrb[11].mxu0  ;;  %433 = vadd.xlane.f32.xlu0 %v4204_v18  ;;  %v4214_v26 = vadd.f32 %v398_v23, %v4167_v52  ;;  %v2929_v27 = vpop.f32.mrb[11].mxu1  ;;  %v504_v28 = vmul.f32 %v4204_v18, %v4204_v18  ;;  %v3397_v23 = vld [vmem:[#allocation10 + $0x20] sm:$0xff]  }
 0x1bc   :  { %2951 = vmatpush3.bf16.msra.mxu1 %v3397_v23 }
 0x1bd   :  { %435 = vadd.xlane.f32.xlu1 %v4210_v24  ;;  %v505_v29 = vmul.f32 %v4210_v24, %v4210_v24  ;;  %2952 = vmatprep.subr.bf16.mxu1 %v3851_v0  ;;  %v519_v46 = vmul.f32 %v4214_v26, %v4214_v26 }
 0x1bf   :  { %533 = vadd.xlane.f32.xlu0 %v504_v28 }
 0x1c0   :  { %v347_v30 = vpop.f32.mrb[12].mxu0  ;;  %v403_v31 = vpop.f32.mrb[12].mxu1 }
 0x1c1   :  { %v4222_v32 = vadd.f32 %v347_v30, %v4167_v52  ;;  %v2904_v33 = vpop.f32.mrb[13].mxu0  ;;  %535 = vadd.xlane.f32.xlu1 %v505_v29  ;;  %v4225_v34 = vadd.f32 %v403_v31, %v4167_v52  ;;  %v2932_v35 = vpop.f32.mrb[13].mxu1  ;;  %v3398_v30 = vld [vmem:[#allocation10 + $0x28] sm:$0xff]  }
 0x1c2   :  { %v350_v36 = vpop.f32.mrb[14].mxu0  ;;  %v406_v37 = vpop.f32.mrb[14].mxu1  ;;  %2953 = vmatpush3.bf16.msra.mxu1 %v3398_v30 }
 0x1c3   :  { %v4228_v38 = vadd.f32 %v350_v36, %v4167_v52  ;;  %v2905_v39 = vpop.f32.mrb[15].mxu0  ;;  %437 = vadd.xlane.f32.xlu0 %v4222_v32  ;;  %v4232_v40 = vadd.f32 %v406_v37, %v4167_v52  ;;  %v2933_v41 = vpop.f32.mrb[15].mxu1  ;;  %v506_v42 = vmul.f32 %v4222_v32, %v4222_v32  ;;  %2954 = vmatprep.subr.bf16.mxu1 %v3851_v0  ;;  %v3399_v37 = vld [vmem:[#allocation10 + $0x30] sm:$0xff]  }
 0x1c4   :  { %v4289_v39 = vadd.f32 %v4169_v54, %v4167_v52 }
 0x1c5   :  { %439 = vadd.xlane.f32.xlu1 %v4228_v38  ;;  %v507_v43 = vmul.f32 %v4228_v38, %v4228_v38 }
 0x1c6   :  { %2955 = vmatpush3.bf16.msra.mxu1 %v3399_v37  ;;  %v514_v54 = vmul.f32 %v4289_v39, %v4289_v39 }
 0x1c7   :  { %537 = vadd.xlane.f32.xlu0 %v506_v42  ;;  %2956 = vmatprep.subr.bf16.mxu1 %v3851_v0  ;;  %v3400_v42 = vld [vmem:[#allocation10 + $0x38] sm:$0xff]  }
 0x1c8   :  { %v355_v44 = vpop.f32.mrb[16].mxu0  ;;  %v411_v45 = vpop.f32.mrb[16].mxu1 }
 0x1c9   :  { %v4240_v47 = vadd.f32 %v355_v44, %v4167_v52  ;;  %v2908_v48 = vpop.f32.mrb[17].mxu0  ;;  %539 = vadd.xlane.f32.xlu1 %v507_v43  ;;  %v4243_v50 = vadd.f32 %v411_v45, %v4167_v52  ;;  %v2936_v53 = vpop.f32.mrb[17].mxu1  ;;  %v4296_v43 = vadd.f32 %v4174_v59, %v4167_v52  ;;  %v517_v59 = vmul.f32 %v4196_v12, %v4196_v12 }
 0x1ca   :  { %v358_v56 = vpop.f32.mrb[18].mxu0  ;;  %v414_v57 = vpop.f32.mrb[18].mxu1  ;;  %2957 = vmatpush3.bf16.msra.mxu1 %v3400_v42  ;;  %v518_v45 = vmul.f32 %v4207_v20, %v4207_v20  ;;  %v520_v48 = vmul.f32 %v4225_v34, %v4225_v34  ;;  %v521_v53 = vmul.f32 %v4232_v40, %v4232_v40  ;;  %v3401_v42 = vld [vmem:[#allocation11] sm:$0xff]  }
 0x1cb   :  { %v4246_v58 = vadd.f32 %v358_v56, %v4167_v52  ;;  %v2909_v61 = vpop.f32.mrb[19].mxu0  ;;  %441 = vadd.xlane.f32.xlu0 %v4240_v47  ;;  %v4250_v62 = vadd.f32 %v414_v57, %v4167_v52  ;;  %v2937_v63 = vpop.f32.mrb[19].mxu1  ;;  %v508_v2 = vmul.f32 %v4240_v47, %v4240_v47  ;;  %3078 = vmatprep.subr.bf16.mxu1 %v3851_v0 }
 0x1cc   :  { %v515_v44 = vmul.f32 %v4296_v43, %v4296_v43  ;;  %v522_v56 = vmul.f32 %v4243_v50, %v4243_v50  ;;  %3011 = vmatpush3.bf16.msra.mxu0 %v3401_v42 }
 0x1cd   :  { %443 = vadd.xlane.f32.xlu1 %v4246_v58  ;;  %v509_v3 = vmul.f32 %v4246_v58, %v4246_v58  ;;  %v523_v57 = vmul.f32 %v4250_v62, %v4250_v62  ;;  %3012 = vmatprep.subr.bf16.mxu0 %v3851_v0 }
 0x1cf   :  { %541 = vadd.xlane.f32.xlu0 %v508_v2 }
 0x1d0   :  { %v363_v5 = vpop.f32.mrb[20].mxu0  ;;  %v419_v7 = vpop.f32.mrb[20].mxu1 }
 0x1d1   :  { %v4260_v8 = vadd.f32 %v363_v5, %v4167_v52  ;;  %v2912_v9 = vpop.f32.mrb[21].mxu0  ;;  %543 = vadd.xlane.f32.xlu1 %v509_v3  ;;  %v4263_v11 = vadd.f32 %v419_v7, %v4167_v52  ;;  %v2940_v13 = vpop.f32.mrb[21].mxu1 }
 0x1d2   :  { %v366_v15 = vpop.f32.mrb[22].mxu0  ;;  %v422_v16 = vpop.f32.mrb[22].mxu1 }
 0x1d3   :  { %v4266_v17 = vadd.f32 %v366_v15, %v4167_v52  ;;  %v2913_v19 = vpop.f32.mrb[23].mxu0  ;;  %445 = vadd.xlane.f32.xlu0 %v4260_v8  ;;  %v2941_v21 = vpop.f32.mrb[23].mxu1  ;;  %v510_v22 = vmul.f32 %v4260_v8, %v4260_v8  ;;  %v524_v61 = vmul.f32 %v4263_v11, %v4263_v11 }
 0x1d5   :  { %447 = vadd.xlane.f32.xlu1 %v4266_v17  ;;  %v511_v25 = vmul.f32 %v4266_v17, %v4266_v17 }
 0x1d7   :  { %545 = vadd.xlane.f32.xlu0 %v510_v22 }
 0x1d8   :  { %v371_v27 = vpop.f32.mrb[24].mxu0 }
 0x1d9   :  { %v4277_v28 = vadd.f32 %v371_v27, %v4167_v52  ;;  %v2916_v29 = vpop.f32.mrb[25].mxu0  ;;  %547 = vadd.xlane.f32.xlu1 %v511_v25 }
 0x1da   :  { %v374_v31 = vpop.f32.mrb[26].mxu0 }
 0x1db   :  { %v4280_v33 = vadd.f32 %v374_v31, %v4167_v52  ;;  %v2917_v35 = vpop.f32.mrb[27].mxu0  ;;  %449 = vadd.xlane.f32.xlu0 %v4277_v28  ;;  %v512_v36 = vmul.f32 %v4277_v28, %v4277_v28  ;;  %v516_v52 = vmul.f32 %v4189_v6, %v4189_v6 }
 0x1dd   :  { %451 = vadd.xlane.f32.xlu1 %v4280_v33  ;;  %v513_v41 = vmul.f32 %v4280_v33, %v4280_v33 }
 0x1df   :  { %549 = vadd.xlane.f32.xlu0 %v512_v36 }
 0x1e1   :  { %551 = vadd.xlane.f32.xlu1 %v513_v41 }
 0x1e3   :  { %453 = vadd.xlane.f32.xlu0 %v4289_v39 }
 0x1e5   :  { %455 = vadd.xlane.f32.xlu1 %v4296_v43 }
 0x1e7   :  { %553 = vadd.xlane.f32.xlu0 %v514_v54 }
 0x1e9   :  { %555 = vadd.xlane.f32.xlu1 %v515_v44 }
 0x1eb   :  { %457 = vadd.xlane.f32.xlu0 %v4189_v6 }
 0x1ed   :  { %459 = vadd.xlane.f32.xlu1 %v4196_v12 }
 0x1ef   :  { %557 = vadd.xlane.f32.xlu0 %v516_v52 }
 0x1f1   :  { %559 = vadd.xlane.f32.xlu1 %v517_v59  ;;  %v777_v59 = vsub.s32 1, %v4158_v49 }
 0x1f3   :  { %461 = vadd.xlane.f32.xlu0 %v4207_v20 }
 0x1f5   :  { %463 = vadd.xlane.f32.xlu1 %v4214_v26 }
 0x1f7   :  { %561 = vadd.xlane.f32.xlu0 %v518_v45 }
 0x1f9   :  { %563 = vadd.xlane.f32.xlu1 %v519_v46  ;;  %v3402_v46 = vld [vmem:[#allocation11 + $0x8] sm:$0xff]  }
 0x1fa   :  { %3013 = vmatpush3.bf16.msra.mxu0 %v3402_v46 }
 0x1fb   :  { %465 = vadd.xlane.f32.xlu0 %v4225_v34  ;;  %3014 = vmatprep.subr.bf16.mxu0 %v3851_v0 }
 0x1fd   :  { %467 = vadd.xlane.f32.xlu1 %v4232_v40 }
 0x1ff   :  { %565 = vadd.xlane.f32.xlu0 %v520_v48 }
 0x201   :  { %567 = vadd.xlane.f32.xlu1 %v521_v53 }
 0x203   :  { %469 = vadd.xlane.f32.xlu0 %v4243_v50 }
 0x205   :  { %471 = vadd.xlane.f32.xlu1 %v4250_v62 }
 0x207   :  { %569 = vadd.xlane.f32.xlu0 %v522_v56 }
 0x209   :  { %571 = vadd.xlane.f32.xlu1 %v523_v57 }
 0x20b   :  { %473 = vadd.xlane.f32.xlu0 %v4263_v11 }
 0x20d   :  { %573 = vadd.xlane.f32.xlu1 %v524_v61 }
 0x238   :  { %v426_v63 = vpop.xlane.xlu0 %425 }
 0x239   :  { %v475_v1 = vmul.f32 0.03125, %v426_v63 }
 0x23a   :  { %v526_v2 = vpop.xlane.xlu1 %525 }
 0x23b   :  { %v600_v3 = vmul.f32 %v475_v1, %v475_v1  ;;  %v575_v5 = vmul.f32 0.03125, %v526_v2  ;;  %v675_v2 = vsub.f32 %v4172_v55, %v475_v1 }
 0x23c   :  { %v428_v7 = vpop.xlane.xlu0 %427 }
 0x23d   :  { %v625_v9 = vsub.f32 %v575_v5, %v600_v3  ;;  %v4332_v13 = vmul.f32 0.03125, %v428_v7  ;;  %v4350_v3 = vrot.slane %v4164_v51, %v777_v59  ;;  %v806_v5 = vsub.s32 2, %v4158_v49 }
 0x23e   :  { %v528_v14 = vpop.xlane.xlu1 %527 }
 0x23f   :  { %v650_v15 = vmax.f32 %v625_v9, 0.0  ;;  %v601_v16 = vmul.f32 %v4332_v13, %v4332_v13  ;;  %v576_v19 = vmul.f32 0.03125, %v528_v14  ;;  %v3403_v14 = vld [vmem:[#allocation11 + $0x10] sm:$0xff]  }
 0x240   :  { %v430_v21 = vpop.xlane.xlu0 %429  ;;  %3015 = vmatpush3.bf16.msra.mxu0 %v3403_v14 }
 0x241   :  { %v700_v22 = vadd.f32 1e-05, %v650_v15  ;;  %v626_v23 = vsub.f32 %v576_v19, %v601_v16  ;;  %v4336_v25 = vmul.f32 0.03125, %v430_v21  ;;  %3016 = vmatprep.subr.bf16.mxu0 %v3851_v0 }
 0x242   :  { %v432_v27 = vpop.xlane.xlu1 %431 }
 0x243   :  { %3441 = vrsqrt.f32 %v700_v22  ;;  %v651_v29 = vmax.f32 %v626_v23, 0.0  ;;  %v4338_v30 = vmul.f32 0.03125, %v432_v27  ;;  %v602_v36 = vmul.f32 %v4336_v25, %v4336_v25 }
 0x244   :  { %v530_v31 = vpop.xlane.xlu0 %529 }
 0x245   :  { %v701_v35 = vadd.f32 1e-05, %v651_v29  ;;  %v577_v37 = vmul.f32 0.03125, %v530_v31  ;;  %v603_v54 = vmul.f32 %v4338_v30, %v4338_v30  ;;  %v4361_v29 = vrot.slane %v4164_v51, %v806_v5 }
 0x246   :  { %v532_v41 = vpop.xlane.xlu1 %531  ;;  %v677_v5 = vsub.f32 %v4186_v4, %v4336_v25 }
 0x247   :  { %3443 = vrsqrt.f32 %v701_v35  ;;  %v627_v44 = vsub.f32 %v577_v37, %v602_v36  ;;  %v578_v52 = vmul.f32 0.03125, %v532_v41  ;;  %v676_v35 = vsub.f32 %v4177_v60, %v4332_v13  ;;  %v3404_v37 = vld [vmem:[#allocation11 + $0x18] sm:$0xff]   ;;  %v3405_v13 = vld [vmem:[#allocation11 + $0x20] sm:$0xff]  }
 0x248   :  { %v434_v45 = vpop.xlane.xlu0 %433  ;;  %3017 = vmatpush3.bf16.msra.mxu0 %v3404_v37 }
 0x249   :  { %v652_v48 = vmax.f32 %v627_v44, 0.0  ;;  %v628_v53 = vsub.f32 %v578_v52, %v603_v54  ;;  %v4345_v56 = vmul.f32 0.03125, %v434_v45  ;;  %3018 = vmatprep.subr.bf16.mxu0 %v3851_v0 }
 0x24a   :  { %v436_v57 = vpop.xlane.xlu1 %435 }
 0x24b   :  { %v702_v61 = vadd.f32 1e-05, %v652_v48  ;;  %v653_v63 = vmax.f32 %v628_v53, 0.0  ;;  %v4353_v7 = vmul.f32 0.03125, %v436_v57  ;;  %v604_v19 = vmul.f32 %v4345_v56, %v4345_v56 }
 0x24c   :  { %v534_v9 = vpop.xlane.xlu0 %533  ;;  %3019 = vmatpush3.bf16.msra.mxu0 %v3405_v13 }
 0x24d   :  { %v3442_v15 = vpop.eup %3441  ;;  %3445 = vrsqrt.f32 %v702_v61  ;;  %v703_v16 = vadd.f32 1e-05, %v653_v63  ;;  %v579_v21 = vmul.f32 0.03125, %v534_v9  ;;  %v605_v22 = vmul.f32 %v4353_v7, %v4353_v7  ;;  %3020 = vmatprep.subr.bf16.mxu0 %v3851_v0 }
 0x24e   :  { %v750_v55 = vmul.f32 %v3442_v15, %v675_v2  ;;  %v536_v1 = vpop.xlane.xlu1 %535 }
 0x24f   :  { %3447 = vrsqrt.f32 %v703_v16  ;;  %v629_v23 = vsub.f32 %v579_v21, %v604_v19  ;;  %v580_v27 = vmul.f32 0.03125, %v536_v1  ;;  %v678_v21 = vsub.f32 %v4192_v10, %v4338_v30 }
 0x250   :  { %v779_v31 = vmul.f32 %v4350_v3, %v750_v55  ;;  %v438_v36 = vpop.xlane.xlu0 %437 }
 0x251   :  { %v3444_v41 = vpop.eup %3443  ;;  %v654_v42 = vmax.f32 %v629_v23, 0.0  ;;  %v630_v54 = vsub.f32 %v580_v27, %v605_v22  ;;  %v4366_v44 = vmul.f32 0.03125, %v438_v36  ;;  %v3406_v22 = vld [vmem:[#allocation11 + $0x28] sm:$0xff]  }
 0x252   :  { %v751_v52 = vmul.f32 %v3444_v41, %v676_v35  ;;  %v440_v59 = vpop.xlane.xlu1 %439  ;;  %v808_v46 = vadd.f32 %v4361_v29, %v779_v31  ;;  %3021 = vmatpush3.bf16.msra.mxu0 %v3406_v22 }
 0x253   :  { %v704_v45 = vadd.f32 1e-05, %v654_v42  ;;  %v655_v51 = vmax.f32 %v630_v54, 0.0  ;;  %v4371_v53 = vmul.f32 0.03125, %v440_v59  ;;  %v606_v61 = vmul.f32 %v4366_v44, %v4366_v44  ;;  %3022 = vmatprep.subr.bf16.mxu0 %v3851_v0 }
 0x254   :  { %v780_v48 = vmul.f32 %v4350_v3, %v751_v52  ;;  %v538_v60 = vpop.xlane.xlu0 %537  ;;  %v3407_v52 = vld [vmem:[#allocation11 + $0x30] sm:$0xff]  }
 0x255   :  { %3449 = vrsqrt.f32 %v704_v45  ;;  %v705_v57 = vadd.f32 1e-05, %v655_v51  ;;  %v581_v63 = vmul.f32 0.03125, %v538_v60  ;;  %v607_v15 = vmul.f32 %v4371_v53, %v4371_v53 }
 0x256   :  { %v809_v2 = vadd.f32 %v4361_v29, %v780_v48  ;;  %v540_v9 = vpop.xlane.xlu1 %539  ;;  %3023 = vmatpush3.bf16.msra.mxu0 %v3407_v52 }
 0x257   :  { %v3446_v14 = vpop.eup %3445  ;;  %3451 = vrsqrt.f32 %v705_v57  ;;  %v631_v16 = vsub.f32 %v581_v63, %v606_v61  ;;  %v582_v19 = vmul.f32 0.03125, %v540_v9  ;;  %3024 = vmatprep.subr.bf16.mxu0 %v3851_v0 }
 0x258   :  { %3453 = vtanh.f32 %v809_v2  ;;  %v752_v55 = vmul.f32 %v3446_v14, %v677_v5  ;;  %v442_v1 = vpop.xlane.xlu0 %441  ;;  %v680_v2 = vsub.f32 %v4210_v24, %v4353_v7 }
 0x259   :  { %v3448_v23 = vpop.eup %3447  ;;  %3455 = vtanh.f32 %v808_v46  ;;  %v656_v27 = vmax.f32 %v631_v16, 0.0  ;;  %v632_v4 = vsub.f32 %v582_v19, %v607_v15  ;;  %v4383_v25 = vmul.f32 0.03125, %v442_v1 }
 0x25a   :  { %v781_v31 = vmul.f32 %v4350_v3, %v752_v55  ;;  %v753_v35 = vmul.f32 %v3448_v23, %v678_v21  ;;  %v444_v36 = vpop.xlane.xlu1 %443  ;;  %v679_v46 = vsub.f32 %v4204_v18, %v4345_v56 }
 0x25b   :  { %v706_v37 = vadd.f32 1e-05, %v656_v27  ;;  %v657_v41 = vmax.f32 %v632_v4, 0.0  ;;  %v608_v30 = vmul.f32 %v4383_v25, %v4383_v25  ;;  %v4390_v42 = vmul.f32 0.03125, %v444_v36 }
 0x25c   :  { %v782_v10 = vmul.f32 %v4350_v3, %v753_v35  ;;  %v542_v54 = vpop.xlane.xlu0 %541  ;;  %v810_v51 = vadd.f32 %v4361_v29, %v781_v31 }
 0x25d   :  { %3457 = vrsqrt.f32 %v706_v37  ;;  %v707_v59 = vadd.f32 1e-05, %v657_v41  ;;  %v583_v45 = vmul.f32 0.03125, %v542_v54  ;;  %v609_v57 = vmul.f32 %v4390_v42, %v4390_v42 }
 0x25e   :  { %v544_v48 = vpop.xlane.xlu1 %543  ;;  %v811_v60 = vadd.f32 %v4361_v29, %v782_v10  ;;  %v681_v41 = vsub.f32 %v4222_v32, %v4366_v44 }
 0x25f   :  { %v3450_v13 = vpop.eup %3449  ;;  %3459 = vrsqrt.f32 %v707_v59  ;;  %v633_v61 = vsub.f32 %v583_v45, %v608_v30  ;;  %v584_v63 = vmul.f32 0.03125, %v544_v48 }
 0x260   :  { %v754_v5 = vmul.f32 %v3450_v13, %v679_v46  ;;  %v446_v9 = vpop.xlane.xlu0 %445  ;;  %3461 = vtanh.f32 %v811_v60 }
 0x261   :  { %v3452_v14 = vpop.eup %3451  ;;  %v658_v15 = vmax.f32 %v633_v61, 0.0  ;;  %v634_v18 = vsub.f32 %v584_v63, %v609_v57  ;;  %v4401_v56 = vmul.f32 0.03125, %v446_v9  ;;  %3463 = vtanh.f32 %v810_v51 }
 0x262   :  { %v3454_v16 = vpop.eup %3453  ;;  %v783_v19 = vmul.f32 %v4350_v3, %v754_v5  ;;  %v755_v21 = vmul.f32 %v3452_v14, %v680_v2  ;;  %v448_v55 = vpop.xlane.xlu1 %447  ;;  %v682_v51 = vsub.f32 %v4228_v38, %v4371_v53 }
 0x263   :  { %v3456_v1 = vpop.eup %3455  ;;  %v708_v22 = vadd.f32 1e-05, %v658_v15  ;;  %v659_v24 = vmax.f32 %v634_v18, 0.0  ;;  %v610_v23 = vmul.f32 %v4401_v56, %v4401_v56  ;;  %v4408_v27 = vmul.f32 0.03125, %v448_v55 }
 0x264   :  { %v784_v7 = vmul.f32 %v4350_v3, %v755_v21  ;;  %v546_v4 = vpop.xlane.xlu0 %545  ;;  %v874_v31 = vpack.c.bf16 %v3454_v16, %v3456_v1  ;;  %v812_v37 = vadd.f32 %v4361_v29, %v783_v19  ;;  %v683_v1 = vsub.f32 %v4240_v47, %v4383_v25 }
 0x265   :  { %3465 = vrsqrt.f32 %v708_v22  ;;  %v709_v35 = vadd.f32 1e-05, %v659_v24  ;;  %v585_v36 = vmul.f32 0.03125, %v546_v4  ;;  %v611_v52 = vmul.f32 %v4408_v27, %v4408_v27 }
 0x266   :  { %2959 = vmatmul.mubr.bf16.vlgmr.msra.gmra.mrb[24].mxu1 %v874_v31  ;;  %v548_v10 = vpop.xlane.xlu1 %547  ;;  %v813_v30 = vadd.f32 %v4361_v29, %v784_v7 }
 0x267   :  { %v3458_v54 = vpop.eup %3457  ;;  %3467 = vrsqrt.f32 %v709_v35  ;;  %v635_v59 = vsub.f32 %v585_v36, %v610_v23  ;;  %v586_v45 = vmul.f32 0.03125, %v548_v10  ;;  %2962 = vmatprep.mubr.msk.bf16.mxu1 %vm3852_vm0, %v3851_v0  ;;  %v684_v35 = vsub.f32 %v4246_v58, %v4390_v42 }
 0x268   :  { %v756_v46 = vmul.f32 %v3458_v54, %v681_v41  ;;  %v450_v48 = vpop.xlane.xlu0 %449  ;;  %3469 = vtanh.f32 %v813_v30 }
 0x269   :  { %v3460_v32 = vpop.eup %3459  ;;  %v660_v44 = vmax.f32 %v635_v59, 0.0  ;;  %v636_v60 = vsub.f32 %v586_v45, %v611_v52  ;;  %v4420_v13 = vmul.f32 0.03125, %v450_v48  ;;  %3471 = vtanh.f32 %v812_v37 }
 0x26a   :  { %v3462_v57 = vpop.eup %3461  ;;  %v785_v61 = vmul.f32 %v4350_v3, %v756_v46  ;;  %v757_v63 = vmul.f32 %v3460_v32, %v682_v51  ;;  %v452_v2 = vpop.xlane.xlu1 %451 }
 0x26b   :  { %v3464_v5 = vpop.eup %3463  ;;  %v710_v9 = vadd.f32 1e-05, %v660_v44  ;;  %v661_v14 = vmax.f32 %v636_v60, 0.0  ;;  %v612_v38 = vmul.f32 %v4420_v13, %v4420_v13  ;;  %v4426_v53 = vmul.f32 0.03125, %v452_v2 }
 0x26c   :  { %v786_v15 = vmul.f32 %v4350_v3, %v757_v63  ;;  %v550_v18 = vpop.xlane.xlu0 %549  ;;  %v875_v16 = vpack.c.bf16 %v3462_v57, %v3464_v5  ;;  %v814_v55 = vadd.f32 %v4361_v29, %v785_v61  ;;  %v685_v63 = vsub.f32 %v4260_v8, %v4401_v56 }
 0x26d   :  { %3473 = vrsqrt.f32 %v710_v9  ;;  %v711_v19 = vadd.f32 1e-05, %v661_v14  ;;  %v587_v21 = vmul.f32 0.03125, %v550_v18  ;;  %v613_v23 = vmul.f32 %v4426_v53, %v4426_v53 }
 0x26e   :  { %2963 = vmatmul.mubr.bf16.gmra.mrb[28].mxu1 %v875_v16  ;;  %v552_v22 = vpop.xlane.xlu1 %551  ;;  %v815_v24 = vadd.f32 %v4361_v29, %v786_v15  ;;  %v686_v18 = vsub.f32 %v4266_v17, %v4408_v27 }
 0x26f   :  { %v3466_v7 = vpop.eup %3465  ;;  %3475 = vrsqrt.f32 %v711_v19  ;;  %v637_v4 = vsub.f32 %v587_v21, %v612_v38  ;;  %v588_v31 = vmul.f32 0.03125, %v552_v22  ;;  %2966 = vmatprep.mubr.msk.bf16.mxu1 %vm3852_vm0, %v3851_v0 }
 0x270   :  { %v758_v36 = vmul.f32 %v3466_v7, %v683_v1  ;;  %v454_v37 = vpop.xlane.xlu0 %453  ;;  %3477 = vtanh.f32 %v815_v24 }
 0x271   :  { %v3468_v47 = vpop.eup %3467  ;;  %v662_v25 = vmax.f32 %v637_v4, 0.0  ;;  %v638_v41 = vsub.f32 %v588_v31, %v613_v23  ;;  %v4438_v10 = vmul.f32 0.03125, %v454_v37  ;;  %3479 = vtanh.f32 %v814_v55 }
 0x272   :  { %v3470_v30 = vpop.eup %3469  ;;  %v787_v54 = vmul.f32 %v4350_v3, %v758_v36  ;;  %v759_v52 = vmul.f32 %v3468_v47, %v684_v35  ;;  %v456_v59 = vpop.xlane.xlu1 %455 }
 0x273   :  { %v3472_v45 = vpop.eup %3471  ;;  %v712_v51 = vadd.f32 1e-05, %v662_v25  ;;  %v663_v46 = vmax.f32 %v638_v41, 0.0  ;;  %v614_v58 = vmul.f32 %v4438_v10, %v4438_v10  ;;  %v4444_v42 = vmul.f32 0.03125, %v456_v59 }
 0x274   :  { %v788_v48 = vmul.f32 %v4350_v3, %v759_v52  ;;  %v554_v32 = vpop.xlane.xlu0 %553  ;;  %v876_v44 = vpack.c.bf16 %v3470_v30, %v3472_v45  ;;  %v816_v61 = vadd.f32 %v4361_v29, %v787_v54  ;;  %v687_v30 = vsub.f32 %v4277_v28, %v4420_v13 }
 0x275   :  { %3481 = vrsqrt.f32 %v712_v51  ;;  %v713_v60 = vadd.f32 1e-05, %v663_v46  ;;  %v589_v57 = vmul.f32 0.03125, %v554_v32  ;;  %v615_v14 = vmul.f32 %v4444_v42, %v4444_v42 }
 0x276   :  { %2967 = vmatmul.mubr.bf16.gmra.mrb[32].mxu1 %v876_v44  ;;  %v556_v2 = vpop.xlane.xlu1 %555  ;;  %v817_v5 = vadd.f32 %v4361_v29, %v788_v48  ;;  %v688_v48 = vsub.f32 %v4280_v33, %v4426_v53 }
 0x277   :  { %v3474_v9 = vpop.eup %3473  ;;  %3483 = vrsqrt.f32 %v713_v60  ;;  %v639_v15 = vsub.f32 %v589_v57, %v614_v58  ;;  %v590_v38 = vmul.f32 0.03125, %v556_v2  ;;  %2970 = vmatprep.mubr.msk.bf16.mxu1 %vm3852_vm0, %v3851_v0 }
 0x278   :  { %v760_v16 = vmul.f32 %v3474_v9, %v685_v63  ;;  %v458_v19 = vpop.xlane.xlu0 %457  ;;  %3485 = vtanh.f32 %v817_v5 }
 0x279   :  { %v3476_v8 = vpop.eup %3475  ;;  %v664_v56 = vmax.f32 %v639_v15, 0.0  ;;  %v640_v21 = vsub.f32 %v590_v38, %v615_v14  ;;  %v4456_v55 = vmul.f32 0.03125, %v458_v19  ;;  %3487 = vtanh.f32 %v816_v61 }
 0x27a   :  { %v3478_v1 = vpop.eup %3477  ;;  %v789_v22 = vmul.f32 %v4350_v3, %v760_v16  ;;  %v761_v24 = vmul.f32 %v3476_v8, %v686_v18  ;;  %v460_v7 = vpop.xlane.xlu1 %459 }
 0x27b   :  { %v3480_v23 = vpop.eup %3479  ;;  %v714_v4 = vadd.f32 1e-05, %v664_v56  ;;  %v665_v31 = vmax.f32 %v640_v21, 0.0  ;;  %v616_v17 = vmul.f32 %v4456_v55, %v4456_v55  ;;  %v4462_v27 = vmul.f32 0.03125, %v460_v7 }
 0x27c   :  { %v790_v35 = vmul.f32 %v4350_v3, %v761_v24  ;;  %v558_v36 = vpop.xlane.xlu0 %557  ;;  %v877_v37 = vpack.c.bf16 %v3478_v1, %v3480_v23  ;;  %v818_v41 = vadd.f32 %v4361_v29, %v789_v22  ;;  %v689_v56 = vsub.f32 %v4289_v39, %v4438_v10 }
 0x27d   :  { %3489 = vrsqrt.f32 %v714_v4  ;;  %v715_v47 = vadd.f32 1e-05, %v665_v31  ;;  %v591_v25 = vmul.f32 0.03125, %v558_v36  ;;  %v617_v45 = vmul.f32 %v4462_v27, %v4462_v27 }
 0x27e   :  { %2971 = vmatmul.mubr.bf16.gmra.mrb[36].mxu1 %v877_v37  ;;  %v560_v54 = vpop.xlane.xlu1 %559  ;;  %v819_v52 = vadd.f32 %v4361_v29, %v790_v35  ;;  %v690_v4 = vsub.f32 %v4296_v43, %v4444_v42 }
 0x27f   :  { %v3482_v59 = vpop.eup %3481  ;;  %3491 = vrsqrt.f32 %v715_v47  ;;  %v641_v51 = vsub.f32 %v591_v25, %v616_v17  ;;  %v592_v46 = vmul.f32 0.03125, %v560_v54  ;;  %2974 = vmatprep.mubr.msk.bf16.mxu1 %vm3852_vm0, %v3851_v0 }
 0x280   :  { %v762_v58 = vmul.f32 %v3482_v59, %v687_v30  ;;  %v462_v32 = vpop.xlane.xlu0 %461  ;;  %3493 = vtanh.f32 %v819_v52 }
 0x281   :  { %v3484_v28 = vpop.eup %3483  ;;  %v666_v13 = vmax.f32 %v641_v51, 0.0  ;;  %v642_v44 = vsub.f32 %v592_v46, %v617_v45  ;;  %v4474_v60 = vmul.f32 0.03125, %v462_v32  ;;  %3495 = vtanh.f32 %v818_v41 }
 0x282   :  { %v3486_v57 = vpop.eup %3485  ;;  %v791_v61 = vmul.f32 %v4350_v3, %v762_v58  ;;  %v763_v63 = vmul.f32 %v3484_v28, %v688_v48  ;;  %v464_v2 = vpop.xlane.xlu1 %463  ;;  %v691_v32 = vsub.f32 %v4189_v6, %v4456_v55 }
 0x283   :  { %v3488_v5 = vpop.eup %3487  ;;  %v716_v9 = vadd.f32 1e-05, %v666_v13  ;;  %v667_v14 = vmax.f32 %v642_v44, 0.0  ;;  %v618_v33 = vmul.f32 %v4474_v60, %v4474_v60  ;;  %v4480_v53 = vmul.f32 0.03125, %v464_v2 }
 0x284   :  { %v792_v15 = vmul.f32 %v4350_v3, %v763_v63  ;;  %v562_v38 = vpop.xlane.xlu0 %561  ;;  %v878_v18 = vpack.c.bf16 %v3486_v57, %v3488_v5  ;;  %v820_v8 = vadd.f32 %v4361_v29, %v791_v61  ;;  %v692_v2 = vsub.f32 %v4196_v12, %v4462_v27 }
 0x285   :  { %3497 = vrsqrt.f32 %v716_v9  ;;  %v717_v16 = vadd.f32 1e-05, %v667_v14  ;;  %v593_v19 = vmul.f32 0.03125, %v562_v38  ;;  %v619_v24 = vmul.f32 %v4480_v53, %v4480_v53 }
 0x286   :  { %2975 = vmatmul.mubr.bf16.gmra.mrb[40].mxu1 %v878_v18  ;;  %v564_v21 = vpop.xlane.xlu1 %563  ;;  %v821_v1 = vadd.f32 %v4361_v29, %v792_v15 }
 0x287   :  { %v3490_v22 = vpop.eup %3489  ;;  %3499 = vrsqrt.f32 %v717_v16  ;;  %v643_v7 = vsub.f32 %v593_v19, %v618_v33  ;;  %v594_v23 = vmul.f32 0.03125, %v564_v21  ;;  %2978 = vmatprep.mubr.msk.bf16.mxu1 %vm3852_vm0, %v3851_v0 }
 0x288   :  { %v764_v31 = vmul.f32 %v3490_v22, %v689_v56  ;;  %v466_v35 = vpop.xlane.xlu0 %465  ;;  %3501 = vtanh.f32 %v821_v1 }
 0x289   :  { %v3492_v39 = vpop.eup %3491  ;;  %v668_v10 = vmax.f32 %v643_v7, 0.0  ;;  %v644_v17 = vsub.f32 %v594_v23, %v619_v24  ;;  %v4492_v36 = vmul.f32 0.03125, %v466_v35  ;;  %3503 = vtanh.f32 %v820_v8 }
 0x28a   :  { %v3494_v37 = vpop.eup %3493  ;;  %v793_v47 = vmul.f32 %v4350_v3, %v764_v31  ;;  %v765_v25 = vmul.f32 %v3492_v39, %v690_v4  ;;  %v468_v41 = vpop.xlane.xlu1 %467  ;;  %v693_v4 = vsub.f32 %v4207_v20, %v4474_v60 }
 0x28b   :  { %v3496_v30 = vpop.eup %3495  ;;  %v718_v54 = vadd.f32 1e-05, %v668_v10  ;;  %v669_v52 = vmax.f32 %v644_v17, 0.0  ;;  %v620_v43 = vmul.f32 %v4492_v36, %v4492_v36  ;;  %v4498_v42 = vmul.f32 0.03125, %v468_v41 }
 0x28c   :  { %v794_v59 = vmul.f32 %v4350_v3, %v765_v25  ;;  %v566_v45 = vpop.xlane.xlu0 %565  ;;  %v879_v51 = vpack.c.bf16 %v3494_v37, %v3496_v30  ;;  %v822_v58 = vadd.f32 %v4361_v29, %v793_v47  ;;  %v694_v47 = vsub.f32 %v4214_v26, %v4480_v53 }
 0x28d   :  { %3505 = vrsqrt.f32 %v718_v54  ;;  %v719_v46 = vadd.f32 1e-05, %v669_v52  ;;  %v595_v48 = vmul.f32 0.03125, %v566_v45  ;;  %v621_v57 = vmul.f32 %v4498_v42, %v4498_v42 }
 0x28e   :  { %2979 = vmatmul.mubr.bf16.gmra.mrb[44].mxu1 %v879_v51  ;;  %v568_v28 = vpop.xlane.xlu1 %567  ;;  %v823_v13 = vadd.f32 %v4361_v29, %v794_v59 }
 0x28f   :  { %v3498_v44 = vpop.eup %3497  ;;  %3507 = vrsqrt.f32 %v719_v46  ;;  %v645_v61 = vsub.f32 %v595_v48, %v620_v43  ;;  %v596_v63 = vmul.f32 0.03125, %v568_v28  ;;  %2982 = vmatprep.mubr.msk.bf16.mxu1 %vm3852_vm0, %v3851_v0 }
 0x290   :  { %v766_v5 = vmul.f32 %v3498_v44, %v691_v32  ;;  %v470_v9 = vpop.xlane.xlu0 %469  ;;  %3509 = vtanh.f32 %v823_v13  ;;  %v695_v44 = vsub.f32 %v4225_v34, %v4492_v36 }
 0x291   :  { %v3500_v6 = vpop.eup %3499  ;;  %v670_v55 = vmax.f32 %v645_v61, 0.0  ;;  %v646_v14 = vsub.f32 %v596_v63, %v621_v57  ;;  %v4510_v15 = vmul.f32 0.03125, %v470_v9  ;;  %3511 = vtanh.f32 %v822_v58 }
 0x292   :  { %v3502_v33 = vpop.eup %3501  ;;  %v795_v38 = vmul.f32 %v4350_v3, %v766_v5  ;;  %v767_v18 = vmul.f32 %v3500_v6, %v692_v2  ;;  %v472_v16 = vpop.xlane.xlu1 %471  ;;  %v696_v5 = vsub.f32 %v4232_v40, %v4498_v42 }
 0x293   :  { %v3504_v19 = vpop.eup %3503  ;;  %v720_v8 = vadd.f32 1e-05, %v670_v55  ;;  %v671_v56 = vmax.f32 %v646_v14, 0.0  ;;  %v4514_v12 = vmul.f32 0.03125, %v472_v16  ;;  %v622_v7 = vmul.f32 %v4510_v15, %v4510_v15 }
 0x294   :  { %v796_v21 = vmul.f32 %v4350_v3, %v767_v18  ;;  %v570_v27 = vpop.xlane.xlu0 %569  ;;  %v880_v1 = vpack.c.bf16 %v3502_v33, %v3504_v19  ;;  %v824_v22 = vadd.f32 %v4361_v29, %v795_v38  ;;  %v697_v19 = vsub.f32 %v4243_v50, %v4510_v15 }
 0x295   :  { %3513 = vrsqrt.f32 %v720_v8  ;;  %v721_v24 = vadd.f32 1e-05, %v671_v56  ;;  %v597_v23 = vmul.f32 0.03125, %v570_v27  ;;  %v623_v10 = vmul.f32 %v4514_v12, %v4514_v12 }
 0x296   :  { %2983 = vmatmul.mubr.bf16.gmra.mrb[48].mxu1 %v880_v1  ;;  %v572_v31 = vpop.xlane.xlu1 %571  ;;  %v825_v35 = vadd.f32 %v4361_v29, %v796_v21  ;;  %3515 = vtanh.f32 %v824_v22  ;;  %v698_v56 = vsub.f32 %v4250_v62, %v4514_v12 }
 0x297   :  { %v3506_v39 = vpop.eup %3505  ;;  %3517 = vrsqrt.f32 %v721_v24  ;;  %v647_v17 = vsub.f32 %v597_v23, %v622_v7  ;;  %v598_v37 = vmul.f32 0.03125, %v572_v31  ;;  %2986 = vmatprep.mubr.msk.bf16.mxu1 %vm3852_vm0, %v3851_v0 }
 0x298   :  { %v768_v25 = vmul.f32 %v3506_v39, %v693_v4  ;;  %v474_v20 = vpop.xlane.xlu0 %473  ;;  %3519 = vtanh.f32 %v825_v35 }
 0x299   :  { %v3508_v60 = vpop.eup %3507  ;;  %v672_v41 = vmax.f32 %v647_v17, 0.0  ;;  %v648_v30 = vsub.f32 %v598_v37, %v623_v10  ;;  %v499_v54 = vmul.f32 0.03125, %v474_v20 }
 0x29a   :  { %v3510_v52 = vpop.eup %3509  ;;  %v797_v59 = vmul.f32 %v4350_v3, %v768_v25  ;;  %v769_v43 = vmul.f32 %v3508_v60, %v694_v47  ;;  %v574_v45 = vpop.xlane.xlu1 %573  ;;  %v3408_v25 = vld [vmem:[#allocation11 + $0x38] sm:$0xff]   ;;  %v3591_v60 = vld [vmem:[%s5096_s10] sm:$0xff] }
 0x29b   :  { %v3512_v51 = vpop.eup %3511  ;;  %v722_v46 = vadd.f32 1e-05, %v672_v41  ;;  %v673_v48 = vmax.f32 %v648_v30, 0.0  ;;  %v624_v58 = vmul.f32 %v499_v54, %v499_v54  ;;  %v599_v28 = vmul.f32 0.03125, %v574_v45  ;;  %3025 = vmatpush3.bf16.msra.mxu0 %v3408_v25 }
 0x29c   :  { %v798_v32 = vmul.f32 %v4350_v3, %v769_v43  ;;  %v881_v26 = vpack.c.bf16 %v3510_v52, %v3512_v51  ;;  %v826_v53 = vadd.f32 %v4361_v29, %v797_v59  ;;  %v699_v23 = vsub.f32 %v4263_v11, %v499_v54  ;;  %3146 = vmatprep.subr.bf16.mxu0 %v3851_v0 }
 0x29d   :  { %3521 = vrsqrt.f32 %v722_v46  ;;  %v723_v13 = vadd.f32 1e-05, %v673_v48  ;;  %v649_v57 = vsub.f32 %v599_v28, %v624_v58 }
 0x29e   :  { %2987 = vmatmul.mubr.bf16.gmra.mrb[52].mxu1 %v881_v26  ;;  %v827_v61 = vadd.f32 %v4361_v29, %v798_v32  ;;  %3523 = vtanh.f32 %v826_v53 }
 0x29f   :  { %v3514_v63 = vpop.eup %3513  ;;  %3525 = vrsqrt.f32 %v723_v13  ;;  %2990 = vmatprep.mubr.msk.bf16.mxu1 %vm3852_vm0, %v3851_v0  ;;  %v674_v6 = vmax.f32 %v649_v57, 0.0 }
 0x2a0   :  { %v3516_v2 = vpop.eup %3515  ;;  %v770_v9 = vmul.f32 %v3514_v63, %v695_v44  ;;  %3527 = vtanh.f32 %v827_v61 }
 0x2a1   :  { %v3518_v55 = vpop.eup %3517  ;;  %v724_v33 = vadd.f32 1e-05, %v674_v6 }
 0x2a2   :  { %v3520_v14 = vpop.eup %3519  ;;  %v799_v34 = vmul.f32 %v4350_v3, %v770_v9  ;;  %v771_v36 = vmul.f32 %v3518_v55, %v696_v5 }
 0x2a3   :  { %v882_v38 = vpack.c.bf16 %v3520_v14, %v3516_v2  ;;  %3529 = vrsqrt.f32 %v724_v33 }
 0x2a4   :  { %v800_v18 = vmul.f32 %v4350_v3, %v771_v36  ;;  %v828_v16 = vadd.f32 %v4361_v29, %v799_v34 }
 0x2a6   :  { %2991 = vmatmul.mubr.bf16.gmra.mrb[56].mxu1 %v882_v38  ;;  %v829_v40 = vadd.f32 %v4361_v29, %v800_v18  ;;  %3531 = vtanh.f32 %v828_v16 }
 0x2a7   :  { %v3522_v42 = vpop.eup %3521  ;;  %2994 = vmatprep.mubr.msk.bf16.mxu1 %vm3852_vm0, %v3851_v0 }
 0x2a8   :  { %v3524_v8 = vpop.eup %3523  ;;  %v772_v21 = vmul.f32 %v3522_v42, %v697_v19  ;;  %3533 = vtanh.f32 %v829_v40 }
 0x2a9   :  { %v3526_v27 = vpop.eup %3525 }
 0x2aa   :  { %v3528_v1 = vpop.eup %3527  ;;  %v801_v22 = vmul.f32 %v4350_v3, %v772_v21  ;;  %v773_v24 = vmul.f32 %v3526_v27, %v698_v56 }
 0x2ab   :  { %v883_v50 = vpack.c.bf16 %v3528_v1, %v3524_v8 }
 0x2ac   :  { %v802_v15 = vmul.f32 %v4350_v3, %v773_v24  ;;  %v830_v7 = vadd.f32 %v4361_v29, %v801_v22 }
 0x2ad   :  { %v3530_v4 = vpop.eup %3529 }
 0x2ae   :  { %2995 = vmatmul.mubr.bf16.gmra.mrb[60].mxu1 %v883_v50  ;;  %v831_v31 = vadd.f32 %v4361_v29, %v802_v15  ;;  %3535 = vtanh.f32 %v830_v7  ;;  %v774_v62 = vmul.f32 %v3530_v4, %v699_v23 }
 0x2af   :  { %2998 = vmatprep.mubr.msk.bf16.mxu1 %vm3852_vm0, %v3851_v0 }
 0x2b0   :  { %3537 = vtanh.f32 %v831_v31  ;;  %v3532_v12 = vpop.eup %3531  ;;  %v803_v35 = vmul.f32 %v4350_v3, %v774_v62 }
 0x2b2   :  { %v3534_v39 = vpop.eup %3533  ;;  %v832_v17 = vadd.f32 %v4361_v29, %v803_v35  ;;  %v889_v29 = vsub.s32 3, %v4158_v49 }
 0x2b3   :  { %v884_v10 = vpack.c.bf16 %v3534_v39, %v3532_v12 }
 0x2b4   :  { %3539 = vtanh.f32 %v832_v17  ;;  %v4568_v41 = vrot.slane %v3591_v60, %v889_v29 }
 0x2b6   :  { %2999 = vmatmul.mubr.bf16.gmra.mrb[64].mxu1 %v884_v10 }
 0x2b7   :  { %3002 = vmatprep.mubr.msk.bf16.mxu1 %vm3852_vm0, %v3851_v0 }
 0x2b8   :  { %v3536_v11 = vpop.eup %3535 }
 0x2ba   :  { %v3538_v37 = vpop.eup %3537 }
 0x2bb   :  { %v885_v47 = vpack.c.bf16 %v3538_v37, %v3536_v11 }
 0x2be   :  { %3003 = vmatmul.mubr.bf16.gmra.mrb[68].mxu1 %v885_v47  ;;  %v3540_v3 = vpop.eup %3539 }
 0x2bf   :  { %3006 = vmatprep.mubr.msk.bf16.mxu1 %vm3852_vm0, %v3851_v0  ;;  %v886_v20 = vpack.c.bf16 %v3540_v3, %v3540_v3 }
 0x2c6   :  { %3007 = vmatmul.mubr.bf16.gmra.mrb[72].mxu1 %v886_v20 }
 0x2c7   :  { %3094 = vmatprep.mubr.msk.bf16.mxu1 %vm3852_vm0, %v3851_v0 }
 0x339   :  { %v973_v30 = vpop.f32.mrb[24].mxu1 }
 0x33a   :  { %v974_v54 = vadd.f32 %v973_v30, %v4568_v41  ;;  %v2960_v52 = vpop.f32.mrb[25].mxu1 }
 0x33b   :  { %v976_v59 = vpop.f32.mrb[26].mxu1 }
 0x33c   :  { %v977_v43 = vadd.f32 %v976_v59, %v4568_v41  ;;  %v2961_v45 = vpop.f32.mrb[27].mxu1  ;;  %v1075_v51 = vmax.f32 %v974_v54, 0.0 }
 0x33e   :  { %v1076_v46 = vmax.f32 %v977_v43, 0.0 }
 0x340   :  { %v1116_v48 = vpack.c.bf16 %v1076_v46, %v1075_v51 }
 0x341   :  { %v981_v58 = vpop.f32.mrb[28].mxu1 }
 0x342   :  { %v982_v32 = vadd.f32 %v981_v58, %v4568_v41  ;;  %v2964_v28 = vpop.f32.mrb[29].mxu1  ;;  %3027 = vmatmul.mubr.bf16.vlgmr.msra.gmra.mrb[28].mxu0 %v1116_v48 }
 0x343   :  { %v984_v26 = vpop.f32.mrb[30].mxu1  ;;  %3030 = vmatprep.mubr.msk.bf16.mxu0 %vm3852_vm0, %v3851_v0 }
 0x344   :  { %v985_v53 = vadd.f32 %v984_v26, %v4568_v41  ;;  %v2965_v13 = vpop.f32.mrb[31].mxu1  ;;  %v1077_v44 = vmax.f32 %v982_v32, 0.0 }
 0x346   :  { %v1078_v57 = vmax.f32 %v985_v53, 0.0 }
 0x348   :  { %v1117_v61 = vpack.c.bf16 %v1078_v57, %v1077_v44 }
 0x349   :  { %v989_v63 = vpop.f32.mrb[32].mxu1 }
 0x34a   :  { %v990_v2 = vadd.f32 %v989_v63, %v4568_v41  ;;  %v2968_v5 = vpop.f32.mrb[33].mxu1  ;;  %3031 = vmatmul.mubr.bf16.gmra.mrb[32].mxu0 %v1117_v61 }
 0x34b   :  { %v992_v9 = vpop.f32.mrb[34].mxu1  ;;  %3034 = vmatprep.mubr.msk.bf16.mxu0 %vm3852_vm0, %v3851_v0 }
 0x34c   :  { %v993_v6 = vadd.f32 %v992_v9, %v4568_v41  ;;  %v2969_v55 = vpop.f32.mrb[35].mxu1  ;;  %v1079_v14 = vmax.f32 %v990_v2, 0.0 }
 0x34e   :  { %v1080_v34 = vmax.f32 %v993_v6, 0.0 }
 0x350   :  { %v1118_v36 = vpack.c.bf16 %v1080_v34, %v1079_v14 }
 0x351   :  { %v997_v33 = vpop.f32.mrb[36].mxu1 }
 0x352   :  { %v998_v38 = vadd.f32 %v997_v33, %v4568_v41  ;;  %v2972_v18 = vpop.f32.mrb[37].mxu1  ;;  %3035 = vmatmul.mubr.bf16.gmra.mrb[36].mxu0 %v1118_v36 }
 0x353   :  { %v1000_v16 = vpop.f32.mrb[38].mxu1  ;;  %3038 = vmatprep.mubr.msk.bf16.mxu0 %vm3852_vm0, %v3851_v0 }
 0x354   :  { %v1001_v19 = vadd.f32 %v1000_v16, %v4568_v41  ;;  %v2973_v40 = vpop.f32.mrb[39].mxu1  ;;  %v1081_v42 = vmax.f32 %v998_v38, 0.0 }
 0x356   :  { %v1082_v8 = vmax.f32 %v1001_v19, 0.0 }
 0x358   :  { %v1119_v56 = vpack.c.bf16 %v1082_v8, %v1081_v42 }
 0x359   :  { %v1005_v21 = vpop.f32.mrb[40].mxu1 }
 0x35a   :  { %v1006_v27 = vadd.f32 %v1005_v21, %v4568_v41  ;;  %v2976_v1 = vpop.f32.mrb[41].mxu1  ;;  %3039 = vmatmul.mubr.bf16.gmra.mrb[40].mxu0 %v1119_v56 }
 0x35b   :  { %v1008_v22 = vpop.f32.mrb[42].mxu1  ;;  %3042 = vmatprep.mubr.msk.bf16.mxu0 %vm3852_vm0, %v3851_v0 }
 0x35c   :  { %v1009_v24 = vadd.f32 %v1008_v22, %v4568_v41  ;;  %v2977_v50 = vpop.f32.mrb[43].mxu1  ;;  %v1083_v15 = vmax.f32 %v1006_v27, 0.0 }
 0x35e   :  { %v1084_v7 = vmax.f32 %v1009_v24, 0.0 }
 0x360   :  { %v1120_v23 = vpack.c.bf16 %v1084_v7, %v1083_v15 }
 0x361   :  { %v1013_v4 = vpop.f32.mrb[44].mxu1 }
 0x362   :  { %v1014_v31 = vadd.f32 %v1013_v4, %v4568_v41  ;;  %v2980_v62 = vpop.f32.mrb[45].mxu1  ;;  %3043 = vmatmul.mubr.bf16.gmra.mrb[44].mxu0 %v1120_v23 }
 0x363   :  { %v1016_v12 = vpop.f32.mrb[46].mxu1  ;;  %3046 = vmatprep.mubr.msk.bf16.mxu0 %vm3852_vm0, %v3851_v0 }
 0x364   :  { %v1017_v35 = vadd.f32 %v1016_v12, %v4568_v41  ;;  %v2981_v39 = vpop.f32.mrb[47].mxu1  ;;  %v1085_v10 = vmax.f32 %v1014_v31, 0.0 }
 0x366   :  { %v1086_v17 = vmax.f32 %v1017_v35, 0.0 }
 0x368   :  { %v1121_v11 = vpack.c.bf16 %v1086_v17, %v1085_v10 }
 0x369   :  { %v1021_v37 = vpop.f32.mrb[48].mxu1 }
 0x36a   :  { %v1022_v47 = vadd.f32 %v1021_v37, %v4568_v41  ;;  %v2984_v25 = vpop.f32.mrb[49].mxu1  ;;  %3047 = vmatmul.mubr.bf16.gmra.mrb[48].mxu0 %v1121_v11  ;;  %v3409_v37 = vld [vmem:[#allocation14] sm:$0xff]  }
 0x36b   :  { %v1024_v3 = vpop.f32.mrb[50].mxu1  ;;  %3050 = vmatprep.mubr.msk.bf16.mxu0 %vm3852_vm0, %v3851_v0  ;;  %3079 = vmatpush3.bf16.msra.mxu1 %v3409_v37  ;;  %v3412_v25 = vld [vmem:[#allocation13 + $0x8] sm:$0xff]  }
 0x36c   :  { %v1025_v20 = vadd.f32 %v1024_v3, %v4568_v41  ;;  %v2985_v29 = vpop.f32.mrb[51].mxu1  ;;  %v1087_v60 = vmax.f32 %v1022_v47, 0.0  ;;  %v3410_v47 = vld [vmem:[#allocation13] sm:$0xff]   ;;  %3080 = vmatprep.subr.bf16.mxu1 %v3851_v0  ;;  %v3413_v3 = vld [vmem:[#allocation14 + $0x10] sm:$0xff]   ;;  %v1502_v37 = vld [vmem:[#allocation5 + $0x18] sm:$0xff] }
 0x36d   :  { %3147 = vmatpush3.bf16.msra.mxu0 %v3410_v47  ;;  %v3415_v29 = vld [vmem:[#allocation14 + $0x18] sm:$0xff]  }
 0x36e   :  { %v1088_v30 = vmax.f32 %v1025_v20, 0.0  ;;  %3148 = vmatprep.subr.bf16.mxu0 %v3851_v0  ;;  %v3414_v20 = vld [vmem:[#allocation13 + $0x10] sm:$0xff]  }
 0x370   :  { %v1122_v54 = vpack.c.bf16 %v1088_v30, %v1087_v60  ;;  %v3416_v60 = vld [vmem:[#allocation13 + $0x18] sm:$0xff]   ;;  %v3417_v30 = vld [vmem:[#allocation14 + $0x20] sm:$0xff]  }
 0x371   :  { %v1029_v52 = vpop.f32.mrb[52].mxu1  ;;  %3149 = vmatpush3.bf16.msra.mxu0 %v3412_v25 }
 0x372   :  { %v1030_v59 = vadd.f32 %v1029_v52, %v4568_v41  ;;  %v2988_v43 = vpop.f32.mrb[53].mxu1  ;;  %3051 = vmatmul.mubr.bf16.gmra.mrb[52].mxu0 %v1122_v54  ;;  %3150 = vmatprep.subr.bf16.mxu0 %v3851_v0  ;;  %v3418_v54 = vld [vmem:[#allocation13 + $0x20] sm:$0xff]   ;;  %v3419_v52 = vld [vmem:[#allocation14 + $0x28] sm:$0xff]  }
 0x373   :  { %v1032_v45 = vpop.f32.mrb[54].mxu1  ;;  %3054 = vmatprep.mubr.msk.bf16.mxu0 %vm3852_vm0, %v3851_v0  ;;  %v3421_v43 = vld [vmem:[#allocation14 + $0x30] sm:$0xff]  }
 0x374   :  { %v1033_v51 = vadd.f32 %v1032_v45, %v4568_v41  ;;  %v2989_v46 = vpop.f32.mrb[55].mxu1  ;;  %v1089_v48 = vmax.f32 %v1030_v59, 0.0  ;;  %v3420_v59 = vld [vmem:[#allocation13 + $0x28] sm:$0xff]   ;;  %v3422_v45 = vld [vmem:[#allocation13 + $0x30] sm:$0xff]  }
 0x375   :  { %3151 = vmatpush3.bf16.msra.mxu0 %v3414_v20 }
 0x376   :  { %v1090_v58 = vmax.f32 %v1033_v51, 0.0  ;;  %3152 = vmatprep.subr.bf16.mxu0 %v3851_v0  ;;  %v4638_v51 = vld [vmem:[%s5097_s11] ss:$0 sm:$0xff] }
 0x378   :  { %v1123_v32 = vpack.c.bf16 %v1090_v58, %v1089_v48 }
 0x379   :  { %v1037_v28 = vpop.f32.mrb[56].mxu1  ;;  %3153 = vmatpush3.bf16.msra.mxu0 %v3416_v60 }
 0x37a   :  { %v1038_v26 = vadd.f32 %v1037_v28, %v4568_v41  ;;  %v2992_v53 = vpop.f32.mrb[57].mxu1  ;;  %3055 = vmatmul.mubr.bf16.gmra.mrb[56].mxu0 %v1123_v32  ;;  %3154 = vmatprep.subr.bf16.mxu0 %v3851_v0 }
 0x37b   :  { %v1040_v13 = vpop.f32.mrb[58].mxu1  ;;  %3058 = vmatprep.mubr.msk.bf16.mxu0 %vm3852_vm0, %v3851_v0 }
 0x37c   :  { %v1041_v44 = vadd.f32 %v1040_v13, %v4568_v41  ;;  %v2993_v57 = vpop.f32.mrb[59].mxu1  ;;  %v1091_v61 = vmax.f32 %v1038_v26, 0.0 }
 0x37d   :  { %3155 = vmatpush3.bf16.msra.mxu0 %v3418_v54 }
 0x37e   :  { %v1092_v63 = vmax.f32 %v1041_v44, 0.0  ;;  %3156 = vmatprep.subr.bf16.mxu0 %v3851_v0 }
 0x380   :  { %v1124_v2 = vpack.c.bf16 %v1092_v63, %v1091_v61 }
 0x381   :  { %v1045_v5 = vpop.f32.mrb[60].mxu1  ;;  %3157 = vmatpush3.bf16.msra.mxu0 %v3420_v59  ;;  %v1504_v59 = vld [vmem:[#allocation5 + $0x28] sm:$0xff] }
 0x382   :  { %v1046_v9 = vadd.f32 %v1045_v5, %v4568_v41  ;;  %v2996_v6 = vpop.f32.mrb[61].mxu1  ;;  %3059 = vmatmul.mubr.bf16.gmra.mrb[60].mxu0 %v1124_v2  ;;  %3158 = vmatprep.subr.bf16.mxu0 %v3851_v0 }
 0x383   :  { %v1048_v55 = vpop.f32.mrb[62].mxu1  ;;  %3062 = vmatprep.mubr.msk.bf16.mxu0 %vm3852_vm0, %v3851_v0 }
 0x384   :  { %v1049_v14 = vadd.f32 %v1048_v55, %v4568_v41  ;;  %v2997_v34 = vpop.f32.mrb[63].mxu1  ;;  %v1093_v36 = vmax.f32 %v1046_v9, 0.0 }
 0x385   :  { %3159 = vmatpush3.bf16.msra.mxu0 %v3422_v45 }
 0x386   :  { %v1094_v33 = vmax.f32 %v1049_v14, 0.0  ;;  %3160 = vmatprep.subr.bf16.mxu0 %v3851_v0 }
 0x388   :  { %v1125_v38 = vpack.c.bf16 %v1094_v33, %v1093_v36 }
 0x389   :  { %v1053_v18 = vpop.f32.mrb[64].mxu1 }
 0x38a   :  { %v1054_v16 = vadd.f32 %v1053_v18, %v4568_v41  ;;  %v3000_v19 = vpop.f32.mrb[65].mxu1  ;;  %3063 = vmatmul.mubr.bf16.gmra.mrb[64].mxu0 %v1125_v38 }
 0x38b   :  { %v1056_v40 = vpop.f32.mrb[66].mxu1  ;;  %3066 = vmatprep.mubr.msk.bf16.mxu0 %vm3852_vm0, %v3851_v0 }
 0x38c   :  { %v1057_v42 = vadd.f32 %v1056_v40, %v4568_v41  ;;  %v3001_v8 = vpop.f32.mrb[67].mxu1  ;;  %v1095_v56 = vmax.f32 %v1054_v16, 0.0 }
 0x38e   :  { %v1096_v21 = vmax.f32 %v1057_v42, 0.0 }
 0x390   :  { %v1126_v27 = vpack.c.bf16 %v1096_v21, %v1095_v56 }
 0x391   :  { %v1061_v1 = vpop.f32.mrb[68].mxu1 }
 0x392   :  { %v1062_v22 = vadd.f32 %v1061_v1, %v4568_v41  ;;  %v3004_v24 = vpop.f32.mrb[69].mxu1  ;;  %3067 = vmatmul.mubr.bf16.gmra.mrb[68].mxu0 %v1126_v27 }
 0x393   :  { %v1064_v50 = vpop.f32.mrb[70].mxu1  ;;  %3070 = vmatprep.mubr.msk.bf16.mxu0 %vm3852_vm0, %v3851_v0 }
 0x394   :  { %v1065_v15 = vadd.f32 %v1064_v50, %v4568_v41  ;;  %v3005_v7 = vpop.f32.mrb[71].mxu1  ;;  %v1097_v23 = vmax.f32 %v1062_v22, 0.0  ;;  %v3423_v22 = vld [vmem:[#allocation14 + $0x38] sm:$0xff]   ;;  %v1499_v50 = vld [vmem:[#allocation5] sm:$0xff] }
 0x396   :  { %v1098_v4 = vmax.f32 %v1065_v15, 0.0  ;;  %v1500_v15 = vld [vmem:[#allocation5 + $0x8] sm:$0xff] }
 0x398   :  { %v1127_v31 = vpack.c.bf16 %v1098_v4, %v1097_v23  ;;  %v3424_v4 = vld [vmem:[#allocation13 + $0x38] sm:$0xff]  }
 0x399   :  { %v1069_v62 = vpop.f32.mrb[72].mxu1  ;;  %3161 = vmatpush3.bf16.msra.mxu0 %v3424_v4  ;;  %v1509_v4 = vld [vmem:[#allocation5 + $0x50] sm:$0xff] }
 0x39a   :  { %v1070_v12 = vadd.f32 %v1069_v62, %v4568_v41  ;;  %v3008_v35 = vpop.f32.mrb[73].mxu1  ;;  %3071 = vmatmul.mubr.bf16.gmra.mrb[72].mxu0 %v1127_v31  ;;  %v3411_v41 = vld [vmem:[#allocation14 + $0x8] sm:$0xff]   ;;  %v1540_v31 = vpack.c.bf16 %v1500_v15, %v1499_v50  ;;  %3282 = vmatprep.subr.bf16.mxu0 %v3851_v0 }
 0x39b   :  { %v1072_v39 = vpop.f32.mrb[74].mxu1  ;;  %3074 = vmatprep.mubr.msk.bf16.mxu0 %vm3852_vm0, %v3851_v0  ;;  %3081 = vmatpush3.bf16.msra.mxu1 %v3411_v41 }
 0x39c   :  { %v1099_v10 = vmax.f32 %v1070_v12, 0.0  ;;  %v3009_v17 = vpop.f32.mrb[75].mxu1  ;;  %3082 = vmatprep.subr.bf16.mxu1 %v3851_v0 }
 0x39e   :  { %v1128_v11 = vpack.c.bf16 %v1099_v10, %v1099_v10 }
 0x39f   :  { %3083 = vmatpush3.bf16.msra.mxu1 %v3413_v3 }
 0x3a0   :  { %3084 = vmatprep.subr.bf16.mxu1 %v3851_v0 }
 0x3a2   :  { %3075 = vmatmul.mubr.bf16.gmra.mrb[76].mxu0 %v1128_v11  ;;  %v1501_v11 = vld [vmem:[#allocation5 + $0x10] sm:$0xff] }
 0x3a3   :  { %3162 = vmatprep.mubr.msk.bf16.mxu0 %vm3852_vm0, %v3851_v0  ;;  %3085 = vmatpush3.bf16.msra.mxu1 %v3415_v29  ;;  %v1541_v25 = vpack.c.bf16 %v1502_v37, %v1501_v11 }
 0x3a4   :  { %3086 = vmatprep.subr.bf16.mxu1 %v3851_v0 }
 0x3a7   :  { %3087 = vmatpush3.bf16.msra.mxu1 %v3417_v30 }
 0x3a8   :  { %3088 = vmatprep.subr.bf16.mxu1 %v3851_v0 }
 0x3ab   :  { %3089 = vmatpush3.bf16.msra.mxu1 %v3419_v52  ;;  %v1503_v52 = vld [vmem:[#allocation5 + $0x20] sm:$0xff] }
 0x3ac   :  { %3090 = vmatprep.subr.bf16.mxu1 %v3851_v0 }
 0x3af   :  { %3091 = vmatpush3.bf16.msra.mxu1 %v3421_v43 }
 0x3b0   :  { %3092 = vmatprep.subr.bf16.mxu1 %v3851_v0 }
 0x3b3   :  { %3093 = vmatpush3.bf16.msra.mxu1 %v3423_v22 }
 0x3b4   :  { %3214 = vmatprep.subr.bf16.mxu1 %v3851_v0 }
 0x3b6   :  { %3095 = vmatmul.mubr.bf16.vlgmr.msra.gmra.mrb[76].mxu1 %v1540_v31  ;;  %v1510_v31 = vld [vmem:[#allocation5 + $0x58] sm:$0xff] }
 0x3b7   :  { %3098 = vmatprep.mubr.msk.bf16.mxu1 %vm3852_vm0, %v3851_v0 }
 0x3be   :  { %3099 = vmatmul.mubr.bf16.gmra.mrb[80].mxu1 %v1541_v25 }
 0x3bf   :  { %3102 = vmatprep.mubr.msk.bf16.mxu1 %vm3852_vm0, %v3851_v0 }
 0x415   :  { %v1218_v46 = vpop.f32.mrb[28].mxu0 }
 0x416   :  { %v4641_v48 = vadd.f32 %v4638_v51, %v1218_v46  ;;  %v3028_v58 = vpop.f32.mrb[29].mxu0  ;;  %v1542_v46 = vpack.c.bf16 %v1504_v59, %v1503_v52 }
 0x417   :  { %v1221_v32 = vpop.f32.mrb[30].mxu0 }
 0x418   :  { %v4644_v28 = vadd.f32 %v4638_v51, %v1221_v32  ;;  %v3029_v26 = vpop.f32.mrb[31].mxu0  ;;  %v1320_v53 = vmul.f32 %v4641_v48, %v4641_v48  ;;  %3103 = vmatmul.mubr.bf16.gmra.mrb[84].mxu1 %v1542_v46 }
 0x419   :  { %3106 = vmatprep.mubr.msk.bf16.mxu1 %vm3852_vm0, %v3851_v0 }
 0x41a   :  { %1345 = vadd.xlane.f32.xlu0 %v1320_v53  ;;  %v1321_v13 = vmul.f32 %v4644_v28, %v4644_v28 }
 0x41c   :  { %1347 = vadd.xlane.f32.xlu1 %v1321_v13 }
 0x41d   :  { %v1226_v44 = vpop.f32.mrb[32].mxu0 }
 0x41e   :  { %v4651_v57 = vadd.f32 %v4638_v51, %v1226_v44  ;;  %v3032_v61 = vpop.f32.mrb[33].mxu0 }
 0x41f   :  { %v1229_v63 = vpop.f32.mrb[34].mxu0  ;;  %v1505_v61 = vld [vmem:[#allocation5 + $0x30] sm:$0xff] }
 0x420   :  { %v4654_v2 = vadd.f32 %v4638_v51, %v1229_v63  ;;  %v3033_v5 = vpop.f32.mrb[35].mxu0  ;;  %v1322_v9 = vmul.f32 %v4651_v57, %v4651_v57  ;;  %v1506_v63 = vld [vmem:[#allocation5 + $0x38] sm:$0xff] }
 0x422   :  { %1349 = vadd.xlane.f32.xlu0 %v1322_v9  ;;  %v1323_v6 = vmul.f32 %v4654_v2, %v4654_v2 }
 0x424   :  { %1351 = vadd.xlane.f32.xlu1 %v1323_v6  ;;  %v1543_v6 = vpack.c.bf16 %v1506_v63, %v1505_v61 }
 0x425   :  { %v1234_v55 = vpop.f32.mrb[36].mxu0 }
 0x426   :  { %v4661_v14 = vadd.f32 %v4638_v51, %v1234_v55  ;;  %v3036_v34 = vpop.f32.mrb[37].mxu0  ;;  %3107 = vmatmul.mubr.bf16.gmra.mrb[88].mxu1 %v1543_v6 }
 0x427   :  { %v1237_v36 = vpop.f32.mrb[38].mxu0  ;;  %3110 = vmatprep.mubr.msk.bf16.mxu1 %vm3852_vm0, %v3851_v0 }
 0x428   :  { %v4664_v33 = vadd.f32 %v4638_v51, %v1237_v36  ;;  %v3037_v38 = vpop.f32.mrb[39].mxu0  ;;  %v1324_v18 = vmul.f32 %v4661_v14, %v4661_v14 }
 0x42a   :  { %1353 = vadd.xlane.f32.xlu0 %v1324_v18  ;;  %v1325_v16 = vmul.f32 %v4664_v33, %v4664_v33 }
 0x42c   :  { %1355 = vadd.xlane.f32.xlu1 %v1325_v16 }
 0x42d   :  { %v1242_v19 = vpop.f32.mrb[40].mxu0 }
 0x42e   :  { %v4671_v40 = vadd.f32 %v4638_v51, %v1242_v19  ;;  %v3040_v42 = vpop.f32.mrb[41].mxu0  ;;  %v1507_v19 = vld [vmem:[#allocation5 + $0x40] sm:$0xff] }
 0x42f   :  { %v1245_v8 = vpop.f32.mrb[42].mxu0  ;;  %v1508_v42 = vld [vmem:[#allocation5 + $0x48] sm:$0xff] }
 0x430   :  { %v4674_v56 = vadd.f32 %v4638_v51, %v1245_v8  ;;  %v3041_v21 = vpop.f32.mrb[43].mxu0  ;;  %v1326_v27 = vmul.f32 %v4671_v40, %v4671_v40 }
 0x432   :  { %1357 = vadd.xlane.f32.xlu0 %v1326_v27  ;;  %v1327_v1 = vmul.f32 %v4674_v56, %v4674_v56  ;;  %v1544_v27 = vpack.c.bf16 %v1508_v42, %v1507_v19  ;;  %v1516_v19 = vld [vmem:[#allocation5 + $0x88] sm:$0xff] }
 0x434   :  { %1359 = vadd.xlane.f32.xlu1 %v1327_v1  ;;  %3111 = vmatmul.mubr.bf16.gmra.mrb[92].mxu1 %v1544_v27 }
 0x435   :  { %v1250_v24 = vpop.f32.mrb[44].mxu0  ;;  %3114 = vmatprep.mubr.msk.bf16.mxu1 %vm3852_vm0, %v3851_v0 }
 0x436   :  { %v4681_v7 = vadd.f32 %v4638_v51, %v1250_v24  ;;  %v3044_v23 = vpop.f32.mrb[45].mxu0 }
 0x437   :  { %v1253_v62 = vpop.f32.mrb[46].mxu0 }
 0x438   :  { %v4685_v12 = vadd.f32 %v4638_v51, %v1253_v62  ;;  %v3045_v35 = vpop.f32.mrb[47].mxu0  ;;  %v1328_v39 = vmul.f32 %v4681_v7, %v4681_v7 }
 0x43a   :  { %1361 = vadd.xlane.f32.xlu0 %v1328_v39  ;;  %v1329_v10 = vmul.f32 %v4685_v12, %v4685_v12  ;;  %v1545_v39 = vpack.c.bf16 %v1510_v31, %v1509_v4  ;;  %v1520_v31 = vld [vmem:[#allocation5 + $0xa8] sm:$0xff] }
 0x43c   :  { %1363 = vadd.xlane.f32.xlu1 %v1329_v10  ;;  %3115 = vmatmul.mubr.bf16.gmra.mrb[96].mxu1 %v1545_v39  ;;  %v1521_v39 = vld [vmem:[#allocation5 + $0xb0] sm:$0xff] }
 0x43d   :  { %v1258_v17 = vpop.f32.mrb[48].mxu0  ;;  %3118 = vmatprep.mubr.msk.bf16.mxu1 %vm3852_vm0, %v3851_v0 }
 0x43e   :  { %v4695_v47 = vadd.f32 %v4638_v51, %v1258_v17  ;;  %v3048_v41 = vpop.f32.mrb[49].mxu0 }
 0x43f   :  { %v1261_v3 = vpop.f32.mrb[50].mxu0 }
 0x440   :  { %v4698_v20 = vadd.f32 %v4638_v51, %v1261_v3  ;;  %v3049_v29 = vpop.f32.mrb[51].mxu0  ;;  %v1330_v60 = vmul.f32 %v4695_v47, %v4695_v47  ;;  %v1511_v3 = vld [vmem:[#allocation5 + $0x60] sm:$0xff] }
 0x441   :  { %v1512_v29 = vld [vmem:[#allocation5 + $0x68] sm:$0xff] }
 0x442   :  { %1365 = vadd.xlane.f32.xlu0 %v1330_v60  ;;  %v1331_v30 = vmul.f32 %v4698_v20, %v4698_v20 }
 0x444   :  { %1367 = vadd.xlane.f32.xlu1 %v1331_v30 }
 0x445   :  { %v1266_v54 = vpop.f32.mrb[52].mxu0 }
 0x446   :  { %v4707_v43 = vadd.f32 %v4638_v51, %v1266_v54  ;;  %v3052_v45 = vpop.f32.mrb[53].mxu0  ;;  %v1546_v54 = vpack.c.bf16 %v1512_v29, %v1511_v3  ;;  %v3426_v3 = vld [vmem:[#allocation16 + $0x8] sm:$0xff]   ;;  %v3427_v29 = vld [vmem:[#allocation16 + $0x10] sm:$0xff]  }
 0x447   :  { %v1269_v58 = vpop.f32.mrb[54].mxu0 }
 0x448   :  { %v4710_v32 = vadd.f32 %v4638_v51, %v1269_v58  ;;  %v3053_v26 = vpop.f32.mrb[55].mxu0  ;;  %v1332_v53 = vmul.f32 %v4707_v43, %v4707_v43  ;;  %3119 = vmatmul.mubr.bf16.gmra.mrb[100].mxu1 %v1546_v54 }
 0x449   :  { %3122 = vmatprep.mubr.msk.bf16.mxu1 %vm3852_vm0, %v3851_v0 }
 0x44a   :  { %1369 = vadd.xlane.f32.xlu0 %v1332_v53  ;;  %v1333_v13 = vmul.f32 %v4710_v32, %v4710_v32  ;;  %v1513_v53 = vld [vmem:[#allocation5 + $0x70] sm:$0xff] }
 0x44c   :  { %1371 = vadd.xlane.f32.xlu1 %v1333_v13  ;;  %v1514_v13 = vld [vmem:[#allocation5 + $0x78] sm:$0xff] }
 0x44d   :  { %v1274_v44 = vpop.f32.mrb[56].mxu0  ;;  %v1547_v63 = vpack.c.bf16 %v1514_v13, %v1513_v53 }
 0x44e   :  { %v4719_v5 = vadd.f32 %v4638_v51, %v1274_v44  ;;  %v3056_v9 = vpop.f32.mrb[57].mxu0 }
 0x44f   :  { %v1277_v55 = vpop.f32.mrb[58].mxu0 }
 0x450   :  { %v4722_v34 = vadd.f32 %v4638_v51, %v1277_v55  ;;  %v3057_v36 = vpop.f32.mrb[59].mxu0  ;;  %v1334_v38 = vmul.f32 %v4719_v5, %v4719_v5  ;;  %3123 = vmatmul.mubr.bf16.gmra.mrb[104].mxu1 %v1547_v63  ;;  %v3431_v63 = vld [vmem:[#allocation16 + $0x30] sm:$0xff]  }
 0x451   :  { %3126 = vmatprep.mubr.msk.bf16.mxu1 %vm3852_vm0, %v3851_v0 }
 0x452   :  { %1373 = vadd.xlane.f32.xlu0 %v1334_v38  ;;  %v1335_v18 = vmul.f32 %v4722_v34, %v4722_v34 }
 0x454   :  { %1375 = vadd.xlane.f32.xlu1 %v1335_v18 }
 0x455   :  { %v1282_v16 = vpop.f32.mrb[60].mxu0 }
 0x456   :  { %v4731_v8 = vadd.f32 %v4638_v51, %v1282_v16  ;;  %v3060_v21 = vpop.f32.mrb[61].mxu0  ;;  %v1515_v16 = vld [vmem:[#allocation5 + $0x80] sm:$0xff] }
 0x457   :  { %v1285_v1 = vpop.f32.mrb[62].mxu0  ;;  %v1548_v27 = vpack.c.bf16 %v1516_v19, %v1515_v16 }
 0x458   :  { %v4734_v22 = vadd.f32 %v4638_v51, %v1285_v1  ;;  %v3061_v24 = vpop.f32.mrb[63].mxu0  ;;  %v1336_v50 = vmul.f32 %v4731_v8, %v4731_v8 }
 0x459   :  { %3127 = vmatmul.mubr.bf16.gmra.mrb[108].mxu1 %v1548_v27 }
 0x45a   :  { %1377 = vadd.xlane.f32.xlu0 %v1336_v50  ;;  %v1337_v15 = vmul.f32 %v4734_v22, %v4734_v22  ;;  %3130 = vmatprep.mubr.msk.bf16.mxu1 %vm3852_vm0, %v3851_v0 }
 0x45c   :  { %1379 = vadd.xlane.f32.xlu1 %v1337_v15  ;;  %v1517_v15 = vld [vmem:[#allocation5 + $0x90] sm:$0xff] }
 0x45d   :  { %v1290_v23 = vpop.f32.mrb[64].mxu0 }
 0x45e   :  { %v4743_v62 = vadd.f32 %v4638_v51, %v1290_v23  ;;  %v3064_v35 = vpop.f32.mrb[65].mxu0  ;;  %v1518_v23 = vld [vmem:[#allocation5 + $0x98] sm:$0xff] }
 0x45f   :  { %v1293_v10 = vpop.f32.mrb[66].mxu0  ;;  %v1549_v4 = vpack.c.bf16 %v1518_v23, %v1517_v15 }
 0x460   :  { %v4746_v17 = vadd.f32 %v4638_v51, %v1293_v10  ;;  %v3065_v11 = vpop.f32.mrb[67].mxu0  ;;  %v1338_v37 = vmul.f32 %v4743_v62, %v4743_v62  ;;  %v1522_v10 = vld [vmem:[#allocation5 + $0xb8] sm:$0xff] }
 0x461   :  { %3131 = vmatmul.mubr.bf16.gmra.mrb[112].mxu1 %v1549_v4  ;;  %v1551_v11 = vpack.c.bf16 %v1522_v10, %v1521_v39 }
 0x462   :  { %1381 = vadd.xlane.f32.xlu0 %v1338_v37  ;;  %v1339_v41 = vmul.f32 %v4746_v17, %v4746_v17  ;;  %3134 = vmatprep.mubr.msk.bf16.mxu1 %vm3852_vm0, %v3851_v0  ;;  %v1523_v37 = vld [vmem:[#allocation5 + $0xc0] sm:$0xff] }
 0x464   :  { %1383 = vadd.xlane.f32.xlu1 %v1339_v41  ;;  %v1552_v41 = vpack.c.bf16 %v1523_v37, %v1523_v37 }
 0x465   :  { %v1298_v25 = vpop.f32.mrb[68].mxu0 }
 0x466   :  { %v4755_v60 = vadd.f32 %v4638_v51, %v1298_v25  ;;  %v3068_v30 = vpop.f32.mrb[69].mxu0  ;;  %v3425_v25 = vld [vmem:[#allocation16] sm:$0xff]  }
 0x467   :  { %v1301_v52 = vpop.f32.mrb[70].mxu0  ;;  %3215 = vmatpush3.bf16.msra.mxu1 %v3425_v25  ;;  %v3428_v30 = vld [vmem:[#allocation16 + $0x18] sm:$0xff]  }
 0x468   :  { %v4758_v59 = vadd.f32 %v4638_v51, %v1301_v52  ;;  %v3069_v45 = vpop.f32.mrb[71].mxu0  ;;  %v1340_v46 = vmul.f32 %v4755_v60, %v4755_v60  ;;  %3216 = vmatprep.subr.bf16.mxu1 %v3851_v0 }
 0x46a   :  { %1385 = vadd.xlane.f32.xlu0 %v1340_v46  ;;  %v1341_v58 = vmul.f32 %v4758_v59, %v4758_v59  ;;  %v3429_v46 = vld [vmem:[#allocation16 + $0x20] sm:$0xff]  }
 0x46b   :  { %3217 = vmatpush3.bf16.msra.mxu1 %v3426_v3 }
 0x46c   :  { %1387 = vadd.xlane.f32.xlu1 %v1341_v58  ;;  %3218 = vmatprep.subr.bf16.mxu1 %v3851_v0 }
 0x46d   :  { %v1306_v26 = vpop.f32.mrb[72].mxu0 }
 0x46e   :  { %v4767_v44 = vadd.f32 %v4638_v51, %v1306_v26  ;;  %v3072_v61 = vpop.f32.mrb[73].mxu0  ;;  %v3430_v26 = vld [vmem:[#allocation16 + $0x28] sm:$0xff]  }
 0x46f   :  { %v1309_v9 = vpop.f32.mrb[74].mxu0  ;;  %3219 = vmatpush3.bf16.msra.mxu1 %v3427_v29 }
 0x470   :  { %v4770_v6 = vadd.f32 %v4638_v51, %v1309_v9  ;;  %v3073_v55 = vpop.f32.mrb[75].mxu0  ;;  %v1342_v36 = vmul.f32 %v4767_v44, %v4767_v44  ;;  %3220 = vmatprep.subr.bf16.mxu1 %v3851_v0 }
 0x472   :  { %1389 = vadd.xlane.f32.xlu0 %v1342_v36  ;;  %v1343_v38 = vmul.f32 %v4770_v6, %v4770_v6  ;;  %v3432_v36 = vld [vmem:[#allocation16 + $0x38] sm:$0xff]  }
 0x473   :  { %3221 = vmatpush3.bf16.msra.mxu1 %v3428_v30 }
 0x474   :  { %1391 = vadd.xlane.f32.xlu1 %v1343_v38  ;;  %3222 = vmatprep.subr.bf16.mxu1 %v3851_v0 }
 0x475   :  { %v1314_v18 = vpop.f32.mrb[76].mxu0 }
 0x476   :  { %v4779_v42 = vadd.f32 %v4638_v51, %v1314_v18  ;;  %v3076_v21 = vpop.f32.mrb[77].mxu0  ;;  %v1519_v51 = vld [vmem:[#allocation5 + $0xa0] sm:$0xff] }
 0x477   :  { %v1317_v1 = vpop.f32.mrb[78].mxu0  ;;  %v1550_v35 = vpack.c.bf16 %v1520_v31, %v1519_v51  ;;  %3223 = vmatpush3.bf16.msra.mxu1 %v3429_v46 }
 0x478   :  { %v3077_v24 = vpop.f32.mrb[79].mxu0  ;;  %v1344_v50 = vmul.f32 %v4779_v42, %v4779_v42  ;;  %3224 = vmatprep.subr.bf16.mxu1 %v3851_v0 }
 0x479   :  { %3135 = vmatmul.mubr.bf16.gmra.mrb[116].mxu1 %v1550_v35 }
 0x47a   :  { %1393 = vadd.xlane.f32.xlu0 %v1344_v50  ;;  %3138 = vmatprep.mubr.msk.bf16.mxu1 %vm3852_vm0, %v3851_v0 }
 0x47b   :  { %3225 = vmatpush3.bf16.msra.mxu1 %v3430_v26 }
 0x47c   :  { %3226 = vmatprep.subr.bf16.mxu1 %v3851_v0 }
 0x47f   :  { %3227 = vmatpush3.bf16.msra.mxu1 %v3431_v63 }
 0x480   :  { %3228 = vmatprep.subr.bf16.mxu1 %v3851_v0 }
 0x481   :  { %3139 = vmatmul.mubr.bf16.gmra.mrb[120].mxu1 %v1551_v11 }
 0x482   :  { %3142 = vmatprep.mubr.msk.bf16.mxu1 %vm3852_vm0, %v3851_v0 }
 0x483   :  { %3229 = vmatpush3.bf16.msra.mxu1 %v3432_v36 }
 0x489   :  { %3143 = vmatmul.mubr.bf16.gmra.mrb[124].mxu1 %v1552_v41 }
 0x48a   :  { %3230 = vmatprep.mubr.msk.bf16.mxu1 %vm3852_vm0, %v3851_v0 }
 0x4a7   :  { %v1346_v54 = vpop.xlane.xlu0 %1345 }
 0x4a8   :  { %v1395_v52 = vmax.f32 %v1346_v54, 1e-24 }
 0x4a9   :  { %v1348_v45 = vpop.xlane.xlu1 %1347 }
 0x4aa   :  { %3541 = vrsqrt.f32 %v1395_v52  ;;  %v1396_v58 = vmax.f32 %v1348_v45, 1e-24 }
 0x4ac   :  { %3543 = vrsqrt.f32 %v1396_v58 }
 0x4af   :  { %v1350_v53 = vpop.xlane.xlu0 %1349 }
 0x4b0   :  { %v1397_v13 = vmax.f32 %v1350_v53, 1e-24 }
 0x4b1   :  { %v1352_v61 = vpop.xlane.xlu1 %1351 }
 0x4b2   :  { %3545 = vrsqrt.f32 %v1397_v13  ;;  %v1398_v9 = vmax.f32 %v1352_v61, 1e-24 }
 0x4b4   :  { %v3542_v55 = vpop.eup %3541  ;;  %3547 = vrsqrt.f32 %v1398_v9 }
 0x4b5   :  { %v1445_v18 = vmul.f32 %v3542_v55, %v4641_v48 }
 0x4b6   :  { %v3544_v38 = vpop.eup %3543 }
 0x4b7   :  { %v1446_v16 = vmul.f32 %v3544_v38, %v4644_v28  ;;  %v1354_v19 = vpop.xlane.xlu0 %1353 }
 0x4b8   :  { %v1399_v21 = vmax.f32 %v1354_v19, 1e-24 }
 0x4b9   :  { %v1356_v27 = vpop.xlane.xlu1 %1355  ;;  %v1486_v1 = vpack.c.bf16 %v1446_v16, %v1445_v18 }
 0x4ba   :  { %3549 = vrsqrt.f32 %v1399_v21  ;;  %v1400_v24 = vmax.f32 %v1356_v27, 1e-24 }
 0x4bb   :  { %3163 = vmatmul.mubr.bf16.vlgmr.msra.gmra.mrb[80].mxu0 %v1486_v1 }
 0x4bc   :  { %v3546_v50 = vpop.eup %3545  ;;  %3551 = vrsqrt.f32 %v1400_v24  ;;  %3166 = vmatprep.mubr.msk.bf16.mxu0 %vm3852_vm0, %v3851_v0 }
 0x4bd   :  { %v1447_v4 = vmul.f32 %v3546_v50, %v4651_v57 }
 0x4be   :  { %v3548_v15 = vpop.eup %3547 }
 0x4bf   :  { %v1358_v23 = vpop.xlane.xlu0 %1357  ;;  %v1448_v48 = vmul.f32 %v3548_v15, %v4654_v2 }
 0x4c0   :  { %v1401_v28 = vmax.f32 %v1358_v23, 1e-24 }
 0x4c1   :  { %v1360_v51 = vpop.xlane.xlu1 %1359  ;;  %v1487_v31 = vpack.c.bf16 %v1448_v48, %v1447_v4 }
 0x4c2   :  { %3553 = vrsqrt.f32 %v1401_v28  ;;  %v1402_v35 = vmax.f32 %v1360_v51, 1e-24 }
 0x4c3   :  { %3167 = vmatmul.mubr.bf16.gmra.mrb[84].mxu0 %v1487_v31 }
 0x4c4   :  { %v3550_v39 = vpop.eup %3549  ;;  %3555 = vrsqrt.f32 %v1402_v35  ;;  %3170 = vmatprep.mubr.msk.bf16.mxu0 %vm3852_vm0, %v3851_v0 }
 0x4c5   :  { %v1449_v37 = vmul.f32 %v3550_v39, %v4661_v14 }
 0x4c6   :  { %v3552_v10 = vpop.eup %3551 }
 0x4c7   :  { %v1362_v11 = vpop.xlane.xlu0 %1361  ;;  %v1450_v41 = vmul.f32 %v3552_v10, %v4664_v33 }
 0x4c8   :  { %v1403_v57 = vmax.f32 %v1362_v11, 1e-24 }
 0x4c9   :  { %v1364_v25 = vpop.xlane.xlu1 %1363  ;;  %v1488_v2 = vpack.c.bf16 %v1450_v41, %v1449_v37 }
 0x4ca   :  { %3557 = vrsqrt.f32 %v1403_v57  ;;  %v1404_v3 = vmax.f32 %v1364_v25, 1e-24 }
 0x4cb   :  { %3171 = vmatmul.mubr.bf16.gmra.mrb[88].mxu0 %v1488_v2 }
 0x4cc   :  { %v3554_v29 = vpop.eup %3553  ;;  %3559 = vrsqrt.f32 %v1404_v3  ;;  %3174 = vmatprep.mubr.msk.bf16.mxu0 %vm3852_vm0, %v3851_v0 }
 0x4cd   :  { %v1451_v52 = vmul.f32 %v3554_v29, %v4671_v40 }
 0x4ce   :  { %v3556_v30 = vpop.eup %3555 }
 0x4cf   :  { %v1366_v54 = vpop.xlane.xlu0 %1365  ;;  %v1452_v45 = vmul.f32 %v3556_v30, %v4674_v56 }
 0x4d0   :  { %v1405_v14 = vmax.f32 %v1366_v54, 1e-24 }
 0x4d1   :  { %v1368_v46 = vpop.xlane.xlu1 %1367  ;;  %v1489_v33 = vpack.c.bf16 %v1452_v45, %v1451_v52 }
 0x4d2   :  { %3561 = vrsqrt.f32 %v1405_v14  ;;  %v1406_v58 = vmax.f32 %v1368_v46, 1e-24 }
 0x4d3   :  { %3175 = vmatmul.mubr.bf16.gmra.mrb[92].mxu0 %v1489_v33 }
 0x4d4   :  { %v3558_v26 = vpop.eup %3557  ;;  %3563 = vrsqrt.f32 %v1406_v58  ;;  %3178 = vmatprep.mubr.msk.bf16.mxu0 %vm3852_vm0, %v3851_v0 }
 0x4d5   :  { %v1453_v61 = vmul.f32 %v3558_v26, %v4681_v7 }
 0x4d6   :  { %v3560_v53 = vpop.eup %3559 }
 0x4d7   :  { %v1370_v13 = vpop.xlane.xlu0 %1369  ;;  %v1454_v63 = vmul.f32 %v3560_v53, %v4685_v12 }
 0x4d8   :  { %v1407_v40 = vmax.f32 %v1370_v13, 1e-24 }
 0x4d9   :  { %v1372_v9 = vpop.xlane.xlu1 %1371  ;;  %v1490_v56 = vpack.c.bf16 %v1454_v63, %v1453_v61 }
 0x4da   :  { %3565 = vrsqrt.f32 %v1407_v40  ;;  %v1408_v55 = vmax.f32 %v1372_v9, 1e-24 }
 0x4db   :  { %3179 = vmatmul.mubr.bf16.gmra.mrb[96].mxu0 %v1490_v56 }
 0x4dc   :  { %v3562_v36 = vpop.eup %3561  ;;  %3567 = vrsqrt.f32 %v1408_v55  ;;  %3182 = vmatprep.mubr.msk.bf16.mxu0 %vm3852_vm0, %v3851_v0 }
 0x4dd   :  { %v1455_v16 = vmul.f32 %v3562_v36, %v4695_v47 }
 0x4de   :  { %v3564_v38 = vpop.eup %3563 }
 0x4df   :  { %v1374_v18 = vpop.xlane.xlu0 %1373  ;;  %v1456_v19 = vmul.f32 %v3564_v38, %v4698_v20 }
 0x4e0   :  { %v1409_v7 = vmax.f32 %v1374_v18, 1e-24 }
 0x4e1   :  { %v1376_v21 = vpop.xlane.xlu1 %1375  ;;  %v1491_v12 = vpack.c.bf16 %v1456_v19, %v1455_v16 }
 0x4e2   :  { %3569 = vrsqrt.f32 %v1409_v7  ;;  %v1410_v27 = vmax.f32 %v1376_v21, 1e-24 }
 0x4e3   :  { %3183 = vmatmul.mubr.bf16.gmra.mrb[100].mxu0 %v1491_v12 }
 0x4e4   :  { %v3566_v1 = vpop.eup %3565  ;;  %3571 = vrsqrt.f32 %v1410_v27  ;;  %3186 = vmatprep.mubr.msk.bf16.mxu0 %vm3852_vm0, %v3851_v0 }
 0x4e5   :  { %v1457_v15 = vmul.f32 %v3566_v1, %v4707_v43 }
 0x4e6   :  { %v3568_v24 = vpop.eup %3567 }
 0x4e7   :  { %v1378_v50 = vpop.xlane.xlu0 %1377  ;;  %v1458_v23 = vmul.f32 %v3568_v24, %v4710_v32 }
 0x4e8   :  { %v1411_v47 = vmax.f32 %v1378_v50, 1e-24 }
 0x4e9   :  { %v1380_v4 = vpop.xlane.xlu1 %1379  ;;  %v1492_v20 = vpack.c.bf16 %v1458_v23, %v1457_v15 }
 0x4ea   :  { %3573 = vrsqrt.f32 %v1411_v47  ;;  %v1412_v48 = vmax.f32 %v1380_v4, 1e-24 }
 0x4eb   :  { %3187 = vmatmul.mubr.bf16.gmra.mrb[104].mxu0 %v1492_v20 }
 0x4ec   :  { %v3570_v28 = vpop.eup %3569  ;;  %3575 = vrsqrt.f32 %v1412_v48  ;;  %3190 = vmatprep.mubr.msk.bf16.mxu0 %vm3852_vm0, %v3851_v0 }
 0x4ed   :  { %v1459_v35 = vmul.f32 %v3570_v28, %v4719_v5 }
 0x4ee   :  { %v3572_v51 = vpop.eup %3571 }
 0x4ef   :  { %v1382_v31 = vpop.xlane.xlu0 %1381  ;;  %v1460_v39 = vmul.f32 %v3572_v51, %v4722_v34 }
 0x4f0   :  { %v1413_v43 = vmax.f32 %v1382_v31, 1e-24 }
 0x4f1   :  { %v1384_v10 = vpop.xlane.xlu1 %1383  ;;  %v1493_v32 = vpack.c.bf16 %v1460_v39, %v1459_v35 }
 0x4f2   :  { %3577 = vrsqrt.f32 %v1413_v43  ;;  %v1414_v11 = vmax.f32 %v1384_v10, 1e-24 }
 0x4f3   :  { %3191 = vmatmul.mubr.bf16.gmra.mrb[108].mxu0 %v1493_v32 }
 0x4f4   :  { %v3574_v37 = vpop.eup %3573  ;;  %3579 = vrsqrt.f32 %v1414_v11  ;;  %3194 = vmatprep.mubr.msk.bf16.mxu0 %vm3852_vm0, %v3851_v0 }
 0x4f5   :  { %v1461_v25 = vmul.f32 %v3574_v37, %v4731_v8 }
 0x4f6   :  { %v3576_v41 = vpop.eup %3575 }
 0x4f7   :  { %v1386_v57 = vpop.xlane.xlu0 %1385  ;;  %v1462_v2 = vmul.f32 %v3576_v41, %v4734_v22 }
 0x4f8   :  { %v1415_v5 = vmax.f32 %v1386_v57, 1e-24 }
 0x4f9   :  { %v1388_v3 = vpop.xlane.xlu1 %1387  ;;  %v1494_v34 = vpack.c.bf16 %v1462_v2, %v1461_v25 }
 0x4fa   :  { %3581 = vrsqrt.f32 %v1415_v5  ;;  %v1416_v29 = vmax.f32 %v1388_v3, 1e-24 }
 0x4fb   :  { %3195 = vmatmul.mubr.bf16.gmra.mrb[112].mxu0 %v1494_v34 }
 0x4fc   :  { %v3578_v30 = vpop.eup %3577  ;;  %3583 = vrsqrt.f32 %v1416_v29  ;;  %3198 = vmatprep.mubr.msk.bf16.mxu0 %vm3852_vm0, %v3851_v0 }
 0x4fd   :  { %v1463_v45 = vmul.f32 %v3578_v30, %v4743_v62 }
 0x4fe   :  { %v3580_v54 = vpop.eup %3579 }
 0x4ff   :  { %v1390_v52 = vpop.xlane.xlu0 %1389  ;;  %v1464_v14 = vmul.f32 %v3580_v54, %v4746_v17  ;;  %v4842_v17 = vpop.f32.mrb[76].mxu1 }
 0x500   :  { %v1417_v8 = vmax.f32 %v1390_v52, 1e-24  ;;  %v3096_v9 = vpop.f32.mrb[77].mxu1 }
 0x501   :  { %v1392_v46 = vpop.xlane.xlu1 %1391  ;;  %v1495_v22 = vpack.c.bf16 %v1464_v14, %v1463_v45  ;;  %v4846_v56 = vpop.f32.mrb[78].mxu1  ;;  %v3436_v9 = vld [vmem:[#allocation17 + $0x18] sm:$0xff]  }
 0x502   :  { %3585 = vrsqrt.f32 %v1417_v8  ;;  %v1418_v33 = vmax.f32 %v1392_v46, 1e-24  ;;  %v3097_v36 = vpop.f32.mrb[79].mxu1 }
 0x503   :  { %3199 = vmatmul.mubr.bf16.gmra.mrb[116].mxu0 %v1495_v22  ;;  %v4850_v18 = vpop.f32.mrb[80].mxu1  ;;  %v1923_v36 = vsub.s32 4, %v4158_v49 }
 0x504   :  { %v3582_v58 = vpop.eup %3581  ;;  %3587 = vrsqrt.f32 %v1418_v33  ;;  %3202 = vmatprep.mubr.msk.bf16.mxu0 %vm3852_vm0, %v3851_v0  ;;  %v3100_v19 = vpop.f32.mrb[81].mxu1 }
 0x505   :  { %v1465_v13 = vmul.f32 %v3582_v58, %v4755_v60  ;;  %v4855_v21 = vpop.f32.mrb[82].mxu1 }
 0x506   :  { %v3584_v26 = vpop.eup %3583  ;;  %v3101_v12 = vpop.f32.mrb[83].mxu1 }
 0x507   :  { %v1394_v53 = vpop.xlane.xlu0 %1393  ;;  %v1466_v61 = vmul.f32 %v3584_v26, %v4758_v59  ;;  %v4857_v1 = vpop.f32.mrb[84].mxu1  ;;  %v3439_v12 = vld [vmem:[#allocation17 + $0x30] sm:$0xff]  }
 0x508   :  { %v1419_v62 = vmax.f32 %v1394_v53, 1e-24 }
 0x509   :  { %v1496_v63 = vpack.c.bf16 %v1466_v61, %v1465_v13 }
 0x50a   :  { %3589 = vrsqrt.f32 %v1419_v62  ;;  %v3433_v62 = vld [vmem:[#allocation17] sm:$0xff]  }
 0x50b   :  { %3203 = vmatmul.mubr.bf16.gmra.mrb[120].mxu0 %v1496_v63  ;;  %v3434_v63 = vld [vmem:[#allocation17 + $0x8] sm:$0xff]  }
 0x50c   :  { %v3586_v40 = vpop.eup %3585  ;;  %3206 = vmatprep.mubr.msk.bf16.mxu0 %vm3852_vm0, %v3851_v0  ;;  %3283 = vmatpush3.bf16.msra.mxu0 %v3433_v62 }
 0x50d   :  { %v1467_v38 = vmul.f32 %v3586_v40, %v4767_v44  ;;  %v3104_v44 = vpop.f32.mrb[85].mxu1  ;;  %3284 = vmatprep.subr.bf16.mxu0 %v3851_v0  ;;  %v3435_v40 = vld [vmem:[#allocation17 + $0x10] sm:$0xff]  }
 0x50e   :  { %v3588_v55 = vpop.eup %3587 }
 0x50f   :  { %v1468_v60 = vmul.f32 %v3588_v55, %v4770_v6  ;;  %v4861_v6 = vpop.f32.mrb[86].mxu1  ;;  %v3437_v55 = vld [vmem:[#allocation17 + $0x20] sm:$0xff]  }
 0x510   :  { %v3105_v24 = vpop.f32.mrb[87].mxu1  ;;  %3285 = vmatpush3.bf16.msra.mxu0 %v3434_v63 }
 0x511   :  { %v1497_v59 = vpack.c.bf16 %v1468_v60, %v1467_v38  ;;  %v4863_v50 = vpop.f32.mrb[88].mxu1  ;;  %3286 = vmatprep.subr.bf16.mxu0 %v3851_v0  ;;  %v3438_v38 = vld [vmem:[#allocation17 + $0x28] sm:$0xff]  }
 0x512   :  { %v3108_v15 = vpop.f32.mrb[89].mxu1  ;;  %v4910_v60 = vld [vmem:[%s5096_s10] sm:$0xff] }
 0x513   :  { %3207 = vmatmul.mubr.bf16.gmra.mrb[124].mxu0 %v1497_v59  ;;  %v4865_v23 = vpop.f32.mrb[90].mxu1  ;;  %v4913_v59 = vrot.slane %v4910_v60, %v1923_v36 }
 0x514   :  { %v3590_v16 = vpop.eup %3589  ;;  %3210 = vmatprep.mubr.msk.bf16.mxu0 %vm3852_vm0, %v3851_v0  ;;  %3287 = vmatpush3.bf16.msra.mxu0 %v3435_v40 }
 0x515   :  { %v1469_v7 = vmul.f32 %v3590_v16, %v4779_v42  ;;  %v3109_v42 = vpop.f32.mrb[91].mxu1  ;;  %3288 = vmatprep.subr.bf16.mxu0 %v3851_v0 }
 0x516   :  { %v4867_v47 = vpop.f32.mrb[92].mxu1 }
 0x517   :  { %v1498_v27 = vpack.c.bf16 %v1469_v7, %v1469_v7  ;;  %v3112_v4 = vpop.f32.mrb[93].mxu1 }
 0x518   :  { %v4869_v20 = vpop.f32.mrb[94].mxu1  ;;  %3289 = vmatpush3.bf16.msra.mxu0 %v3436_v9  ;;  %v3440_v4 = vld [vmem:[#allocation17 + $0x38] sm:$0xff]  }
 0x519   :  { %v3113_v48 = vpop.f32.mrb[95].mxu1  ;;  %3290 = vmatprep.subr.bf16.mxu0 %v3851_v0 }
 0x51a   :  { %v4871_v28 = vpop.f32.mrb[96].mxu1 }
 0x51b   :  { %3211 = vmatmul.mubr.bf16.gmra.mrb[128].mxu0 %v1498_v27  ;;  %v3116_v51 = vpop.f32.mrb[97].mxu1 }
 0x51c   :  { %3298 = vmatprep.mubr.msk.bf16.mxu0 %vm3852_vm0, %v3851_v0  ;;  %v4873_v31 = vpop.f32.mrb[98].mxu1  ;;  %3291 = vmatpush3.bf16.msra.mxu0 %v3437_v55 }
 0x51d   :  { %v3117_v35 = vpop.f32.mrb[99].mxu1  ;;  %3292 = vmatprep.subr.bf16.mxu0 %v3851_v0 }
 0x51e   :  { %v4875_v39 = vpop.f32.mrb[100].mxu1 }
 0x51f   :  { %v3120_v43 = vpop.f32.mrb[101].mxu1 }
 0x520   :  { %v4877_v10 = vpop.f32.mrb[102].mxu1  ;;  %3293 = vmatpush3.bf16.msra.mxu0 %v3438_v38 }
 0x521   :  { %v3121_v32 = vpop.f32.mrb[103].mxu1  ;;  %3294 = vmatprep.subr.bf16.mxu0 %v3851_v0 }
 0x523   :  { %v4879_v11 = vpop.f32.mrb[104].mxu1 }
 0x524   :  { %v3124_v37 = vpop.f32.mrb[105].mxu1  ;;  %3295 = vmatpush3.bf16.msra.mxu0 %v3439_v12 }
 0x525   :  { %v4881_v41 = vpop.f32.mrb[106].mxu1  ;;  %3296 = vmatprep.subr.bf16.mxu0 %v3851_v0 }
 0x526   :  { %v3125_v57 = vpop.f32.mrb[107].mxu1 }
 0x528   :  { %3297 = vmatpush3.bf16.msra.mxu0 %v3440_v4 }
 0x52c   :  { %v4883_v25 = vpop.f32.mrb[108].mxu1 }
 0x52d   :  { %v3128_v2 = vpop.f32.mrb[109].mxu1 }
 0x52e   :  { %v4885_v5 = vpop.f32.mrb[110].mxu1 }
 0x52f   :  { %v3129_v3 = vpop.f32.mrb[111].mxu1 }
 0x534   :  { %v4887_v34 = vpop.f32.mrb[112].mxu1 }
 0x535   :  { %v3132_v29 = vpop.f32.mrb[113].mxu1 }
 0x536   :  { %v4889_v30 = vpop.f32.mrb[114].mxu1 }
 0x537   :  { %v3133_v54 = vpop.f32.mrb[115].mxu1 }
 0x54c   :  { %v4891_v52 = vpop.f32.mrb[116].mxu1 }
 0x54d   :  { %v3136_v45 = vpop.f32.mrb[117].mxu1 }
 0x54e   :  { %v4893_v14 = vpop.f32.mrb[118].mxu1 }
 0x54f   :  { %v3137_v8 = vpop.f32.mrb[119].mxu1 }
 0x554   :  { %v4895_v46 = vpop.f32.mrb[120].mxu1 }
 0x555   :  { %v3140_v22 = vpop.f32.mrb[121].mxu1 }
 0x556   :  { %v4897_v33 = vpop.f32.mrb[122].mxu1 }
 0x557   :  { %v3141_v58 = vpop.f32.mrb[123].mxu1 }
 0x55c   :  { %v4899_v26 = vpop.f32.mrb[124].mxu1 }
 0x55d   :  { %v3144_v53 = vpop.f32.mrb[125].mxu1 }
 0x55e   :  { %v1734_v13 = vpop.f32.mrb[126].mxu1 }
 0x55f   :  { %v3145_v61 = vpop.f32.mrb[127].mxu1 }
 0x58e   :  { %v1819_v16 = vpop.f32.mrb[80].mxu0 }
 0x58f   :  { %v1820_v19 = vadd.f32 %v1819_v16, %v4842_v17  ;;  %v3164_v7 = vpop.f32.mrb[81].mxu0 }
 0x590   :  { %v1822_v27 = vpop.f32.mrb[82].mxu0 }
 0x591   :  { %v1925_v44 = vadd.f32 %v4913_v59, %v1820_v19  ;;  %v1823_v24 = vadd.f32 %v1822_v27, %v4846_v56  ;;  %v3165_v15 = vpop.f32.mrb[83].mxu0 }
 0x593   :  { %v1926_v42 = vadd.f32 %v4913_v59, %v1823_v24  ;;  %v1950_v48 = vmax.f32 %v1925_v44, 0.0 }
 0x595   :  { %v1951_v51 = vmax.f32 %v1926_v42, 0.0 }
 0x596   :  { %v1827_v17 = vpop.f32.mrb[84].mxu0 }
 0x597   :  { %v1991_v35 = vpack.c.bf16 %v1951_v51, %v1950_v48  ;;  %v1828_v43 = vadd.f32 %v1827_v17, %v4850_v18  ;;  %v3168_v32 = vpop.f32.mrb[85].mxu0 }
 0x598   :  { %v1830_v37 = vpop.f32.mrb[86].mxu0 }
 0x599   :  { %v1927_v57 = vadd.f32 %v4913_v59, %v1828_v43  ;;  %v1831_v56 = vadd.f32 %v1830_v37, %v4855_v21  ;;  %v3169_v2 = vpop.f32.mrb[87].mxu0  ;;  %3231 = vmatmul.mubr.bf16.vlgmr.msra.gmra.mrb[128].mxu1 %v1991_v35 }
 0x59a   :  { %3234 = vmatprep.mubr.msk.bf16.mxu1 %vm3852_vm0, %v3851_v0 }
 0x59b   :  { %v1928_v3 = vadd.f32 %v4913_v59, %v1831_v56  ;;  %v1952_v29 = vmax.f32 %v1927_v57, 0.0 }
 0x59d   :  { %v1953_v54 = vmax.f32 %v1928_v3, 0.0 }
 0x59e   :  { %v1835_v45 = vpop.f32.mrb[88].mxu0 }
 0x59f   :  { %v1836_v8 = vadd.f32 %v1835_v45, %v4857_v1  ;;  %v3172_v18 = vpop.f32.mrb[89].mxu0  ;;  %v1992_v22 = vpack.c.bf16 %v1953_v54, %v1952_v29 }
 0x5a0   :  { %v1838_v58 = vpop.f32.mrb[90].mxu0 }
 0x5a1   :  { %v1929_v53 = vadd.f32 %v4913_v59, %v1836_v8  ;;  %v1839_v13 = vadd.f32 %v1838_v58, %v4861_v6  ;;  %v3173_v21 = vpop.f32.mrb[91].mxu0  ;;  %3235 = vmatmul.mubr.bf16.gmra.mrb[132].mxu1 %v1992_v22 }
 0x5a2   :  { %3238 = vmatprep.mubr.msk.bf16.mxu1 %vm3852_vm0, %v3851_v0 }
 0x5a3   :  { %v1930_v61 = vadd.f32 %v4913_v59, %v1839_v13  ;;  %v1954_v62 = vmax.f32 %v1929_v53, 0.0 }
 0x5a5   :  { %v1955_v63 = vmax.f32 %v1930_v61, 0.0 }
 0x5a6   :  { %v1843_v40 = vpop.f32.mrb[92].mxu0 }
 0x5a7   :  { %v1844_v9 = vadd.f32 %v1843_v40, %v4863_v50  ;;  %v3176_v1 = vpop.f32.mrb[93].mxu0  ;;  %v1993_v55 = vpack.c.bf16 %v1955_v63, %v1954_v62 }
 0x5a8   :  { %v1846_v36 = vpop.f32.mrb[94].mxu0 }
 0x5a9   :  { %v1931_v38 = vadd.f32 %v4913_v59, %v1844_v9  ;;  %v1847_v16 = vadd.f32 %v1846_v36, %v4865_v23  ;;  %v3177_v6 = vpop.f32.mrb[95].mxu0  ;;  %3239 = vmatmul.mubr.bf16.gmra.mrb[136].mxu1 %v1993_v55 }
 0x5aa   :  { %3242 = vmatprep.mubr.msk.bf16.mxu1 %vm3852_vm0, %v3851_v0 }
 0x5ab   :  { %v1932_v19 = vadd.f32 %v4913_v59, %v1847_v16  ;;  %v1956_v7 = vmax.f32 %v1931_v38, 0.0 }
 0x5ad   :  { %v1957_v12 = vmax.f32 %v1932_v19, 0.0 }
 0x5ae   :  { %v1851_v27 = vpop.f32.mrb[96].mxu0 }
 0x5af   :  { %v1852_v44 = vadd.f32 %v1851_v27, %v4867_v47  ;;  %v3180_v50 = vpop.f32.mrb[97].mxu0  ;;  %v1994_v24 = vpack.c.bf16 %v1957_v12, %v1956_v7 }
 0x5b0   :  { %v1854_v15 = vpop.f32.mrb[98].mxu0 }
 0x5b1   :  { %v1933_v42 = vadd.f32 %v4913_v59, %v1852_v44  ;;  %v1855_v4 = vadd.f32 %v1854_v15, %v4869_v20  ;;  %v3181_v23 = vpop.f32.mrb[99].mxu0  ;;  %3243 = vmatmul.mubr.bf16.gmra.mrb[140].mxu1 %v1994_v24 }
 0x5b2   :  { %3246 = vmatprep.mubr.msk.bf16.mxu1 %vm3852_vm0, %v3851_v0 }
 0x5b3   :  { %v1934_v48 = vadd.f32 %v4913_v59, %v1855_v4  ;;  %v1958_v51 = vmax.f32 %v1933_v42, 0.0 }
 0x5b5   :  { %v1959_v17 = vmax.f32 %v1934_v48, 0.0 }
 0x5b6   :  { %v1859_v35 = vpop.f32.mrb[100].mxu0 }
 0x5b7   :  { %v1860_v43 = vadd.f32 %v1859_v35, %v4871_v28  ;;  %v3184_v47 = vpop.f32.mrb[101].mxu0  ;;  %v1995_v32 = vpack.c.bf16 %v1959_v17, %v1958_v51 }
 0x5b8   :  { %v1862_v37 = vpop.f32.mrb[102].mxu0 }
 0x5b9   :  { %v1935_v57 = vadd.f32 %v4913_v59, %v1860_v43  ;;  %v1863_v56 = vadd.f32 %v1862_v37, %v4873_v31  ;;  %v3185_v20 = vpop.f32.mrb[103].mxu0  ;;  %3247 = vmatmul.mubr.bf16.gmra.mrb[144].mxu1 %v1995_v32 }
 0x5ba   :  { %3250 = vmatprep.mubr.msk.bf16.mxu1 %vm3852_vm0, %v3851_v0 }
 0x5bb   :  { %v1936_v2 = vadd.f32 %v4913_v59, %v1863_v56  ;;  %v1960_v3 = vmax.f32 %v1935_v57, 0.0 }
 0x5bd   :  { %v1961_v29 = vmax.f32 %v1936_v2, 0.0 }
 0x5be   :  { %v1867_v54 = vpop.f32.mrb[104].mxu0 }
 0x5bf   :  { %v1868_v45 = vadd.f32 %v1867_v54, %v4875_v39  ;;  %v3188_v28 = vpop.f32.mrb[105].mxu0  ;;  %v1996_v8 = vpack.c.bf16 %v1961_v29, %v1960_v3 }
 0x5c0   :  { %v1870_v18 = vpop.f32.mrb[106].mxu0 }
 0x5c1   :  { %v1937_v22 = vadd.f32 %v4913_v59, %v1868_v45  ;;  %v1871_v58 = vadd.f32 %v1870_v18, %v4877_v10  ;;  %v3189_v31 = vpop.f32.mrb[107].mxu0  ;;  %3251 = vmatmul.mubr.bf16.gmra.mrb[148].mxu1 %v1996_v8 }
 0x5c2   :  { %3254 = vmatprep.mubr.msk.bf16.mxu1 %vm3852_vm0, %v3851_v0 }
 0x5c3   :  { %v1938_v53 = vadd.f32 %v4913_v59, %v1871_v58  ;;  %v1962_v13 = vmax.f32 %v1937_v22, 0.0 }
 0x5c5   :  { %v1963_v21 = vmax.f32 %v1938_v53, 0.0 }
 0x5c6   :  { %v1875_v61 = vpop.f32.mrb[108].mxu0 }
 0x5c7   :  { %v1876_v62 = vadd.f32 %v1875_v61, %v4879_v11  ;;  %v3192_v39 = vpop.f32.mrb[109].mxu0  ;;  %v1997_v63 = vpack.c.bf16 %v1963_v21, %v1962_v13 }
 0x5c8   :  { %v1878_v40 = vpop.f32.mrb[110].mxu0 }
 0x5c9   :  { %v1939_v9 = vadd.f32 %v4913_v59, %v1876_v62  ;;  %v1879_v1 = vadd.f32 %v1878_v40, %v4881_v41  ;;  %v3193_v10 = vpop.f32.mrb[111].mxu0  ;;  %3255 = vmatmul.mubr.bf16.gmra.mrb[152].mxu1 %v1997_v63 }
 0x5ca   :  { %3258 = vmatprep.mubr.msk.bf16.mxu1 %vm3852_vm0, %v3851_v0 }
 0x5cb   :  { %v1940_v55 = vadd.f32 %v4913_v59, %v1879_v1  ;;  %v1964_v36 = vmax.f32 %v1939_v9, 0.0  ;;  %v2006_v9 = vsub.s32 5, %v4158_v49 }
 0x5cd   :  { %v1965_v38 = vmax.f32 %v1940_v55, 0.0  ;;  %v4993_v1 = vrot.slane %v4910_v60, %v2006_v9 }
 0x5ce   :  { %v1883_v16 = vpop.f32.mrb[112].mxu0 }
 0x5cf   :  { %v1884_v6 = vadd.f32 %v1883_v16, %v4883_v25  ;;  %v3196_v11 = vpop.f32.mrb[113].mxu0  ;;  %v1998_v19 = vpack.c.bf16 %v1965_v38, %v1964_v36 }
 0x5d0   :  { %v1886_v7 = vpop.f32.mrb[114].mxu0 }
 0x5d1   :  { %v1941_v12 = vadd.f32 %v4913_v59, %v1884_v6  ;;  %v1887_v27 = vadd.f32 %v1886_v7, %v4885_v5  ;;  %v3197_v41 = vpop.f32.mrb[115].mxu0  ;;  %3259 = vmatmul.mubr.bf16.gmra.mrb[156].mxu1 %v1998_v19 }
 0x5d2   :  { %3262 = vmatprep.mubr.msk.bf16.mxu1 %vm3852_vm0, %v3851_v0 }
 0x5d3   :  { %v1942_v44 = vadd.f32 %v4913_v59, %v1887_v27  ;;  %v1966_v50 = vmax.f32 %v1941_v12, 0.0 }
 0x5d5   :  { %v1967_v24 = vmax.f32 %v1942_v44, 0.0 }
 0x5d6   :  { %v1891_v15 = vpop.f32.mrb[116].mxu0 }
 0x5d7   :  { %v1892_v42 = vadd.f32 %v1891_v15, %v4887_v34  ;;  %v3200_v25 = vpop.f32.mrb[117].mxu0  ;;  %v1999_v4 = vpack.c.bf16 %v1967_v24, %v1966_v50 }
 0x5d8   :  { %v1894_v23 = vpop.f32.mrb[118].mxu0 }
 0x5d9   :  { %v1943_v48 = vadd.f32 %v4913_v59, %v1892_v42  ;;  %v1895_v51 = vadd.f32 %v1894_v23, %v4889_v30  ;;  %v3201_v5 = vpop.f32.mrb[119].mxu0  ;;  %3263 = vmatmul.mubr.bf16.gmra.mrb[160].mxu1 %v1999_v4 }
 0x5da   :  { %3266 = vmatprep.mubr.msk.bf16.mxu1 %vm3852_vm0, %v3851_v0 }
 0x5db   :  { %v1944_v17 = vadd.f32 %v4913_v59, %v1895_v51  ;;  %v1968_v35 = vmax.f32 %v1943_v48, 0.0 }
 0x5dd   :  { %v1969_v43 = vmax.f32 %v1944_v17, 0.0 }
 0x5de   :  { %v1899_v47 = vpop.f32.mrb[120].mxu0 }
 0x5df   :  { %v1900_v32 = vadd.f32 %v1899_v47, %v4891_v52  ;;  %v3204_v34 = vpop.f32.mrb[121].mxu0  ;;  %v2000_v37 = vpack.c.bf16 %v1969_v43, %v1968_v35 }
 0x5e0   :  { %v1902_v57 = vpop.f32.mrb[122].mxu0 }
 0x5e1   :  { %v1945_v56 = vadd.f32 %v4913_v59, %v1900_v32  ;;  %v1903_v20 = vadd.f32 %v1902_v57, %v4893_v14  ;;  %v3205_v30 = vpop.f32.mrb[123].mxu0  ;;  %3267 = vmatmul.mubr.bf16.gmra.mrb[164].mxu1 %v2000_v37 }
 0x5e2   :  { %3270 = vmatprep.mubr.msk.bf16.mxu1 %vm3852_vm0, %v3851_v0 }
 0x5e3   :  { %v1946_v2 = vadd.f32 %v4913_v59, %v1903_v20  ;;  %v1970_v3 = vmax.f32 %v1945_v56, 0.0 }
 0x5e5   :  { %v1971_v29 = vmax.f32 %v1946_v2, 0.0 }
 0x5e6   :  { %v1907_v54 = vpop.f32.mrb[124].mxu0 }
 0x5e7   :  { %v1908_v45 = vadd.f32 %v1907_v54, %v4895_v46  ;;  %v3208_v52 = vpop.f32.mrb[125].mxu0  ;;  %v2001_v28 = vpack.c.bf16 %v1971_v29, %v1970_v3 }
 0x5e8   :  { %v1910_v8 = vpop.f32.mrb[126].mxu0 }
 0x5e9   :  { %v1947_v18 = vadd.f32 %v4913_v59, %v1908_v45  ;;  %v1911_v22 = vadd.f32 %v1910_v8, %v4897_v33  ;;  %v3209_v14 = vpop.f32.mrb[127].mxu0  ;;  %3271 = vmatmul.mubr.bf16.gmra.mrb[168].mxu1 %v2001_v28 }
 0x5ea   :  { %3274 = vmatprep.mubr.msk.bf16.mxu1 %vm3852_vm0, %v3851_v0 }
 0x5eb   :  { %v1948_v58 = vadd.f32 %v4913_v59, %v1911_v22  ;;  %v1972_v31 = vmax.f32 %v1947_v18, 0.0 }
 0x5ed   :  { %v1973_v53 = vmax.f32 %v1948_v58, 0.0 }
 0x5ee   :  { %v1915_v13 = vpop.f32.mrb[128].mxu0 }
 0x5ef   :  { %v1916_v21 = vadd.f32 %v1915_v13, %v4899_v26  ;;  %v3212_v46 = vpop.f32.mrb[129].mxu0  ;;  %v2002_v61 = vpack.c.bf16 %v1973_v53, %v1972_v31 }
 0x5f0   :  { %v1918_v62 = vpop.f32.mrb[130].mxu0 }
 0x5f1   :  { %v1949_v39 = vadd.f32 %v4913_v59, %v1916_v21  ;;  %v3213_v63 = vpop.f32.mrb[131].mxu0  ;;  %3275 = vmatmul.mubr.bf16.gmra.mrb[172].mxu1 %v2002_v61 }
 0x5f2   :  { %3278 = vmatprep.mubr.msk.bf16.mxu1 %vm3852_vm0, %v3851_v0 }
 0x5f3   :  { %v1974_v33 = vmax.f32 %v1949_v39, 0.0 }
 0x5f5   :  { %v2003_v40 = vpack.c.bf16 %v1974_v33, %v1974_v33 }
 0x5f9   :  { %3279 = vmatmul.mubr.bf16.gmra.mrb[176].mxu1 %v2003_v40 }
 0x66c   :  { %v2090_v10 = vpop.f32.mrb[128].mxu1 }
 0x66d   :  { %v2091_v26 = vadd.f32 %v2090_v10, %v4993_v1  ;;  %v3232_v55 = vpop.f32.mrb[129].mxu1 }
 0x66e   :  { %v2093_v36 = vpop.f32.mrb[130].mxu1 }
 0x66f   :  { %v2094_v59 = vadd.f32 %v2093_v36, %v4993_v1  ;;  %v3233_v38 = vpop.f32.mrb[131].mxu1  ;;  %v2192_v16 = vmax.f32 %v2091_v26, 0.0 }
 0x671   :  { %v2193_v6 = vmax.f32 %v2094_v59, 0.0 }
 0x673   :  { %v2233_v11 = vpack.c.bf16 %v2193_v6, %v2192_v16 }
 0x674   :  { %v2098_v19 = vpop.f32.mrb[132].mxu1 }
 0x675   :  { %v2099_v7 = vadd.f32 %v2098_v19, %v4993_v1  ;;  %v3236_v12 = vpop.f32.mrb[133].mxu1  ;;  %3299 = vmatmul.mubr.bf16.vlgmr.msra.gmra.mrb[132].mxu0 %v2233_v11 }
 0x676   :  { %v2101_v49 = vpop.f32.mrb[134].mxu1  ;;  %3302 = vmatprep.mubr.msk.bf16.mxu0 %vm3852_vm0, %v3851_v0 }
 0x677   :  { %v2102_v60 = vadd.f32 %v2101_v49, %v4993_v1  ;;  %v3237_v27 = vpop.f32.mrb[135].mxu1  ;;  %v2194_v41 = vmax.f32 %v2099_v7, 0.0 }
 0x679   :  { %v2195_v44 = vmax.f32 %v2102_v60, 0.0 }
 0x67b   :  { %v2234_v50 = vpack.c.bf16 %v2195_v44, %v2194_v41 }
 0x67c   :  { %v2106_v24 = vpop.f32.mrb[136].mxu1 }
 0x67d   :  { %v2107_v15 = vadd.f32 %v2106_v24, %v4993_v1  ;;  %v3240_v42 = vpop.f32.mrb[137].mxu1  ;;  %3303 = vmatmul.mubr.bf16.gmra.mrb[136].mxu0 %v2234_v50 }
 0x67e   :  { %v2109_v25 = vpop.f32.mrb[138].mxu1  ;;  %3306 = vmatprep.mubr.msk.bf16.mxu0 %vm3852_vm0, %v3851_v0 }
 0x67f   :  { %v2110_v4 = vadd.f32 %v2109_v25, %v4993_v1  ;;  %v3241_v23 = vpop.f32.mrb[139].mxu1  ;;  %v2196_v48 = vmax.f32 %v2107_v15, 0.0 }
 0x681   :  { %v2197_v51 = vmax.f32 %v2110_v4, 0.0 }
 0x683   :  { %v2235_v5 = vpack.c.bf16 %v2197_v51, %v2196_v48 }
 0x684   :  { %v2114_v17 = vpop.f32.mrb[140].mxu1 }
 0x685   :  { %v2115_v35 = vadd.f32 %v2114_v17, %v4993_v1  ;;  %v3244_v43 = vpop.f32.mrb[141].mxu1  ;;  %3307 = vmatmul.mubr.bf16.gmra.mrb[140].mxu0 %v2235_v5 }
 0x686   :  { %v2117_v47 = vpop.f32.mrb[142].mxu1  ;;  %3310 = vmatprep.mubr.msk.bf16.mxu0 %vm3852_vm0, %v3851_v0 }
 0x687   :  { %v2118_v32 = vadd.f32 %v2117_v47, %v4993_v1  ;;  %v3245_v34 = vpop.f32.mrb[143].mxu1  ;;  %v2198_v37 = vmax.f32 %v2115_v35, 0.0 }
 0x689   :  { %v2199_v57 = vmax.f32 %v2118_v32, 0.0 }
 0x68b   :  { %v2236_v56 = vpack.c.bf16 %v2199_v57, %v2198_v37 }
 0x68c   :  { %v2122_v20 = vpop.f32.mrb[144].mxu1 }
 0x68d   :  { %v2123_v30 = vadd.f32 %v2122_v20, %v4993_v1  ;;  %v3248_v2 = vpop.f32.mrb[145].mxu1  ;;  %3311 = vmatmul.mubr.bf16.gmra.mrb[144].mxu0 %v2236_v56 }
 0x68e   :  { %v2125_v3 = vpop.f32.mrb[146].mxu1  ;;  %3314 = vmatprep.mubr.msk.bf16.mxu0 %vm3852_vm0, %v3851_v0 }
 0x68f   :  { %v2126_v29 = vadd.f32 %v2125_v3, %v4993_v1  ;;  %v3249_v54 = vpop.f32.mrb[147].mxu1  ;;  %v2200_v45 = vmax.f32 %v2123_v30, 0.0 }
 0x691   :  { %v2201_v52 = vmax.f32 %v2126_v29, 0.0 }
 0x693   :  { %v2237_v28 = vpack.c.bf16 %v2201_v52, %v2200_v45 }
 0x694   :  { %v2130_v8 = vpop.f32.mrb[148].mxu1 }
 0x695   :  { %v2131_v18 = vadd.f32 %v2130_v8, %v4993_v1  ;;  %v3252_v22 = vpop.f32.mrb[149].mxu1  ;;  %3315 = vmatmul.mubr.bf16.gmra.mrb[148].mxu0 %v2237_v28 }
 0x696   :  { %v2133_v14 = vpop.f32.mrb[150].mxu1  ;;  %3318 = vmatprep.mubr.msk.bf16.mxu0 %vm3852_vm0, %v3851_v0 }
 0x697   :  { %v2134_v58 = vadd.f32 %v2133_v14, %v4993_v1  ;;  %v3253_v31 = vpop.f32.mrb[151].mxu1  ;;  %v2202_v53 = vmax.f32 %v2131_v18, 0.0 }
 0x699   :  { %v2203_v13 = vmax.f32 %v2134_v58, 0.0 }
 0x69b   :  { %v2238_v21 = vpack.c.bf16 %v2203_v13, %v2202_v53 }
 0x69c   :  { %v2138_v46 = vpop.f32.mrb[152].mxu1 }
 0x69d   :  { %v2139_v61 = vadd.f32 %v2138_v46, %v4993_v1  ;;  %v3256_v62 = vpop.f32.mrb[153].mxu1  ;;  %3319 = vmatmul.mubr.bf16.gmra.mrb[152].mxu0 %v2238_v21  ;;  %v5047_v21 = vld [vmem:[%s5098_s12] ss:$0 sm:$0xff] }
 0x69e   :  { %v2141_v39 = vpop.f32.mrb[154].mxu1  ;;  %3322 = vmatprep.mubr.msk.bf16.mxu0 %vm3852_vm0, %v3851_v0 }
 0x69f   :  { %v2142_v63 = vadd.f32 %v2141_v39, %v4993_v1  ;;  %v3257_v33 = vpop.f32.mrb[155].mxu1  ;;  %v2204_v40 = vmax.f32 %v2139_v61, 0.0  ;;  %v2437_v61 = vld [vmem:[#allocation7] sm:$0xff] }
 0x6a1   :  { %v2205_v9 = vmax.f32 %v2142_v63, 0.0  ;;  %v2438_v63 = vld [vmem:[#allocation7 + $0x8] sm:$0xff] }
 0x6a3   :  { %v2239_v10 = vpack.c.bf16 %v2205_v9, %v2204_v40 }
 0x6a4   :  { %v2146_v26 = vpop.f32.mrb[156].mxu1 }
 0x6a5   :  { %v2147_v55 = vadd.f32 %v2146_v26, %v4993_v1  ;;  %v3260_v36 = vpop.f32.mrb[157].mxu1  ;;  %3323 = vmatmul.mubr.bf16.gmra.mrb[156].mxu0 %v2239_v10 }
 0x6a6   :  { %v2149_v59 = vpop.f32.mrb[158].mxu1  ;;  %3326 = vmatprep.mubr.msk.bf16.mxu0 %vm3852_vm0, %v3851_v0  ;;  %v2439_v36 = vld [vmem:[#allocation7 + $0x10] sm:$0xff] }
 0x6a7   :  { %v2150_v38 = vadd.f32 %v2149_v59, %v4993_v1  ;;  %v3261_v16 = vpop.f32.mrb[159].mxu1  ;;  %v2206_v6 = vmax.f32 %v2147_v55, 0.0 }
 0x6a9   :  { %v2207_v11 = vmax.f32 %v2150_v38, 0.0 }
 0x6ab   :  { %v2240_v19 = vpack.c.bf16 %v2207_v11, %v2206_v6  ;;  %v2440_v11 = vld [vmem:[#allocation7 + $0x18] sm:$0xff] }
 0x6ac   :  { %v2154_v7 = vpop.f32.mrb[160].mxu1 }
 0x6ad   :  { %v2155_v12 = vadd.f32 %v2154_v7, %v4993_v1  ;;  %v3264_v49 = vpop.f32.mrb[161].mxu1  ;;  %3327 = vmatmul.mubr.bf16.gmra.mrb[160].mxu0 %v2240_v19 }
 0x6ae   :  { %v2157_v60 = vpop.f32.mrb[162].mxu1  ;;  %3330 = vmatprep.mubr.msk.bf16.mxu0 %vm3852_vm0, %v3851_v0 }
 0x6af   :  { %v2158_v27 = vadd.f32 %v2157_v60, %v4993_v1  ;;  %v3265_v41 = vpop.f32.mrb[163].mxu1  ;;  %v2208_v44 = vmax.f32 %v2155_v12, 0.0 }
 0x6b1   :  { %v2209_v50 = vmax.f32 %v2158_v27, 0.0 }
 0x6b3   :  { %v2241_v24 = vpack.c.bf16 %v2209_v50, %v2208_v44  ;;  %v2441_v50 = vld [vmem:[#allocation7 + $0x20] sm:$0xff] }
 0x6b4   :  { %v2162_v15 = vpop.f32.mrb[164].mxu1 }
 0x6b5   :  { %v2163_v42 = vadd.f32 %v2162_v15, %v4993_v1  ;;  %v3268_v25 = vpop.f32.mrb[165].mxu1  ;;  %3331 = vmatmul.mubr.bf16.gmra.mrb[164].mxu0 %v2241_v24 }
 0x6b6   :  { %v2165_v4 = vpop.f32.mrb[166].mxu1  ;;  %3334 = vmatprep.mubr.msk.bf16.mxu0 %vm3852_vm0, %v3851_v0 }
 0x6b7   :  { %v2166_v23 = vadd.f32 %v2165_v4, %v4993_v1  ;;  %v3269_v48 = vpop.f32.mrb[167].mxu1  ;;  %v2210_v51 = vmax.f32 %v2163_v42, 0.0  ;;  %v2442_v4 = vld [vmem:[#allocation7 + $0x28] sm:$0xff] }
 0x6b9   :  { %v2211_v5 = vmax.f32 %v2166_v23, 0.0 }
 0x6bb   :  { %v2242_v17 = vpack.c.bf16 %v2211_v5, %v2210_v51 }
 0x6bc   :  { %v2170_v35 = vpop.f32.mrb[168].mxu1 }
 0x6bd   :  { %v2171_v43 = vadd.f32 %v2170_v35, %v4993_v1  ;;  %v3272_v47 = vpop.f32.mrb[169].mxu1  ;;  %3335 = vmatmul.mubr.bf16.gmra.mrb[168].mxu0 %v2242_v17 }
 0x6be   :  { %v2173_v32 = vpop.f32.mrb[170].mxu1  ;;  %3338 = vmatprep.mubr.msk.bf16.mxu0 %vm3852_vm0, %v3851_v0 }
 0x6bf   :  { %v2174_v34 = vadd.f32 %v2173_v32, %v4993_v1  ;;  %v3273_v37 = vpop.f32.mrb[171].mxu1  ;;  %v2212_v57 = vmax.f32 %v2171_v43, 0.0  ;;  %v2443_v32 = vld [vmem:[#allocation7 + $0x30] sm:$0xff] }
 0x6c1   :  { %v2213_v56 = vmax.f32 %v2174_v34, 0.0 }
 0x6c3   :  { %v2243_v20 = vpack.c.bf16 %v2213_v56, %v2212_v57 }
 0x6c4   :  { %v2178_v30 = vpop.f32.mrb[172].mxu1 }
 0x6c5   :  { %v2179_v2 = vadd.f32 %v2178_v30, %v4993_v1  ;;  %v3276_v3 = vpop.f32.mrb[173].mxu1  ;;  %3339 = vmatmul.mubr.bf16.gmra.mrb[172].mxu0 %v2243_v20  ;;  %v2444_v20 = vld [vmem:[#allocation7 + $0x38] sm:$0xff] }
 0x6c6   :  { %v2181_v29 = vpop.f32.mrb[174].mxu1  ;;  %3342 = vmatprep.mubr.msk.bf16.mxu0 %vm3852_vm0, %v3851_v0 }
 0x6c7   :  { %v2182_v54 = vadd.f32 %v2181_v29, %v4993_v1  ;;  %v3277_v45 = vpop.f32.mrb[175].mxu1  ;;  %v2214_v52 = vmax.f32 %v2179_v2, 0.0 }
 0x6c9   :  { %v2215_v28 = vmax.f32 %v2182_v54, 0.0 }
 0x6cb   :  { %v2244_v8 = vpack.c.bf16 %v2215_v28, %v2214_v52 }
 0x6cc   :  { %v2186_v18 = vpop.f32.mrb[176].mxu1 }
 0x6cd   :  { %v2187_v22 = vadd.f32 %v2186_v18, %v4993_v1  ;;  %v3280_v14 = vpop.f32.mrb[177].mxu1  ;;  %3343 = vmatmul.mubr.bf16.gmra.mrb[176].mxu0 %v2244_v8  ;;  %v2445_v8 = vld [vmem:[#allocation7 + $0x40] sm:$0xff] }
 0x6ce   :  { %v2189_v58 = vpop.f32.mrb[178].mxu1  ;;  %3346 = vmatprep.mubr.msk.bf16.mxu0 %vm3852_vm0, %v3851_v0 }
 0x6cf   :  { %v2216_v31 = vmax.f32 %v2187_v22, 0.0  ;;  %v3281_v53 = vpop.f32.mrb[179].mxu1 }
 0x6d1   :  { %v2245_v13 = vpack.c.bf16 %v2216_v31, %v2216_v31  ;;  %v2446_v31 = vld [vmem:[#allocation7 + $0x48] sm:$0xff] }
 0x6d5   :  { %3347 = vmatmul.mubr.bf16.gmra.mrb[180].mxu0 %v2245_v13 }
 0x748   :  { %v2335_v46 = vpop.f32.mrb[132].mxu0 }
 0x749   :  { %v2336_v62 = vadd.f32 %v5047_v21, %v2335_v46  ;;  %v3300_v1 = vpop.f32.mrb[133].mxu0 }
 0x74a   :  { %v2338_v39 = vpop.f32.mrb[134].mxu0 }
 0x74b   :  { %v2462_v33 = vsub.f32 %v2336_v62, %v2437_v61  ;;  %v2339_v40 = vadd.f32 %v5047_v21, %v2338_v39  ;;  %v3301_v0 = vpop.f32.mrb[135].mxu0 }
 0x74d   :  { %v2463_v9 = vsub.f32 %v2339_v40, %v2438_v63  ;;  %v2487_v10 = vmul.f32 %v2462_v33, %v2462_v33  ;;  %v2447_v33 = vld [vmem:[#allocation7 + $0x50] sm:$0xff] }
 0x74f   :  { %v2488_v26 = vmul.f32 %v2463_v9, %v2463_v9 }
 0x750   :  { %v2343_v55 = vpop.f32.mrb[136].mxu0 }
 0x751   :  { %v2615_v59 = vadd.f32 %v2488_v26, %v2487_v10  ;;  %v2344_v38 = vadd.f32 %v5047_v21, %v2343_v55  ;;  %v3304_v16 = vpop.f32.mrb[137].mxu0  ;;  %v2448_v26 = vld [vmem:[#allocation7 + $0x58] sm:$0xff] }
 0x752   :  { %v2346_v6 = vpop.f32.mrb[138].mxu0 }
 0x753   :  { %v2464_v19 = vsub.f32 %v2344_v38, %v2439_v36  ;;  %v2347_v7 = vadd.f32 %v5047_v21, %v2346_v6  ;;  %v3305_v12 = vpop.f32.mrb[139].mxu0 }
 0x755   :  { %v2489_v49 = vmul.f32 %v2464_v19, %v2464_v19  ;;  %v2465_v60 = vsub.f32 %v2347_v7, %v2440_v11  ;;  %v2449_v7 = vld [vmem:[#allocation7 + $0x60] sm:$0xff] }
 0x757   :  { %v2616_v27 = vadd.f32 %v2615_v59, %v2489_v49  ;;  %v2490_v41 = vmul.f32 %v2465_v60, %v2465_v60 }
 0x758   :  { %v2351_v44 = vpop.f32.mrb[140].mxu0 }
 0x759   :  { %v2617_v24 = vadd.f32 %v2616_v27, %v2490_v41  ;;  %v2352_v15 = vadd.f32 %v5047_v21, %v2351_v44  ;;  %v3308_v42 = vpop.f32.mrb[141].mxu0  ;;  %v2450_v41 = vld [vmem:[#allocation7 + $0x68] sm:$0xff] }
 0x75a   :  { %v2354_v25 = vpop.f32.mrb[142].mxu0 }
 0x75b   :  { %v2466_v23 = vsub.f32 %v2352_v15, %v2441_v50  ;;  %v2355_v48 = vadd.f32 %v5047_v21, %v2354_v25  ;;  %v3309_v51 = vpop.f32.mrb[143].mxu0 }
 0x75d   :  { %v2491_v5 = vmul.f32 %v2466_v23, %v2466_v23  ;;  %v2467_v17 = vsub.f32 %v2355_v48, %v2442_v4  ;;  %v2451_v48 = vld [vmem:[#allocation7 + $0x70] sm:$0xff] }
 0x75f   :  { %v2618_v35 = vadd.f32 %v2617_v24, %v2491_v5  ;;  %v2492_v43 = vmul.f32 %v2467_v17, %v2467_v17 }
 0x760   :  { %v2359_v47 = vpop.f32.mrb[144].mxu0 }
 0x761   :  { %v2619_v34 = vadd.f32 %v2618_v35, %v2492_v43  ;;  %v2360_v37 = vadd.f32 %v5047_v21, %v2359_v47  ;;  %v3312_v57 = vpop.f32.mrb[145].mxu0  ;;  %v2452_v43 = vld [vmem:[#allocation7 + $0x78] sm:$0xff] }
 0x762   :  { %v2362_v56 = vpop.f32.mrb[146].mxu0 }
 0x763   :  { %v2468_v30 = vsub.f32 %v2360_v37, %v2443_v32  ;;  %v2363_v2 = vadd.f32 %v5047_v21, %v2362_v56  ;;  %v3313_v3 = vpop.f32.mrb[147].mxu0 }
 0x765   :  { %v2493_v29 = vmul.f32 %v2468_v30, %v2468_v30  ;;  %v2469_v54 = vsub.f32 %v2363_v2, %v2444_v20  ;;  %v2453_v2 = vld [vmem:[#allocation7 + $0x80] sm:$0xff] }
 0x767   :  { %v2620_v45 = vadd.f32 %v2619_v34, %v2493_v29  ;;  %v2494_v52 = vmul.f32 %v2469_v54, %v2469_v54 }
 0x768   :  { %v2367_v28 = vpop.f32.mrb[148].mxu0 }
 0x769   :  { %v2621_v18 = vadd.f32 %v2620_v45, %v2494_v52  ;;  %v2368_v22 = vadd.f32 %v5047_v21, %v2367_v28  ;;  %v3316_v14 = vpop.f32.mrb[149].mxu0  ;;  %v2454_v52 = vld [vmem:[#allocation7 + $0x88] sm:$0xff] }
 0x76a   :  { %v2370_v58 = vpop.f32.mrb[150].mxu0 }
 0x76b   :  { %v2470_v53 = vsub.f32 %v2368_v22, %v2445_v8  ;;  %v2371_v13 = vadd.f32 %v5047_v21, %v2370_v58  ;;  %v3317_v46 = vpop.f32.mrb[151].mxu0 }
 0x76d   :  { %v2495_v61 = vmul.f32 %v2470_v53, %v2470_v53  ;;  %v2471_v62 = vsub.f32 %v2371_v13, %v2446_v31  ;;  %v2455_v13 = vld [vmem:[#allocation7 + $0x90] sm:$0xff] }
 0x76f   :  { %v2622_v1 = vadd.f32 %v2621_v18, %v2495_v61  ;;  %v2496_v39 = vmul.f32 %v2471_v62, %v2471_v62 }
 0x770   :  { %v2375_v63 = vpop.f32.mrb[152].mxu0 }
 0x771   :  { %v2623_v40 = vadd.f32 %v2622_v1, %v2496_v39  ;;  %v2376_v0 = vadd.f32 %v5047_v21, %v2375_v63  ;;  %v3320_v9 = vpop.f32.mrb[153].mxu0  ;;  %v2456_v39 = vld [vmem:[#allocation7 + $0x98] sm:$0xff] }
 0x772   :  { %v2378_v10 = vpop.f32.mrb[154].mxu0 }
 0x773   :  { %v2472_v55 = vsub.f32 %v2376_v0, %v2447_v33  ;;  %v2379_v36 = vadd.f32 %v5047_v21, %v2378_v10  ;;  %v3321_v59 = vpop.f32.mrb[155].mxu0 }
 0x775   :  { %v2497_v38 = vmul.f32 %v2472_v55, %v2472_v55  ;;  %v2473_v16 = vsub.f32 %v2379_v36, %v2448_v26  ;;  %v2457_v36 = vld [vmem:[#allocation7 + $0xa0] sm:$0xff] }
 0x777   :  { %v2624_v6 = vadd.f32 %v2623_v40, %v2497_v38  ;;  %v2498_v11 = vmul.f32 %v2473_v16, %v2473_v16 }
 0x778   :  { %v2383_v19 = vpop.f32.mrb[156].mxu0 }
 0x779   :  { %v2625_v12 = vadd.f32 %v2624_v6, %v2498_v11  ;;  %v2384_v49 = vadd.f32 %v5047_v21, %v2383_v19  ;;  %v3324_v60 = vpop.f32.mrb[157].mxu0  ;;  %v2458_v11 = vld [vmem:[#allocation7 + $0xa8] sm:$0xff] }
 0x77a   :  { %v2386_v27 = vpop.f32.mrb[158].mxu0 }
 0x77b   :  { %v2474_v44 = vsub.f32 %v2384_v49, %v2449_v7  ;;  %v2387_v50 = vadd.f32 %v5047_v21, %v2386_v27  ;;  %v3325_v24 = vpop.f32.mrb[159].mxu0 }
 0x77d   :  { %v2499_v15 = vmul.f32 %v2474_v44, %v2474_v44  ;;  %v2475_v42 = vsub.f32 %v2387_v50, %v2450_v41  ;;  %v2459_v50 = vld [vmem:[#allocation7 + $0xb0] sm:$0xff] }
 0x77f   :  { %v2626_v25 = vadd.f32 %v2625_v12, %v2499_v15  ;;  %v2500_v4 = vmul.f32 %v2475_v42, %v2475_v42 }
 0x780   :  { %v2391_v23 = vpop.f32.mrb[160].mxu0 }
 0x781   :  { %v2627_v51 = vadd.f32 %v2626_v25, %v2500_v4  ;;  %v2392_v5 = vadd.f32 %v5047_v21, %v2391_v23  ;;  %v3328_v17 = vpop.f32.mrb[161].mxu0  ;;  %v2460_v4 = vld [vmem:[#allocation7 + $0xb8] sm:$0xff] }
 0x782   :  { %v2394_v35 = vpop.f32.mrb[162].mxu0 }
 0x783   :  { %v2476_v47 = vsub.f32 %v2392_v5, %v2451_v48  ;;  %v2395_v32 = vadd.f32 %v5047_v21, %v2394_v35  ;;  %v3329_v34 = vpop.f32.mrb[163].mxu0 }
 0x785   :  { %v2501_v37 = vmul.f32 %v2476_v47, %v2476_v47  ;;  %v2477_v57 = vsub.f32 %v2395_v32, %v2452_v43  ;;  %v2461_v32 = vld [vmem:[#allocation7 + $0xc0] sm:$0xff] }
 0x787   :  { %v2628_v56 = vadd.f32 %v2627_v51, %v2501_v37  ;;  %v2502_v20 = vmul.f32 %v2477_v57, %v2477_v57 }
 0x788   :  { %v2399_v30 = vpop.f32.mrb[164].mxu0 }
 0x789   :  { %v2629_v3 = vadd.f32 %v2628_v56, %v2502_v20  ;;  %v2400_v29 = vadd.f32 %v5047_v21, %v2399_v30  ;;  %v3332_v54 = vpop.f32.mrb[165].mxu0 }
 0x78a   :  { %v2402_v45 = vpop.f32.mrb[166].mxu0 }
 0x78b   :  { %v2478_v28 = vsub.f32 %v2400_v29, %v2453_v2  ;;  %v2403_v8 = vadd.f32 %v5047_v21, %v2402_v45  ;;  %v3333_v18 = vpop.f32.mrb[167].mxu0 }
 0x78d   :  { %v2503_v22 = vmul.f32 %v2478_v28, %v2478_v28  ;;  %v2479_v14 = vsub.f32 %v2403_v8, %v2454_v52 }
 0x78f   :  { %v2630_v58 = vadd.f32 %v2629_v3, %v2503_v22  ;;  %v2504_v31 = vmul.f32 %v2479_v14, %v2479_v14 }
 0x790   :  { %v2407_v53 = vpop.f32.mrb[168].mxu0 }
 0x791   :  { %v2631_v46 = vadd.f32 %v2630_v58, %v2504_v31  ;;  %v2408_v61 = vadd.f32 %v5047_v21, %v2407_v53  ;;  %v3336_v62 = vpop.f32.mrb[169].mxu0 }
 0x792   :  { %v2410_v1 = vpop.f32.mrb[170].mxu0 }
 0x793   :  { %v2480_v63 = vsub.f32 %v2408_v61, %v2455_v13  ;;  %v2411_v33 = vadd.f32 %v5047_v21, %v2410_v1  ;;  %v3337_v40 = vpop.f32.mrb[171].mxu0 }
 0x795   :  { %v2505_v0 = vmul.f32 %v2480_v63, %v2480_v63  ;;  %v2481_v9 = vsub.f32 %v2411_v33, %v2456_v39 }
 0x797   :  { %v2632_v10 = vadd.f32 %v2631_v46, %v2505_v0  ;;  %v2506_v26 = vmul.f32 %v2481_v9, %v2481_v9 }
 0x798   :  { %v2415_v55 = vpop.f32.mrb[172].mxu0 }
 0x799   :  { %v2633_v59 = vadd.f32 %v2632_v10, %v2506_v26  ;;  %v2416_v38 = vadd.f32 %v5047_v21, %v2415_v55  ;;  %v3340_v16 = vpop.f32.mrb[173].mxu0 }
 0x79a   :  { %v2418_v6 = vpop.f32.mrb[174].mxu0 }
 0x79b   :  { %v2482_v19 = vsub.f32 %v2416_v38, %v2457_v36  ;;  %v2419_v7 = vadd.f32 %v5047_v21, %v2418_v6  ;;  %v3341_v12 = vpop.f32.mrb[175].mxu0 }
 0x79d   :  { %v2507_v49 = vmul.f32 %v2482_v19, %v2482_v19  ;;  %v2483_v60 = vsub.f32 %v2419_v7, %v2458_v11 }
 0x79f   :  { %v2634_v27 = vadd.f32 %v2633_v59, %v2507_v49  ;;  %v2508_v41 = vmul.f32 %v2483_v60, %v2483_v60 }
 0x7a0   :  { %v2423_v44 = vpop.f32.mrb[176].mxu0 }
 0x7a1   :  { %v2635_v24 = vadd.f32 %v2634_v27, %v2508_v41  ;;  %v2424_v15 = vadd.f32 %v5047_v21, %v2423_v44  ;;  %v3344_v42 = vpop.f32.mrb[177].mxu0 }
 0x7a2   :  { %v2426_v25 = vpop.f32.mrb[178].mxu0 }
 0x7a3   :  { %v2484_v23 = vsub.f32 %v2424_v15, %v2459_v50  ;;  %v2427_v48 = vadd.f32 %v5047_v21, %v2426_v25  ;;  %v3345_v51 = vpop.f32.mrb[179].mxu0 }
 0x7a5   :  { %v2509_v5 = vmul.f32 %v2484_v23, %v2484_v23  ;;  %v2485_v17 = vsub.f32 %v2427_v48, %v2460_v4 }
 0x7a7   :  { %v2636_v35 = vadd.f32 %v2635_v24, %v2509_v5  ;;  %v2510_v43 = vmul.f32 %v2485_v17, %v2485_v17 }
 0x7a8   :  { %v2431_v47 = vpop.f32.mrb[180].mxu0 }
 0x7a9   :  { %v2432_v34 = vadd.f32 %v5047_v21, %v2431_v47  ;;  %v3348_v37 = vpop.f32.mrb[181].mxu0  ;;  %v2637_v57 = vadd.f32 %v2636_v35, %v2510_v43 }
 0x7aa   :  { %v2434_v56 = vpop.f32.mrb[182].mxu0 }
 0x7ab   :  { %v2486_v20 = vsub.f32 %v2432_v34, %v2461_v32  ;;  %v3349_v30 = vpop.f32.mrb[183].mxu0 }
 0x7ad   :  { %v2511_v2 = vmul.f32 %v2486_v20, %v2486_v20 }
 0x7af   :  { %v2638_v3 = vadd.f32 %v2637_v57, %v2511_v2 }
 0x7b1   :  { %2639 = vadd.xlane.f32.xlu1 %v2638_v3 }
 0x83e   :  { %v2640_v29 = vpop.xlane.xlu1 %2639 }
 0x83f   :  { %v2641_v54 = vrot.slane %v2640_v29, 4 }
 0x841   :  { %v2642_v45 = vadd.f32 %v2641_v54, %v2640_v29 }
 0x843   :  { %v2643_v52 = vrot.slane %v2642_v45, 2 }
 0x845   :  { %v2644_v28 = vadd.f32 %v2643_v52, %v2642_v45 }
 0x847   :  { %v2645_v8 = vrot.slane %v2644_v28, 1 }
 0x849   :  { %v2646_v18 = vadd.f32 %v2645_v8, %v2644_v28 }
 0x84b   :  { %3366 = vpush %v2646_v18 }
 0x87c   :  { %s3367_s12 = spop %3366 }
 0x87d   :  { %2649 = sst [smem:[#allocation19]] %s3367_s12 }
 0x87e   :  { %3822 = shalt.err (!%p3819_p12)
}
 0x87f   :  { %s3853_s29 = smov [#allocation19]  }
 0x880   :  { %2657 = dma.smem_to_hbm %s3853_s29, 16, %s5099_s13, [#allocation4]  }
 0x881   :  { %3835 = dma.done.wait [#allocation4], 16  }
 0x882   :  { %3836 = vsyncadd [#allocation4], 4294967280 }
 0x883   :  { %2661 = sfence }
 0x884   :  { %2662 = vsyncpa [#allocation3], 1 }
 0x885   :  { %2663 = vsyncpa [#allocation6], 1 }
 0x886   :  { %2664 = vsyncpa [#allocation9], 1 }
 0x887   :  { %2665 = vsyncpa [#allocation12], 1 }
 0x888   :  { %2666 = vsyncpa [#allocation15], 1 }
 0x889   :  { %2667 = vsyncpa [#allocation18], 1 }
 0x88a   :  { %2668 = vsyncpa [#allocation4], 1 }

</bundles_post_ra>
